<compile_context>
chip_gen: v7x
topology: tpu7x:2x2x1
jax: 0.10.0
libtpu: 0.0.40
codegen_flags: <defaults>
</compile_context>

<pallas_src>
import jax
import jax.numpy as jnp
from jax.experimental import pallas as pl
from jax.experimental.pallas import tpu as pltpu

IN_FEATURES = 32        # stand-in for BERT hidden size (768 in the real model)
OUT_FEATURES = 7        # fixed by torch.reshape(e, (B, 200*7)) in the reference forward
LSTM_HID = 100          # 200 // 2 per direction
GB = 128                # lane-aligned block width
FEAT = 2 * GB           # 256: padded bi-LSTM feature width, [fwd | bwd] halves
NGATE = 4               # i, f, g, o
GCOLS = 2 * NGATE * GB  # 1024: interleaved gate blocks [i_f,i_b,f_f,f_b,g_f,g_b,o_f,o_b]
SEQ = 8
BATCH = 2
BP = 8                  # sublane-padded batch used inside the kernel
VOCAB = 64
L1_OUT = 400

# ---- coalesced-slab row offsets (all 8-aligned) ------------------------------
# slab 1: LSTM, 1024 lanes
WIH_R0 = 0
WHH_R0 = WIH_R0 + 2 * IN_FEATURES      # 64
BG_R0 = WHH_R0 + FEAT                  # 320
LSTM_ROWS = BG_R0 + 8                  # 328
# slab 2: linear1, 400 lanes
B1_R0 = OUT_FEATURES * FEAT            # 1792
W1_ROWS = B1_R0 + 8                    # 1800
# slab 3: all remaining small weights / biases, 256 lanes
CAT_R0 = 0
W1S_R0 = CAT_R0 + FEAT                 # 256
B1S_R0 = W1S_R0 + FEAT                 # 512
W2S_R0 = B1S_R0 + 8                    # 520
B2S_R0 = W2S_R0 + 64                   # 584
W2_R0 = B2S_R0 + 8                     # 592
B2_R0 = W2_R0 + L1_OUT                 # 992
W3_R0 = B2_R0 + 8                      # 1000
B3_R0 = W3_R0 + FEAT                   # 1256
WD_R0 = B3_R0 + 8                      # 1264
BD_R0 = WD_R0 + 64                     # 1328
SMALL_ROWS = BD_R0 + 8                 # 1336

# packed-output lane map (inside the dead 100..127 lane pad of each 256 block)
WTS_LANE0 = LSTM_HID                   # lanes 100..107 : wts   (B, 7, S)
SENT_LANE0 = WTS_LANE0 + SEQ           # lanes 108..109 : pre-sigmoid wts1 (B, 7, 2)


def _head_kernel(xcat_ref, lstm_ref, w1_ref, small_ref, out_ref, hseq_ref):
    f32 = jnp.float32
    bf16 = jnp.bfloat16
    S = SEQ
    B = BP

    # ---- carve the coalesced weight slabs (static ref slices) ---------------
    wih = lstm_ref[WIH_R0:WIH_R0 + 2 * IN_FEATURES, :]           # (64, 1024) bf16
    whh = lstm_ref[WHH_R0:WHH_R0 + FEAT, :]                      # (256, 1024) bf16
    bg = lstm_ref[BG_R0:BG_R0 + 1, :].astype(f32)                # (1, 1024)

    # ---- bidirectional LSTM: both directions fused into one recurrence ------
    # Input projections for every timestep and both directions in ONE matmul;
    # the backward-direction time reversal is folded into xcat (wrapper glue)
    # and the gate bias is added once, outside the serial loop.
    gx = jnp.dot(xcat_ref[...], wih, preferred_element_type=f32) + bg   # (S*8, 1024)

    h = jnp.zeros((B, FEAT), f32)                                # [h_fwd | h_bwd]
    c = jnp.zeros((B, FEAT), f32)
    for t in range(S):                                           # static unroll, S = 8
        # tile-aligned (8, 1024) slice + one (8,256)@(256,1024) bf16 MXU op/step
        g = gx[t * B:(t + 1) * B, :] + jnp.dot(
            h.astype(bf16), whh, preferred_element_type=f32)
        i_g = jax.nn.sigmoid(g[:, 0 * FEAT:1 * FEAT])            # 128-aligned gates
        f_g = jax.nn.sigmoid(g[:, 1 * FEAT:2 * FEAT])
        g_g = jnp.tanh(g[:, 2 * FEAT:3 * FEAT])
        o_g = jax.nn.sigmoid(g[:, 3 * FEAT:4 * FEAT])
        c = f_g * c + i_g * g_g
        h = o_g * jnp.tanh(c)
        # park h in its final batch-major s_e layout (128-aligned stores, off
        # the recurrence critical path); the bwd half belongs to time S-1-t.
        # NOTE: every (t, half) pair is written and the pad lanes of h are
        # provably zero (zero-padded gate columns and zero bias pad), so the
        # uninitialized scratch is fully overwritten.
        hseq_ref[:, t, 0:GB] = h[:, 0:GB]
        hseq_ref[:, S - 1 - t, GB:FEAT] = h[:, GB:FEAT]

    s_e = hseq_ref[...]                                          # (B, S, 256) f32
    s_e_flat = s_e.reshape(B * S, FEAT)
    s_e_bf = s_e_flat.astype(bf16)

    # ---- attention weights: softmax over the sequence axis (exact divide) ---
    cat = small_ref[CAT_R0:CAT_R0 + FEAT, 0:OUT_FEATURES]        # (256, 7) bf16
    comp = jnp.dot(s_e_bf, cat, preferred_element_type=f32)      # (B*S, 7)
    comp = jnp.transpose(comp.reshape(B, S, OUT_FEATURES), (0, 2, 1))   # (B, 7, S)
    m = jnp.max(comp, axis=-1, keepdims=True)
    p = jnp.exp(comp - m)
    wts = p / jnp.sum(p, axis=-1, keepdims=True)                 # (B, 7, S) f32

    # ---- sentence branch: linear2_sen(relu(linear1_sen(s_e))) ---------------
    w1s = small_ref[W1S_R0:W1S_R0 + FEAT, 0:64]
    b1s = small_ref[B1S_R0:B1S_R0 + 1, 0:64].astype(f32)
    w2s = small_ref[W2S_R0:W2S_R0 + 64, 0:2]
    b2s = small_ref[B2S_R0:B2S_R0 + 1, 0:2].astype(f32)
    c1 = jnp.maximum(jnp.dot(s_e_bf, w1s, preferred_element_type=f32) + b1s, 0.0)
    c1 = jnp.dot(c1.astype(bf16), w2s, preferred_element_type=f32) + b2s
    comp1 = c1.reshape(B, S, 2)                                  # (B, S, 2) f32

    # ---- augmented value matrix: identity columns in lanes 100..107 carry
    # wts, and comp1 columns in lanes 108..109 carry wts1, through the SAME
    # seq contraction that builds e -- so wts / wts1 land in the dead lane
    # padding of the e slab for free (single lane-dense output).
    lane = jax.lax.broadcasted_iota(jnp.int32, (B, S, FEAT), 2)
    seq = jax.lax.broadcasted_iota(jnp.int32, (B, S, FEAT), 1)
    v = s_e + jnp.where(lane == seq + WTS_LANE0, 1.0, 0.0)
    v = v + jnp.where(lane == SENT_LANE0, comp1[:, :, 0:1], 0.0)
    v = v + jnp.where(lane == SENT_LANE0 + 1, comp1[:, :, 1:2], 0.0)

    # e_aug[b, n]: lanes 0..99 / 128..227 = e, 100..107 = wts, 108..109 = wts1
    e_aug = jnp.einsum('bns,bsk->bnk', wts, v,
                       preferred_element_type=f32)               # (B, 7, 256)

    # ---- feed-forward head; linear1 as 7 lane-aligned partial dots ----------
    # (the wts / wts1 lanes of e_aug hit all-zero weight rows in w1, so they do
    #  not perturb the result).
    b1 = w1_ref[B1_R0:B1_R0 + 1, :].astype(f32)                  # (1, 400)
    acc = jnp.zeros((B, L1_OUT), f32) + b1
    for n in range(OUT_FEATURES):
        acc = acc + jnp.dot(e_aug[:, n, :].astype(bf16),
                            w1_ref[n * FEAT:(n + 1) * FEAT, :],
                            preferred_element_type=f32)
    l = jnp.maximum(acc, 0.0)
    # TODO(synk): dropout1 / dropout2 (p=0.5 / p=0.2) treated as eval-mode identity.
    w2 = small_ref[W2_R0:W2_R0 + L1_OUT, :]
    b2 = small_ref[B2_R0:B2_R0 + 1, :].astype(f32)
    l = jnp.maximum(jnp.dot(l.astype(bf16), w2, preferred_element_type=f32) + b2, 0.0)
    w3 = small_ref[W3_R0:W3_R0 + FEAT, 0:64]
    b3 = small_ref[B3_R0:B3_R0 + 1, 0:64].astype(f32)
    l = jnp.maximum(jnp.dot(l.astype(bf16), w3, preferred_element_type=f32) + b3, 0.0)
    wd = small_ref[WD_R0:WD_R0 + 64, 0:OUT_FEATURES]
    bd = small_ref[BD_R0:BD_R0 + 1, 0:OUT_FEATURES].astype(f32)
    model_output = jax.nn.sigmoid(
        jnp.dot(l.astype(bf16), wd, preferred_element_type=f32) + bd)    # (B, 7)

    # ---- single lane-dense packed output (one output DMA) -------------------
    out_ref[:, 0:OUT_FEATURES, :] = e_aug
    out_ref[:, OUT_FEATURES, :] = jnp.concatenate(
        [model_output, jnp.zeros((B, FEAT - OUT_FEATURES), f32)], axis=-1)


def pack_params(p):
    """Plain-JAX layout plumbing (run once): repack reference-shaped weights into
    three 128-lane-aligned bf16 slabs (one DMA each) in the fused fwd/bwd layout."""
    H = LSTM_HID
    f32 = jnp.float32

    def scatter_gates(w, d):
        # w: (K, 4*H) in PyTorch gate order (i, f, g, o) -> (K, 1024) with gate n
        # of direction d placed at lane block 2*n + d (first H of 128 lanes used).
        out = jnp.zeros((w.shape[0], GCOLS), f32)
        for n in range(NGATE):
            col = (2 * n + d) * GB
            out = out.at[:, col:col + H].set(w[:, n * H:(n + 1) * H])
        return out

    def pad_feat_rows(w):
        # w: (2*H, N) rows [fwd | bwd] -> (256, N): fwd rows at 0..99, bwd rows
        # at 128..227, matching the kernel's s_e lane layout.
        out = jnp.zeros((FEAT, w.shape[1]), f32)
        out = out.at[:H, :].set(w[:H, :])
        out = out.at[GB:GB + H, :].set(w[H:, :])
        return out

    # slab 1: LSTM [wih(64) ; whh(256) ; fused gate bias(1)]
    wih = jnp.concatenate([scatter_gates(p['wih_f'], 0),
                           scatter_gates(p['wih_b'], 1)], axis=0)       # (64, 1024)
    whh = jnp.zeros((FEAT, GCOLS), f32)
    whh = whh.at[:H, :].set(scatter_gates(p['whh_f'], 0))
    whh = whh.at[GB:GB + H, :].set(scatter_gates(p['whh_b'], 1))        # (256, 1024)
    bg = scatter_gates(p['b_f'], 0) + scatter_gates(p['b_b'], 1)        # (1, 1024)
    lstm = jnp.zeros((LSTM_ROWS, GCOLS), f32)
    lstm = lstm.at[WIH_R0:WIH_R0 + 2 * IN_FEATURES].set(wih)
    lstm = lstm.at[WHH_R0:WHH_R0 + FEAT].set(whh)
    lstm = lstm.at[BG_R0].set(bg[0])

    # slab 2: linear1 (200*7 -> 400); reference row j = n*200 + k is re-packed
    # to n*256 + k' with k' = k (fwd, k<100) or 128+(k-100) (bwd); pad rows
    # stay zero; final row is the bias.
    w1 = jnp.zeros((W1_ROWS, L1_OUT), f32)
    for n in range(OUT_FEATURES):
        w1 = w1.at[n * FEAT:n * FEAT + H].set(p['w1r'][n, :H, :])
        w1 = w1.at[n * FEAT + GB:n * FEAT + GB + H].set(p['w1r'][n, H:, :])
    w1 = w1.at[B1_R0].set(p['b1'][0])

    # slab 3: all remaining small weights / biases, 256 lanes wide.
    small = jnp.zeros((SMALL_ROWS, FEAT), f32)

    def put(s, r0, w):
        return s.at[r0:r0 + w.shape[0], :w.shape[1]].set(w)

    small = put(small, CAT_R0, pad_feat_rows(p['category']))
    small = put(small, W1S_R0, pad_feat_rows(p['w1s']))
    small = put(small, B1S_R0, p['b1s'])
    small = put(small, W2S_R0, p['w2s'])
    small = put(small, B2S_R0, p['b2s'])
    small = put(small, W2_R0, p['w2'])
    small = put(small, B2_R0, p['b2'])
    small = put(small, W3_R0, p['w3'])
    small = put(small, B3_R0, p['b3'])
    small = put(small, WD_R0, p['wd'])
    small = put(small, BD_R0, p['bd'])

    return dict(lstm=lstm.astype(jnp.bfloat16),
                w1=w1.astype(jnp.bfloat16),
                small=small.astype(jnp.bfloat16))


@jax.jit
def bert_head_forward(hidden, q):
    """hidden: (B, S, IN_FEATURES) f32 -- stand-in for BERT 'last' hidden states.
    q: packed bf16 slabs from pack_params()."""
    B, S, F = hidden.shape
    # Pad the batch to BP=8 sublane rows so every per-step read / op in the
    # kernel is tile aligned; fuse fwd + time-reversed bwd inputs along lanes:
    # row t*BP + b of xcat holds [x(b, t) | x(b, S-1-t)].
    hp = jnp.zeros((BP, S, F), hidden.dtype).at[:B].set(hidden)
    xcat = jnp.concatenate([hp, hp[:, ::-1, :]], axis=-1)               # (BP, S, 2F)
    xcat = jnp.transpose(xcat, (1, 0, 2)).reshape(S * BP, 2 * F)
    xcat = xcat.astype(jnp.bfloat16)

    vmem = pl.BlockSpec(memory_space=pltpu.MemorySpace.VMEM)
    packed = pl.pallas_call(
        _head_kernel,
        out_shape=jax.ShapeDtypeStruct((BP, OUT_FEATURES + 1, FEAT), jnp.float32),
        in_specs=[vmem] * 4,
        out_specs=vmem,
        scratch_shapes=[pltpu.VMEM((BP, SEQ, FEAT), jnp.float32)],
        compiler_params=pltpu.CompilerParams(vmem_limit_bytes=32 * 1024 * 1024),
    )(xcat, q['lstm'], q['w1'], q['small'])

    # glue: unpack the single lane-dense output slab (plain JAX).
    eb = packed[:B, :OUT_FEATURES, :]                                   # (B, 7, 256)
    model_output = packed[:B, OUT_FEATURES, :OUT_FEATURES]              # (B, 7)
    wts = eb[:, :, WTS_LANE0:WTS_LANE0 + S]                             # (B, 7, S)
    model_output_sent = jax.nn.sigmoid(eb[:, :, SENT_LANE0:SENT_LANE0 + 2])
    e = jnp.concatenate([eb[:, :, :LSTM_HID], eb[:, :, GB:GB + LSTM_HID]],
                        axis=-1)                                        # (B, 7, 200)
    return model_output, wts, model_output_sent, e


def make_params(key):
    ks = jax.random.split(key, 16)

    def w(k, shape, fan_in):
        return (jax.random.normal(k, shape, jnp.float32) / jnp.sqrt(float(fan_in)))

    H4 = 4 * LSTM_HID
    p = {}
    # LSTM weights (pre-transposed to (in, 4*hid), gate order i,f,g,o);
    # fused bias b_ih + b_hh per direction.
    p['wih_f'] = w(ks[0], (IN_FEATURES, H4), IN_FEATURES)
    p['whh_f'] = w(ks[1], (LSTM_HID, H4), LSTM_HID)
    p['b_f'] = jnp.zeros((1, H4), jnp.float32)
    p['wih_b'] = w(ks[2], (IN_FEATURES, H4), IN_FEATURES)
    p['whh_b'] = w(ks[3], (LSTM_HID, H4), LSTM_HID)
    p['b_b'] = jnp.zeros((1, H4), jnp.float32)
    # category (xavier-normal-like), shape (200, out_features)
    p['category'] = w(ks[4], (2 * LSTM_HID, OUT_FEATURES), 2 * LSTM_HID)
    # sentence branch
    p['w1s'] = w(ks[5], (2 * LSTM_HID, 64), 2 * LSTM_HID)
    p['b1s'] = jnp.zeros((1, 64), jnp.float32)
    p['w2s'] = w(ks[6], (64, 2), 64)
    p['b2s'] = jnp.zeros((1, 2), jnp.float32)
    # linear1: (200*7 -> 400), pre-reshaped to (7, 200, 400) (row-major j = n*200 + k)
    p['w1r'] = w(ks[7], (OUT_FEATURES, 2 * LSTM_HID, L1_OUT), 2 * LSTM_HID * OUT_FEATURES)
    p['b1'] = jnp.zeros((1, L1_OUT), jnp.float32)
    p['w2'] = w(ks[8], (L1_OUT, 256), L1_OUT)
    p['b2'] = jnp.zeros((1, 256), jnp.float32)
    p['w3'] = w(ks[9], (256, 64), 256)
    p['b3'] = jnp.zeros((1, 64), jnp.float32)
    p['wd'] = w(ks[10], (64, OUT_FEATURES), 64)
    p['bd'] = jnp.zeros((1, OUT_FEATURES), jnp.float32)
    # synthetic "BERT" embedding tables (deterministic stand-in for the encoder)
    p['tok_emb'] = w(ks[11], (VOCAB, IN_FEATURES), IN_FEATURES)
    p['typ_emb'] = w(ks[12], (2, IN_FEATURES), IN_FEATURES)
    return p


if __name__ == "__main__":
    key = jax.random.PRNGKey(0)
    pkey, ikey, tkey = jax.random.split(key, 3)
    params = make_params(pkey)
    packed = pack_params(params)

    ids = jax.random.randint(ikey, (BATCH, SEQ), 0, VOCAB, dtype=jnp.int32)
    mask = jnp.ones((BATCH, SEQ), jnp.int32)       # consumed only by the (stubbed) encoder
    token_type_ids = jax.random.randint(tkey, (BATCH, SEQ), 0, 2, dtype=jnp.int32)

    # Stand-in for encoded_layers[12] (strategy='last'); plain-JAX glue.
    hidden = params['tok_emb'][ids] + params['typ_emb'][token_type_ids]   # (B, S, H)

    model_output, wts, model_output_sent, e = jax.block_until_ready(
        bert_head_forward(hidden, packed))

    assert model_output.shape == (BATCH, OUT_FEATURES)
    assert wts.shape == (BATCH, OUT_FEATURES, SEQ)
    assert model_output_sent.shape == (BATCH, OUT_FEATURES, 2)
    assert e.shape == (BATCH, OUT_FEATURES, 2 * LSTM_HID)
    print("KERNEL_OK")
</pallas_src>

<mosaic_0001>
module attributes {stable_mosaic.version = 11 : i64} {
  func.func @_head_kernel(%arg0: memref<64x64xbf16, #tpu.memory_space<vmem>>, %arg1: memref<328x1024xbf16, #tpu.memory_space<vmem>>, %arg2: memref<1800x400xbf16, #tpu.memory_space<vmem>>, %arg3: memref<1336x256xbf16, #tpu.memory_space<vmem>>, %arg4: memref<8x8x256xf32, #tpu.memory_space<vmem>>, %arg5: memref<8x8x256xf32, #tpu.memory_space<vmem>>) attributes {dimension_semantics = [], scalar_prefetch = 0 : i64, scratch_operands = 1 : i64, tpu.core_type = #tpu.core_type<tc>} {
    %c0 = arith.constant 0 : index
    %c0_0 = arith.constant 0 : index
    %0 = vector.load %arg1[%c0, %c0_0] : memref<328x1024xbf16, #tpu.memory_space<vmem>>, vector<64x1024xbf16>
    %c64 = arith.constant 64 : index
    %c0_1 = arith.constant 0 : index
    %1 = vector.load %arg1[%c64, %c0_1] : memref<328x1024xbf16, #tpu.memory_space<vmem>>, vector<256x1024xbf16>
    %c320 = arith.constant 320 : index
    %c0_2 = arith.constant 0 : index
    %2 = vector.load %arg1[%c320, %c0_2] : memref<328x1024xbf16, #tpu.memory_space<vmem>>, vector<1x1024xbf16>
    %3 = arith.extf %2 : vector<1x1024xbf16> to vector<1x1024xf32>
    %c0_3 = arith.constant 0 : index
    %c0_4 = arith.constant 0 : index
    %4 = vector.load %arg0[%c0_3, %c0_4] : memref<64x64xbf16, #tpu.memory_space<vmem>>, vector<64x64xbf16>
    %cst = arith.constant dense<0.000000e+00> : vector<64x1024xf32>
    %5 = tpu.matmul %4, %0, %cst {dimension_numbers = #tpu.dot_dimension_numbers<[1], [0], [0], [1], [0, 0, 1, 1], [], []>} : vector<64x64xbf16>, vector<64x1024xbf16>, vector<64x1024xf32> -> vector<64x1024xf32>
    %6 = vector.broadcast %3 : vector<1x1024xf32> to vector<64x1024xf32>
    %7 = arith.addf %5, %6 : vector<64x1024xf32>
    %cst_5 = arith.constant 0.000000e+00 : f32
    %8 = vector.broadcast %cst_5 : f32 to vector<8x256xf32>
    %cst_6 = arith.constant 0.000000e+00 : f32
    %9 = vector.broadcast %cst_6 : f32 to vector<8x256xf32>
    %10 = vector.extract_strided_slice %7 {offsets = [0, 0], sizes = [8, 1024], strides = [1, 1]} : vector<64x1024xf32> to vector<8x1024xf32>
    %11 = arith.truncf %8 : vector<8x256xf32> to vector<8x256xbf16>
    %cst_7 = arith.constant dense<0.000000e+00> : vector<8x1024xf32>
    %12 = tpu.matmul %11, %1, %cst_7 {dimension_numbers = #tpu.dot_dimension_numbers<[1], [0], [0], [1], [0, 0, 1, 1], [], []>} : vector<8x256xbf16>, vector<256x1024xbf16>, vector<8x1024xf32> -> vector<8x1024xf32>
    %13 = arith.addf %10, %12 : vector<8x1024xf32>
    %14 = vector.extract_strided_slice %13 {offsets = [0, 0], sizes = [8, 256], strides = [1, 1]} : vector<8x1024xf32> to vector<8x256xf32>
    %15 = arith.negf %14 : vector<8x256xf32>
    %16 = math.exp %15 : vector<8x256xf32>
    %cst_8 = arith.constant 1.000000e+00 : f32
    %17 = vector.broadcast %cst_8 : f32 to vector<8x256xf32>
    %18 = arith.addf %17, %16 : vector<8x256xf32>
    %19 = arith.divf %17, %18 : vector<8x256xf32>
    %20 = vector.extract_strided_slice %13 {offsets = [0, 256], sizes = [8, 256], strides = [1, 1]} : vector<8x1024xf32> to vector<8x256xf32>
    %21 = arith.negf %20 : vector<8x256xf32>
    %22 = math.exp %21 : vector<8x256xf32>
    %cst_9 = arith.constant 1.000000e+00 : f32
    %23 = vector.broadcast %cst_9 : f32 to vector<8x256xf32>
    %24 = arith.addf %23, %22 : vector<8x256xf32>
    %25 = arith.divf %23, %24 : vector<8x256xf32>
    %26 = vector.extract_strided_slice %13 {offsets = [0, 512], sizes = [8, 256], strides = [1, 1]} : vector<8x1024xf32> to vector<8x256xf32>
    %27 = math.tanh %26 : vector<8x256xf32>
    %28 = vector.extract_strided_slice %13 {offsets = [0, 768], sizes = [8, 256], strides = [1, 1]} : vector<8x1024xf32> to vector<8x256xf32>
    %29 = arith.negf %28 : vector<8x256xf32>
    %30 = math.exp %29 : vector<8x256xf32>
    %cst_10 = arith.constant 1.000000e+00 : f32
    %31 = vector.broadcast %cst_10 : f32 to vector<8x256xf32>
    %32 = arith.addf %31, %30 : vector<8x256xf32>
    %33 = arith.divf %31, %32 : vector<8x256xf32>
    %34 = arith.mulf %25, %9 : vector<8x256xf32>
    %35 = arith.mulf %19, %27 : vector<8x256xf32>
    %36 = arith.addf %34, %35 : vector<8x256xf32>
    %37 = math.tanh %36 : vector<8x256xf32>
    %38 = arith.mulf %33, %37 : vector<8x256xf32>
    %39 = vector.extract_strided_slice %38 {offsets = [0, 0], sizes = [8, 128], strides = [1, 1]} : vector<8x256xf32> to vector<8x128xf32>
    %c0_11 = arith.constant 0 : index
    %c0_12 = arith.constant 0 : index
    %c0_13 = arith.constant 0 : index
    %40 = vector.load %arg5[%c0_11, %c0_12, %c0_13] : memref<8x8x256xf32, #tpu.memory_space<vmem>>, vector<8x1x128xf32>
    %41 = vector.shape_cast %40 : vector<8x1x128xf32> to vector<8x128xf32>
    %42 = vector.shape_cast %39 : vector<8x128xf32> to vector<8x1x128xf32>
    tpu.vector_store %arg5[%c0_11, %c0_12, %c0_13], %42 {strides = array<i32>} : memref<8x8x256xf32, #tpu.memory_space<vmem>>, vector<8x1x128xf32>,
    %43 = vector.extract_strided_slice %38 {offsets = [0, 128], sizes = [8, 128], strides = [1, 1]} : vector<8x256xf32> to vector<8x128xf32>
    %c0_14 = arith.constant 0 : index
    %c7 = arith.constant 7 : index
    %c128 = arith.constant 128 : index
    %44 = vector.load %arg5[%c0_14, %c7, %c128] : memref<8x8x256xf32, #tpu.memory_space<vmem>>, vector<8x1x128xf32>
    %45 = vector.shape_cast %44 : vector<8x1x128xf32> to vector<8x128xf32>
    %46 = vector.shape_cast %43 : vector<8x128xf32> to vector<8x1x128xf32>
    tpu.vector_store %arg5[%c0_14, %c7, %c128], %46 {strides = array<i32>} : memref<8x8x256xf32, #tpu.memory_space<vmem>>, vector<8x1x128xf32>,
    %47 = vector.extract_strided_slice %7 {offsets = [8, 0], sizes = [8, 1024], strides = [1, 1]} : vector<64x1024xf32> to vector<8x1024xf32>
    %48 = arith.truncf %38 : vector<8x256xf32> to vector<8x256xbf16>
    %cst_15 = arith.constant dense<0.000000e+00> : vector<8x1024xf32>
    %49 = tpu.matmul %48, %1, %cst_15 {dimension_numbers = #tpu.dot_dimension_numbers<[1], [0], [0], [1], [0, 0, 1, 1], [], []>} : vector<8x256xbf16>, vector<256x1024xbf16>, vector<8x1024xf32> -> vector<8x1024xf32>
    %50 = arith.addf %47, %49 : vector<8x1024xf32>
    %51 = vector.extract_strided_slice %50 {offsets = [0, 0], sizes = [8, 256], strides = [1, 1]} : vector<8x1024xf32> to vector<8x256xf32>
    %52 = arith.negf %51 : vector<8x256xf32>
    %53 = math.exp %52 : vector<8x256xf32>
    %cst_16 = arith.constant 1.000000e+00 : f32
    %54 = vector.broadcast %cst_16 : f32 to vector<8x256xf32>
    %55 = arith.addf %54, %53 : vector<8x256xf32>
    %56 = arith.divf %54, %55 : vector<8x256xf32>
    %57 = vector.extract_strided_slice %50 {offsets = [0, 256], sizes = [8, 256], strides = [1, 1]} : vector<8x1024xf32> to vector<8x256xf32>
    %58 = arith.negf %57 : vector<8x256xf32>
    %59 = math.exp %58 : vector<8x256xf32>
    %cst_17 = arith.constant 1.000000e+00 : f32
    %60 = vector.broadcast %cst_17 : f32 to vector<8x256xf32>
    %61 = arith.addf %60, %59 : vector<8x256xf32>
    %62 = arith.divf %60, %61 : vector<8x256xf32>
    %63 = vector.extract_strided_slice %50 {offsets = [0, 512], sizes = [8, 256], strides = [1, 1]} : vector<8x1024xf32> to vector<8x256xf32>
    %64 = math.tanh %63 : vector<8x256xf32>
    %65 = vector.extract_strided_slice %50 {offsets = [0, 768], sizes = [8, 256], strides = [1, 1]} : vector<8x1024xf32> to vector<8x256xf32>
    %66 = arith.negf %65 : vector<8x256xf32>
    %67 = math.exp %66 : vector<8x256xf32>
    %cst_18 = arith.constant 1.000000e+00 : f32
    %68 = vector.broadcast %cst_18 : f32 to vector<8x256xf32>
    %69 = arith.addf %68, %67 : vector<8x256xf32>
    %70 = arith.divf %68, %69 : vector<8x256xf32>
    %71 = arith.mulf %62, %36 : vector<8x256xf32>
    %72 = arith.mulf %56, %64 : vector<8x256xf32>
    %73 = arith.addf %71, %72 : vector<8x256xf32>
    %74 = math.tanh %73 : vector<8x256xf32>
    %75 = arith.mulf %70, %74 : vector<8x256xf32>
    %76 = vector.extract_strided_slice %75 {offsets = [0, 0], sizes = [8, 128], strides = [1, 1]} : vector<8x256xf32> to vector<8x128xf32>
    %c0_19 = arith.constant 0 : index
    %c1 = arith.constant 1 : index
    %c0_20 = arith.constant 0 : index
    %77 = vector.load %arg5[%c0_19, %c1, %c0_20] : memref<8x8x256xf32, #tpu.memory_space<vmem>>, vector<8x1x128xf32>
    %78 = vector.shape_cast %77 : vector<8x1x128xf32> to vector<8x128xf32>
    %79 = vector.shape_cast %76 : vector<8x128xf32> to vector<8x1x128xf32>
    tpu.vector_store %arg5[%c0_19, %c1, %c0_20], %79 {strides = array<i32>} : memref<8x8x256xf32, #tpu.memory_space<vmem>>, vector<8x1x128xf32>,
    %80 = vector.extract_strided_slice %75 {offsets = [0, 128], sizes = [8, 128], strides = [1, 1]} : vector<8x256xf32> to vector<8x128xf32>
    %c0_21 = arith.constant 0 : index
    %c6 = arith.constant 6 : index
    %c128_22 = arith.constant 128 : index
    %81 = vector.load %arg5[%c0_21, %c6, %c128_22] : memref<8x8x256xf32, #tpu.memory_space<vmem>>, vector<8x1x128xf32>
    %82 = vector.shape_cast %81 : vector<8x1x128xf32> to vector<8x128xf32>
    %83 = vector.shape_cast %80 : vector<8x128xf32> to vector<8x1x128xf32>
    tpu.vector_store %arg5[%c0_21, %c6, %c128_22], %83 {strides = array<i32>} : memref<8x8x256xf32, #tpu.memory_space<vmem>>, vector<8x1x128xf32>,
    %84 = vector.extract_strided_slice %7 {offsets = [16, 0], sizes = [8, 1024], strides = [1, 1]} : vector<64x1024xf32> to vector<8x1024xf32>
    %85 = arith.truncf %75 : vector<8x256xf32> to vector<8x256xbf16>
    %cst_23 = arith.constant dense<0.000000e+00> : vector<8x1024xf32>
    %86 = tpu.matmul %85, %1, %cst_23 {dimension_numbers = #tpu.dot_dimension_numbers<[1], [0], [0], [1], [0, 0, 1, 1], [], []>} : vector<8x256xbf16>, vector<256x1024xbf16>, vector<8x1024xf32> -> vector<8x1024xf32>
    %87 = arith.addf %84, %86 : vector<8x1024xf32>
    %88 = vector.extract_strided_slice %87 {offsets = [0, 0], sizes = [8, 256], strides = [1, 1]} : vector<8x1024xf32> to vector<8x256xf32>
    %89 = arith.negf %88 : vector<8x256xf32>
    %90 = math.exp %89 : vector<8x256xf32>
    %cst_24 = arith.constant 1.000000e+00 : f32
    %91 = vector.broadcast %cst_24 : f32 to vector<8x256xf32>
    %92 = arith.addf %91, %90 : vector<8x256xf32>
    %93 = arith.divf %91, %92 : vector<8x256xf32>
    %94 = vector.extract_strided_slice %87 {offsets = [0, 256], sizes = [8, 256], strides = [1, 1]} : vector<8x1024xf32> to vector<8x256xf32>
    %95 = arith.negf %94 : vector<8x256xf32>
    %96 = math.exp %95 : vector<8x256xf32>
    %cst_25 = arith.constant 1.000000e+00 : f32
    %97 = vector.broadcast %cst_25 : f32 to vector<8x256xf32>
    %98 = arith.addf %97, %96 : vector<8x256xf32>
    %99 = arith.divf %97, %98 : vector<8x256xf32>
    %100 = vector.extract_strided_slice %87 {offsets = [0, 512], sizes = [8, 256], strides = [1, 1]} : vector<8x1024xf32> to vector<8x256xf32>
    %101 = math.tanh %100 : vector<8x256xf32>
    %102 = vector.extract_strided_slice %87 {offsets = [0, 768], sizes = [8, 256], strides = [1, 1]} : vector<8x1024xf32> to vector<8x256xf32>
    %103 = arith.negf %102 : vector<8x256xf32>
    %104 = math.exp %103 : vector<8x256xf32>
    %cst_26 = arith.constant 1.000000e+00 : f32
    %105 = vector.broadcast %cst_26 : f32 to vector<8x256xf32>
    %106 = arith.addf %105, %104 : vector<8x256xf32>
    %107 = arith.divf %105, %106 : vector<8x256xf32>
    %108 = arith.mulf %99, %73 : vector<8x256xf32>
    %109 = arith.mulf %93, %101 : vector<8x256xf32>
    %110 = arith.addf %108, %109 : vector<8x256xf32>
    %111 = math.tanh %110 : vector<8x256xf32>
    %112 = arith.mulf %107, %111 : vector<8x256xf32>
    %113 = vector.extract_strided_slice %112 {offsets = [0, 0], sizes = [8, 128], strides = [1, 1]} : vector<8x256xf32> to vector<8x128xf32>
    %c0_27 = arith.constant 0 : index
    %c2 = arith.constant 2 : index
    %c0_28 = arith.constant 0 : index
    %114 = vector.load %arg5[%c0_27, %c2, %c0_28] : memref<8x8x256xf32, #tpu.memory_space<vmem>>, vector<8x1x128xf32>
    %115 = vector.shape_cast %114 : vector<8x1x128xf32> to vector<8x128xf32>
    %116 = vector.shape_cast %113 : vector<8x128xf32> to vector<8x1x128xf32>
    tpu.vector_store %arg5[%c0_27, %c2, %c0_28], %116 {strides = array<i32>} : memref<8x8x256xf32, #tpu.memory_space<vmem>>, vector<8x1x128xf32>,
    %117 = vector.extract_strided_slice %112 {offsets = [0, 128], sizes = [8, 128], strides = [1, 1]} : vector<8x256xf32> to vector<8x128xf32>
    %c0_29 = arith.constant 0 : index
    %c5 = arith.constant 5 : index
    %c128_30 = arith.constant 128 : index
    %118 = vector.load %arg5[%c0_29, %c5, %c128_30] : memref<8x8x256xf32, #tpu.memory_space<vmem>>, vector<8x1x128xf32>
    %119 = vector.shape_cast %118 : vector<8x1x128xf32> to vector<8x128xf32>
    %120 = vector.shape_cast %117 : vector<8x128xf32> to vector<8x1x128xf32>
    tpu.vector_store %arg5[%c0_29, %c5, %c128_30], %120 {strides = array<i32>} : memref<8x8x256xf32, #tpu.memory_space<vmem>>, vector<8x1x128xf32>,
    %121 = vector.extract_strided_slice %7 {offsets = [24, 0], sizes = [8, 1024], strides = [1, 1]} : vector<64x1024xf32> to vector<8x1024xf32>
    %122 = arith.truncf %112 : vector<8x256xf32> to vector<8x256xbf16>
    %cst_31 = arith.constant dense<0.000000e+00> : vector<8x1024xf32>
    %123 = tpu.matmul %122, %1, %cst_31 {dimension_numbers = #tpu.dot_dimension_numbers<[1], [0], [0], [1], [0, 0, 1, 1], [], []>} : vector<8x256xbf16>, vector<256x1024xbf16>, vector<8x1024xf32> -> vector<8x1024xf32>
    %124 = arith.addf %121, %123 : vector<8x1024xf32>
    %125 = vector.extract_strided_slice %124 {offsets = [0, 0], sizes = [8, 256], strides = [1, 1]} : vector<8x1024xf32> to vector<8x256xf32>
    %126 = arith.negf %125 : vector<8x256xf32>
    %127 = math.exp %126 : vector<8x256xf32>
    %cst_32 = arith.constant 1.000000e+00 : f32
    %128 = vector.broadcast %cst_32 : f32 to vector<8x256xf32>
    %129 = arith.addf %128, %127 : vector<8x256xf32>
    %130 = arith.divf %128, %129 : vector<8x256xf32>
    %131 = vector.extract_strided_slice %124 {offsets = [0, 256], sizes = [8, 256], strides = [1, 1]} : vector<8x1024xf32> to vector<8x256xf32>
    %132 = arith.negf %131 : vector<8x256xf32>
    %133 = math.exp %132 : vector<8x256xf32>
    %cst_33 = arith.constant 1.000000e+00 : f32
    %134 = vector.broadcast %cst_33 : f32 to vector<8x256xf32>
    %135 = arith.addf %134, %133 : vector<8x256xf32>
    %136 = arith.divf %134, %135 : vector<8x256xf32>
    %137 = vector.extract_strided_slice %124 {offsets = [0, 512], sizes = [8, 256], strides = [1, 1]} : vector<8x1024xf32> to vector<8x256xf32>
    %138 = math.tanh %137 : vector<8x256xf32>
    %139 = vector.extract_strided_slice %124 {offsets = [0, 768], sizes = [8, 256], strides = [1, 1]} : vector<8x1024xf32> to vector<8x256xf32>
    %140 = arith.negf %139 : vector<8x256xf32>
    %141 = math.exp %140 : vector<8x256xf32>
    %cst_34 = arith.constant 1.000000e+00 : f32
    %142 = vector.broadcast %cst_34 : f32 to vector<8x256xf32>
    %143 = arith.addf %142, %141 : vector<8x256xf32>
    %144 = arith.divf %142, %143 : vector<8x256xf32>
    %145 = arith.mulf %136, %110 : vector<8x256xf32>
    %146 = arith.mulf %130, %138 : vector<8x256xf32>
    %147 = arith.addf %145, %146 : vector<8x256xf32>
    %148 = math.tanh %147 : vector<8x256xf32>
    %149 = arith.mulf %144, %148 : vector<8x256xf32>
    %150 = vector.extract_strided_slice %149 {offsets = [0, 0], sizes = [8, 128], strides = [1, 1]} : vector<8x256xf32> to vector<8x128xf32>
    %c0_35 = arith.constant 0 : index
    %c3 = arith.constant 3 : index
    %c0_36 = arith.constant 0 : index
    %151 = vector.load %arg5[%c0_35, %c3, %c0_36] : memref<8x8x256xf32, #tpu.memory_space<vmem>>, vector<8x1x128xf32>
    %152 = vector.shape_cast %151 : vector<8x1x128xf32> to vector<8x128xf32>
    %153 = vector.shape_cast %150 : vector<8x128xf32> to vector<8x1x128xf32>
    tpu.vector_store %arg5[%c0_35, %c3, %c0_36], %153 {strides = array<i32>} : memref<8x8x256xf32, #tpu.memory_space<vmem>>, vector<8x1x128xf32>,
    %154 = vector.extract_strided_slice %149 {offsets = [0, 128], sizes = [8, 128], strides = [1, 1]} : vector<8x256xf32> to vector<8x128xf32>
    %c0_37 = arith.constant 0 : index
    %c4 = arith.constant 4 : index
    %c128_38 = arith.constant 128 : index
    %155 = vector.load %arg5[%c0_37, %c4, %c128_38] : memref<8x8x256xf32, #tpu.memory_space<vmem>>, vector<8x1x128xf32>
    %156 = vector.shape_cast %155 : vector<8x1x128xf32> to vector<8x128xf32>
    %157 = vector.shape_cast %154 : vector<8x128xf32> to vector<8x1x128xf32>
    tpu.vector_store %arg5[%c0_37, %c4, %c128_38], %157 {strides = array<i32>} : memref<8x8x256xf32, #tpu.memory_space<vmem>>, vector<8x1x128xf32>,
    %158 = vector.extract_strided_slice %7 {offsets = [32, 0], sizes = [8, 1024], strides = [1, 1]} : vector<64x1024xf32> to vector<8x1024xf32>
    %159 = arith.truncf %149 : vector<8x256xf32> to vector<8x256xbf16>
    %cst_39 = arith.constant dense<0.000000e+00> : vector<8x1024xf32>
    %160 = tpu.matmul %159, %1, %cst_39 {dimension_numbers = #tpu.dot_dimension_numbers<[1], [0], [0], [1], [0, 0, 1, 1], [], []>} : vector<8x256xbf16>, vector<256x1024xbf16>, vector<8x1024xf32> -> vector<8x1024xf32>
    %161 = arith.addf %158, %160 : vector<8x1024xf32>
    %162 = vector.extract_strided_slice %161 {offsets = [0, 0], sizes = [8, 256], strides = [1, 1]} : vector<8x1024xf32> to vector<8x256xf32>
    %163 = arith.negf %162 : vector<8x256xf32>
    %164 = math.exp %163 : vector<8x256xf32>
    %cst_40 = arith.constant 1.000000e+00 : f32
    %165 = vector.broadcast %cst_40 : f32 to vector<8x256xf32>
    %166 = arith.addf %165, %164 : vector<8x256xf32>
    %167 = arith.divf %165, %166 : vector<8x256xf32>
    %168 = vector.extract_strided_slice %161 {offsets = [0, 256], sizes = [8, 256], strides = [1, 1]} : vector<8x1024xf32> to vector<8x256xf32>
    %169 = arith.negf %168 : vector<8x256xf32>
    %170 = math.exp %169 : vector<8x256xf32>
    %cst_41 = arith.constant 1.000000e+00 : f32
    %171 = vector.broadcast %cst_41 : f32 to vector<8x256xf32>
    %172 = arith.addf %171, %170 : vector<8x256xf32>
    %173 = arith.divf %171, %172 : vector<8x256xf32>
    %174 = vector.extract_strided_slice %161 {offsets = [0, 512], sizes = [8, 256], strides = [1, 1]} : vector<8x1024xf32> to vector<8x256xf32>
    %175 = math.tanh %174 : vector<8x256xf32>
    %176 = vector.extract_strided_slice %161 {offsets = [0, 768], sizes = [8, 256], strides = [1, 1]} : vector<8x1024xf32> to vector<8x256xf32>
    %177 = arith.negf %176 : vector<8x256xf32>
    %178 = math.exp %177 : vector<8x256xf32>
    %cst_42 = arith.constant 1.000000e+00 : f32
    %179 = vector.broadcast %cst_42 : f32 to vector<8x256xf32>
    %180 = arith.addf %179, %178 : vector<8x256xf32>
    %181 = arith.divf %179, %180 : vector<8x256xf32>
    %182 = arith.mulf %173, %147 : vector<8x256xf32>
    %183 = arith.mulf %167, %175 : vector<8x256xf32>
    %184 = arith.addf %182, %183 : vector<8x256xf32>
    %185 = math.tanh %184 : vector<8x256xf32>
    %186 = arith.mulf %181, %185 : vector<8x256xf32>
    %187 = vector.extract_strided_slice %186 {offsets = [0, 0], sizes = [8, 128], strides = [1, 1]} : vector<8x256xf32> to vector<8x128xf32>
    %c0_43 = arith.constant 0 : index
    %c4_44 = arith.constant 4 : index
    %c0_45 = arith.constant 0 : index
    %188 = vector.load %arg5[%c0_43, %c4_44, %c0_45] : memref<8x8x256xf32, #tpu.memory_space<vmem>>, vector<8x1x128xf32>
    %189 = vector.shape_cast %188 : vector<8x1x128xf32> to vector<8x128xf32>
    %190 = vector.shape_cast %187 : vector<8x128xf32> to vector<8x1x128xf32>
    tpu.vector_store %arg5[%c0_43, %c4_44, %c0_45], %190 {strides = array<i32>} : memref<8x8x256xf32, #tpu.memory_space<vmem>>, vector<8x1x128xf32>,
    %191 = vector.extract_strided_slice %186 {offsets = [0, 128], sizes = [8, 128], strides = [1, 1]} : vector<8x256xf32> to vector<8x128xf32>
    %c0_46 = arith.constant 0 : index
    %c3_47 = arith.constant 3 : index
    %c128_48 = arith.constant 128 : index
    %192 = vector.load %arg5[%c0_46, %c3_47, %c128_48] : memref<8x8x256xf32, #tpu.memory_space<vmem>>, vector<8x1x128xf32>
    %193 = vector.shape_cast %192 : vector<8x1x128xf32> to vector<8x128xf32>
    %194 = vector.shape_cast %191 : vector<8x128xf32> to vector<8x1x128xf32>
    tpu.vector_store %arg5[%c0_46, %c3_47, %c128_48], %194 {strides = array<i32>} : memref<8x8x256xf32, #tpu.memory_space<vmem>>, vector<8x1x128xf32>,
    %195 = vector.extract_strided_slice %7 {offsets = [40, 0], sizes = [8, 1024], strides = [1, 1]} : vector<64x1024xf32> to vector<8x1024xf32>
    %196 = arith.truncf %186 : vector<8x256xf32> to vector<8x256xbf16>
    %cst_49 = arith.constant dense<0.000000e+00> : vector<8x1024xf32>
    %197 = tpu.matmul %196, %1, %cst_49 {dimension_numbers = #tpu.dot_dimension_numbers<[1], [0], [0], [1], [0, 0, 1, 1], [], []>} : vector<8x256xbf16>, vector<256x1024xbf16>, vector<8x1024xf32> -> vector<8x1024xf32>
    %198 = arith.addf %195, %197 : vector<8x1024xf32>
    %199 = vector.extract_strided_slice %198 {offsets = [0, 0], sizes = [8, 256], strides = [1, 1]} : vector<8x1024xf32> to vector<8x256xf32>
    %200 = arith.negf %199 : vector<8x256xf32>
    %201 = math.exp %200 : vector<8x256xf32>
    %cst_50 = arith.constant 1.000000e+00 : f32
    %202 = vector.broadcast %cst_50 : f32 to vector<8x256xf32>
    %203 = arith.addf %202, %201 : vector<8x256xf32>
    %204 = arith.divf %202, %203 : vector<8x256xf32>
    %205 = vector.extract_strided_slice %198 {offsets = [0, 256], sizes = [8, 256], strides = [1, 1]} : vector<8x1024xf32> to vector<8x256xf32>
    %206 = arith.negf %205 : vector<8x256xf32>
    %207 = math.exp %206 : vector<8x256xf32>
    %cst_51 = arith.constant 1.000000e+00 : f32
    %208 = vector.broadcast %cst_51 : f32 to vector<8x256xf32>
    %209 = arith.addf %208, %207 : vector<8x256xf32>
    %210 = arith.divf %208, %209 : vector<8x256xf32>
    %211 = vector.extract_strided_slice %198 {offsets = [0, 512], sizes = [8, 256], strides = [1, 1]} : vector<8x1024xf32> to vector<8x256xf32>
    %212 = math.tanh %211 : vector<8x256xf32>
    %213 = vector.extract_strided_slice %198 {offsets = [0, 768], sizes = [8, 256], strides = [1, 1]} : vector<8x1024xf32> to vector<8x256xf32>
    %214 = arith.negf %213 : vector<8x256xf32>
    %215 = math.exp %214 : vector<8x256xf32>
    %cst_52 = arith.constant 1.000000e+00 : f32
    %216 = vector.broadcast %cst_52 : f32 to vector<8x256xf32>
    %217 = arith.addf %216, %215 : vector<8x256xf32>
    %218 = arith.divf %216, %217 : vector<8x256xf32>
    %219 = arith.mulf %210, %184 : vector<8x256xf32>
    %220 = arith.mulf %204, %212 : vector<8x256xf32>
    %221 = arith.addf %219, %220 : vector<8x256xf32>
    %222 = math.tanh %221 : vector<8x256xf32>
    %223 = arith.mulf %218, %222 : vector<8x256xf32>
    %224 = vector.extract_strided_slice %223 {offsets = [0, 0], sizes = [8, 128], strides = [1, 1]} : vector<8x256xf32> to vector<8x128xf32>
    %c0_53 = arith.constant 0 : index
    %c5_54 = arith.constant 5 : index
    %c0_55 = arith.constant 0 : index
    %225 = vector.load %arg5[%c0_53, %c5_54, %c0_55] : memref<8x8x256xf32, #tpu.memory_space<vmem>>, vector<8x1x128xf32>
    %226 = vector.shape_cast %225 : vector<8x1x128xf32> to vector<8x128xf32>
    %227 = vector.shape_cast %224 : vector<8x128xf32> to vector<8x1x128xf32>
    tpu.vector_store %arg5[%c0_53, %c5_54, %c0_55], %227 {strides = array<i32>} : memref<8x8x256xf32, #tpu.memory_space<vmem>>, vector<8x1x128xf32>,
    %228 = vector.extract_strided_slice %223 {offsets = [0, 128], sizes = [8, 128], strides = [1, 1]} : vector<8x256xf32> to vector<8x128xf32>
    %c0_56 = arith.constant 0 : index
    %c2_57 = arith.constant 2 : index
    %c128_58 = arith.constant 128 : index
    %229 = vector.load %arg5[%c0_56, %c2_57, %c128_58] : memref<8x8x256xf32, #tpu.memory_space<vmem>>, vector<8x1x128xf32>
    %230 = vector.shape_cast %229 : vector<8x1x128xf32> to vector<8x128xf32>
    %231 = vector.shape_cast %228 : vector<8x128xf32> to vector<8x1x128xf32>
    tpu.vector_store %arg5[%c0_56, %c2_57, %c128_58], %231 {strides = array<i32>} : memref<8x8x256xf32, #tpu.memory_space<vmem>>, vector<8x1x128xf32>,
    %232 = vector.extract_strided_slice %7 {offsets = [48, 0], sizes = [8, 1024], strides = [1, 1]} : vector<64x1024xf32> to vector<8x1024xf32>
    %233 = arith.truncf %223 : vector<8x256xf32> to vector<8x256xbf16>
    %cst_59 = arith.constant dense<0.000000e+00> : vector<8x1024xf32>
    %234 = tpu.matmul %233, %1, %cst_59 {dimension_numbers = #tpu.dot_dimension_numbers<[1], [0], [0], [1], [0, 0, 1, 1], [], []>} : vector<8x256xbf16>, vector<256x1024xbf16>, vector<8x1024xf32> -> vector<8x1024xf32>
    %235 = arith.addf %232, %234 : vector<8x1024xf32>
    %236 = vector.extract_strided_slice %235 {offsets = [0, 0], sizes = [8, 256], strides = [1, 1]} : vector<8x1024xf32> to vector<8x256xf32>
    %237 = arith.negf %236 : vector<8x256xf32>
    %238 = math.exp %237 : vector<8x256xf32>
    %cst_60 = arith.constant 1.000000e+00 : f32
    %239 = vector.broadcast %cst_60 : f32 to vector<8x256xf32>
    %240 = arith.addf %239, %238 : vector<8x256xf32>
    %241 = arith.divf %239, %240 : vector<8x256xf32>
    %242 = vector.extract_strided_slice %235 {offsets = [0, 256], sizes = [8, 256], strides = [1, 1]} : vector<8x1024xf32> to vector<8x256xf32>
    %243 = arith.negf %242 : vector<8x256xf32>
    %244 = math.exp %243 : vector<8x256xf32>
    %cst_61 = arith.constant 1.000000e+00 : f32
    %245 = vector.broadcast %cst_61 : f32 to vector<8x256xf32>
    %246 = arith.addf %245, %244 : vector<8x256xf32>
    %247 = arith.divf %245, %246 : vector<8x256xf32>
    %248 = vector.extract_strided_slice %235 {offsets = [0, 512], sizes = [8, 256], strides = [1, 1]} : vector<8x1024xf32> to vector<8x256xf32>
    %249 = math.tanh %248 : vector<8x256xf32>
    %250 = vector.extract_strided_slice %235 {offsets = [0, 768], sizes = [8, 256], strides = [1, 1]} : vector<8x1024xf32> to vector<8x256xf32>
    %251 = arith.negf %250 : vector<8x256xf32>
    %252 = math.exp %251 : vector<8x256xf32>
    %cst_62 = arith.constant 1.000000e+00 : f32
    %253 = vector.broadcast %cst_62 : f32 to vector<8x256xf32>
    %254 = arith.addf %253, %252 : vector<8x256xf32>
    %255 = arith.divf %253, %254 : vector<8x256xf32>
    %256 = arith.mulf %247, %221 : vector<8x256xf32>
    %257 = arith.mulf %241, %249 : vector<8x256xf32>
    %258 = arith.addf %256, %257 : vector<8x256xf32>
    %259 = math.tanh %258 : vector<8x256xf32>
    %260 = arith.mulf %255, %259 : vector<8x256xf32>
    %261 = vector.extract_strided_slice %260 {offsets = [0, 0], sizes = [8, 128], strides = [1, 1]} : vector<8x256xf32> to vector<8x128xf32>
    %c0_63 = arith.constant 0 : index
    %c6_64 = arith.constant 6 : index
    %c0_65 = arith.constant 0 : index
    %262 = vector.load %arg5[%c0_63, %c6_64, %c0_65] : memref<8x8x256xf32, #tpu.memory_space<vmem>>, vector<8x1x128xf32>
    %263 = vector.shape_cast %262 : vector<8x1x128xf32> to vector<8x128xf32>
    %264 = vector.shape_cast %261 : vector<8x128xf32> to vector<8x1x128xf32>
    tpu.vector_store %arg5[%c0_63, %c6_64, %c0_65], %264 {strides = array<i32>} : memref<8x8x256xf32, #tpu.memory_space<vmem>>, vector<8x1x128xf32>,
    %265 = vector.extract_strided_slice %260 {offsets = [0, 128], sizes = [8, 128], strides = [1, 1]} : vector<8x256xf32> to vector<8x128xf32>
    %c0_66 = arith.constant 0 : index
    %c1_67 = arith.constant 1 : index
    %c128_68 = arith.constant 128 : index
    %266 = vector.load %arg5[%c0_66, %c1_67, %c128_68] : memref<8x8x256xf32, #tpu.memory_space<vmem>>, vector<8x1x128xf32>
    %267 = vector.shape_cast %266 : vector<8x1x128xf32> to vector<8x128xf32>
    %268 = vector.shape_cast %265 : vector<8x128xf32> to vector<8x1x128xf32>
    tpu.vector_store %arg5[%c0_66, %c1_67, %c128_68], %268 {strides = array<i32>} : memref<8x8x256xf32, #tpu.memory_space<vmem>>, vector<8x1x128xf32>,
    %269 = vector.extract_strided_slice %7 {offsets = [56, 0], sizes = [8, 1024], strides = [1, 1]} : vector<64x1024xf32> to vector<8x1024xf32>
    %270 = arith.truncf %260 : vector<8x256xf32> to vector<8x256xbf16>
    %cst_69 = arith.constant dense<0.000000e+00> : vector<8x1024xf32>
    %271 = tpu.matmul %270, %1, %cst_69 {dimension_numbers = #tpu.dot_dimension_numbers<[1], [0], [0], [1], [0, 0, 1, 1], [], []>} : vector<8x256xbf16>, vector<256x1024xbf16>, vector<8x1024xf32> -> vector<8x1024xf32>
    %272 = arith.addf %269, %271 : vector<8x1024xf32>
    %273 = vector.extract_strided_slice %272 {offsets = [0, 0], sizes = [8, 256], strides = [1, 1]} : vector<8x1024xf32> to vector<8x256xf32>
    %274 = arith.negf %273 : vector<8x256xf32>
    %275 = math.exp %274 : vector<8x256xf32>
    %cst_70 = arith.constant 1.000000e+00 : f32
    %276 = vector.broadcast %cst_70 : f32 to vector<8x256xf32>
    %277 = arith.addf %276, %275 : vector<8x256xf32>
    %278 = arith.divf %276, %277 : vector<8x256xf32>
    %279 = vector.extract_strided_slice %272 {offsets = [0, 256], sizes = [8, 256], strides = [1, 1]} : vector<8x1024xf32> to vector<8x256xf32>
    %280 = arith.negf %279 : vector<8x256xf32>
    %281 = math.exp %280 : vector<8x256xf32>
    %cst_71 = arith.constant 1.000000e+00 : f32
    %282 = vector.broadcast %cst_71 : f32 to vector<8x256xf32>
    %283 = arith.addf %282, %281 : vector<8x256xf32>
    %284 = arith.divf %282, %283 : vector<8x256xf32>
    %285 = vector.extract_strided_slice %272 {offsets = [0, 512], sizes = [8, 256], strides = [1, 1]} : vector<8x1024xf32> to vector<8x256xf32>
    %286 = math.tanh %285 : vector<8x256xf32>
    %287 = vector.extract_strided_slice %272 {offsets = [0, 768], sizes = [8, 256], strides = [1, 1]} : vector<8x1024xf32> to vector<8x256xf32>
    %288 = arith.negf %287 : vector<8x256xf32>
    %289 = math.exp %288 : vector<8x256xf32>
    %cst_72 = arith.constant 1.000000e+00 : f32
    %290 = vector.broadcast %cst_72 : f32 to vector<8x256xf32>
    %291 = arith.addf %290, %289 : vector<8x256xf32>
    %292 = arith.divf %290, %291 : vector<8x256xf32>
    %293 = arith.mulf %284, %258 : vector<8x256xf32>
    %294 = arith.mulf %278, %286 : vector<8x256xf32>
    %295 = arith.addf %293, %294 : vector<8x256xf32>
    %296 = math.tanh %295 : vector<8x256xf32>
    %297 = arith.mulf %292, %296 : vector<8x256xf32>
    %298 = vector.extract_strided_slice %297 {offsets = [0, 0], sizes = [8, 128], strides = [1, 1]} : vector<8x256xf32> to vector<8x128xf32>
    %c0_73 = arith.constant 0 : index
    %c7_74 = arith.constant 7 : index
    %c0_75 = arith.constant 0 : index
    %299 = vector.load %arg5[%c0_73, %c7_74, %c0_75] : memref<8x8x256xf32, #tpu.memory_space<vmem>>, vector<8x1x128xf32>
    %300 = vector.shape_cast %299 : vector<8x1x128xf32> to vector<8x128xf32>
    %301 = vector.shape_cast %298 : vector<8x128xf32> to vector<8x1x128xf32>
    tpu.vector_store %arg5[%c0_73, %c7_74, %c0_75], %301 {strides = array<i32>} : memref<8x8x256xf32, #tpu.memory_space<vmem>>, vector<8x1x128xf32>,
    %302 = vector.extract_strided_slice %297 {offsets = [0, 128], sizes = [8, 128], strides = [1, 1]} : vector<8x256xf32> to vector<8x128xf32>
    %c0_76 = arith.constant 0 : index
    %c0_77 = arith.constant 0 : index
    %c128_78 = arith.constant 128 : index
    %303 = vector.load %arg5[%c0_76, %c0_77, %c128_78] : memref<8x8x256xf32, #tpu.memory_space<vmem>>, vector<8x1x128xf32>
    %304 = vector.shape_cast %303 : vector<8x1x128xf32> to vector<8x128xf32>
    %305 = vector.shape_cast %302 : vector<8x128xf32> to vector<8x1x128xf32>
    tpu.vector_store %arg5[%c0_76, %c0_77, %c128_78], %305 {strides = array<i32>} : memref<8x8x256xf32, #tpu.memory_space<vmem>>, vector<8x1x128xf32>,
    %c0_79 = arith.constant 0 : index
    %c0_80 = arith.constant 0 : index
    %c0_81 = arith.constant 0 : index
    %306 = vector.load %arg5[%c0_79, %c0_80, %c0_81] : memref<8x8x256xf32, #tpu.memory_space<vmem>>, vector<8x8x256xf32>
    %307 = vector.shape_cast %306 : vector<8x8x256xf32> to vector<64x256xf32>
    %308 = arith.truncf %307 : vector<64x256xf32> to vector<64x256xbf16>
    %c0_82 = arith.constant 0 : index
    %c0_83 = arith.constant 0 : index
    %309 = vector.load %arg3[%c0_82, %c0_83] : memref<1336x256xbf16, #tpu.memory_space<vmem>>, vector<256x7xbf16>
    %cst_84 = arith.constant dense<0.000000e+00> : vector<64x7xf32>
    %310 = tpu.matmul %308, %309, %cst_84 {dimension_numbers = #tpu.dot_dimension_numbers<[1], [0], [0], [1], [0, 0, 1, 1], [], []>} : vector<64x256xbf16>, vector<256x7xbf16>, vector<64x7xf32> -> vector<64x7xf32>
    %311 = vector.shape_cast %310 : vector<64x7xf32> to vector<8x8x7xf32>
    %312 = tpu.transpose %311, [0, 2, 1] : vector<8x8x7xf32> -> vector<8x7x8xf32>
    %cst_85 = arith.constant dense<0xFF800000> : vector<8x7xf32>
    %313 = vector.multi_reduction <maximumf>, %312, %cst_85 [2] : vector<8x7x8xf32> to vector<8x7xf32>
    %314 = vector.shape_cast %313 : vector<8x7xf32> to vector<8x7x1xf32>
    %315 = vector.broadcast %314 : vector<8x7x1xf32> to vector<8x7x8xf32>
    %316 = arith.subf %312, %315 : vector<8x7x8xf32>
    %317 = math.exp %316 : vector<8x7x8xf32>
    %cst_86 = arith.constant dense<0.000000e+00> : vector<8x7xf32>
    %318 = vector.multi_reduction <add>, %317, %cst_86 [2] : vector<8x7x8xf32> to vector<8x7xf32>
    %319 = vector.shape_cast %318 : vector<8x7xf32> to vector<8x7x1xf32>
    %320 = vector.broadcast %319 : vector<8x7x1xf32> to vector<8x7x8xf32>
    %321 = arith.divf %317, %320 : vector<8x7x8xf32>
    %c256 = arith.constant 256 : index
    %c0_87 = arith.constant 0 : index
    %322 = vector.load %arg3[%c256, %c0_87] : memref<1336x256xbf16, #tpu.memory_space<vmem>>, vector<256x64xbf16>
    %c512 = arith.constant 512 : index
    %c0_88 = arith.constant 0 : index
    %323 = vector.load %arg3[%c512, %c0_88] : memref<1336x256xbf16, #tpu.memory_space<vmem>>, vector<1x64xbf16>
    %324 = arith.extf %323 : vector<1x64xbf16> to vector<1x64xf32>
    %c520 = arith.constant 520 : index
    %c0_89 = arith.constant 0 : index
    %325 = vector.load %arg3[%c520, %c0_89] : memref<1336x256xbf16, #tpu.memory_space<vmem>>, vector<64x2xbf16>
    %c584 = arith.constant 584 : index
    %c0_90 = arith.constant 0 : index
    %326 = vector.load %arg3[%c584, %c0_90] : memref<1336x256xbf16, #tpu.memory_space<vmem>>, vector<1x2xbf16>
    %327 = arith.extf %326 : vector<1x2xbf16> to vector<1x2xf32>
    %cst_91 = arith.constant dense<0.000000e+00> : vector<64x64xf32>
    %328 = tpu.matmul %308, %322, %cst_91 {dimension_numbers = #tpu.dot_dimension_numbers<[1], [0], [0], [1], [0, 0, 1, 1], [], []>} : vector<64x256xbf16>, vector<256x64xbf16>, vector<64x64xf32> -> vector<64x64xf32>
    %329 = vector.broadcast %324 : vector<1x64xf32> to vector<64x64xf32>
    %330 = arith.addf %328, %329 : vector<64x64xf32>
    %cst_92 = arith.constant 0.000000e+00 : f32
    %331 = vector.broadcast %cst_92 : f32 to vector<64x64xf32>
    %332 = arith.maximumf %330, %331 : vector<64x64xf32>
    %333 = arith.truncf %332 : vector<64x64xf32> to vector<64x64xbf16>
    %cst_93 = arith.constant dense<0.000000e+00> : vector<64x2xf32>
    %334 = tpu.matmul %333, %325, %cst_93 {dimension_numbers = #tpu.dot_dimension_numbers<[1], [0], [0], [1], [0, 0, 1, 1], [], []>} : vector<64x64xbf16>, vector<64x2xbf16>, vector<64x2xf32> -> vector<64x2xf32>
    %335 = vector.broadcast %327 : vector<1x2xf32> to vector<64x2xf32>
    %336 = arith.addf %334, %335 : vector<64x2xf32>
    %337 = vector.shape_cast %336 : vector<64x2xf32> to vector<8x8x2xf32>
    %338 = tpu.iota {dimensions = array<i32: 2>} : vector<8x8x256xi32>
    %339 = tpu.iota {dimensions = array<i32: 1>} : vector<8x8x256xi32>
    %c100_i32 = arith.constant 100 : i32
    %340 = vector.broadcast %c100_i32 : i32 to vector<8x8x256xi32>
    %341 = arith.addi %339, %340 : vector<8x8x256xi32>
    %342 = arith.cmpi eq, %338, %341 : vector<8x8x256xi32>
    %cst_94 = arith.constant 1.000000e+00 : f32
    %cst_95 = arith.constant 0.000000e+00 : f32
    %343 = vector.broadcast %cst_94 : f32 to vector<8x8x256xf32>
    %344 = vector.broadcast %cst_95 : f32 to vector<8x8x256xf32>
    %345 = arith.select %342, %343, %344 : vector<8x8x256xi1>, vector<8x8x256xf32>
    %346 = arith.addf %306, %345 : vector<8x8x256xf32>
    %c108_i32 = arith.constant 108 : i32
    %347 = vector.broadcast %c108_i32 : i32 to vector<8x8x256xi32>
    %348 = arith.cmpi eq, %338, %347 : vector<8x8x256xi32>
    %349 = vector.extract_strided_slice %337 {offsets = [0, 0, 0], sizes = [8, 8, 1], strides = [1, 1, 1]} : vector<8x8x2xf32> to vector<8x8x1xf32>
    %cst_96 = arith.constant 0.000000e+00 : f32
    %350 = vector.shape_cast %349 : vector<8x8x1xf32> to vector<8x8x1xf32>
    %351 = vector.broadcast %350 : vector<8x8x1xf32> to vector<8x8x256xf32>
    %352 = vector.broadcast %cst_96 : f32 to vector<8x8x256xf32>
    %353 = arith.select %348, %351, %352 : vector<8x8x256xi1>, vector<8x8x256xf32>
    %354 = arith.addf %346, %353 : vector<8x8x256xf32>
    %c109_i32 = arith.constant 109 : i32
    %355 = vector.broadcast %c109_i32 : i32 to vector<8x8x256xi32>
    %356 = arith.cmpi eq, %338, %355 : vector<8x8x256xi32>
    %357 = vector.extract_strided_slice %337 {offsets = [0, 0, 1], sizes = [8, 8, 1], strides = [1, 1, 1]} : vector<8x8x2xf32> to vector<8x8x1xf32>
    %cst_97 = arith.constant 0.000000e+00 : f32
    %358 = vector.shape_cast %357 : vector<8x8x1xf32> to vector<8x8x1xf32>
    %359 = vector.broadcast %358 : vector<8x8x1xf32> to vector<8x8x256xf32>
    %360 = vector.broadcast %cst_97 : f32 to vector<8x8x256xf32>
    %361 = arith.select %356, %359, %360 : vector<8x8x256xi1>, vector<8x8x256xf32>
    %362 = arith.addf %354, %361 : vector<8x8x256xf32>
    "tpu.trace_start"() <{level = 10 : i32, message = "bns,bsk->bnk"}> : () -> ()
    %cst_98 = arith.constant dense<0.000000e+00> : vector<8x7x256xf32>
    %363 = tpu.matmul %321, %362, %cst_98 {dimension_numbers = #tpu.dot_dimension_numbers<[2], [1], [1], [2], [0, 0, 0, 1, 1, 2], [0], [0]>} : vector<8x7x8xf32>, vector<8x8x256xf32>, vector<8x7x256xf32> -> vector<8x7x256xf32>
    "tpu.trace_stop"() : () -> ()
    %c1792 = arith.constant 1792 : index
    %c0_99 = arith.constant 0 : index
    %364 = vector.load %arg2[%c1792, %c0_99] : memref<1800x400xbf16, #tpu.memory_space<vmem>>, vector<1x400xbf16>
    %365 = arith.extf %364 : vector<1x400xbf16> to vector<1x400xf32>
    %cst_100 = arith.constant 0.000000e+00 : f32
    %366 = vector.broadcast %cst_100 : f32 to vector<8x400xf32>
    %367 = vector.broadcast %365 : vector<1x400xf32> to vector<8x400xf32>
    %368 = arith.addf %366, %367 : vector<8x400xf32>
    %369 = vector.extract_strided_slice %363 {offsets = [0, 0, 0], sizes = [8, 1, 256], strides = [1, 1, 1]} : vector<8x7x256xf32> to vector<8x1x256xf32>
    %370 = vector.shape_cast %369 : vector<8x1x256xf32> to vector<8x256xf32>
    %371 = arith.truncf %370 : vector<8x256xf32> to vector<8x256xbf16>
    %c0_101 = arith.constant 0 : index
    %c0_102 = arith.constant 0 : index
    %372 = vector.load %arg2[%c0_101, %c0_102] : memref<1800x400xbf16, #tpu.memory_space<vmem>>, vector<256x400xbf16>
    %cst_103 = arith.constant dense<0.000000e+00> : vector<8x400xf32>
    %373 = tpu.matmul %371, %372, %cst_103 {dimension_numbers = #tpu.dot_dimension_numbers<[1], [0], [0], [1], [0, 0, 1, 1], [], []>} : vector<8x256xbf16>, vector<256x400xbf16>, vector<8x400xf32> -> vector<8x400xf32>
    %374 = arith.addf %368, %373 : vector<8x400xf32>
    %375 = vector.extract_strided_slice %363 {offsets = [0, 1, 0], sizes = [8, 1, 256], strides = [1, 1, 1]} : vector<8x7x256xf32> to vector<8x1x256xf32>
    %376 = vector.shape_cast %375 : vector<8x1x256xf32> to vector<8x256xf32>
    %377 = arith.truncf %376 : vector<8x256xf32> to vector<8x256xbf16>
    %c256_104 = arith.constant 256 : index
    %c0_105 = arith.constant 0 : index
    %378 = vector.load %arg2[%c256_104, %c0_105] : memref<1800x400xbf16, #tpu.memory_space<vmem>>, vector<256x400xbf16>
    %cst_106 = arith.constant dense<0.000000e+00> : vector<8x400xf32>
    %379 = tpu.matmul %377, %378, %cst_106 {dimension_numbers = #tpu.dot_dimension_numbers<[1], [0], [0], [1], [0, 0, 1, 1], [], []>} : vector<8x256xbf16>, vector<256x400xbf16>, vector<8x400xf32> -> vector<8x400xf32>
    %380 = arith.addf %374, %379 : vector<8x400xf32>
    %381 = vector.extract_strided_slice %363 {offsets = [0, 2, 0], sizes = [8, 1, 256], strides = [1, 1, 1]} : vector<8x7x256xf32> to vector<8x1x256xf32>
    %382 = vector.shape_cast %381 : vector<8x1x256xf32> to vector<8x256xf32>
    %383 = arith.truncf %382 : vector<8x256xf32> to vector<8x256xbf16>
    %c512_107 = arith.constant 512 : index
    %c0_108 = arith.constant 0 : index
    %384 = vector.load %arg2[%c512_107, %c0_108] : memref<1800x400xbf16, #tpu.memory_space<vmem>>, vector<256x400xbf16>
    %cst_109 = arith.constant dense<0.000000e+00> : vector<8x400xf32>
    %385 = tpu.matmul %383, %384, %cst_109 {dimension_numbers = #tpu.dot_dimension_numbers<[1], [0], [0], [1], [0, 0, 1, 1], [], []>} : vector<8x256xbf16>, vector<256x400xbf16>, vector<8x400xf32> -> vector<8x400xf32>
    %386 = arith.addf %380, %385 : vector<8x400xf32>
    %387 = vector.extract_strided_slice %363 {offsets = [0, 3, 0], sizes = [8, 1, 256], strides = [1, 1, 1]} : vector<8x7x256xf32> to vector<8x1x256xf32>
    %388 = vector.shape_cast %387 : vector<8x1x256xf32> to vector<8x256xf32>
    %389 = arith.truncf %388 : vector<8x256xf32> to vector<8x256xbf16>
    %c768 = arith.constant 768 : index
    %c0_110 = arith.constant 0 : index
    %390 = vector.load %arg2[%c768, %c0_110] : memref<1800x400xbf16, #tpu.memory_space<vmem>>, vector<256x400xbf16>
    %cst_111 = arith.constant dense<0.000000e+00> : vector<8x400xf32>
    %391 = tpu.matmul %389, %390, %cst_111 {dimension_numbers = #tpu.dot_dimension_numbers<[1], [0], [0], [1], [0, 0, 1, 1], [], []>} : vector<8x256xbf16>, vector<256x400xbf16>, vector<8x400xf32> -> vector<8x400xf32>
    %392 = arith.addf %386, %391 : vector<8x400xf32>
    %393 = vector.extract_strided_slice %363 {offsets = [0, 4, 0], sizes = [8, 1, 256], strides = [1, 1, 1]} : vector<8x7x256xf32> to vector<8x1x256xf32>
    %394 = vector.shape_cast %393 : vector<8x1x256xf32> to vector<8x256xf32>
    %395 = arith.truncf %394 : vector<8x256xf32> to vector<8x256xbf16>
    %c1024 = arith.constant 1024 : index
    %c0_112 = arith.constant 0 : index
    %396 = vector.load %arg2[%c1024, %c0_112] : memref<1800x400xbf16, #tpu.memory_space<vmem>>, vector<256x400xbf16>
    %cst_113 = arith.constant dense<0.000000e+00> : vector<8x400xf32>
    %397 = tpu.matmul %395, %396, %cst_113 {dimension_numbers = #tpu.dot_dimension_numbers<[1], [0], [0], [1], [0, 0, 1, 1], [], []>} : vector<8x256xbf16>, vector<256x400xbf16>, vector<8x400xf32> -> vector<8x400xf32>
    %398 = arith.addf %392, %397 : vector<8x400xf32>
    %399 = vector.extract_strided_slice %363 {offsets = [0, 5, 0], sizes = [8, 1, 256], strides = [1, 1, 1]} : vector<8x7x256xf32> to vector<8x1x256xf32>
    %400 = vector.shape_cast %399 : vector<8x1x256xf32> to vector<8x256xf32>
    %401 = arith.truncf %400 : vector<8x256xf32> to vector<8x256xbf16>
    %c1280 = arith.constant 1280 : index
    %c0_114 = arith.constant 0 : index
    %402 = vector.load %arg2[%c1280, %c0_114] : memref<1800x400xbf16, #tpu.memory_space<vmem>>, vector<256x400xbf16>
    %cst_115 = arith.constant dense<0.000000e+00> : vector<8x400xf32>
    %403 = tpu.matmul %401, %402, %cst_115 {dimension_numbers = #tpu.dot_dimension_numbers<[1], [0], [0], [1], [0, 0, 1, 1], [], []>} : vector<8x256xbf16>, vector<256x400xbf16>, vector<8x400xf32> -> vector<8x400xf32>
    %404 = arith.addf %398, %403 : vector<8x400xf32>
    %405 = vector.extract_strided_slice %363 {offsets = [0, 6, 0], sizes = [8, 1, 256], strides = [1, 1, 1]} : vector<8x7x256xf32> to vector<8x1x256xf32>
    %406 = vector.shape_cast %405 : vector<8x1x256xf32> to vector<8x256xf32>
    %407 = arith.truncf %406 : vector<8x256xf32> to vector<8x256xbf16>
    %c1536 = arith.constant 1536 : index
    %c0_116 = arith.constant 0 : index
    %408 = vector.load %arg2[%c1536, %c0_116] : memref<1800x400xbf16, #tpu.memory_space<vmem>>, vector<256x400xbf16>
    %cst_117 = arith.constant dense<0.000000e+00> : vector<8x400xf32>
    %409 = tpu.matmul %407, %408, %cst_117 {dimension_numbers = #tpu.dot_dimension_numbers<[1], [0], [0], [1], [0, 0, 1, 1], [], []>} : vector<8x256xbf16>, vector<256x400xbf16>, vector<8x400xf32> -> vector<8x400xf32>
    %410 = arith.addf %404, %409 : vector<8x400xf32>
    %cst_118 = arith.constant 0.000000e+00 : f32
    %411 = vector.broadcast %cst_118 : f32 to vector<8x400xf32>
    %412 = arith.maximumf %410, %411 : vector<8x400xf32>
    %c592 = arith.constant 592 : index
    %c0_119 = arith.constant 0 : index
    %413 = vector.load %arg3[%c592, %c0_119] : memref<1336x256xbf16, #tpu.memory_space<vmem>>, vector<400x256xbf16>
    %c992 = arith.constant 992 : index
    %c0_120 = arith.constant 0 : index
    %414 = vector.load %arg3[%c992, %c0_120] : memref<1336x256xbf16, #tpu.memory_space<vmem>>, vector<1x256xbf16>
    %415 = arith.extf %414 : vector<1x256xbf16> to vector<1x256xf32>
    %416 = arith.truncf %412 : vector<8x400xf32> to vector<8x400xbf16>
    %cst_121 = arith.constant dense<0.000000e+00> : vector<8x256xf32>
    %417 = tpu.matmul %416, %413, %cst_121 {dimension_numbers = #tpu.dot_dimension_numbers<[1], [0], [0], [1], [0, 0, 1, 1], [], []>} : vector<8x400xbf16>, vector<400x256xbf16>, vector<8x256xf32> -> vector<8x256xf32>
    %418 = vector.broadcast %415 : vector<1x256xf32> to vector<8x256xf32>
    %419 = arith.addf %417, %418 : vector<8x256xf32>
    %cst_122 = arith.constant 0.000000e+00 : f32
    %420 = vector.broadcast %cst_122 : f32 to vector<8x256xf32>
    %421 = arith.maximumf %419, %420 : vector<8x256xf32>
    %c1000 = arith.constant 1000 : index
    %c0_123 = arith.constant 0 : index
    %422 = vector.load %arg3[%c1000, %c0_123] : memref<1336x256xbf16, #tpu.memory_space<vmem>>, vector<256x64xbf16>
    %c1256 = arith.constant 1256 : index
    %c0_124 = arith.constant 0 : index
    %423 = vector.load %arg3[%c1256, %c0_124] : memref<1336x256xbf16, #tpu.memory_space<vmem>>, vector<1x64xbf16>
    %424 = arith.extf %423 : vector<1x64xbf16> to vector<1x64xf32>
    %425 = arith.truncf %421 : vector<8x256xf32> to vector<8x256xbf16>
    %cst_125 = arith.constant dense<0.000000e+00> : vector<8x64xf32>
    %426 = tpu.matmul %425, %422, %cst_125 {dimension_numbers = #tpu.dot_dimension_numbers<[1], [0], [0], [1], [0, 0, 1, 1], [], []>} : vector<8x256xbf16>, vector<256x64xbf16>, vector<8x64xf32> -> vector<8x64xf32>
    %427 = vector.broadcast %424 : vector<1x64xf32> to vector<8x64xf32>
    %428 = arith.addf %426, %427 : vector<8x64xf32>
    %cst_126 = arith.constant 0.000000e+00 : f32
    %429 = vector.broadcast %cst_126 : f32 to vector<8x64xf32>
    %430 = arith.maximumf %428, %429 : vector<8x64xf32>
    %c1264 = arith.constant 1264 : index
    %c0_127 = arith.constant 0 : index
    %431 = vector.load %arg3[%c1264, %c0_127] : memref<1336x256xbf16, #tpu.memory_space<vmem>>, vector<64x7xbf16>
    %c1328 = arith.constant 1328 : index
    %c0_128 = arith.constant 0 : index
    %432 = vector.load %arg3[%c1328, %c0_128] : memref<1336x256xbf16, #tpu.memory_space<vmem>>, vector<1x7xbf16>
    %433 = arith.extf %432 : vector<1x7xbf16> to vector<1x7xf32>
    %434 = arith.truncf %430 : vector<8x64xf32> to vector<8x64xbf16>
    %cst_129 = arith.constant dense<0.000000e+00> : vector<8x7xf32>
    %435 = tpu.matmul %434, %431, %cst_129 {dimension_numbers = #tpu.dot_dimension_numbers<[1], [0], [0], [1], [0, 0, 1, 1], [], []>} : vector<8x64xbf16>, vector<64x7xbf16>, vector<8x7xf32> -> vector<8x7xf32>
    %436 = vector.broadcast %433 : vector<1x7xf32> to vector<8x7xf32>
    %437 = arith.addf %435, %436 : vector<8x7xf32>
    %438 = arith.negf %437 : vector<8x7xf32>
    %439 = math.exp %438 : vector<8x7xf32>
    %cst_130 = arith.constant 1.000000e+00 : f32
    %440 = vector.broadcast %cst_130 : f32 to vector<8x7xf32>
    %441 = arith.addf %440, %439 : vector<8x7xf32>
    %442 = arith.divf %440, %441 : vector<8x7xf32>
    %c0_131 = arith.constant 0 : index
    %c0_132 = arith.constant 0 : index
    %c0_133 = arith.constant 0 : index
    %443 = vector.load %arg4[%c0_131, %c0_132, %c0_133] : memref<8x8x256xf32, #tpu.memory_space<vmem>>, vector<8x7x256xf32>
    tpu.vector_store %arg4[%c0_131, %c0_132, %c0_133], %363 {strides = array<i32>} : memref<8x8x256xf32, #tpu.memory_space<vmem>>, vector<8x7x256xf32>,
    %cst_134 = arith.constant 0.000000e+00 : f32
    %444 = vector.broadcast %cst_134 : f32 to vector<8x249xf32>
    %445 = tpu.concatenate %442, %444 in 1 : vector<8x7xf32>, vector<8x249xf32> -> vector<8x256xf32>
    %c0_135 = arith.constant 0 : index
    %c7_136 = arith.constant 7 : index
    %c0_137 = arith.constant 0 : index
    %446 = vector.load %arg4[%c0_135, %c7_136, %c0_137] : memref<8x8x256xf32, #tpu.memory_space<vmem>>, vector<8x1x256xf32>
    %447 = vector.shape_cast %446 : vector<8x1x256xf32> to vector<8x256xf32>
    %448 = vector.shape_cast %445 : vector<8x256xf32> to vector<8x1x256xf32>
    tpu.vector_store %arg4[%c0_135, %c7_136, %c0_137], %448 {strides = array<i32>} : memref<8x8x256xf32, #tpu.memory_space<vmem>>, vector<8x1x256xf32>,
    return
  }
}

</mosaic_0001>

<bundles_post_ra>
// kernel: bert_head_forward.1
= control target key start
LH: loop header
LB: loop body
LE: loop exit
PB: predicated region body
PF: predicated region fallthrough
CT: control target
= control target key end

     0   :  { %v17108_v3 = vmov 0   ;;  %vm410_vm0 = vcmask 523264   ;;  %vm4658_vm2 = vcmask 63488   ;;  %vm5239_vm5 = vcmask 64512   ;;  %s17103_s1 = inlined_call_operand.vmem [shape: bf16[328,1024], index: 1, kind: input, shape index: {}]   ;;  %s17104_s0 = inlined_call_operand.vmem [shape: bf16[64,64], index: 0, kind: input, shape index: {}]   ;;  %s17105_s3 = inlined_call_operand.vmem [shape: bf16[1336,256], index: 3, kind: input, shape index: {}]   ;;  %s17106_s2 = inlined_call_operand.vmem [shape: bf16[1800,400], index: 2, kind: input, shape index: {}]   ;;  %s17107_s4 = inlined_call_operand.vmem [shape: f32[8,8,256], index: 4, kind: output, shape index: {}]  }
   0x1   :  { %v18_v0 = vld [vmem:[%s17103_s1] sm:$0xff]  ;;  %v20_v2 = vld [vmem:[%s17103_s1 + $0x10] sm:$0xff]  ;;  %455 = vmatprep.mubr.bf16.mxu1 %v17108_v3  ;;  %601 = vmatprep.mubr.bf16.mxu0 %v17108_v3  ;;  %v19_v31 = vld [vmem:[%s17103_s1 + $0x8] sm:$0xff]  ;;  %vm5971_vm6 = vcmask 1041409   ;;  %vm5974_vm7 = vcmask 1042434   ;;  %vm5977_vm8 = vcmask 1043459  }
   0x2   :  { %v22_v1 = vld [vmem:[%s17103_s1 + $0x20] sm:$0xff]  ;;  %v24_v5 = vld [vmem:[%s17103_s1 + $0x30] sm:$0xff]  ;;  %v23_v32 = vld [vmem:[%s17103_s1 + $0x28] sm:$0xff]  ;;  %vm5980_vm9 = vcmask 1044484   ;;  %vm5983_vm10 = vcmask 1045509   ;;  %vm5986_vm11 = vcmask 1046534  }
   0x3   :  { %v10214_v4 = vcombine.high %v18_v0, %v22_v1  ;;  %v10213_v6 = vcombine.low %v18_v0, %v22_v1  ;;  %v26_v7 = vld [vmem:[%s17103_s1 + $0x40] sm:$0xff]  ;;  %v10218_v9 = vcombine.high %v20_v2, %v24_v5  ;;  %v10217_v10 = vcombine.low %v20_v2, %v24_v5  ;;  %v28_v12 = vld [vmem:[%s17103_s1 + $0x50] sm:$0xff]  ;;  %v27_v42 = vld [vmem:[%s17103_s1 + $0x48] sm:$0xff] }
   0x4   :  { %v30_v8 = vld [vmem:[%s17103_s1 + $0x60] sm:$0xff]  ;;  %v32_v13 = vld [vmem:[%s17103_s1 + $0x70] sm:$0xff]  ;;  %v10216_v38 = vcombine.high %v19_v31, %v23_v32  ;;  %v31_v43 = vld [vmem:[%s17103_s1 + $0x68] sm:$0xff]  ;;  %v10215_v44 = vcombine.low %v19_v31, %v23_v32  ;;  %vm5989_vm12 = vcmask 1047559   ;;  %vm9746_vm13 = vcmask 130048  }
   0x5   :  { %v10222_v11 = vcombine.high %v26_v7, %v30_v8  ;;  %v34_v14 = vld [vmem:[%s17103_s1 + $0x80] sm:$0xff]  ;;  %423 = vmatprep.subr.bf16.mxu1 %v10214_v4  ;;  %v10226_v15 = vcombine.high %v28_v12, %v32_v13  ;;  %v36_v17 = vld [vmem:[%s17103_s1 + $0x90] sm:$0xff]  ;;  %569 = vmatprep.subr.bf16.mxu0 %v10218_v9  ;;  %v10221_v19 = vcombine.low %v26_v7, %v30_v8  ;;  %v35_v48 = vld [vmem:[%s17103_s1 + $0x88] sm:$0xff]  ;;  %vm12400_vm14 = vmmov 0  }
   0x6   :  { %v38_v16 = vld [vmem:[%s17103_s1 + $0xa0] sm:$0xff]  ;;  %v40_v18 = vld [vmem:[%s17103_s1 + $0xb0] sm:$0xff]  ;;  %424 = vmatpush1.bf16.msra.mxu1 %v10213_v6  ;;  %570 = vmatpush1.bf16.msra.mxu0 %v10217_v10  ;;  %v10225_v20 = vcombine.low %v28_v12, %v32_v13  ;;  %v10224_v47 = vcombine.high %v27_v42, %v31_v43  ;;  %v39_v49 = vld [vmem:[%s17103_s1 + $0xa8] sm:$0xff]  ;;  %v10223_v52 = vcombine.low %v27_v42, %v31_v43  ;;  %vm10115_vm15 = vcmask 56320  }
   0x7   :  { %425 = vmatprep.subr.bf16.mxu1 %v10222_v11  ;;  %v10230_v21 = vcombine.high %v34_v14, %v38_v16  ;;  %571 = vmatprep.subr.bf16.mxu0 %v10226_v15  ;;  %v10234_v22 = vcombine.high %v36_v17, %v40_v18  ;;  %v42_v23 = vld [vmem:[%s17103_s1 + $0xc0] sm:$0xff]  ;;  %v44_v25 = vld [vmem:[%s17103_s1 + $0xd0] sm:$0xff]  ;;  %v10229_v27 = vcombine.low %v34_v14, %v38_v16  ;;  %v43_v56 = vld [vmem:[%s17103_s1 + $0xc8] sm:$0xff] }
   0x8   :  { %v46_v24 = vld [vmem:[%s17103_s1 + $0xe0] sm:$0xff]  ;;  %v48_v26 = vld [vmem:[%s17103_s1 + $0xf0] sm:$0xff]  ;;  %v10233_v28 = vcombine.low %v36_v17, %v40_v18  ;;  %v10232_v54 = vcombine.high %v35_v48, %v39_v49  ;;  %v47_v57 = vld [vmem:[%s17103_s1 + $0xe8] sm:$0xff]  ;;  %v10231_v61 = vcombine.low %v35_v48, %v39_v49 }
   0x9   :  { %v10238_v29 = vcombine.high %v42_v23, %v46_v24  ;;  %v10242_v30 = vcombine.high %v44_v25, %v48_v26  ;;  %v50_v33 = vld [vmem:[%s17103_s1 + $0x100] sm:$0xff]  ;;  %v10237_v35 = vcombine.low %v42_v23, %v46_v24  ;;  %v10241_v36 = vcombine.low %v44_v25, %v48_v26  ;;  %v12544_v58 = vld [vmem:[%s17104_s0 + $0x8] sm:$0xff]   ;;  %v12562_v1 = vld [vmem:[%s17103_s1 + $0x18] sm:$0xff] }
   0xa   :  { %426 = vmatpush1.bf16.msra.mxu1 %v10221_v19  ;;  %572 = vmatpush1.bf16.msra.mxu0 %v10225_v20  ;;  %v54_v34 = vld [vmem:[%s17103_s1 + $0x120] sm:$0xff]  ;;  %v10240_v63 = vcombine.high %v43_v56, %v47_v57  ;;  %v12567_v2 = vld [vmem:[%s17103_s1 + $0x38] sm:$0xff]  ;;  %v10239_v6 = vcombine.low %v43_v56, %v47_v57  ;;  %v12591_v10 = vld [vmem:[%s17104_s0 + $0x10] sm:$0xff]  }
   0xb   :  { %427 = vmatprep.subr.bf16.mxu1 %v10230_v21  ;;  %573 = vmatprep.subr.bf16.mxu0 %v10234_v22  ;;  %v12491_v37 = vld [vmem:[%s17104_s0] sm:$0xff]   ;;  %v12493_v39 = vcombine.high %v50_v33, %v54_v34  ;;  %v12507_v45 = vcombine.low %v50_v33, %v54_v34  ;;  %v10220_v8 = vcombine.high %v12562_v1, %v12567_v2  ;;  %v12626_v19 = vld [vmem:[%s17104_s0 + $0x18] sm:$0xff]  }
   0xc   :  { %v58_v40 = vld [vmem:[%s17103_s1 + $0x140] sm:$0xff]  ;;  %v10219_v32 = vcombine.low %v12562_v1, %v12567_v2  ;;  %v45_v48 = vld [vmem:[%s17103_s1 + $0xd8] sm:$0xff] }
   0xd   :  { %17338 = vst [vmem:[#allocation3_spill] sm:$0xff] %v12493_v39  ;;  %v62_v41 = vld [vmem:[%s17103_s1 + $0x160] sm:$0xff]  ;;  %17339 = vst [vmem:[#allocation4_spill] sm:$0xff] %v12507_v45  ;;  %v49_v49 = vld [vmem:[%s17103_s1 + $0xf8] sm:$0xff] }
   0xe   :  { %428 = vmatpush1.bf16.msra.mxu1 %v10229_v27  ;;  %574 = vmatpush1.bf16.msra.mxu0 %v10233_v28  ;;  %v12510_v46 = vcombine.high %v58_v40, %v62_v41  ;;  %v66_v50 = vld [vmem:[%s17103_s1 + $0x180] sm:$0xff]  ;;  %v12529_v53 = vcombine.low %v58_v40, %v62_v41  ;;  %v29_v28 = vld [vmem:[%s17103_s1 + $0x58] sm:$0xff]  ;;  %v10244_v56 = vcombine.high %v45_v48, %v49_v49 }
   0xf   :  { %429 = vmatprep.subr.bf16.mxu1 %v10238_v29  ;;  %575 = vmatprep.subr.bf16.mxu0 %v10242_v30  ;;  %v70_v51 = vld [vmem:[%s17103_s1 + $0x1a0] sm:$0xff]  ;;  %v33_v29 = vld [vmem:[%s17103_s1 + $0x78] sm:$0xff]  ;;  %v10243_v1 = vcombine.low %v45_v48, %v49_v49 }
  0x10   :  { %17340 = vst [vmem:[#allocation5_spill] sm:$0xff] %v12510_v46  ;;  %17341 = vst [vmem:[#allocation6_spill] sm:$0xff] %v12529_v53  ;;  %v12533_v55 = vcombine.high %v66_v50, %v70_v51  ;;  %v74_v59 = vld [vmem:[%s17103_s1 + $0x1c0] sm:$0xff]  ;;  %v12554_v62 = vcombine.low %v66_v50, %v70_v51  ;;  %v10228_v34 = vcombine.high %v29_v28, %v33_v29 }
  0x11   :  { %v78_v60 = vld [vmem:[%s17103_s1 + $0x1e0] sm:$0xff]  ;;  %v10227_v42 = vcombine.low %v29_v28, %v33_v29 }
  0x12   :  { %430 = vmatpush1.bf16.msra.mxu1 %v10237_v35  ;;  %576 = vmatpush1.bf16.msra.mxu0 %v10241_v36  ;;  %17342 = vst [vmem:[#allocation7_spill] sm:$0xff] %v12533_v55  ;;  %17343 = vst [vmem:[#allocation8_spill] sm:$0xff] %v12554_v62  ;;  %v12557_v0 = vcombine.high %v74_v59, %v78_v60  ;;  %v82_v4 = vld [vmem:[%s17103_s1 + $0x200] sm:$0xff]  ;;  %v12579_v7 = vcombine.low %v74_v59, %v78_v60  ;;  %v37_v36 = vld [vmem:[%s17103_s1 + $0x98] sm:$0xff] }
  0x13   :  { %496 = vmatprep.subr.bf16.mxu1 %v10216_v38  ;;  %1355 = vmatprep.subr.bf16.mxu0 %v12493_v39  ;;  %v86_v5 = vld [vmem:[%s17103_s1 + $0x220] sm:$0xff]  ;;  %v41_v38 = vld [vmem:[%s17103_s1 + $0xb8] sm:$0xff]  ;;  %v51_v59 = vld [vmem:[%s17103_s1 + $0x108] sm:$0xff] }
  0x14   :  { %17344 = vst [vmem:[#allocation9_spill] sm:$0xff] %v12557_v0  ;;  %17345 = vst [vmem:[#allocation10_spill] sm:$0xff] %v12579_v7  ;;  %v12584_v9 = vcombine.high %v82_v4, %v86_v5  ;;  %v90_v11 = vld [vmem:[%s17103_s1 + $0x240] sm:$0xff]  ;;  %v12601_v13 = vcombine.low %v82_v4, %v86_v5  ;;  %v55_v60 = vld [vmem:[%s17103_s1 + $0x128] sm:$0xff] }
  0x15   :  { %10245 = vmatmul.mubr.msk.bf16.vlgmr.msra.gmra.mrb[0].mxu1 %vm410_vm0, %v12491_v37  ;;  %10253 = vmatmul.mubr.msk.bf16.vlgmr.msra.gmra.mrb[0].mxu0 %vm410_vm0, %v12491_v37  ;;  %v94_v12 = vld [vmem:[%s17103_s1 + $0x260] sm:$0xff]  ;;  %v12736_v4 = vcombine.high %v51_v59, %v55_v60 }
  0x16   :  { %497 = vmatpush1.bf16.msra.mxu1 %v10215_v44  ;;  %1356 = vmatpush1.bf16.msra.mxu0 %v12507_v45  ;;  %17346 = vst [vmem:[#allocation11_spill] sm:$0xff] %v12584_v9  ;;  %17347 = vst [vmem:[#allocation12_spill] sm:$0xff] %v12601_v13  ;;  %v12604_v14 = vcombine.high %v90_v11, %v94_v12  ;;  %v98_v15 = vld [vmem:[%s17103_s1 + $0x280] sm:$0xff]  ;;  %v12616_v17 = vcombine.low %v90_v11, %v94_v12 }
  0x17   :  { %465 = vmatprep.mubr.bf16.mxu1 %v17108_v3  ;;  %1357 = vmatprep.subr.bf16.mxu0 %v12510_v46  ;;  %v102_v16 = vld [vmem:[%s17103_s1 + $0x2a0] sm:$0xff]  ;;  %v10236_v44 = vcombine.high %v37_v36, %v41_v38  ;;  %17362 = vst [vmem:[#allocation27_spill] sm:$0xff] %v12736_v4 }
  0x18   :  { %498 = vmatprep.subr.bf16.mxu1 %v10224_v47  ;;  %611 = vmatprep.mubr.bf16.mxu0 %v17108_v3  ;;  %17348 = vst [vmem:[#allocation13_spill] sm:$0xff] %v12604_v14  ;;  %17349 = vst [vmem:[#allocation14_spill] sm:$0xff] %v12616_v17  ;;  %v12619_v18 = vcombine.high %v98_v15, %v102_v16  ;;  %v106_v20 = vld [vmem:[%s17103_s1 + $0x2c0] sm:$0xff]  ;;  %v12636_v22 = vcombine.low %v98_v15, %v102_v16 }
  0x19   :  { %v110_v21 = vld [vmem:[%s17103_s1 + $0x2e0] sm:$0xff] }
  0x1a   :  { %499 = vmatpush1.bf16.msra.mxu1 %v10223_v52  ;;  %1358 = vmatpush1.bf16.msra.mxu0 %v12529_v53  ;;  %17350 = vst [vmem:[#allocation15_spill] sm:$0xff] %v12619_v18  ;;  %17351 = vst [vmem:[#allocation16_spill] sm:$0xff] %v12636_v22  ;;  %v12639_v23 = vcombine.high %v106_v20, %v110_v21  ;;  %v114_v24 = vld [vmem:[%s17103_s1 + $0x300] sm:$0xff]  ;;  %v12651_v26 = vcombine.low %v106_v20, %v110_v21 }
  0x1b   :  { %500 = vmatprep.subr.bf16.mxu1 %v10232_v54  ;;  %1359 = vmatprep.subr.bf16.mxu0 %v12533_v55  ;;  %v118_v25 = vld [vmem:[%s17103_s1 + $0x320] sm:$0xff]  ;;  %v10235_v52 = vcombine.low %v37_v36, %v41_v38  ;;  %v59_v36 = vld [vmem:[%s17103_s1 + $0x148] sm:$0xff] }
  0x1c   :  { %17352 = vst [vmem:[#allocation17_spill] sm:$0xff] %v12639_v23  ;;  %17353 = vst [vmem:[#allocation18_spill] sm:$0xff] %v12651_v26  ;;  %v12654_v27 = vcombine.high %v114_v24, %v118_v25  ;;  %v122_v30 = vld [vmem:[%s17103_s1 + $0x340] sm:$0xff]  ;;  %v12674_v33 = vcombine.low %v114_v24, %v118_v25  ;;  %v63_v38 = vld [vmem:[%s17103_s1 + $0x168] sm:$0xff] }
  0x1d   :  { %10246 = vmatmul.mubr.msk.bf16.gmra.mrb[4].mxu1 %vm410_vm0, %v12544_v58  ;;  %10254 = vmatmul.mubr.msk.bf16.gmra.mrb[4].mxu0 %vm410_vm0, %v12544_v58  ;;  %v126_v31 = vld [vmem:[%s17103_s1 + $0x360] sm:$0xff]  ;;  %v12813_v48 = vcombine.high %v59_v36, %v63_v38 }
  0x1e   :  { %475 = vmatprep.mubr.bf16.mxu1 %v17108_v3  ;;  %501 = vmatpush1.bf16.msra.mxu1 %v10231_v61  ;;  %17354 = vst [vmem:[#allocation19_spill] sm:$0xff] %v12654_v27  ;;  %17355 = vst [vmem:[#allocation20_spill] sm:$0xff] %v12674_v33  ;;  %v12677_v35 = vcombine.high %v122_v30, %v126_v31  ;;  %v130_v40 = vld [vmem:[%s17103_s1 + $0x380] sm:$0xff]  ;;  %v12695_v43 = vcombine.low %v122_v30, %v126_v31  ;;  %v52_v30 = vld [vmem:[%s17103_s1 + $0x110] sm:$0xff] }
  0x1f   :  { %1360 = vmatpush1.bf16.msra.mxu0 %v12554_v62  ;;  %502 = vmatprep.subr.bf16.mxu1 %v10240_v63  ;;  %v134_v41 = vld [vmem:[%s17103_s1 + $0x3a0] sm:$0xff]  ;;  %v56_v31 = vld [vmem:[%s17103_s1 + $0x130] sm:$0xff]  ;;  %17374 = vst [vmem:[#allocation39_spill] sm:$0xff] %v12813_v48 }
  0x20   :  { %1361 = vmatprep.subr.bf16.mxu0 %v12557_v0  ;;  %621 = vmatprep.mubr.bf16.mxu0 %v17108_v3  ;;  %17356 = vst [vmem:[#allocation21_spill] sm:$0xff] %v12677_v35  ;;  %17357 = vst [vmem:[#allocation22_spill] sm:$0xff] %v12695_v43  ;;  %v12698_v47 = vcombine.high %v130_v40, %v134_v41  ;;  %v138_v50 = vld [vmem:[%s17103_s1 + $0x3c0] sm:$0xff]  ;;  %v12713_v54 = vcombine.low %v130_v40, %v134_v41  ;;  %v60_v40 = vld [vmem:[%s17103_s1 + $0x150] sm:$0xff] }
  0x21   :  { %v142_v51 = vld [vmem:[%s17103_s1 + $0x3e0] sm:$0xff]  ;;  %v64_v41 = vld [vmem:[%s17103_s1 + $0x170] sm:$0xff] }
  0x22   :  { %503 = vmatpush1.bf16.msra.mxu1 %v10239_v6  ;;  %17358 = vst [vmem:[#allocation23_spill] sm:$0xff] %v12698_v47  ;;  %17359 = vst [vmem:[#allocation24_spill] sm:$0xff] %v12713_v54  ;;  %v12716_v57 = vcombine.high %v138_v50, %v142_v51  ;;  %v146_v61 = vld [vmem:[%s17103_s1 + $0x400] sm:$0xff]  ;;  %v12734_v2 = vcombine.low %v138_v50, %v142_v51  ;;  %v12816_v49 = vcombine.high %v60_v40, %v64_v41  ;;  %v67_v50 = vld [vmem:[%s17103_s1 + $0x188] sm:$0xff] }
  0x23   :  { %1362 = vmatpush1.bf16.msra.mxu0 %v12579_v7  ;;  %642 = vmatprep.subr.bf16.mxu1 %v10220_v8  ;;  %v150_v63 = vld [vmem:[%s17103_s1 + $0x420] sm:$0xff]  ;;  %v71_v51 = vld [vmem:[%s17103_s1 + $0x1a8] sm:$0xff] }
  0x24   :  { %1363 = vmatprep.subr.bf16.mxu0 %v12584_v9  ;;  %17360 = vst [vmem:[#allocation25_spill] sm:$0xff] %v12716_v57  ;;  %17361 = vst [vmem:[#allocation26_spill] sm:$0xff] %v12734_v2  ;;  %v12739_v5 = vcombine.high %v146_v61, %v150_v63  ;;  %v154_v6 = vld [vmem:[%s17103_s1 + $0x440] sm:$0xff]  ;;  %v12748_v11 = vcombine.low %v146_v61, %v150_v63  ;;  %v75_v63 = vld [vmem:[%s17103_s1 + $0x1c8] sm:$0xff] }
  0x25   :  { %10247 = vmatmul.mubr.msk.bf16.gmra.mrb[8].mxu1 %vm410_vm0, %v12591_v10  ;;  %10255 = vmatmul.mubr.msk.bf16.gmra.mrb[8].mxu0 %vm410_vm0, %v12591_v10  ;;  %v158_v8 = vld [vmem:[%s17103_s1 + $0x460] sm:$0xff]  ;;  %17375 = vst [vmem:[#allocation40_spill] sm:$0xff] %v12816_v49 }
  0x26   :  { %485 = vmatprep.mubr.bf16.mxu1 %v17108_v3  ;;  %631 = vmatprep.mubr.bf16.mxu0 %v17108_v3  ;;  %17363 = vst [vmem:[#allocation28_spill] sm:$0xff] %v12739_v5  ;;  %17364 = vst [vmem:[#allocation29_spill] sm:$0xff] %v12748_v11  ;;  %v12752_v12 = vcombine.high %v154_v6, %v158_v8  ;;  %v162_v15 = vld [vmem:[%s17103_s1 + $0x480] sm:$0xff]  ;;  %v12764_v20 = vcombine.low %v154_v6, %v158_v8  ;;  %v76_v6 = vld [vmem:[%s17103_s1 + $0x1d0] sm:$0xff] }
  0x27   :  { %1364 = vmatpush1.bf16.msra.mxu0 %v12601_v13  ;;  %v166_v16 = vld [vmem:[%s17103_s1 + $0x4a0] sm:$0xff]  ;;  %v80_v8 = vld [vmem:[%s17103_s1 + $0x1f0] sm:$0xff] }
  0x28   :  { %1365 = vmatprep.subr.bf16.mxu0 %v12604_v14  ;;  %17365 = vst [vmem:[#allocation30_spill] sm:$0xff] %v12752_v12  ;;  %17366 = vst [vmem:[#allocation31_spill] sm:$0xff] %v12764_v20  ;;  %v12767_v21 = vcombine.high %v162_v15, %v166_v16  ;;  %v170_v24 = vld [vmem:[%s17103_s1 + $0x4c0] sm:$0xff]  ;;  %v12776_v28 = vcombine.low %v162_v15, %v166_v16  ;;  %v12860_v15 = vcombine.low %v67_v50, %v71_v51 }
  0x29   :  { %v174_v25 = vld [vmem:[%s17103_s1 + $0x4e0] sm:$0xff] }
  0x2a   :  { %17367 = vst [vmem:[#allocation32_spill] sm:$0xff] %v12767_v21  ;;  %17368 = vst [vmem:[#allocation33_spill] sm:$0xff] %v12776_v28  ;;  %v12779_v29 = vcombine.high %v170_v24, %v174_v25 }
  0x2b   :  { %1366 = vmatpush1.bf16.msra.mxu0 %v12616_v17  ;;  %17380 = vst [vmem:[#allocation45_spill] sm:$0xff] %v12860_v15 }
  0x2c   :  { %1367 = vmatprep.subr.bf16.mxu0 %v12619_v18  ;;  %17369 = vst [vmem:[#allocation34_spill] sm:$0xff] %v12779_v29 }
  0x2d   :  { %10248 = vmatmul.mubr.msk.bf16.gmra.mrb[12].mxu1 %vm410_vm0, %v12626_v19  ;;  %10256 = vmatmul.mubr.msk.bf16.gmra.mrb[12].mxu0 %vm410_vm0, %v12626_v19 }
  0x2e   :  { %528 = vmatprep.mubr.bf16.mxu1 %v17108_v3  ;;  %1387 = vmatprep.mubr.bf16.mxu0 %v17108_v3 }
  0x2f   :  { %1368 = vmatpush1.bf16.msra.mxu0 %v12636_v22 }
  0x30   :  { %1369 = vmatprep.subr.bf16.mxu0 %v12639_v23 }
  0x33   :  { %1370 = vmatpush1.bf16.msra.mxu0 %v12651_v26 }
  0x34   :  { %1371 = vmatprep.subr.bf16.mxu0 %v12654_v27 }
  0x35   :  { %10249 = vmatmul.mubr.msk.bf16.vlgmr.msra.gmra.mrb[16].mxu1 %vm410_vm0, %v12491_v37 }
  0x36   :  { %643 = vmatpush1.bf16.msra.mxu1 %v10219_v32  ;;  %538 = vmatprep.mubr.bf16.mxu1 %v17108_v3  ;;  %v12791_v32 = vcombine.low %v170_v24, %v174_v25  ;;  %v12869_v25 = vcombine.high %v76_v6, %v80_v8 }
  0x37   :  { %1372 = vmatpush1.bf16.msra.mxu0 %v12674_v33  ;;  %644 = vmatprep.subr.bf16.mxu1 %v10228_v34  ;;  %v12794_v34 = vcombine.high %v52_v30, %v56_v31 }
  0x38   :  { %1373 = vmatprep.subr.bf16.mxu0 %v12677_v35  ;;  %17370 = vst [vmem:[#allocation35_spill] sm:$0xff] %v12791_v32  ;;  %17383 = vst [vmem:[#allocation48_spill] sm:$0xff] %v12869_v25 }
  0x39   :  { %17371 = vst [vmem:[#allocation36_spill] sm:$0xff] %v12794_v34 }
  0x3a   :  { %645 = vmatpush1.bf16.msra.mxu1 %v10227_v42  ;;  %v12808_v42 = vcombine.low %v51_v59, %v55_v60  ;;  %v12834_v59 = vcombine.low %v59_v36, %v63_v38  ;;  %v12838_v60 = vcombine.low %v60_v40, %v64_v41  ;;  %v84_v36 = vld [vmem:[%s17103_s1 + $0x210] sm:$0xff]  ;;  %v12891_v41 = vcombine.low %v76_v6, %v80_v8 }
  0x3b   :  { %1374 = vmatpush1.bf16.msra.mxu0 %v12695_v43  ;;  %646 = vmatprep.subr.bf16.mxu1 %v10236_v44  ;;  %v12811_v44 = vcombine.low %v52_v30, %v56_v31  ;;  %v83_v30 = vld [vmem:[%s17103_s1 + $0x208] sm:$0xff]  ;;  %v88_v38 = vld [vmem:[%s17103_s1 + $0x230] sm:$0xff] }
  0x3c   :  { %1375 = vmatprep.subr.bf16.mxu0 %v12698_v47  ;;  %17372 = vst [vmem:[#allocation37_spill] sm:$0xff] %v12808_v42  ;;  %17376 = vst [vmem:[#allocation41_spill] sm:$0xff] %v12834_v59  ;;  %v87_v31 = vld [vmem:[%s17103_s1 + $0x228] sm:$0xff]  ;;  %v12915_v6 = vcombine.low %v84_v36, %v88_v38 }
  0x3d   :  { %10250 = vmatmul.mubr.msk.bf16.gmra.mrb[20].mxu1 %vm410_vm0, %v12544_v58  ;;  %17373 = vst [vmem:[#allocation38_spill] sm:$0xff] %v12811_v44  ;;  %17377 = vst [vmem:[#allocation42_spill] sm:$0xff] %v12838_v60 }
  0x3e   :  { %548 = vmatprep.mubr.bf16.mxu1 %v17108_v3  ;;  %647 = vmatpush1.bf16.msra.mxu1 %v10235_v52  ;;  %v68_v52 = vld [vmem:[%s17103_s1 + $0x190] sm:$0xff]  ;;  %17385 = vst [vmem:[#allocation50_spill] sm:$0xff] %v12891_v41  ;;  %17389 = vst [vmem:[#allocation54_spill] sm:$0xff] %v12915_v6 }
  0x3f   :  { %1376 = vmatpush1.bf16.msra.mxu0 %v12713_v54  ;;  %648 = vmatprep.subr.bf16.mxu1 %v10244_v56  ;;  %v72_v56 = vld [vmem:[%s17103_s1 + $0x1b0] sm:$0xff] }
  0x40   :  { %1377 = vmatprep.subr.bf16.mxu0 %v12716_v57  ;;  %v12843_v61 = vcombine.high %v68_v52, %v72_v56  ;;  %v12864_v16 = vcombine.low %v68_v52, %v72_v56  ;;  %v95_v52 = vld [vmem:[%s17103_s1 + $0x268] sm:$0xff]  ;;  %v92_v56 = vld [vmem:[%s17103_s1 + $0x250] sm:$0xff] }
  0x42   :  { %649 = vmatpush1.bf16.msra.mxu1 %v10243_v1  ;;  %17379 = vst [vmem:[#allocation44_spill] sm:$0xff] %v12843_v61  ;;  %v79_v1 = vld [vmem:[%s17103_s1 + $0x1e8] sm:$0xff]  ;;  %17381 = vst [vmem:[#allocation46_spill] sm:$0xff] %v12864_v16 }
  0x43   :  { %1378 = vmatpush1.bf16.msra.mxu0 %v12734_v2  ;;  %1396 = vmatprep.subr.bf16.mxu1 %v12736_v4  ;;  %v12866_v24 = vcombine.high %v75_v63, %v79_v1  ;;  %v12886_v40 = vcombine.low %v75_v63, %v79_v1  ;;  %v96_v63 = vld [vmem:[%s17103_s1 + $0x270] sm:$0xff]  ;;  %v12911_v1 = vcombine.low %v83_v30, %v87_v31 }
  0x44   :  { %1379 = vmatprep.subr.bf16.mxu0 %v12739_v5 }
  0x45   :  { %10251 = vmatmul.mubr.msk.bf16.gmra.mrb[24].mxu1 %vm410_vm0, %v12591_v10  ;;  %17382 = vst [vmem:[#allocation47_spill] sm:$0xff] %v12866_v24  ;;  %17384 = vst [vmem:[#allocation49_spill] sm:$0xff] %v12886_v40 }
  0x46   :  { %558 = vmatprep.mubr.bf16.mxu1 %v17108_v3  ;;  %17388 = vst [vmem:[#allocation53_spill] sm:$0xff] %v12911_v1 }
  0x47   :  { %1380 = vmatpush1.bf16.msra.mxu0 %v12748_v11 }
  0x48   :  { %1381 = vmatprep.subr.bf16.mxu0 %v12752_v12 }
  0x4b   :  { %1382 = vmatpush1.bf16.msra.mxu0 %v12764_v20 }
  0x4c   :  { %1383 = vmatprep.subr.bf16.mxu0 %v12767_v21 }
  0x4d   :  { %10252 = vmatmul.mubr.msk.bf16.gmra.mrb[28].mxu1 %vm410_vm0, %v12626_v19 }
  0x4e   :  { %674 = vmatprep.mubr.bf16.mxu1 %v17108_v3 }
  0x4f   :  { %1384 = vmatpush1.bf16.msra.mxu0 %v12776_v28 }
  0x50   :  { %1385 = vmatprep.subr.bf16.mxu0 %v12779_v29 }
  0x53   :  { %1386 = vmatpush1.bf16.msra.mxu0 %v12791_v32 }
  0x54   :  { %1437 = vmatprep.subr.bf16.mxu0 %v12794_v34 }
  0x55   :  { %10257 = vmatmul.mubr.msk.bf16.vlgmr.msra.gmra.mrb[32].mxu1 %vm410_vm0, %v12491_v37  ;;  %v12840_v37 = vcombine.high %v67_v50, %v71_v51  ;;  %v12893_v50 = vcombine.high %v83_v30, %v87_v31  ;;  %v12896_v51 = vcombine.high %v84_v36, %v88_v38  ;;  %v103_v30 = vld [vmem:[%s17103_s1 + $0x2a8] sm:$0xff]  ;;  %v100_v31 = vld [vmem:[%s17103_s1 + $0x290] sm:$0xff] }
  0x56   :  { %1388 = vmatmul.mubr.bf16.vlgmr.msra.gmra.mrb[16].mxu0 %v17108_v3  ;;  %1397 = vmatpush1.bf16.msra.mxu1 %v12808_v42  ;;  %v104_v36 = vld [vmem:[%s17103_s1 + $0x2b0] sm:$0xff] }
  0x57   :  { %1438 = vmatpush1.bf16.msra.mxu0 %v12811_v44  ;;  %1398 = vmatprep.subr.bf16.mxu1 %v12813_v48  ;;  %17378 = vst [vmem:[#allocation43_spill] sm:$0xff] %v12840_v37  ;;  %17386 = vst [vmem:[#allocation51_spill] sm:$0xff] %v12893_v50 }
  0x58   :  { %1439 = vmatprep.subr.bf16.mxu0 %v12816_v49  ;;  %684 = vmatprep.mubr.bf16.mxu1 %v17108_v3  ;;  %17387 = vst [vmem:[#allocation52_spill] sm:$0xff] %v12896_v51  ;;  %v115_v49 = vld [vmem:[%s17103_s1 + $0x308] sm:$0xff] }
  0x59   :  { %1469 = vmatprep.mubr.bf16.mxu0 %v17108_v3 }
  0x5a   :  { %1399 = vmatpush1.bf16.msra.mxu1 %v12834_v59 }
  0x5b   :  { %1440 = vmatpush1.bf16.msra.mxu0 %v12838_v60  ;;  %1400 = vmatprep.subr.bf16.mxu1 %v12840_v37 }
  0x5c   :  { %1441 = vmatprep.subr.bf16.mxu0 %v12843_v61  ;;  %v12947_v61 = vcombine.high %v100_v31, %v104_v36 }
  0x5d   :  { %10258 = vmatmul.mubr.msk.bf16.gmra.mrb[36].mxu1 %vm410_vm0, %v12544_v58  ;;  %v91_v58 = vld [vmem:[%s17103_s1 + $0x248] sm:$0xff] }
  0x5e   :  { %1401 = vmatpush1.bf16.msra.mxu1 %v12860_v15  ;;  %694 = vmatprep.mubr.bf16.mxu1 %v17108_v3  ;;  %v12917_v8 = vcombine.high %v91_v58, %v95_v52  ;;  %v12920_v3 = vcombine.high %v92_v56, %v96_v63  ;;  %v12937_v38 = vcombine.low %v91_v58, %v95_v52  ;;  %v111_v58 = vld [vmem:[%s17103_s1 + $0x2e8] sm:$0xff]  ;;  %v108_v52 = vld [vmem:[%s17103_s1 + $0x2d0] sm:$0xff] }
  0x5f   :  { %1442 = vmatpush1.bf16.msra.mxu0 %v12864_v16  ;;  %1402 = vmatprep.subr.bf16.mxu1 %v12866_v24  ;;  %17396 = vst [vmem:[#allocation60_spill] sm:$0xff] %v12947_v61 }
  0x60   :  { %1443 = vmatprep.subr.bf16.mxu0 %v12869_v25  ;;  %17390 = vst [vmem:[#allocation55_spill] sm:$0xff] %v12917_v8  ;;  %17391 = vst [vmem:[#allocation56_spill] sm:$0xff] %v12920_v3  ;;  %v99_v25 = vld [vmem:[%s17103_s1 + $0x288] sm:$0xff] }
  0x61   :  { %17392 = vst [vmem:[#allocation57_spill] sm:$0xff] %v12937_v38  ;;  %v12944_v16 = vcombine.high %v99_v25, %v103_v30 }
  0x62   :  { %1403 = vmatpush1.bf16.msra.mxu1 %v12886_v40 }
  0x63   :  { %1444 = vmatpush1.bf16.msra.mxu0 %v12891_v41  ;;  %1404 = vmatprep.subr.bf16.mxu1 %v12893_v50  ;;  %v12942_v41 = vcombine.low %v92_v56, %v96_v63  ;;  %17395 = vst [vmem:[#allocation59_spill] sm:$0xff] %v12944_v16  ;;  %v112_v56 = vld [vmem:[%s17103_s1 + $0x2f0] sm:$0xff]  ;;  %v12962_v63 = vcombine.low %v99_v25, %v103_v30  ;;  %v119_v25 = vld [vmem:[%s17103_s1 + $0x328] sm:$0xff] }
  0x64   :  { %1445 = vmatprep.subr.bf16.mxu0 %v12896_v51  ;;  %v17393_v51 = vmov 0   ;;  %v12971_v60 = vcombine.high %v108_v52, %v112_v56  ;;  %v116_v30 = vld [vmem:[%s17103_s1 + $0x310] sm:$0xff] }
  0x65   :  { %10259 = vmatmul.mubr.msk.bf16.gmra.mrb[40].mxu1 %vm410_vm0, %v12591_v10  ;;  %17394 = vst [vmem:[#allocation58_spill] sm:$0xff] %v12942_v41  ;;  %v107_v10 = vld [vmem:[%s17103_s1 + $0x2c8] sm:$0xff]  ;;  %17397 = vst [vmem:[#allocation61_spill] sm:$0xff] %v12962_v63 }
  0x66   :  { %1405 = vmatpush1.bf16.msra.mxu1 %v12911_v1  ;;  %704 = vmatprep.mubr.bf16.mxu1 %v17393_v51  ;;  %17400 = vst [vmem:[#allocation64_spill] sm:$0xff] %v12971_v60 }
  0x67   :  { %1446 = vmatpush1.bf16.msra.mxu0 %v12915_v6  ;;  %1406 = vmatprep.subr.bf16.mxu1 %v12917_v8  ;;  %v12968_v6 = vcombine.high %v107_v10, %v111_v58 }
  0x68   :  { %1447 = vmatprep.subr.bf16.mxu0 %v12920_v3  ;;  %v12966_v3 = vcombine.low %v100_v31, %v104_v36  ;;  %v120_v31 = vld [vmem:[%s17103_s1 + $0x330] sm:$0xff]  ;;  %v12988_v36 = vcombine.low %v107_v10, %v111_v58  ;;  %v127_v10 = vld [vmem:[%s17103_s1 + $0x368] sm:$0xff] }
  0x69   :  { %17399 = vst [vmem:[#allocation63_spill] sm:$0xff] %v12968_v6  ;;  %v12998_v44 = vcombine.high %v116_v30, %v120_v31  ;;  %v124_v58 = vld [vmem:[%s17103_s1 + $0x350] sm:$0xff] }
  0x6a   :  { %1407 = vmatpush1.bf16.msra.mxu1 %v12937_v38  ;;  %17398 = vst [vmem:[#allocation62_spill] sm:$0xff] %v12966_v3  ;;  %17401 = vst [vmem:[#allocation65_spill] sm:$0xff] %v12988_v36 }
  0x6b   :  { %1448 = vmatpush1.bf16.msra.mxu0 %v12942_v41  ;;  %1408 = vmatprep.subr.bf16.mxu1 %v12944_v16  ;;  %v12995_v41 = vcombine.high %v115_v49, %v119_v25  ;;  %17404 = vst [vmem:[#allocation68_spill] sm:$0xff] %v12998_v44 }
  0x6c   :  { %1449 = vmatprep.subr.bf16.mxu0 %v12947_v61  ;;  %v12993_v61 = vcombine.low %v108_v52, %v112_v56  ;;  %v128_v52 = vld [vmem:[%s17103_s1 + $0x370] sm:$0xff]  ;;  %v13013_v56 = vcombine.low %v115_v49, %v119_v25  ;;  %v135_v49 = vld [vmem:[%s17103_s1 + $0x3a8] sm:$0xff] }
  0x6d   :  { %10260 = vmatmul.mubr.msk.bf16.gmra.mrb[44].mxu1 %vm410_vm0, %v12626_v19  ;;  %17403 = vst [vmem:[#allocation67_spill] sm:$0xff] %v12995_v41  ;;  %v123_v19 = vld [vmem:[%s17103_s1 + $0x348] sm:$0xff]  ;;  %v132_v25 = vld [vmem:[%s17103_s1 + $0x390] sm:$0xff] }
  0x6e   :  { %1409 = vmatpush1.bf16.msra.mxu1 %v12962_v63  ;;  %1428 = vmatprep.mubr.bf16.mxu1 %v17393_v51  ;;  %17402 = vst [vmem:[#allocation66_spill] sm:$0xff] %v12993_v61  ;;  %17405 = vst [vmem:[#allocation69_spill] sm:$0xff] %v13013_v56  ;;  %v131_v63 = vld [vmem:[%s17103_s1 + $0x388] sm:$0xff] }
  0x6f   :  { %1450 = vmatpush1.bf16.msra.mxu0 %v12966_v3  ;;  %1410 = vmatprep.subr.bf16.mxu1 %v12968_v6  ;;  %v13019_v3 = vcombine.high %v123_v19, %v127_v10  ;;  %v13022_v6 = vcombine.high %v124_v58, %v128_v52 }
  0x70   :  { %1451 = vmatprep.subr.bf16.mxu0 %v12971_v60  ;;  %v13017_v60 = vcombine.low %v116_v30, %v120_v31  ;;  %v136_v30 = vld [vmem:[%s17103_s1 + $0x3b0] sm:$0xff]  ;;  %v13037_v31 = vcombine.low %v123_v19, %v127_v10  ;;  %v143_v19 = vld [vmem:[%s17103_s1 + $0x3e8] sm:$0xff] }
  0x71   :  { %17407 = vst [vmem:[#allocation71_spill] sm:$0xff] %v13019_v3  ;;  %17408 = vst [vmem:[#allocation72_spill] sm:$0xff] %v13022_v6  ;;  %v140_v10 = vld [vmem:[%s17103_s1 + $0x3d0] sm:$0xff] }
  0x72   :  { %1411 = vmatpush1.bf16.msra.mxu1 %v12988_v36  ;;  %17406 = vst [vmem:[#allocation70_spill] sm:$0xff] %v13017_v60  ;;  %17409 = vst [vmem:[#allocation73_spill] sm:$0xff] %v13037_v31  ;;  %v139_v36 = vld [vmem:[%s17103_s1 + $0x3c8] sm:$0xff] }
  0x73   :  { %1452 = vmatpush1.bf16.msra.mxu0 %v12993_v61  ;;  %1412 = vmatprep.subr.bf16.mxu1 %v12995_v41  ;;  %v13043_v61 = vcombine.high %v131_v63, %v135_v49  ;;  %v13046_v41 = vcombine.high %v132_v25, %v136_v30 }
  0x74   :  { %1453 = vmatprep.subr.bf16.mxu0 %v12998_v44  ;;  %v13041_v44 = vcombine.low %v124_v58, %v128_v52  ;;  %v144_v58 = vld [vmem:[%s17103_s1 + $0x3f0] sm:$0xff]  ;;  %v13061_v52 = vcombine.low %v131_v63, %v135_v49  ;;  %v151_v63 = vld [vmem:[%s17103_s1 + $0x428] sm:$0xff] }
  0x75   :  { %17411 = vst [vmem:[#allocation75_spill] sm:$0xff] %v13043_v61  ;;  %17412 = vst [vmem:[#allocation76_spill] sm:$0xff] %v13046_v41  ;;  %v148_v49 = vld [vmem:[%s17103_s1 + $0x410] sm:$0xff] }
  0x76   :  { %1413 = vmatpush1.bf16.msra.mxu1 %v13013_v56  ;;  %17410 = vst [vmem:[#allocation74_spill] sm:$0xff] %v13041_v44  ;;  %17413 = vst [vmem:[#allocation77_spill] sm:$0xff] %v13061_v52  ;;  %v147_v56 = vld [vmem:[%s17103_s1 + $0x408] sm:$0xff] }
  0x77   :  { %1454 = vmatpush1.bf16.msra.mxu0 %v13017_v60  ;;  %1414 = vmatprep.subr.bf16.mxu1 %v13019_v3  ;;  %v13067_v60 = vcombine.high %v139_v36, %v143_v19  ;;  %v13070_v3 = vcombine.high %v140_v10, %v144_v58 }
  0x78   :  { %1455 = vmatprep.subr.bf16.mxu0 %v13022_v6  ;;  %v13065_v6 = vcombine.low %v132_v25, %v136_v30  ;;  %v152_v25 = vld [vmem:[%s17103_s1 + $0x430] sm:$0xff]  ;;  %v13085_v30 = vcombine.low %v139_v36, %v143_v19  ;;  %v159_v36 = vld [vmem:[%s17103_s1 + $0x468] sm:$0xff] }
  0x79   :  { %17415 = vst [vmem:[#allocation79_spill] sm:$0xff] %v13067_v60  ;;  %17416 = vst [vmem:[#allocation80_spill] sm:$0xff] %v13070_v3  ;;  %v156_v19 = vld [vmem:[%s17103_s1 + $0x450] sm:$0xff] }
  0x7a   :  { %1415 = vmatpush1.bf16.msra.mxu1 %v13037_v31  ;;  %17414 = vst [vmem:[#allocation78_spill] sm:$0xff] %v13065_v6  ;;  %17417 = vst [vmem:[#allocation81_spill] sm:$0xff] %v13085_v30  ;;  %v155_v31 = vld [vmem:[%s17103_s1 + $0x448] sm:$0xff] }
  0x7b   :  { %1456 = vmatpush1.bf16.msra.mxu0 %v13041_v44  ;;  %1416 = vmatprep.subr.bf16.mxu1 %v13043_v61  ;;  %v13091_v44 = vcombine.high %v147_v56, %v151_v63  ;;  %v13094_v61 = vcombine.high %v148_v49, %v152_v25 }
  0x7c   :  { %1457 = vmatprep.subr.bf16.mxu0 %v13046_v41  ;;  %v13089_v41 = vcombine.low %v140_v10, %v144_v58  ;;  %v160_v10 = vld [vmem:[%s17103_s1 + $0x470] sm:$0xff]  ;;  %v13109_v58 = vcombine.low %v147_v56, %v151_v63  ;;  %v167_v56 = vld [vmem:[%s17103_s1 + $0x4a8] sm:$0xff] }
  0x7d   :  { %17419 = vst [vmem:[#allocation83_spill] sm:$0xff] %v13091_v44  ;;  %17420 = vst [vmem:[#allocation84_spill] sm:$0xff] %v13094_v61  ;;  %v164_v63 = vld [vmem:[%s17103_s1 + $0x490] sm:$0xff] }
  0x7e   :  { %1417 = vmatpush1.bf16.msra.mxu1 %v13061_v52  ;;  %17418 = vst [vmem:[#allocation82_spill] sm:$0xff] %v13089_v41  ;;  %17421 = vst [vmem:[#allocation85_spill] sm:$0xff] %v13109_v58  ;;  %v163_v52 = vld [vmem:[%s17103_s1 + $0x488] sm:$0xff] }
  0x7f   :  { %1458 = vmatpush1.bf16.msra.mxu0 %v13065_v6  ;;  %1418 = vmatprep.subr.bf16.mxu1 %v13067_v60  ;;  %v13115_v6 = vcombine.high %v155_v31, %v159_v36  ;;  %v13118_v60 = vcombine.high %v156_v19, %v160_v10 }
  0x80   :  { %1459 = vmatprep.subr.bf16.mxu0 %v13070_v3  ;;  %v13113_v3 = vcombine.low %v148_v49, %v152_v25  ;;  %v168_v49 = vld [vmem:[%s17103_s1 + $0x4b0] sm:$0xff]  ;;  %v13133_v25 = vcombine.low %v155_v31, %v159_v36  ;;  %v175_v31 = vld [vmem:[%s17103_s1 + $0x4e8] sm:$0xff] }
  0x81   :  { %17423 = vst [vmem:[#allocation87_spill] sm:$0xff] %v13115_v6  ;;  %17424 = vst [vmem:[#allocation88_spill] sm:$0xff] %v13118_v60  ;;  %v172_v36 = vld [vmem:[%s17103_s1 + $0x4d0] sm:$0xff] }
  0x82   :  { %1419 = vmatpush1.bf16.msra.mxu1 %v13085_v30  ;;  %17422 = vst [vmem:[#allocation86_spill] sm:$0xff] %v13113_v3  ;;  %17425 = vst [vmem:[#allocation89_spill] sm:$0xff] %v13133_v25  ;;  %v171_v30 = vld [vmem:[%s17103_s1 + $0x4c8] sm:$0xff] }
  0x83   :  { %1460 = vmatpush1.bf16.msra.mxu0 %v13089_v41  ;;  %1420 = vmatprep.subr.bf16.mxu1 %v13091_v44  ;;  %v13139_v41 = vcombine.high %v163_v52, %v167_v56  ;;  %v13142_v44 = vcombine.high %v164_v63, %v168_v49 }
  0x84   :  { %1461 = vmatprep.subr.bf16.mxu0 %v13094_v61  ;;  %v13137_v61 = vcombine.low %v156_v19, %v160_v10  ;;  %v176_v19 = vld [vmem:[%s17103_s1 + $0x4f0] sm:$0xff]  ;;  %v13157_v10 = vcombine.low %v163_v52, %v167_v56  ;;  %v57_v52 = vld [vmem:[%s17103_s1 + $0x138] sm:$0xff]  ;;  %v13175_v56 = vcombine.low %v171_v30, %v175_v31 }
  0x85   :  { %17427 = vst [vmem:[#allocation91_spill] sm:$0xff] %v13139_v41  ;;  %17428 = vst [vmem:[#allocation92_spill] sm:$0xff] %v13142_v44 }
  0x86   :  { %1421 = vmatpush1.bf16.msra.mxu1 %v13109_v58  ;;  %17426 = vst [vmem:[#allocation90_spill] sm:$0xff] %v13137_v61  ;;  %17429 = vst [vmem:[#allocation93_spill] sm:$0xff] %v13157_v10  ;;  %v53_v58 = vld [vmem:[%s17103_s1 + $0x118] sm:$0xff] }
  0x87   :  { %1462 = vmatpush1.bf16.msra.mxu0 %v13113_v3  ;;  %1422 = vmatprep.subr.bf16.mxu1 %v13115_v6  ;;  %v13163_v3 = vcombine.high %v171_v30, %v175_v31  ;;  %v13166_v6 = vcombine.high %v172_v36, %v176_v19  ;;  %17433 = vst [vmem:[#allocation97_spill] sm:$0xff] %v13175_v56 }
  0x88   :  { %1463 = vmatprep.subr.bf16.mxu0 %v13118_v60  ;;  %v13161_v60 = vcombine.low %v164_v63, %v168_v49  ;;  %v13179_v63 = vcombine.low %v172_v36, %v176_v19  ;;  %v13181_v49 = vcombine.high %v53_v58, %v57_v52  ;;  %v13191_v30 = vcombine.low %v53_v58, %v57_v52  ;;  %v69_v36 = vld [vmem:[%s17103_s1 + $0x198] sm:$0xff] }
  0x89   :  { %17431 = vst [vmem:[#allocation95_spill] sm:$0xff] %v13163_v3  ;;  %17432 = vst [vmem:[#allocation96_spill] sm:$0xff] %v13166_v6  ;;  %v73_v19 = vld [vmem:[%s17103_s1 + $0x1b8] sm:$0xff] }
  0x8a   :  { %1423 = vmatpush1.bf16.msra.mxu1 %v13133_v25  ;;  %17430 = vst [vmem:[#allocation94_spill] sm:$0xff] %v13161_v60  ;;  %17434 = vst [vmem:[#allocation98_spill] sm:$0xff] %v13179_v63  ;;  %v13210_v52 = vcombine.high %v69_v36, %v73_v19 }
  0x8b   :  { %1464 = vmatpush1.bf16.msra.mxu0 %v13137_v61  ;;  %1424 = vmatprep.subr.bf16.mxu1 %v13139_v41  ;;  %17435 = vst [vmem:[#allocation99_spill] sm:$0xff] %v13181_v49  ;;  %v65_v61 = vld [vmem:[%s17103_s1 + $0x178] sm:$0xff] }
  0x8c   :  { %1465 = vmatprep.subr.bf16.mxu0 %v13142_v44  ;;  %v61_v44 = vld [vmem:[%s17103_s1 + $0x158] sm:$0xff] }
  0x8d   :  { %v13195_v31 = vcombine.high %v61_v44, %v65_v61  ;;  %v13207_v58 = vcombine.low %v61_v44, %v65_v61  ;;  %v13222_v44 = vcombine.low %v69_v36, %v73_v19 }
  0x8e   :  { %1425 = vmatpush1.bf16.msra.mxu1 %v13157_v10 }
  0x8f   :  { %1466 = vmatpush1.bf16.msra.mxu0 %v13161_v60  ;;  %1426 = vmatprep.subr.bf16.mxu1 %v13163_v3  ;;  %v89_v60 = vld [vmem:[%s17103_s1 + $0x238] sm:$0xff] }
  0x90   :  { %1467 = vmatprep.subr.bf16.mxu0 %v13166_v6  ;;  %v85_v6 = vld [vmem:[%s17103_s1 + $0x218] sm:$0xff] }
  0x91   :  { %v13239_v19 = vcombine.high %v85_v6, %v89_v60 }
  0x92   :  { %1427 = vmatpush1.bf16.msra.mxu1 %v13175_v56 }
  0x93   :  { %1468 = vmatpush1.bf16.msra.mxu0 %v13179_v63  ;;  %1478 = vmatprep.subr.bf16.mxu1 %v13181_v49  ;;  %v77_v63 = vld [vmem:[%s17103_s1 + $0x1d8] sm:$0xff] }
  0x94   :  { %1709 = vmatprep.subr.bf16.mxu0 %v12493_v39  ;;  %v81_v39 = vld [vmem:[%s17103_s1 + $0x1f8] sm:$0xff] }
  0x95   :  { %1429 = vmatmul.mubr.bf16.vlgmr.msra.gmra.mrb[48].mxu1 %v17393_v51  ;;  %v13225_v61 = vcombine.high %v77_v63, %v81_v39  ;;  %v13236_v36 = vcombine.low %v77_v63, %v81_v39  ;;  %v13250_v39 = vcombine.low %v85_v6, %v89_v60 }
  0x96   :  { %1470 = vmatmul.mubr.bf16.vlgmr.msra.gmra.mrb[20].mxu0 %v17393_v51  ;;  %1479 = vmatpush1.bf16.msra.mxu1 %v13191_v30 }
  0x97   :  { %1480 = vmatprep.subr.bf16.mxu1 %v13195_v31  ;;  %1510 = vmatprep.mubr.bf16.mxu1 %v17393_v51 }
  0x98   :  { %1710 = vmatpush1.bf16.msra.mxu0 %v12507_v45  ;;  %v97_v45 = vld [vmem:[%s17103_s1 + $0x278] sm:$0xff] }
  0x99   :  { %1711 = vmatprep.subr.bf16.mxu0 %v12510_v46  ;;  %v93_v46 = vld [vmem:[%s17103_s1 + $0x258] sm:$0xff] }
  0x9a   :  { %1481 = vmatpush1.bf16.msra.mxu1 %v13207_v58  ;;  %v13253_v63 = vcombine.high %v93_v46, %v97_v45  ;;  %v13264_v60 = vcombine.low %v93_v46, %v97_v45 }
  0x9b   :  { %1482 = vmatprep.subr.bf16.mxu1 %v13210_v52 }
  0x9c   :  { %1712 = vmatpush1.bf16.msra.mxu0 %v12529_v53  ;;  %v105_v53 = vld [vmem:[%s17103_s1 + $0x2b8] sm:$0xff] }
  0x9d   :  { %1713 = vmatprep.subr.bf16.mxu0 %v12533_v55  ;;  %v101_v55 = vld [vmem:[%s17103_s1 + $0x298] sm:$0xff] }
  0x9e   :  { %1483 = vmatpush1.bf16.msra.mxu1 %v13222_v44  ;;  %v13267_v6 = vcombine.high %v101_v55, %v105_v53  ;;  %v13278_v45 = vcombine.low %v101_v55, %v105_v53 }
  0x9f   :  { %1484 = vmatprep.subr.bf16.mxu1 %v13225_v61 }
  0xa0   :  { %1714 = vmatpush1.bf16.msra.mxu0 %v12554_v62  ;;  %v113_v62 = vld [vmem:[%s17103_s1 + $0x2f8] sm:$0xff] }
  0xa1   :  { %1715 = vmatprep.subr.bf16.mxu0 %v12557_v0  ;;  %v109_v0 = vld [vmem:[%s17103_s1 + $0x2d8] sm:$0xff] }
  0xa2   :  { %1485 = vmatpush1.bf16.msra.mxu1 %v13236_v36  ;;  %v13281_v46 = vcombine.high %v109_v0, %v113_v62  ;;  %v13292_v53 = vcombine.low %v109_v0, %v113_v62 }
  0xa3   :  { %1486 = vmatprep.subr.bf16.mxu1 %v13239_v19 }
  0xa4   :  { %1716 = vmatpush1.bf16.msra.mxu0 %v12579_v7  ;;  %v121_v7 = vld [vmem:[%s17103_s1 + $0x338] sm:$0xff] }
  0xa5   :  { %1717 = vmatprep.subr.bf16.mxu0 %v12584_v9  ;;  %v117_v9 = vld [vmem:[%s17103_s1 + $0x318] sm:$0xff] }
  0xa6   :  { %1487 = vmatpush1.bf16.msra.mxu1 %v13250_v39  ;;  %v13295_v55 = vcombine.high %v117_v9, %v121_v7  ;;  %v13306_v62 = vcombine.low %v117_v9, %v121_v7 }
  0xa7   :  { %1488 = vmatprep.subr.bf16.mxu1 %v13253_v63 }
  0xa8   :  { %1718 = vmatpush1.bf16.msra.mxu0 %v12601_v13  ;;  %v129_v13 = vld [vmem:[%s17103_s1 + $0x378] sm:$0xff] }
  0xa9   :  { %1719 = vmatprep.subr.bf16.mxu0 %v12604_v14  ;;  %v125_v14 = vld [vmem:[%s17103_s1 + $0x358] sm:$0xff] }
  0xaa   :  { %1489 = vmatpush1.bf16.msra.mxu1 %v13264_v60  ;;  %v13309_v0 = vcombine.high %v125_v14, %v129_v13  ;;  %v13320_v7 = vcombine.low %v125_v14, %v129_v13 }
  0xab   :  { %1490 = vmatprep.subr.bf16.mxu1 %v13267_v6 }
  0xac   :  { %1720 = vmatpush1.bf16.msra.mxu0 %v12616_v17  ;;  %v137_v17 = vld [vmem:[%s17103_s1 + $0x3b8] sm:$0xff]  ;;  %17436 = vst [vmem:[#allocation100_spill] sm:$0xff] %v13320_v7 }
  0xad   :  { %1721 = vmatprep.subr.bf16.mxu0 %v12619_v18  ;;  %v133_v18 = vld [vmem:[%s17103_s1 + $0x398] sm:$0xff] }
  0xae   :  { %1491 = vmatpush1.bf16.msra.mxu1 %v13278_v45  ;;  %v13323_v9 = vcombine.high %v133_v18, %v137_v17  ;;  %v13334_v13 = vcombine.low %v133_v18, %v137_v17 }
  0xaf   :  { %1492 = vmatprep.subr.bf16.mxu1 %v13281_v46 }
  0xb0   :  { %1722 = vmatpush1.bf16.msra.mxu0 %v12636_v22  ;;  %17437 = vst [vmem:[#allocation101_spill] sm:$0xff] %v13323_v9  ;;  %v145_v22 = vld [vmem:[%s17103_s1 + $0x3f8] sm:$0xff]  ;;  %17438 = vst [vmem:[#allocation102_spill] sm:$0xff] %v13334_v13 }
  0xb1   :  { %1723 = vmatprep.subr.bf16.mxu0 %v12639_v23  ;;  %v141_v23 = vld [vmem:[%s17103_s1 + $0x3d8] sm:$0xff] }
  0xb2   :  { %1493 = vmatpush1.bf16.msra.mxu1 %v13292_v53  ;;  %v13337_v14 = vcombine.high %v141_v23, %v145_v22  ;;  %v13348_v17 = vcombine.low %v141_v23, %v145_v22 }
  0xb3   :  { %1494 = vmatprep.subr.bf16.mxu1 %v13295_v55 }
  0xb4   :  { %1724 = vmatpush1.bf16.msra.mxu0 %v12651_v26  ;;  %17439 = vst [vmem:[#allocation103_spill] sm:$0xff] %v13337_v14  ;;  %v153_v26 = vld [vmem:[%s17103_s1 + $0x438] sm:$0xff]  ;;  %17440 = vst [vmem:[#allocation104_spill] sm:$0xff] %v13348_v17 }
  0xb5   :  { %1725 = vmatprep.subr.bf16.mxu0 %v12654_v27  ;;  %v149_v27 = vld [vmem:[%s17103_s1 + $0x418] sm:$0xff] }
  0xb6   :  { %1495 = vmatpush1.bf16.msra.mxu1 %v13306_v62  ;;  %v13351_v18 = vcombine.high %v149_v27, %v153_v26  ;;  %v13362_v22 = vcombine.low %v149_v27, %v153_v26 }
  0xb7   :  { %1496 = vmatprep.subr.bf16.mxu1 %v13309_v0 }
  0xb8   :  { %1726 = vmatpush1.bf16.msra.mxu0 %v12674_v33  ;;  %17441 = vst [vmem:[#allocation105_spill] sm:$0xff] %v13351_v18  ;;  %v161_v33 = vld [vmem:[%s17103_s1 + $0x478] sm:$0xff]  ;;  %17442 = vst [vmem:[#allocation106_spill] sm:$0xff] %v13362_v22 }
  0xb9   :  { %1727 = vmatprep.subr.bf16.mxu0 %v12677_v35  ;;  %v157_v35 = vld [vmem:[%s17103_s1 + $0x458] sm:$0xff] }
  0xba   :  { %1497 = vmatpush1.bf16.msra.mxu1 %v13320_v7  ;;  %v13365_v23 = vcombine.high %v157_v35, %v161_v33  ;;  %v13376_v26 = vcombine.low %v157_v35, %v161_v33 }
  0xbb   :  { %1498 = vmatprep.subr.bf16.mxu1 %v13323_v9 }
  0xbc   :  { %1728 = vmatpush1.bf16.msra.mxu0 %v12695_v43  ;;  %17443 = vst [vmem:[#allocation107_spill] sm:$0xff] %v13365_v23  ;;  %v169_v43 = vld [vmem:[%s17103_s1 + $0x4b8] sm:$0xff]  ;;  %17444 = vst [vmem:[#allocation108_spill] sm:$0xff] %v13376_v26 }
  0xbd   :  { %1729 = vmatprep.subr.bf16.mxu0 %v12698_v47  ;;  %v165_v47 = vld [vmem:[%s17103_s1 + $0x498] sm:$0xff] }
  0xbe   :  { %1499 = vmatpush1.bf16.msra.mxu1 %v13334_v13  ;;  %v13379_v27 = vcombine.high %v165_v47, %v169_v43  ;;  %v13390_v33 = vcombine.low %v165_v47, %v169_v43  ;;  %v17255_v43 = vlaneseq }
  0xbf   :  { %1500 = vmatprep.subr.bf16.mxu1 %v13337_v14 }
  0xc0   :  { %1730 = vmatpush1.bf16.msra.mxu0 %v12713_v54  ;;  %17445 = vst [vmem:[#allocation109_spill] sm:$0xff] %v13379_v27  ;;  %v177_v54 = vld [vmem:[%s17103_s1 + $0x4f8] sm:$0xff]  ;;  %17446 = vst [vmem:[#allocation110_spill] sm:$0xff] %v13390_v33  ;;  %v13415_v47 = vshrl.u32 %v17255_v43, 7 }
  0xc1   :  { %1731 = vmatprep.subr.bf16.mxu0 %v12716_v57  ;;  %v173_v57 = vld [vmem:[%s17103_s1 + $0x4d8] sm:$0xff] }
  0xc2   :  { %1501 = vmatpush1.bf16.msra.mxu1 %v13348_v17  ;;  %v13393_v35 = vcombine.high %v173_v57, %v177_v54  ;;  %17449 = vst [vmem:[#allocation113_spill] sm:$0xff] %v13415_v47 }
  0xc3   :  { %1502 = vmatprep.subr.bf16.mxu1 %v13351_v18 }
  0xc4   :  { %1732 = vmatpush1.bf16.msra.mxu0 %v12734_v2  ;;  %17447 = vst [vmem:[#allocation111_spill] sm:$0xff] %v13393_v35 }
  0xc5   :  { %1733 = vmatprep.subr.bf16.mxu0 %v12739_v5  ;;  %v13398_v5 = vcombine.low %v173_v57, %v177_v54  ;;  %v180_v54 = vld [vmem:[%s17103_s1 + $0x510] sm:$0x11]  ;;  %v178_v57 = vld [vmem:[%s17103_s1 + $0x500] sm:$0x11] }
  0xc6   :  { %1503 = vmatpush1.bf16.msra.mxu1 %v13362_v22  ;;  %v183_v43 = vunpack.c.h.bf16 %v178_v57 }
  0xc7   :  { %1504 = vmatprep.subr.bf16.mxu1 %v13365_v23  ;;  %17448 = vst [vmem:[#allocation112_spill] sm:$0xff] %v13398_v5 }
  0xc8   :  { %1734 = vmatpush1.bf16.msra.mxu0 %v12748_v11 }
  0xc9   :  { %1735 = vmatprep.subr.bf16.mxu0 %v12752_v12 }
  0xca   :  { %1505 = vmatpush1.bf16.msra.mxu1 %v13376_v26 }
  0xcb   :  { %1506 = vmatprep.subr.bf16.mxu1 %v13379_v27 }
  0xcc   :  { %1736 = vmatpush1.bf16.msra.mxu0 %v12764_v20 }
  0xcd   :  { %1737 = vmatprep.subr.bf16.mxu0 %v12767_v21 }
  0xce   :  { %1507 = vmatpush1.bf16.msra.mxu1 %v13390_v33 }
  0xcf   :  { %1508 = vmatprep.subr.bf16.mxu1 %v13393_v35 }
  0xd0   :  { %1738 = vmatpush1.bf16.msra.mxu0 %v12776_v28 }
  0xd1   :  { %1739 = vmatprep.subr.bf16.mxu0 %v12779_v29  ;;  %v187_v29 = vunpack.c.h.bf16 %v180_v54 }
  0xd2   :  { %1509 = vmatpush1.bf16.msra.mxu1 %v13398_v5 }
  0xd3   :  { %1750 = vmatprep.subr.bf16.mxu1 %v12736_v4 }
  0xd4   :  { %1740 = vmatpush1.bf16.msra.mxu0 %v12791_v32  ;;  %v13426_v32 = vsub.s32 0, %v13415_v47 }
  0xd5   :  { %1511 = vmatmul.mubr.bf16.vlgmr.msra.gmra.mrb[52].mxu1 %v17393_v51  ;;  %1791 = vmatprep.subr.bf16.mxu0 %v12794_v34  ;;  %v186_v51 = vunpack.c.l.bf16 %v180_v54  ;;  %v182_v34 = vunpack.c.l.bf16 %v178_v57 }
  0xd6   :  { %1751 = vmatpush1.bf16.msra.mxu1 %v12808_v42  ;;  %17450 = vst [vmem:[#allocation114_spill] sm:$0xff] %v13426_v32  ;;  %v13443_v2 = vrot.slane %v187_v29, %v13426_v32  ;;  %v13446_v54 = vrot.slane %v183_v43, %v13426_v32 }
  0xd7   :  { %1752 = vmatprep.subr.bf16.mxu1 %v12813_v48  ;;  %v13433_v21 = vrot.slane %v186_v51, %v13426_v32  ;;  %v13436_v20 = vrot.slane %v182_v34, %v13426_v32 }
  0xda   :  { %1753 = vmatpush1.bf16.msra.mxu1 %v12834_v59  ;;  %v17490_v59 = vld [vmem:[#allocation85_spill] sm:$0xff] }
  0xdb   :  { %1754 = vmatprep.subr.bf16.mxu1 %v12840_v37 }
  0xde   :  { %1755 = vmatpush1.bf16.msra.mxu1 %v12860_v15 }
  0xdf   :  { %1756 = vmatprep.subr.bf16.mxu1 %v12866_v24  ;;  %v17455_v24 = vld [vmem:[#allocation61_spill] sm:$0xff] }
  0xe2   :  { %1757 = vmatpush1.bf16.msra.mxu1 %v12886_v40 }
  0xe3   :  { %1758 = vmatprep.subr.bf16.mxu1 %v12893_v50 }
  0xe6   :  { %1759 = vmatpush1.bf16.msra.mxu1 %v12911_v1 }
  0xe7   :  { %1760 = vmatprep.subr.bf16.mxu1 %v12917_v8 }
  0xe8   :  { %v13430_v28 = vpop.f32.mrb[0].mxu1  ;;  %v13440_v11 = vpop.f32.mrb[0].mxu0 }
  0xe9   :  { %v13438_v12 = vpop.f32.mrb[1].mxu1  ;;  %v13448_v8 = vpop.f32.mrb[1].mxu0 }
  0xea   :  { %v461_v57 = vpop.f32.mrb[2].mxu1  ;;  %1761 = vmatpush1.bf16.msra.mxu1 %v12937_v38  ;;  %v607_v1 = vpop.f32.mrb[2].mxu0  ;;  %v17456_v38 = vld [vmem:[#allocation63_spill] sm:$0xff] }
  0xeb   :  { %v13452_v51 = vadd.f32 %v461_v57, %v13436_v20  ;;  %v463_v34 = vpop.f32.mrb[3].mxu1  ;;  %1762 = vmatprep.subr.bf16.mxu1 %v12944_v16  ;;  %v13459_v29 = vadd.f32 %v607_v1, %v13433_v21  ;;  %v609_v43 = vpop.f32.mrb[3].mxu0 }
  0xec   :  { %v13456_v50 = vadd.f32 %v463_v34, %v13446_v54  ;;  %v13462_v40 = vadd.f32 %v609_v43, %v13443_v2 }
  0xed   :  { %17451 = vst [vmem:[#allocation115_spill] sm:$0xff] %v13452_v51  ;;  %17453 = vst [vmem:[#allocation117_spill] sm:$0xff] %v13459_v29  ;;  %v17461_v29 = vld [vmem:[#allocation67_spill] sm:$0xff] }
  0xee   :  { %17452 = vst [vmem:[#allocation116_spill] sm:$0xff] %v13456_v50  ;;  %17454 = vst [vmem:[#allocation118_spill] sm:$0xff] %v13462_v40  ;;  %1763 = vmatpush1.bf16.msra.mxu1 %v17455_v24  ;;  %v17459_v50 = vld [vmem:[#allocation65_spill] sm:$0xff] }
  0xef   :  { %1764 = vmatprep.subr.bf16.mxu1 %v17456_v38 }
  0xf0   :  { %v467_v57 = vpop.f32.mrb[4].mxu1  ;;  %v613_v40 = vpop.f32.mrb[4].mxu0 }
  0xf1   :  { %v13467_v51 = vadd.f32 %v467_v57, %v13436_v20  ;;  %v469_v15 = vpop.f32.mrb[5].mxu1  ;;  %v13481_v57 = vadd.f32 %v613_v40, %v13433_v21 }
  0xf2   :  { %v13470_v16 = vadd.f32 %v469_v15, %v13446_v54  ;;  %v471_v34 = vpop.f32.mrb[6].mxu1  ;;  %1765 = vmatpush1.bf16.msra.mxu1 %v17459_v50 }
  0xf3   :  { %17457 = vst [vmem:[#allocation119_spill] sm:$0xff] %v13467_v51  ;;  %v13474_v1 = vadd.f32 %v471_v34, %v13436_v20  ;;  %v473_v43 = vpop.f32.mrb[7].mxu1  ;;  %1766 = vmatprep.subr.bf16.mxu1 %v17461_v29  ;;  %17463 = vst [vmem:[#allocation123_spill] sm:$0xff] %v13481_v57  ;;  %v615_v51 = vpop.f32.mrb[5].mxu0  ;;  %v17468_v29 = vld [vmem:[#allocation71_spill] sm:$0xff]  ;;  %v17471_v57 = vld [vmem:[#allocation73_spill] sm:$0xff] }
  0xf4   :  { %17458 = vst [vmem:[#allocation120_spill] sm:$0xff] %v13470_v16  ;;  %v13478_v38 = vadd.f32 %v473_v43, %v13446_v54  ;;  %v13484_v15 = vadd.f32 %v615_v51, %v13443_v2  ;;  %v617_v16 = vpop.f32.mrb[6].mxu0 }
  0xf5   :  { %17460 = vst [vmem:[#allocation121_spill] sm:$0xff] %v13474_v1  ;;  %v13487_v50 = vadd.f32 %v617_v16, %v13433_v21  ;;  %v619_v34 = vpop.f32.mrb[7].mxu0  ;;  %v17466_v1 = vld [vmem:[#allocation69_spill] sm:$0xff] }
  0xf6   :  { %17462 = vst [vmem:[#allocation122_spill] sm:$0xff] %v13478_v38  ;;  %17464 = vst [vmem:[#allocation124_spill] sm:$0xff] %v13484_v15  ;;  %1767 = vmatpush1.bf16.msra.mxu1 %v17466_v1  ;;  %v13491_v24 = vadd.f32 %v619_v34, %v13443_v2  ;;  %v17473_v34 = vld [vmem:[#allocation75_spill] sm:$0xff] }
  0xf7   :  { %17465 = vst [vmem:[#allocation125_spill] sm:$0xff] %v13487_v50  ;;  %1768 = vmatprep.subr.bf16.mxu1 %v17468_v29 }
  0xf8   :  { %17467 = vst [vmem:[#allocation126_spill] sm:$0xff] %v13491_v24  ;;  %v477_v43 = vpop.f32.mrb[8].mxu1  ;;  %v623_v1 = vpop.f32.mrb[8].mxu0 }
  0xf9   :  { %v13495_v40 = vadd.f32 %v477_v43, %v13436_v20  ;;  %v479_v38 = vpop.f32.mrb[9].mxu1  ;;  %v13509_v43 = vadd.f32 %v623_v1, %v13433_v21 }
  0xfa   :  { %v13498_v51 = vadd.f32 %v479_v38, %v13446_v54  ;;  %v481_v15 = vpop.f32.mrb[10].mxu1  ;;  %1769 = vmatpush1.bf16.msra.mxu1 %v17471_v57 }
  0xfb   :  { %17469 = vst [vmem:[#allocation127_spill] sm:$0xff] %v13495_v40  ;;  %v13502_v16 = vadd.f32 %v481_v15, %v13436_v20  ;;  %v483_v50 = vpop.f32.mrb[11].mxu1  ;;  %1770 = vmatprep.subr.bf16.mxu1 %v17473_v34  ;;  %17475 = vst [vmem:[#allocation131_spill] sm:$0xff] %v13509_v43  ;;  %v625_v40 = vpop.f32.mrb[9].mxu0  ;;  %v17480_v34 = vld [vmem:[#allocation79_spill] sm:$0xff] }
  0xfc   :  { %17470 = vst [vmem:[#allocation128_spill] sm:$0xff] %v13498_v51  ;;  %v13506_v24 = vadd.f32 %v483_v50, %v13446_v54  ;;  %v13512_v38 = vadd.f32 %v625_v40, %v13443_v2  ;;  %v627_v51 = vpop.f32.mrb[10].mxu0 }
  0xfd   :  { %17472 = vst [vmem:[#allocation129_spill] sm:$0xff] %v13502_v16  ;;  %v13515_v57 = vadd.f32 %v627_v51, %v13433_v21  ;;  %v629_v15 = vpop.f32.mrb[11].mxu0  ;;  %v17478_v16 = vld [vmem:[#allocation77_spill] sm:$0xff]  ;;  %v179_v51 = vld [vmem:[%s17103_s1 + $0x508] sm:$0x11] }
  0xfe   :  { %17474 = vst [vmem:[#allocation130_spill] sm:$0xff] %v13506_v24  ;;  %17476 = vst [vmem:[#allocation132_spill] sm:$0xff] %v13512_v38  ;;  %1771 = vmatpush1.bf16.msra.mxu1 %v17478_v16  ;;  %v13519_v29 = vadd.f32 %v629_v15, %v13443_v2 }
  0xff   :  { %17477 = vst [vmem:[#allocation133_spill] sm:$0xff] %v13515_v57  ;;  %1772 = vmatprep.subr.bf16.mxu1 %v17480_v34  ;;  %v17483_v57 = vld [vmem:[#allocation81_spill] sm:$0xff]  ;;  %v17485_v34 = vld [vmem:[#allocation83_spill] sm:$0xff] }
 0x100   :  { %17479 = vst [vmem:[#allocation134_spill] sm:$0xff] %v13519_v29  ;;  %v487_v50 = vpop.f32.mrb[12].mxu1  ;;  %v633_v43 = vpop.f32.mrb[12].mxu0 }
 0x101   :  { %v13523_v1 = vadd.f32 %v487_v50, %v13436_v20  ;;  %v489_v24 = vpop.f32.mrb[13].mxu1 }
 0x102   :  { %v13526_v40 = vadd.f32 %v489_v24, %v13446_v54  ;;  %v491_v38 = vpop.f32.mrb[14].mxu1  ;;  %1773 = vmatpush1.bf16.msra.mxu1 %v17483_v57  ;;  %v13540_v24 = vadd.f32 %v633_v43, %v13433_v21  ;;  %v185_v57 = vunpack.c.h.bf16 %v179_v51 }
 0x103   :  { %17481 = vst [vmem:[#allocation135_spill] sm:$0xff] %v13523_v1  ;;  %v13533_v15 = vadd.f32 %v491_v38, %v13436_v20  ;;  %v493_v29 = vpop.f32.mrb[15].mxu1  ;;  %1774 = vmatprep.subr.bf16.mxu1 %v17485_v34  ;;  %v184_v1 = vunpack.c.l.bf16 %v179_v51 }
 0x104   :  { %17482 = vst [vmem:[#allocation136_spill] sm:$0xff] %v13526_v40  ;;  %v13537_v50 = vadd.f32 %v493_v29, %v13446_v54  ;;  %17487 = vst [vmem:[#allocation139_spill] sm:$0xff] %v13540_v24  ;;  %v635_v40 = vpop.f32.mrb[13].mxu0  ;;  %v17492_v29 = vld [vmem:[#allocation87_spill] sm:$0xff]  ;;  %v13561_v51 = vrot.slane %v185_v57, %v13426_v32 }
 0x105   :  { %17484 = vst [vmem:[#allocation137_spill] sm:$0xff] %v13533_v15  ;;  %v13543_v16 = vadd.f32 %v635_v40, %v13443_v2  ;;  %v637_v37 = vpop.f32.mrb[14].mxu0 }
 0x106   :  { %17486 = vst [vmem:[#allocation138_spill] sm:$0xff] %v13537_v50  ;;  %v13546_v38 = vadd.f32 %v637_v37, %v13433_v21  ;;  %v639_v15 = vpop.f32.mrb[15].mxu0  ;;  %1775 = vmatpush1.bf16.msra.mxu1 %v17490_v59  ;;  %v13556_v50 = vrot.slane %v184_v1, %v13426_v32 }
 0x107   :  { %17488 = vst [vmem:[#allocation140_spill] sm:$0xff] %v13543_v16  ;;  %v13550_v34 = vadd.f32 %v639_v15, %v13443_v2  ;;  %1776 = vmatprep.subr.bf16.mxu1 %v17492_v29 }
 0x108   :  { %17489 = vst [vmem:[#allocation141_spill] sm:$0xff] %v13546_v38  ;;  %v13553_v43 = vpop.f32.mrb[16].mxu1 }
 0x109   :  { %17491 = vst [vmem:[#allocation142_spill] sm:$0xff] %v13550_v34  ;;  %v13558_v40 = vpop.f32.mrb[17].mxu1 }
 0x10a   :  { %v534_v37 = vpop.f32.mrb[18].mxu1  ;;  %1777 = vmatpush1.bf16.msra.mxu1 %v13133_v25 }
 0x10b   :  { %v13565_v38 = vadd.f32 %v534_v37, %v13556_v50  ;;  %v536_v15 = vpop.f32.mrb[19].mxu1  ;;  %1778 = vmatprep.subr.bf16.mxu1 %v13139_v41 }
 0x10c   :  { %v13569_v34 = vadd.f32 %v536_v15, %v13561_v51 }
 0x10d   :  { %17493 = vst [vmem:[#allocation143_spill] sm:$0xff] %v13565_v38 }
 0x10e   :  { %17494 = vst [vmem:[#allocation144_spill] sm:$0xff] %v13569_v34  ;;  %1779 = vmatpush1.bf16.msra.mxu1 %v13157_v10 }
 0x10f   :  { %1780 = vmatprep.subr.bf16.mxu1 %v13163_v3 }
 0x110   :  { %v540_v1 = vpop.f32.mrb[20].mxu1 }
 0x111   :  { %v13574_v57 = vadd.f32 %v540_v1, %v13556_v50  ;;  %v542_v16 = vpop.f32.mrb[21].mxu1 }
 0x112   :  { %v13577_v24 = vadd.f32 %v542_v16, %v13561_v51  ;;  %v544_v37 = vpop.f32.mrb[22].mxu1  ;;  %1781 = vmatpush1.bf16.msra.mxu1 %v13175_v56 }
 0x113   :  { %17495 = vst [vmem:[#allocation145_spill] sm:$0xff] %v13574_v57  ;;  %v13581_v38 = vadd.f32 %v544_v37, %v13556_v50  ;;  %v546_v15 = vpop.f32.mrb[23].mxu1  ;;  %1832 = vmatprep.subr.bf16.mxu1 %v13181_v49 }
 0x114   :  { %17496 = vst [vmem:[#allocation146_spill] sm:$0xff] %v13577_v24  ;;  %v13585_v34 = vadd.f32 %v546_v15, %v13561_v51 }
 0x115   :  { %17497 = vst [vmem:[#allocation147_spill] sm:$0xff] %v13581_v38 }
 0x116   :  { %17498 = vst [vmem:[#allocation148_spill] sm:$0xff] %v13585_v34 }
 0x118   :  { %v550_v3 = vpop.f32.mrb[24].mxu1 }
 0x119   :  { %v13588_v1 = vadd.f32 %v550_v3, %v13556_v50  ;;  %v552_v57 = vpop.f32.mrb[25].mxu1 }
 0x11a   :  { %v13591_v16 = vadd.f32 %v552_v57, %v13561_v51  ;;  %v554_v24 = vpop.f32.mrb[26].mxu1  ;;  %v181_v57 = vld [vmem:[%s17103_s1 + $0x518] sm:$0x11] }
 0x11b   :  { %17499 = vst [vmem:[#allocation149_spill] sm:$0xff] %v13588_v1  ;;  %v13594_v56 = vadd.f32 %v554_v24, %v13556_v50  ;;  %v556_v37 = vpop.f32.mrb[27].mxu1 }
 0x11c   :  { %17500 = vst [vmem:[#allocation150_spill] sm:$0xff] %v13591_v16  ;;  %v13597_v38 = vadd.f32 %v556_v37, %v13561_v51  ;;  %v189_v16 = vunpack.c.h.bf16 %v181_v57 }
 0x11d   :  { %17501 = vst [vmem:[#allocation151_spill] sm:$0xff] %v13594_v56 }
 0x11e   :  { %17502 = vst [vmem:[#allocation152_spill] sm:$0xff] %v13597_v38  ;;  %v188_v38 = vunpack.c.l.bf16 %v181_v57 }
 0x120   :  { %v560_v49 = vpop.f32.mrb[28].mxu1 }
 0x121   :  { %v13600_v15 = vadd.f32 %v560_v49, %v13556_v50  ;;  %v562_v34 = vpop.f32.mrb[29].mxu1  ;;  %v458_v49 = vadd.f32 %v13430_v28, %v13436_v20 }
 0x122   :  { %v13603_v3 = vadd.f32 %v562_v34, %v13561_v51  ;;  %v564_v1 = vpop.f32.mrb[30].mxu1  ;;  %v460_v34 = vadd.f32 %v13438_v12, %v13446_v54 }
 0x123   :  { %17503 = vst [vmem:[#allocation153_spill] sm:$0xff] %v13600_v15  ;;  %v13609_v24 = vadd.f32 %v564_v1, %v13556_v50  ;;  %v566_v56 = vpop.f32.mrb[31].mxu1 }
 0x124   :  { %17504 = vst [vmem:[#allocation154_spill] sm:$0xff] %v13603_v3  ;;  %v13612_v37 = vadd.f32 %v566_v56, %v13561_v51  ;;  %v13621_v3 = vrot.slane %v188_v38, %v13426_v32  ;;  %v13626_v56 = vrot.slane %v189_v16, %v13426_v32 }
 0x125   :  { %17505 = vst [vmem:[#allocation155_spill] sm:$0xff] %v13609_v24 }
 0x126   :  { %17506 = vst [vmem:[#allocation156_spill] sm:$0xff] %v13612_v37 }
 0x128   :  { %v13616_v15 = vpop.f32.mrb[32].mxu1 }
 0x129   :  { %v1389_v10 = vpop.f32.mrb[16].mxu0  ;;  %v13623_v1 = vpop.f32.mrb[33].mxu1 }
 0x12a   :  { %v1519_v24 = vadd.f32 %v1389_v10, %v458_v49  ;;  %v1391_v37 = vpop.f32.mrb[17].mxu0  ;;  %v680_v57 = vpop.f32.mrb[34].mxu1 }
 0x12b   :  { %v1520_v41 = vadd.f32 %v1391_v37, %v460_v34  ;;  %v13629_v20 = vadd.f32 %v680_v57, %v13621_v3  ;;  %v682_v28 = vpop.f32.mrb[35].mxu1  ;;  %v1393_v25 = vpop.f32.mrb[18].mxu0 }
 0x12c   :  { %v13632_v12 = vadd.f32 %v682_v28, %v13626_v56  ;;  %v1394_v54 = vpop.f32.mrb[19].mxu0 }
 0x12e   :  { %17507 = vst [vmem:[#allocation157_spill] sm:$0xff] %v13632_v12 }
 0x130   :  { %v686_v38 = vpop.f32.mrb[36].mxu1 }
 0x131   :  { %v13635_v29 = vadd.f32 %v686_v38, %v13621_v3  ;;  %v688_v10 = vpop.f32.mrb[37].mxu1 }
 0x132   :  { %v13638_v16 = vadd.f32 %v688_v10, %v13626_v56  ;;  %v690_v49 = vpop.f32.mrb[38].mxu1 }
 0x133   :  { %17508 = vst [vmem:[#allocation158_spill] sm:$0xff] %v13635_v29  ;;  %v13641_v37 = vadd.f32 %v690_v49, %v13621_v3  ;;  %v692_v34 = vpop.f32.mrb[39].mxu1  ;;  %v10390_v29 = vmul.f32 -1.442695, %v1520_v41 }
 0x134   :  { %17509 = vst [vmem:[#allocation159_spill] sm:$0xff] %v13638_v16  ;;  %v13644_v57 = vadd.f32 %v692_v34, %v13626_v56 }
 0x135   :  { %17510 = vst [vmem:[#allocation160_spill] sm:$0xff] %v13641_v37 }
 0x136   :  { %17511 = vst [vmem:[#allocation161_spill] sm:$0xff] %v13644_v57 }
 0x138   :  { %v696_v25 = vpop.f32.mrb[40].mxu1 }
 0x139   :  { %v13647_v28 = vadd.f32 %v696_v25, %v13621_v3  ;;  %v698_v54 = vpop.f32.mrb[41].mxu1 }
 0x13a   :  { %v13650_v38 = vadd.f32 %v698_v54, %v13626_v56  ;;  %v700_v32 = vpop.f32.mrb[42].mxu1 }
 0x13b   :  { %17512 = vst [vmem:[#allocation162_spill] sm:$0xff] %v13647_v28  ;;  %v13653_v10 = vadd.f32 %v700_v32, %v13621_v3  ;;  %v702_v16 = vpop.f32.mrb[43].mxu1 }
 0x13c   :  { %17513 = vst [vmem:[#allocation163_spill] sm:$0xff] %v13650_v38  ;;  %v13656_v49 = vadd.f32 %v702_v16, %v13626_v56 }
 0x13d   :  { %17514 = vst [vmem:[#allocation164_spill] sm:$0xff] %v13653_v10  ;;  %v10389_v10 = vmul.f32 -1.442695, %v1519_v24  ;;  %v606_v24 = vadd.f32 %v13448_v8, %v13443_v2 }
 0x13e   :  { %17515 = vst [vmem:[#allocation165_spill] sm:$0xff] %v13656_v49 }
 0x13f   :  { %12104 = vpow2.f32 %v10389_v10 }
 0x140   :  { %v706_v37 = vpop.f32.mrb[44].mxu1  ;;  %12106 = vpow2.f32 %v10390_v29 }
 0x141   :  { %v13659_v34 = vadd.f32 %v706_v37, %v13621_v3  ;;  %v708_v57 = vpop.f32.mrb[45].mxu1 }
 0x142   :  { %v13662_v25 = vadd.f32 %v708_v57, %v13626_v56  ;;  %v710_v28 = vpop.f32.mrb[46].mxu1 }
 0x143   :  { %17516 = vst [vmem:[#allocation166_spill] sm:$0xff] %v13659_v34  ;;  %v13665_v54 = vadd.f32 %v710_v28, %v13621_v3  ;;  %v712_v38 = vpop.f32.mrb[47].mxu1  ;;  %v531_v34 = vadd.f32 %v13553_v43, %v13556_v50  ;;  %v604_v28 = vadd.f32 %v13440_v11, %v13433_v21 }
 0x144   :  { %17517 = vst [vmem:[#allocation167_spill] sm:$0xff] %v13662_v25  ;;  %v13668_v32 = vadd.f32 %v712_v38, %v13626_v56  ;;  %v533_v25 = vadd.f32 %v13558_v40, %v13561_v51 }
 0x145   :  { %17518 = vst [vmem:[#allocation168_spill] sm:$0xff] %v13665_v54 }
 0x146   :  { %17519 = vst [vmem:[#allocation169_spill] sm:$0xff] %v13668_v32 }
 0x149   :  { %v12105_v16 = vpop.eup %12104 }
 0x14a   :  { %v12107_v49 = vpop.eup %12106  ;;  %v1533_v37 = vadd.f32 1.0, %v12105_v16 }
 0x14b   :  { %v1534_v57 = vadd.f32 1.0, %v12107_v49 }
 0x14c   :  { %12108 = vrcp.f32 %v1533_v37 }
 0x14d   :  { %12110 = vrcp.f32 %v1534_v57 }
 0x156   :  { %v12109_v2 = vpop.eup %12108 }
 0x157   :  { %v12111_v21 = vpop.eup %12110 }
 0x168   :  { %v1430_v54 = vpop.f32.mrb[48].mxu1 }
 0x169   :  { %v1521_v41 = vadd.f32 %v1430_v54, %v531_v34  ;;  %v1432_v38 = vpop.f32.mrb[49].mxu1  ;;  %v1471_v29 = vpop.f32.mrb[20].mxu0 }
 0x16a   :  { %v1522_v10 = vadd.f32 %v1432_v38, %v533_v25  ;;  %v1523_v16 = vadd.f32 %v1471_v29, %v604_v28  ;;  %v1434_v32 = vpop.f32.mrb[50].mxu1  ;;  %v1473_v12 = vpop.f32.mrb[21].mxu0 }
 0x16b   :  { %v10391_v50 = vmul.f32 -1.442695, %v1521_v41  ;;  %v1524_v43 = vadd.f32 %v1473_v12, %v606_v24  ;;  %v1435_v49 = vpop.f32.mrb[51].mxu1  ;;  %v1475_v40 = vpop.f32.mrb[22].mxu0 }
 0x16c   :  { %v10392_v51 = vmul.f32 -1.442695, %v1522_v10  ;;  %12112 = vtanh.f32 %v1523_v16  ;;  %v1476_v11 = vpop.f32.mrb[23].mxu0  ;;  %v677_v16 = vadd.f32 %v13616_v15, %v13621_v3  ;;  %v12397_v3 = vmov 1966171168  }
 0x16d   :  { %12114 = vpow2.f32 %v10391_v50  ;;  %v679_v50 = vadd.f32 %v13623_v1, %v13626_v56  ;;  %v1578_v1 = vunpack.c.l.s4 %v12397_v3 }
 0x16e   :  { %12116 = vpow2.f32 %v10392_v51 }
 0x16f   :  { %12118 = vtanh.f32 %v1524_v43  ;;  %v1579_v56 = vunpack.c.0.s8 %v1578_v1 }
 0x176   :  { %v12113_v8 = vpop.eup %12112 }
 0x177   :  { %v12115_v34 = vpop.eup %12114  ;;  %v1567_v54 = vmul.f32 %v12113_v8, %v12109_v2 }
 0x178   :  { %v12117_v25 = vpop.eup %12116  ;;  %v1545_v37 = vadd.f32 1.0, %v12115_v34 }
 0x179   :  { %v12119_v32 = vpop.eup %12118  ;;  %v1546_v28 = vadd.f32 1.0, %v12117_v25 }
 0x17a   :  { %12120 = vrcp.f32 %v1545_v37  ;;  %v1568_v57 = vmul.f32 %v12119_v32, %v12111_v21 }
 0x17b   :  { %12122 = vrcp.f32 %v1546_v28  ;;  %v13689_v28 = vsub.s32 %v1579_v56, %v13415_v47  ;;  %v17543_v47 = vld [vmem:[#allocation84_spill] sm:$0xff] }
 0x184   :  { %v12121_v12 = vpop.eup %12120 }
 0x185   :  { %v12123_v24 = vpop.eup %12122  ;;  %v1565_v41 = vmul.f32 0.0, %v12121_v12 }
 0x186   :  { %v1566_v38 = vmul.f32 0.0, %v12123_v24 }
 0x187   :  { %v13678_v29 = vadd.f32 %v1567_v54, %v1565_v41 }
 0x188   :  { %v13680_v10 = vadd.f32 %v1568_v57, %v1566_v38 }
 0x1a8   :  { %v1512_v43 = vpop.f32.mrb[52].mxu1 }
 0x1a9   :  { %v1525_v49 = vadd.f32 %v1512_v43, %v677_v16  ;;  %v1514_v40 = vpop.f32.mrb[53].mxu1 }
 0x1aa   :  { %v1526_v51 = vadd.f32 %v1514_v40, %v679_v50  ;;  %v1516_v11 = vpop.f32.mrb[54].mxu1 }
 0x1ab   :  { %v10393_v2 = vmul.f32 -1.442695, %v1525_v49  ;;  %v1517_v21 = vpop.f32.mrb[55].mxu1 }
 0x1ac   :  { %v10394_v8 = vmul.f32 -1.442695, %v1526_v51 }
 0x1ad   :  { %12124 = vpow2.f32 %v10393_v2 }
 0x1ae   :  { %12126 = vpow2.f32 %v10394_v8 }
 0x1af   :  { %12128 = vtanh.f32 %v13678_v29 }
 0x1b0   :  { %12130 = vtanh.f32 %v13680_v10 }
 0x1b7   :  { %v12125_v34 = vpop.eup %12124 }
 0x1b8   :  { %v12127_v54 = vpop.eup %12126  ;;  %v1559_v25 = vadd.f32 1.0, %v12125_v34 }
 0x1b9   :  { %v1560_v15 = vadd.f32 1.0, %v12127_v54  ;;  %v12129_v37 = vpop.eup %12128 }
 0x1ba   :  { %12132 = vrcp.f32 %v1559_v25  ;;  %v12131_v32 = vpop.eup %12130 }
 0x1bb   :  { %12134 = vrcp.f32 %v1560_v15 }
 0x1c4   :  { %v12133_v57 = vpop.eup %12132 }
 0x1c5   :  { %v12135_v12 = vpop.eup %12134  ;;  %v1573_v24 = vmul.f32 %v12133_v57, %v12129_v37 }
 0x1c6   :  { %v1574_v41 = vmul.f32 %v12135_v12, %v12131_v32 }
 0x1c7   :  { %v1576_v38 = vcombine.high %v1573_v24, %v1573_v24  ;;  %v1583_v16 = vrot.slane %v1573_v24, %v13689_v28  ;;  %v13695_v2 = vpack.c.bf16 %v1573_v24, %v1573_v24 }
 0x1c8   :  { %v1642_v50 = vcombine.high %v1574_v41, %v1574_v41  ;;  %v1649_v43 = vrot.slane %v1574_v41, %v13689_v28  ;;  %v1708_v49 = vpack.c.bf16 %v1574_v41, %v1574_v41  ;;  %v17520_v41 = vld [vmem:[#allocation38_spill] sm:$0xff] }
 0x1c9   :  { %v1590_v40 = vrot.slane %v1576_v38, %v13689_v28  ;;  %v1591_v51 = vcombine.high %v1583_v16, %v1583_v16  ;;  %v1599_v11 = vrot.slane %v1583_v16, %v13689_v28  ;;  %10395 = vst.sshfl [vmem:[#allocation2] sm:$0x1 pattern:$0x73625140] %v1583_v16 }
 0x1ca   :  { %v1656_v21 = vrot.slane %v1642_v50, %v13689_v28  ;;  %v1657_v8 = vcombine.high %v1649_v43, %v1649_v43  ;;  %v1665_v34 = vrot.slane %v1649_v43, %v13689_v28  ;;  %10399 = vst.sshfl [vmem:[#allocation2 + $0xf] sm:$0x1 pattern:$0x73625140] %v1649_v43  ;;  %1741 = vmatprep.mubr.bf16.mxu0 %v1708_v49 }
 0x1cb   :  { %1782 = vmatprep.mubr.bf16.mxu1 %v1708_v49  ;;  %v1592_v54 = vcombine.high %v1590_v40, %v1590_v40  ;;  %v1606_v25 = vrot.slane %v1590_v40, %v13689_v28  ;;  %v1613_v15 = vrot.slane %v1591_v51, %v13689_v28  ;;  %v1621_v3 = vcombine.high %v1599_v11, %v1599_v11  ;;  %v17522_v11 = vld [vmem:[#allocation42_spill] sm:$0xff] }
 0x1cc   :  { %10396 = vst.sshfl [vmem:[#allocation2 + $0x10] sm:$0x1 pattern:$0x73625140] %v1591_v51  ;;  %1742 = vmatmul.mubr.bf16.vlgmr.msra.gmra.mrb[24].mxu0 %v13695_v2  ;;  %v1658_v1 = vcombine.high %v1656_v21, %v1656_v21  ;;  %v1672_v56 = vrot.slane %v1656_v21, %v13689_v28  ;;  %v1679_v37 = vrot.slane %v1657_v8, %v13689_v28 }
 0x1cd   :  { %10397 = vst.sshfl [vmem:[#allocation2 + $0x40] sm:$0x1 pattern:$0x73625140] %v1590_v40  ;;  %v1687_v32 = vcombine.high %v1665_v34, %v1665_v34  ;;  %1783 = vmatmul.mubr.bf16.vlgmr.msra.gmra.mrb[56].mxu1 %v13695_v2  ;;  %v1620_v57 = vrot.slane %v1592_v54, %v13689_v28  ;;  %v1622_v12 = vcombine.high %v1606_v25, %v1606_v25  ;;  %1635 = vst [vmem:[#allocation2 + $0x20] sm:$0x1] %v1621_v3 }
 0x1ce   :  { %10400 = vst.sshfl [vmem:[#allocation2 + $0x1f] sm:$0x1 pattern:$0x73625140] %v1657_v8  ;;  %v1623_v24 = vcombine.high %v1613_v15, %v1613_v15  ;;  %1792 = vmatpush1.bf16.msra.mxu0 %v17520_v41  ;;  %1833 = vmatpush1.bf16.msra.mxu1 %v13191_v30  ;;  %v1686_v38 = vrot.slane %v1658_v1, %v13689_v28  ;;  %v17521_v40 = vld [vmem:[#allocation40_spill] sm:$0xff]  ;;  %v17526_v34 = vld [vmem:[#allocation50_spill] sm:$0xff] }
 0x1cf   :  { %10401 = vst.sshfl [vmem:[#allocation2 + $0x4f] sm:$0x1 pattern:$0x73625140] %v1656_v21  ;;  %v1688_v16 = vcombine.high %v1672_v56, %v1672_v56  ;;  %v1689_v50 = vcombine.high %v1679_v37, %v1679_v37  ;;  %1701 = vst [vmem:[#allocation2 + $0x2f] sm:$0x1] %v1687_v32  ;;  %1823 = vmatprep.mubr.bf16.mxu0 %v1708_v49  ;;  %1864 = vmatprep.mubr.bf16.mxu1 %v1708_v49 }
 0x1d0   :  { %10398 = vst.sshfl [vmem:[#allocation2 + $0x50] sm:$0x1 pattern:$0x73625140] %v1592_v54  ;;  %v1624_v43 = vcombine.high %v1620_v57, %v1620_v57  ;;  %1636 = vst [vmem:[#allocation2 + $0x30] sm:$0x1] %v1623_v24  ;;  %1793 = vmatprep.subr.bf16.mxu0 %v17521_v40  ;;  %1834 = vmatprep.subr.bf16.mxu1 %v13195_v31  ;;  %v1690_v51 = vcombine.high %v1686_v38, %v1686_v38 }
 0x1d1   :  { %10402 = vst.sshfl [vmem:[#allocation2 + $0x5f] sm:$0x1 pattern:$0x73625140] %v1658_v1  ;;  %1639 = vst [vmem:[#allocation2 + $0x60] sm:$0x1] %v1622_v12 }
 0x1d2   :  { %1702 = vst [vmem:[#allocation2 + $0x3f] sm:$0x1] %v1689_v50  ;;  %1705 = vst [vmem:[#allocation2 + $0x6f] sm:$0x1] %v1688_v16  ;;  %1794 = vmatpush1.bf16.msra.mxu0 %v17522_v11  ;;  %1835 = vmatpush1.bf16.msra.mxu1 %v13207_v58  ;;  %v17523_v21 = vld [vmem:[#allocation44_spill] sm:$0xff]  ;;  %v17524_v49 = vld [vmem:[#allocation46_spill] sm:$0xff] }
 0x1d3   :  { %1640 = vst [vmem:[#allocation2 + $0x70] sm:$0x1] %v1624_v43  ;;  %1706 = vst [vmem:[#allocation2 + $0x7f] sm:$0x1] %v1690_v51  ;;  %1795 = vmatprep.subr.bf16.mxu0 %v17523_v21  ;;  %1836 = vmatprep.subr.bf16.mxu1 %v13210_v52  ;;  %v17525_v8 = vld [vmem:[#allocation48_spill] sm:$0xff]  ;;  %v17528_v25 = vld [vmem:[#allocation54_spill] sm:$0xff] }
 0x1d4   :  { %v17527_v54 = vld [vmem:[#allocation52_spill] sm:$0xff]  ;;  %v17530_v3 = vld [vmem:[#allocation58_spill] sm:$0xff] }
 0x1d5   :  { %v17529_v15 = vld [vmem:[#allocation56_spill] sm:$0xff]  ;;  %v17532_v56 = vld [vmem:[#allocation62_spill] sm:$0xff] }
 0x1d6   :  { %1796 = vmatpush1.bf16.msra.mxu0 %v17524_v49  ;;  %1837 = vmatpush1.bf16.msra.mxu1 %v13222_v44  ;;  %v17531_v1 = vld [vmem:[#allocation60_spill] sm:$0xff]  ;;  %v17534_v32 = vld [vmem:[#allocation66_spill] sm:$0xff] }
 0x1d7   :  { %1797 = vmatprep.subr.bf16.mxu0 %v17525_v8  ;;  %1838 = vmatprep.subr.bf16.mxu1 %v13225_v61  ;;  %v17533_v37 = vld [vmem:[#allocation64_spill] sm:$0xff]  ;;  %v17536_v12 = vld [vmem:[#allocation70_spill] sm:$0xff] }
 0x1d8   :  { %v17535_v57 = vld [vmem:[#allocation68_spill] sm:$0xff]  ;;  %v17538_v38 = vld [vmem:[#allocation74_spill] sm:$0xff] }
 0x1d9   :  { %v17537_v24 = vld [vmem:[#allocation72_spill] sm:$0xff]  ;;  %v17540_v50 = vld [vmem:[#allocation78_spill] sm:$0xff] }
 0x1da   :  { %1798 = vmatpush1.bf16.msra.mxu0 %v17526_v34  ;;  %1839 = vmatpush1.bf16.msra.mxu1 %v13236_v36  ;;  %v17539_v16 = vld [vmem:[#allocation76_spill] sm:$0xff]  ;;  %v17542_v51 = vld [vmem:[#allocation82_spill] sm:$0xff] }
 0x1db   :  { %1799 = vmatprep.subr.bf16.mxu0 %v17527_v54  ;;  %1840 = vmatprep.subr.bf16.mxu1 %v13239_v19  ;;  %v17541_v43 = vld [vmem:[#allocation80_spill] sm:$0xff] }
 0x1de   :  { %1800 = vmatpush1.bf16.msra.mxu0 %v17528_v25  ;;  %1841 = vmatpush1.bf16.msra.mxu1 %v13250_v39 }
 0x1df   :  { %1801 = vmatprep.subr.bf16.mxu0 %v17529_v15  ;;  %1842 = vmatprep.subr.bf16.mxu1 %v13253_v63 }
 0x1e2   :  { %1802 = vmatpush1.bf16.msra.mxu0 %v17530_v3  ;;  %1843 = vmatpush1.bf16.msra.mxu1 %v13264_v60 }
 0x1e3   :  { %1803 = vmatprep.subr.bf16.mxu0 %v17531_v1  ;;  %1844 = vmatprep.subr.bf16.mxu1 %v13267_v6 }
 0x1e6   :  { %1804 = vmatpush1.bf16.msra.mxu0 %v17532_v56  ;;  %1845 = vmatpush1.bf16.msra.mxu1 %v13278_v45 }
 0x1e7   :  { %1805 = vmatprep.subr.bf16.mxu0 %v17533_v37  ;;  %1846 = vmatprep.subr.bf16.mxu1 %v13281_v46 }
 0x1ea   :  { %1806 = vmatpush1.bf16.msra.mxu0 %v17534_v32  ;;  %1847 = vmatpush1.bf16.msra.mxu1 %v13292_v53 }
 0x1eb   :  { %1807 = vmatprep.subr.bf16.mxu0 %v17535_v57  ;;  %1848 = vmatprep.subr.bf16.mxu1 %v13295_v55 }
 0x1ee   :  { %1808 = vmatpush1.bf16.msra.mxu0 %v17536_v12  ;;  %1849 = vmatpush1.bf16.msra.mxu1 %v13306_v62 }
 0x1ef   :  { %1809 = vmatprep.subr.bf16.mxu0 %v17537_v24  ;;  %1850 = vmatprep.subr.bf16.mxu1 %v13309_v0 }
 0x1f2   :  { %1810 = vmatpush1.bf16.msra.mxu0 %v17538_v38  ;;  %1851 = vmatpush1.bf16.msra.mxu1 %v13320_v7  ;;  %v17544_v7 = vld [vmem:[#allocation86_spill] sm:$0xff] }
 0x1f3   :  { %1811 = vmatprep.subr.bf16.mxu0 %v17539_v16  ;;  %1852 = vmatprep.subr.bf16.mxu1 %v13323_v9  ;;  %v17545_v9 = vld [vmem:[#allocation88_spill] sm:$0xff] }
 0x1f6   :  { %1812 = vmatpush1.bf16.msra.mxu0 %v17540_v50  ;;  %1853 = vmatpush1.bf16.msra.mxu1 %v13334_v13  ;;  %v17546_v13 = vld [vmem:[#allocation90_spill] sm:$0xff] }
 0x1f7   :  { %1813 = vmatprep.subr.bf16.mxu0 %v17541_v43  ;;  %1854 = vmatprep.subr.bf16.mxu1 %v13337_v14  ;;  %v17547_v14 = vld [vmem:[#allocation92_spill] sm:$0xff] }
 0x1fa   :  { %1814 = vmatpush1.bf16.msra.mxu0 %v17542_v51  ;;  %1855 = vmatpush1.bf16.msra.mxu1 %v13348_v17  ;;  %v17548_v17 = vld [vmem:[#allocation94_spill] sm:$0xff] }
 0x1fb   :  { %1815 = vmatprep.subr.bf16.mxu0 %v17543_v47  ;;  %1856 = vmatprep.subr.bf16.mxu1 %v13351_v18  ;;  %v17549_v18 = vld [vmem:[#allocation96_spill] sm:$0xff] }
 0x1fe   :  { %1816 = vmatpush1.bf16.msra.mxu0 %v17544_v7  ;;  %1857 = vmatpush1.bf16.msra.mxu1 %v13362_v22  ;;  %v17550_v22 = vld [vmem:[#allocation98_spill] sm:$0xff] }
 0x1ff   :  { %1817 = vmatprep.subr.bf16.mxu0 %v17545_v9  ;;  %1858 = vmatprep.subr.bf16.mxu1 %v13365_v23  ;;  %v17551_v23 = vld [vmem:[#allocation3_spill] sm:$0xff] }
 0x202   :  { %1818 = vmatpush1.bf16.msra.mxu0 %v17546_v13  ;;  %1859 = vmatpush1.bf16.msra.mxu1 %v13376_v26 }
 0x203   :  { %1819 = vmatprep.subr.bf16.mxu0 %v17547_v14  ;;  %1860 = vmatprep.subr.bf16.mxu1 %v13379_v27  ;;  %v17552_v27 = vld [vmem:[#allocation4_spill] sm:$0xff] }
 0x206   :  { %1820 = vmatpush1.bf16.msra.mxu0 %v17548_v17  ;;  %1861 = vmatpush1.bf16.msra.mxu1 %v13390_v33  ;;  %v17553_v33 = vld [vmem:[#allocation5_spill] sm:$0xff] }
 0x207   :  { %1821 = vmatprep.subr.bf16.mxu0 %v17549_v18  ;;  %1862 = vmatprep.subr.bf16.mxu1 %v13393_v35  ;;  %v17554_v35 = vld [vmem:[#allocation6_spill] sm:$0xff]  ;;  %v17559_v18 = vld [vmem:[#allocation45_spill] sm:$0xff] }
 0x20a   :  { %1822 = vmatpush1.bf16.msra.mxu0 %v17550_v22  ;;  %1863 = vmatpush1.bf16.msra.mxu1 %v13398_v5  ;;  %v17555_v22 = vld [vmem:[#allocation41_spill] sm:$0xff]  ;;  %v17556_v5 = vld [vmem:[#allocation7_spill] sm:$0xff] }
 0x20b   :  { %2063 = vmatprep.subr.bf16.mxu0 %v17551_v23  ;;  %2104 = vmatprep.subr.bf16.mxu1 %v12736_v4  ;;  %v17557_v23 = vld [vmem:[#allocation43_spill] sm:$0xff]  ;;  %v17558_v4 = vld [vmem:[#allocation8_spill] sm:$0xff] }
 0x20d   :  { %1824 = vmatmul.mubr.bf16.vlgmr.msra.gmra.mrb[28].mxu0 %v13695_v2  ;;  %1865 = vmatmul.mubr.bf16.vlgmr.msra.gmra.mrb[60].mxu1 %v13695_v2  ;;  %v17560_v2 = vld [vmem:[#allocation9_spill] sm:$0xff] }
 0x20e   :  { %2064 = vmatpush1.bf16.msra.mxu0 %v17552_v27  ;;  %2105 = vmatpush1.bf16.msra.mxu1 %v12808_v42  ;;  %v17561_v27 = vld [vmem:[#allocation47_spill] sm:$0xff]  ;;  %v17562_v42 = vld [vmem:[#allocation10_spill] sm:$0xff] }
 0x20f   :  { %2065 = vmatprep.subr.bf16.mxu0 %v17553_v33  ;;  %2106 = vmatprep.subr.bf16.mxu1 %v12813_v48  ;;  %v17563_v33 = vld [vmem:[#allocation49_spill] sm:$0xff]  ;;  %v17564_v48 = vld [vmem:[#allocation11_spill] sm:$0xff] }
 0x212   :  { %2066 = vmatpush1.bf16.msra.mxu0 %v17554_v35  ;;  %2107 = vmatpush1.bf16.msra.mxu1 %v17555_v22  ;;  %v17565_v35 = vld [vmem:[#allocation51_spill] sm:$0xff]  ;;  %v17566_v22 = vld [vmem:[#allocation12_spill] sm:$0xff] }
 0x213   :  { %2067 = vmatprep.subr.bf16.mxu0 %v17556_v5  ;;  %2108 = vmatprep.subr.bf16.mxu1 %v17557_v23  ;;  %v17567_v5 = vld [vmem:[#allocation53_spill] sm:$0xff] }
 0x214   :  { %v17568_v23 = vld [vmem:[#allocation13_spill] sm:$0xff] }
 0x216   :  { %2068 = vmatpush1.bf16.msra.mxu0 %v17558_v4  ;;  %2109 = vmatpush1.bf16.msra.mxu1 %v17559_v18  ;;  %v17569_v4 = vld [vmem:[#allocation55_spill] sm:$0xff]  ;;  %v17570_v18 = vld [vmem:[#allocation14_spill] sm:$0xff] }
 0x217   :  { %2069 = vmatprep.subr.bf16.mxu0 %v17560_v2  ;;  %2110 = vmatprep.subr.bf16.mxu1 %v17561_v27  ;;  %v17571_v2 = vld [vmem:[#allocation57_spill] sm:$0xff]  ;;  %v17572_v27 = vld [vmem:[#allocation15_spill] sm:$0xff] }
 0x21a   :  { %2070 = vmatpush1.bf16.msra.mxu0 %v17562_v42  ;;  %2111 = vmatpush1.bf16.msra.mxu1 %v17563_v33  ;;  %v17573_v42 = vld [vmem:[#allocation59_spill] sm:$0xff]  ;;  %v17574_v33 = vld [vmem:[#allocation16_spill] sm:$0xff] }
 0x21b   :  { %2071 = vmatprep.subr.bf16.mxu0 %v17564_v48  ;;  %2112 = vmatprep.subr.bf16.mxu1 %v17565_v35  ;;  %v17575_v48 = vld [vmem:[#allocation61_spill] sm:$0xff] }
 0x21c   :  { %v17576_v35 = vld [vmem:[#allocation17_spill] sm:$0xff] }
 0x21e   :  { %2072 = vmatpush1.bf16.msra.mxu0 %v17566_v22  ;;  %2113 = vmatpush1.bf16.msra.mxu1 %v17567_v5  ;;  %v17577_v22 = vld [vmem:[#allocation63_spill] sm:$0xff]  ;;  %v17578_v5 = vld [vmem:[#allocation18_spill] sm:$0xff] }
 0x21f   :  { %2073 = vmatprep.subr.bf16.mxu0 %v17568_v23  ;;  %2114 = vmatprep.subr.bf16.mxu1 %v17569_v4  ;;  %v17579_v23 = vld [vmem:[#allocation65_spill] sm:$0xff]  ;;  %v17580_v4 = vld [vmem:[#allocation19_spill] sm:$0xff] }
 0x222   :  { %2074 = vmatpush1.bf16.msra.mxu0 %v17570_v18  ;;  %2115 = vmatpush1.bf16.msra.mxu1 %v17571_v2  ;;  %v17581_v18 = vld [vmem:[#allocation67_spill] sm:$0xff]  ;;  %v17582_v2 = vld [vmem:[#allocation20_spill] sm:$0xff] }
 0x223   :  { %2075 = vmatprep.subr.bf16.mxu0 %v17572_v27  ;;  %2116 = vmatprep.subr.bf16.mxu1 %v17573_v42  ;;  %v17583_v27 = vld [vmem:[#allocation69_spill] sm:$0xff] }
 0x224   :  { %v17584_v42 = vld [vmem:[#allocation21_spill] sm:$0xff] }
 0x226   :  { %2076 = vmatpush1.bf16.msra.mxu0 %v17574_v33  ;;  %2117 = vmatpush1.bf16.msra.mxu1 %v17575_v48  ;;  %v17585_v33 = vld [vmem:[#allocation71_spill] sm:$0xff]  ;;  %v17586_v48 = vld [vmem:[#allocation22_spill] sm:$0xff] }
 0x227   :  { %2077 = vmatprep.subr.bf16.mxu0 %v17576_v35  ;;  %2118 = vmatprep.subr.bf16.mxu1 %v17577_v22  ;;  %v17587_v35 = vld [vmem:[#allocation73_spill] sm:$0xff]  ;;  %v17588_v22 = vld [vmem:[#allocation23_spill] sm:$0xff] }
 0x22a   :  { %2078 = vmatpush1.bf16.msra.mxu0 %v17578_v5  ;;  %2119 = vmatpush1.bf16.msra.mxu1 %v17579_v23  ;;  %v17589_v5 = vld [vmem:[#allocation75_spill] sm:$0xff]  ;;  %v17590_v23 = vld [vmem:[#allocation24_spill] sm:$0xff] }
 0x22b   :  { %2079 = vmatprep.subr.bf16.mxu0 %v17580_v4  ;;  %2120 = vmatprep.subr.bf16.mxu1 %v17581_v18  ;;  %v17591_v4 = vld [vmem:[#allocation77_spill] sm:$0xff] }
 0x22c   :  { %v17592_v18 = vld [vmem:[#allocation25_spill] sm:$0xff] }
 0x22e   :  { %2080 = vmatpush1.bf16.msra.mxu0 %v17582_v2  ;;  %2121 = vmatpush1.bf16.msra.mxu1 %v17583_v27  ;;  %v17593_v2 = vld [vmem:[#allocation79_spill] sm:$0xff]  ;;  %v17594_v27 = vld [vmem:[#allocation26_spill] sm:$0xff] }
 0x22f   :  { %2081 = vmatprep.subr.bf16.mxu0 %v17584_v42  ;;  %2122 = vmatprep.subr.bf16.mxu1 %v17585_v33  ;;  %v17595_v42 = vld [vmem:[#allocation81_spill] sm:$0xff]  ;;  %v17596_v33 = vld [vmem:[#allocation28_spill] sm:$0xff] }
 0x232   :  { %2082 = vmatpush1.bf16.msra.mxu0 %v17586_v48  ;;  %2123 = vmatpush1.bf16.msra.mxu1 %v17587_v35  ;;  %v17597_v48 = vld [vmem:[#allocation83_spill] sm:$0xff]  ;;  %v17598_v35 = vld [vmem:[#allocation29_spill] sm:$0xff] }
 0x233   :  { %2083 = vmatprep.subr.bf16.mxu0 %v17588_v22  ;;  %2124 = vmatprep.subr.bf16.mxu1 %v17589_v5  ;;  %v17599_v5 = vld [vmem:[#allocation30_spill] sm:$0xff] }
 0x236   :  { %2084 = vmatpush1.bf16.msra.mxu0 %v17590_v23  ;;  %2125 = vmatpush1.bf16.msra.mxu1 %v17591_v4  ;;  %v17600_v23 = vld [vmem:[#allocation87_spill] sm:$0xff] }
 0x237   :  { %2085 = vmatprep.subr.bf16.mxu0 %v17592_v18  ;;  %2126 = vmatprep.subr.bf16.mxu1 %v17593_v2  ;;  %v17601_v4 = vld [vmem:[#allocation31_spill] sm:$0xff]  ;;  %v17602_v18 = vld [vmem:[#allocation89_spill] sm:$0xff]  ;;  %v17603_v2 = vld [vmem:[#allocation32_spill] sm:$0xff] }
 0x23a   :  { %2086 = vmatpush1.bf16.msra.mxu0 %v17594_v27  ;;  %2127 = vmatpush1.bf16.msra.mxu1 %v17595_v42  ;;  %v17604_v27 = vld [vmem:[#allocation91_spill] sm:$0xff]  ;;  %v17605_v42 = vld [vmem:[#allocation33_spill] sm:$0xff] }
 0x23b   :  { %2087 = vmatprep.subr.bf16.mxu0 %v17596_v33  ;;  %2128 = vmatprep.subr.bf16.mxu1 %v17597_v48  ;;  %v17606_v33 = vld [vmem:[#allocation93_spill] sm:$0xff]  ;;  %v17607_v48 = vld [vmem:[#allocation34_spill] sm:$0xff] }
 0x23e   :  { %2088 = vmatpush1.bf16.msra.mxu0 %v17598_v35  ;;  %2129 = vmatpush1.bf16.msra.mxu1 %v17490_v59  ;;  %v17608_v35 = vld [vmem:[#allocation95_spill] sm:$0xff] }
 0x23f   :  { %2089 = vmatprep.subr.bf16.mxu0 %v17599_v5  ;;  %2130 = vmatprep.subr.bf16.mxu1 %v17600_v23  ;;  %v17609_v59 = vld [vmem:[#allocation35_spill] sm:$0xff]  ;;  %v17610_v5 = vld [vmem:[#allocation97_spill] sm:$0xff]  ;;  %v17611_v23 = vld [vmem:[#allocation36_spill] sm:$0xff] }
 0x242   :  { %2090 = vmatpush1.bf16.msra.mxu0 %v17601_v4  ;;  %2131 = vmatpush1.bf16.msra.mxu1 %v17602_v18  ;;  %v17612_v4 = vld [vmem:[#allocation99_spill] sm:$0xff] }
 0x243   :  { %2091 = vmatprep.subr.bf16.mxu0 %v17603_v2  ;;  %2132 = vmatprep.subr.bf16.mxu1 %v17604_v27  ;;  %v17613_v2 = vld [vmem:[#allocation115_spill] sm:$0xff] }
 0x246   :  { %2092 = vmatpush1.bf16.msra.mxu0 %v17605_v42  ;;  %2133 = vmatpush1.bf16.msra.mxu1 %v17606_v33  ;;  %v17614_v42 = vld [vmem:[#allocation143_spill] sm:$0xff]  ;;  %v17615_v33 = vld [vmem:[#allocation116_spill] sm:$0xff] }
 0x247   :  { %2093 = vmatprep.subr.bf16.mxu0 %v17607_v48  ;;  %2134 = vmatprep.subr.bf16.mxu1 %v17608_v35  ;;  %v17616_v35 = vld [vmem:[#allocation144_spill] sm:$0xff] }
 0x24a   :  { %2094 = vmatpush1.bf16.msra.mxu0 %v17609_v59  ;;  %2135 = vmatpush1.bf16.msra.mxu1 %v17610_v5 }
 0x24b   :  { %2145 = vmatprep.subr.bf16.mxu0 %v17611_v23  ;;  %2186 = vmatprep.subr.bf16.mxu1 %v17612_v4 }
 0x29f   :  { %v1743_v18 = vpop.f32.mrb[24].mxu0 }
 0x2a0   :  { %v1873_v22 = vadd.f32 %v1743_v18, %v17613_v2  ;;  %v1784_v27 = vpop.f32.mrb[56].mxu1  ;;  %v1745_v17 = vpop.f32.mrb[25].mxu0 }
 0x2a1   :  { %v1875_v14 = vadd.f32 %v1784_v27, %v17614_v42  ;;  %v1874_v26 = vadd.f32 %v1745_v17, %v17615_v33  ;;  %v1786_v48 = vpop.f32.mrb[57].mxu1  ;;  %v1747_v13 = vpop.f32.mrb[26].mxu0 }
 0x2a2   :  { %v1876_v9 = vadd.f32 %v1786_v48, %v17616_v35  ;;  %v1788_v59 = vpop.f32.mrb[58].mxu1  ;;  %v1748_v7 = vpop.f32.mrb[27].mxu0  ;;  %v10403_v47 = vmul.f32 -1.442695, %v1873_v22 }
 0x2a3   :  { %v1789_v5 = vpop.f32.mrb[59].mxu1  ;;  %v10405_v23 = vmul.f32 -1.442695, %v1875_v14  ;;  %v10404_v51 = vmul.f32 -1.442695, %v1874_v26  ;;  %v17617_v59 = vld [vmem:[#allocation117_spill] sm:$0xff] }
 0x2a4   :  { %v10406_v4 = vmul.f32 -1.442695, %v1876_v9  ;;  %12136 = vpow2.f32 %v10403_v47  ;;  %v17619_v26 = vld [vmem:[#allocation157_spill] sm:$0xff] }
 0x2a5   :  { %12138 = vpow2.f32 %v10405_v23 }
 0x2a6   :  { %12140 = vpow2.f32 %v10404_v51 }
 0x2a7   :  { %12142 = vpow2.f32 %v10406_v4  ;;  %v17618_v4 = vld [vmem:[#allocation118_spill] sm:$0xff] }
 0x2ae   :  { %v12137_v18 = vpop.eup %12136 }
 0x2af   :  { %v12139_v2 = vpop.eup %12138  ;;  %v1887_v17 = vadd.f32 1.0, %v12137_v18 }
 0x2b0   :  { %v12141_v42 = vpop.eup %12140  ;;  %v1899_v33 = vadd.f32 1.0, %v12139_v2 }
 0x2b1   :  { %v12143_v27 = vpop.eup %12142  ;;  %v1888_v13 = vadd.f32 1.0, %v12141_v42  ;;  %12144 = vrcp.f32 %v1887_v17 }
 0x2b2   :  { %v1900_v43 = vadd.f32 1.0, %v12143_v27  ;;  %12146 = vrcp.f32 %v1899_v33 }
 0x2b3   :  { %12148 = vrcp.f32 %v1888_v13 }
 0x2b4   :  { %12150 = vrcp.f32 %v1900_v43 }
 0x2bb   :  { %v12145_v17 = vpop.eup %12144 }
 0x2bc   :  { %v12147_v33 = vpop.eup %12146 }
 0x2e0   :  { %v1825_v48 = vpop.f32.mrb[28].mxu0  ;;  %v1866_v5 = vpop.f32.mrb[60].mxu1 }
 0x2e1   :  { %v1877_v7 = vadd.f32 %v1825_v48, %v17617_v59  ;;  %v1879_v9 = vadd.f32 %v1866_v5, %v13629_v20  ;;  %v1827_v14 = vpop.f32.mrb[29].mxu0  ;;  %v1868_v22 = vpop.f32.mrb[61].mxu1  ;;  %v1919_v5 = vmul.f32 %v12147_v33, %v13678_v29 }
 0x2e2   :  { %v1878_v23 = vadd.f32 %v1827_v14, %v17618_v4  ;;  %v1880_v35 = vadd.f32 %v1868_v22, %v17619_v26  ;;  %v1829_v47 = vpop.f32.mrb[30].mxu0  ;;  %v1870_v51 = vpop.f32.mrb[62].mxu1 }
 0x2e3   :  { %12152 = vtanh.f32 %v1877_v7  ;;  %v10407_v18 = vmul.f32 -1.442695, %v1879_v9  ;;  %v1830_v2 = vpop.f32.mrb[31].mxu0  ;;  %v1871_v42 = vpop.f32.mrb[63].mxu1 }
 0x2e4   :  { %12154 = vtanh.f32 %v1878_v23  ;;  %v10408_v27 = vmul.f32 -1.442695, %v1880_v35  ;;  %v12149_v20 = vpop.eup %12148 }
 0x2e5   :  { %12156 = vpow2.f32 %v10407_v18  ;;  %v12151_v13 = vpop.eup %12150 }
 0x2e6   :  { %12158 = vpow2.f32 %v10408_v27  ;;  %v1920_v22 = vmul.f32 %v12151_v13, %v13680_v10 }
 0x2ed   :  { %v12153_v48 = vpop.eup %12152 }
 0x2ee   :  { %v12155_v43 = vpop.eup %12154  ;;  %v1921_v59 = vmul.f32 %v12153_v48, %v12145_v17 }
 0x2ef   :  { %v12157_v14 = vpop.eup %12156  ;;  %v1922_v7 = vmul.f32 %v12155_v43, %v12149_v20 }
 0x2f0   :  { %v12159_v9 = vpop.eup %12158  ;;  %v13847_v4 = vadd.f32 %v1921_v59, %v1919_v5  ;;  %v1913_v23 = vadd.f32 1.0, %v12157_v14 }
 0x2f1   :  { %v13849_v26 = vadd.f32 %v1922_v7, %v1920_v22  ;;  %v1914_v35 = vadd.f32 1.0, %v12159_v9 }
 0x2f2   :  { %12160 = vtanh.f32 %v13847_v4 }
 0x2f3   :  { %12162 = vrcp.f32 %v1913_v23 }
 0x2f4   :  { %12164 = vtanh.f32 %v13849_v26 }
 0x2f5   :  { %12166 = vrcp.f32 %v1914_v35 }
 0x2fc   :  { %v12161_v47 = vpop.eup %12160 }
 0x2fd   :  { %v12163_v29 = vpop.eup %12162 }
 0x2fe   :  { %v12165_v51 = vpop.eup %12164  ;;  %v1927_v18 = vmul.f32 %v12163_v29, %v12161_v47 }
 0x2ff   :  { %v12167_v2 = vpop.eup %12166 }
 0x300   :  { %v1928_v10 = vmul.f32 %v12167_v2, %v12165_v51  ;;  %v1930_v42 = vcombine.high %v1927_v18, %v1927_v18  ;;  %v1937_v27 = vrot.slane %v1927_v18, %v13689_v28  ;;  %v13857_v5 = vpack.c.bf16 %v1927_v18, %v1927_v18 }
 0x302   :  { %v1996_v17 = vcombine.high %v1928_v10, %v1928_v10  ;;  %v2003_v33 = vrot.slane %v1928_v10, %v13689_v28  ;;  %v2062_v20 = vpack.c.bf16 %v1928_v10, %v1928_v10  ;;  %v1944_v13 = vrot.slane %v1930_v42, %v13689_v28  ;;  %10409 = vst.sshfl [vmem:[#allocation2 + $0x1] sm:$0x1 pattern:$0x73625140] %v1937_v27 }
 0x303   :  { %v1945_v48 = vcombine.high %v1937_v27, %v1937_v27  ;;  %v1953_v43 = vrot.slane %v1937_v27, %v13689_v28 }
 0x304   :  { %v2010_v59 = vrot.slane %v1996_v17, %v13689_v28  ;;  %v2011_v14 = vcombine.high %v2003_v33, %v2003_v33  ;;  %v2019_v22 = vrot.slane %v2003_v33, %v13689_v28  ;;  %10413 = vst.sshfl [vmem:[#allocation2 + $0xe] sm:$0x1 pattern:$0x73625140] %v2003_v33  ;;  %2095 = vmatprep.mubr.bf16.mxu0 %v2062_v20 }
 0x305   :  { %2136 = vmatprep.mubr.bf16.mxu1 %v2062_v20  ;;  %10411 = vst.sshfl [vmem:[#allocation2 + $0x41] sm:$0x1 pattern:$0x73625140] %v1944_v13  ;;  %v1946_v7 = vcombine.high %v1944_v13, %v1944_v13  ;;  %v1960_v9 = vrot.slane %v1944_v13, %v13689_v28  ;;  %v1967_v23 = vrot.slane %v1945_v48, %v13689_v28 }
 0x306   :  { %v1975_v35 = vcombine.high %v1953_v43, %v1953_v43  ;;  %10410 = vst.sshfl [vmem:[#allocation2 + $0x11] sm:$0x1 pattern:$0x73625140] %v1945_v48  ;;  %2096 = vmatmul.mubr.bf16.vlgmr.msra.gmra.mrb[32].mxu0 %v13857_v5  ;;  %v2012_v47 = vcombine.high %v2010_v59, %v2010_v59  ;;  %v2026_v29 = vrot.slane %v2010_v59, %v13689_v28  ;;  %v17621_v43 = vld [vmem:[#allocation101_spill] sm:$0xff] }
 0x307   :  { %v2033_v51 = vrot.slane %v2011_v14, %v13689_v28  ;;  %v2041_v18 = vcombine.high %v2019_v22, %v2019_v22  ;;  %10414 = vst.sshfl [vmem:[#allocation2 + $0x1e] sm:$0x1 pattern:$0x73625140] %v2011_v14  ;;  %2137 = vmatmul.mubr.bf16.vlgmr.msra.gmra.mrb[64].mxu1 %v13857_v5  ;;  %v1974_v2 = vrot.slane %v1946_v7, %v13689_v28  ;;  %v17623_v14 = vld [vmem:[#allocation80_spill] sm:$0xff]  ;;  %v17624_v22 = vld [vmem:[#allocation103_spill] sm:$0xff] }
 0x308   :  { %10415 = vst.sshfl [vmem:[#allocation2 + $0x4e] sm:$0x1 pattern:$0x73625140] %v2010_v59  ;;  %v1976_v10 = vcombine.high %v1960_v9, %v1960_v9  ;;  %v1977_v42 = vcombine.high %v1967_v23, %v1967_v23  ;;  %1989 = vst [vmem:[#allocation2 + $0x21] sm:$0x1] %v1975_v35  ;;  %2146 = vmatpush1.bf16.msra.mxu0 %v17520_v41  ;;  %2187 = vmatpush1.bf16.msra.mxu1 %v13191_v30 }
 0x309   :  { %10412 = vst.sshfl [vmem:[#allocation2 + $0x51] sm:$0x1 pattern:$0x73625140] %v1946_v7  ;;  %v2040_v27 = vrot.slane %v2012_v47, %v13689_v28  ;;  %v2042_v17 = vcombine.high %v2026_v29, %v2026_v29  ;;  %v2043_v33 = vcombine.high %v2033_v51, %v2033_v51  ;;  %2055 = vst [vmem:[#allocation2 + $0x2e] sm:$0x1] %v2041_v18  ;;  %2177 = vmatprep.mubr.bf16.mxu0 %v2062_v20 }
 0x30a   :  { %10416 = vst.sshfl [vmem:[#allocation2 + $0x5e] sm:$0x1 pattern:$0x73625140] %v2012_v47  ;;  %2218 = vmatprep.mubr.bf16.mxu1 %v2062_v20  ;;  %v1978_v13 = vcombine.high %v1974_v2, %v1974_v2  ;;  %1990 = vst [vmem:[#allocation2 + $0x31] sm:$0x1] %v1977_v42  ;;  %2147 = vmatprep.subr.bf16.mxu0 %v17521_v40 }
 0x30b   :  { %1993 = vst [vmem:[#allocation2 + $0x61] sm:$0x1] %v1976_v10  ;;  %2188 = vmatprep.subr.bf16.mxu1 %v13195_v31  ;;  %v2044_v48 = vcombine.high %v2040_v27, %v2040_v27  ;;  %2056 = vst [vmem:[#allocation2 + $0x3e] sm:$0x1] %v2043_v33  ;;  %v17620_v20 = vld [vmem:[#allocation100_spill] sm:$0xff]  ;;  %v17622_v59 = vld [vmem:[#allocation102_spill] sm:$0xff] }
 0x30c   :  { %2059 = vst [vmem:[#allocation2 + $0x6e] sm:$0x1] %v2042_v17  ;;  %1994 = vst [vmem:[#allocation2 + $0x71] sm:$0x1] %v1978_v13  ;;  %2148 = vmatpush1.bf16.msra.mxu0 %v17522_v11  ;;  %2189 = vmatpush1.bf16.msra.mxu1 %v13207_v58  ;;  %v17625_v7 = vld [vmem:[#allocation82_spill] sm:$0xff]  ;;  %v17626_v9 = vld [vmem:[#allocation104_spill] sm:$0xff] }
 0x30d   :  { %2060 = vst [vmem:[#allocation2 + $0x7e] sm:$0x1] %v2044_v48  ;;  %2149 = vmatprep.subr.bf16.mxu0 %v17523_v21  ;;  %2190 = vmatprep.subr.bf16.mxu1 %v13210_v52  ;;  %v17627_v23 = vld [vmem:[#allocation84_spill] sm:$0xff]  ;;  %v17628_v35 = vld [vmem:[#allocation105_spill] sm:$0xff]  ;;  %v17629_v47 = vld [vmem:[#allocation86_spill] sm:$0xff] }
 0x30e   :  { %v17630_v29 = vld [vmem:[#allocation106_spill] sm:$0xff]  ;;  %v17631_v51 = vld [vmem:[#allocation88_spill] sm:$0xff]  ;;  %v17632_v18 = vld [vmem:[#allocation107_spill] sm:$0xff] }
 0x30f   :  { %v17633_v2 = vld [vmem:[#allocation90_spill] sm:$0xff]  ;;  %v17634_v10 = vld [vmem:[#allocation108_spill] sm:$0xff]  ;;  %v17636_v27 = vld [vmem:[#allocation109_spill] sm:$0xff] }
 0x310   :  { %2150 = vmatpush1.bf16.msra.mxu0 %v17524_v49  ;;  %2191 = vmatpush1.bf16.msra.mxu1 %v13222_v44  ;;  %v17635_v42 = vld [vmem:[#allocation92_spill] sm:$0xff]  ;;  %v17637_v17 = vld [vmem:[#allocation94_spill] sm:$0xff]  ;;  %v17640_v48 = vld [vmem:[#allocation111_spill] sm:$0xff] }
 0x311   :  { %2151 = vmatprep.subr.bf16.mxu0 %v17525_v8  ;;  %2192 = vmatprep.subr.bf16.mxu1 %v13225_v61  ;;  %v17638_v33 = vld [vmem:[#allocation110_spill] sm:$0xff]  ;;  %v17639_v13 = vld [vmem:[#allocation96_spill] sm:$0xff] }
 0x314   :  { %2152 = vmatpush1.bf16.msra.mxu0 %v17526_v34  ;;  %2193 = vmatpush1.bf16.msra.mxu1 %v13236_v36 }
 0x315   :  { %2153 = vmatprep.subr.bf16.mxu0 %v17527_v54  ;;  %2194 = vmatprep.subr.bf16.mxu1 %v13239_v19 }
 0x318   :  { %2154 = vmatpush1.bf16.msra.mxu0 %v17528_v25  ;;  %2195 = vmatpush1.bf16.msra.mxu1 %v13250_v39 }
 0x319   :  { %2155 = vmatprep.subr.bf16.mxu0 %v17529_v15  ;;  %2196 = vmatprep.subr.bf16.mxu1 %v13253_v63 }
 0x31c   :  { %2156 = vmatpush1.bf16.msra.mxu0 %v17530_v3  ;;  %2197 = vmatpush1.bf16.msra.mxu1 %v13264_v60 }
 0x31d   :  { %2157 = vmatprep.subr.bf16.mxu0 %v17531_v1  ;;  %2198 = vmatprep.subr.bf16.mxu1 %v13267_v6 }
 0x320   :  { %2158 = vmatpush1.bf16.msra.mxu0 %v17532_v56  ;;  %2199 = vmatpush1.bf16.msra.mxu1 %v13278_v45 }
 0x321   :  { %2159 = vmatprep.subr.bf16.mxu0 %v17533_v37  ;;  %2200 = vmatprep.subr.bf16.mxu1 %v13281_v46 }
 0x324   :  { %2160 = vmatpush1.bf16.msra.mxu0 %v17534_v32  ;;  %2201 = vmatpush1.bf16.msra.mxu1 %v13292_v53 }
 0x325   :  { %2161 = vmatprep.subr.bf16.mxu0 %v17535_v57  ;;  %2202 = vmatprep.subr.bf16.mxu1 %v13295_v55 }
 0x328   :  { %2162 = vmatpush1.bf16.msra.mxu0 %v17536_v12  ;;  %2203 = vmatpush1.bf16.msra.mxu1 %v13306_v62 }
 0x329   :  { %2163 = vmatprep.subr.bf16.mxu0 %v17537_v24  ;;  %2204 = vmatprep.subr.bf16.mxu1 %v13309_v0 }
 0x32c   :  { %2164 = vmatpush1.bf16.msra.mxu0 %v17538_v38  ;;  %2205 = vmatpush1.bf16.msra.mxu1 %v17620_v20 }
 0x32d   :  { %2165 = vmatprep.subr.bf16.mxu0 %v17539_v16  ;;  %2206 = vmatprep.subr.bf16.mxu1 %v17621_v43 }
 0x330   :  { %2166 = vmatpush1.bf16.msra.mxu0 %v17540_v50  ;;  %2207 = vmatpush1.bf16.msra.mxu1 %v17622_v59 }
 0x331   :  { %2167 = vmatprep.subr.bf16.mxu0 %v17623_v14  ;;  %2208 = vmatprep.subr.bf16.mxu1 %v17624_v22 }
 0x334   :  { %2168 = vmatpush1.bf16.msra.mxu0 %v17625_v7  ;;  %2209 = vmatpush1.bf16.msra.mxu1 %v17626_v9 }
 0x335   :  { %2169 = vmatprep.subr.bf16.mxu0 %v17627_v23  ;;  %2210 = vmatprep.subr.bf16.mxu1 %v17628_v35 }
 0x338   :  { %2170 = vmatpush1.bf16.msra.mxu0 %v17629_v47  ;;  %2211 = vmatpush1.bf16.msra.mxu1 %v17630_v29  ;;  %v17641_v29 = vld [vmem:[#allocation98_spill] sm:$0xff] }
 0x339   :  { %2171 = vmatprep.subr.bf16.mxu0 %v17631_v51  ;;  %2212 = vmatprep.subr.bf16.mxu1 %v17632_v18  ;;  %v17642_v51 = vld [vmem:[#allocation112_spill] sm:$0xff]  ;;  %v17643_v18 = vld [vmem:[#allocation3_spill] sm:$0xff] }
 0x33c   :  { %2172 = vmatpush1.bf16.msra.mxu0 %v17633_v2  ;;  %2213 = vmatpush1.bf16.msra.mxu1 %v17634_v10  ;;  %v17644_v2 = vld [vmem:[#allocation27_spill] sm:$0xff] }
 0x33d   :  { %2173 = vmatprep.subr.bf16.mxu0 %v17635_v42  ;;  %2214 = vmatprep.subr.bf16.mxu1 %v17636_v27  ;;  %v17645_v27 = vld [vmem:[#allocation4_spill] sm:$0xff]  ;;  %v17654_v42 = vld [vmem:[#allocation45_spill] sm:$0xff] }
 0x340   :  { %2174 = vmatpush1.bf16.msra.mxu0 %v17637_v17  ;;  %2215 = vmatpush1.bf16.msra.mxu1 %v17638_v33  ;;  %v17646_v17 = vld [vmem:[#allocation37_spill] sm:$0xff] }
 0x341   :  { %2175 = vmatprep.subr.bf16.mxu0 %v17639_v13  ;;  %2216 = vmatprep.subr.bf16.mxu1 %v17640_v48  ;;  %v17647_v33 = vld [vmem:[#allocation5_spill] sm:$0xff]  ;;  %v17648_v13 = vld [vmem:[#allocation39_spill] sm:$0xff]  ;;  %v17649_v48 = vld [vmem:[#allocation6_spill] sm:$0xff] }
 0x344   :  { %2176 = vmatpush1.bf16.msra.mxu0 %v17641_v29  ;;  %2217 = vmatpush1.bf16.msra.mxu1 %v17642_v51  ;;  %v17650_v29 = vld [vmem:[#allocation41_spill] sm:$0xff]  ;;  %v17651_v51 = vld [vmem:[#allocation7_spill] sm:$0xff] }
 0x345   :  { %2417 = vmatprep.subr.bf16.mxu0 %v17643_v18  ;;  %2458 = vmatprep.subr.bf16.mxu1 %v17644_v2  ;;  %v17652_v18 = vld [vmem:[#allocation43_spill] sm:$0xff]  ;;  %v17653_v2 = vld [vmem:[#allocation8_spill] sm:$0xff] }
 0x347   :  { %2178 = vmatmul.mubr.bf16.vlgmr.msra.gmra.mrb[36].mxu0 %v13857_v5  ;;  %2219 = vmatmul.mubr.bf16.vlgmr.msra.gmra.mrb[68].mxu1 %v13857_v5  ;;  %v17655_v5 = vld [vmem:[#allocation9_spill] sm:$0xff] }
 0x348   :  { %2418 = vmatpush1.bf16.msra.mxu0 %v17645_v27  ;;  %2459 = vmatpush1.bf16.msra.mxu1 %v17646_v17  ;;  %v17656_v27 = vld [vmem:[#allocation47_spill] sm:$0xff]  ;;  %v17657_v17 = vld [vmem:[#allocation10_spill] sm:$0xff] }
 0x349   :  { %2419 = vmatprep.subr.bf16.mxu0 %v17647_v33  ;;  %2460 = vmatprep.subr.bf16.mxu1 %v17648_v13  ;;  %v17658_v33 = vld [vmem:[#allocation49_spill] sm:$0xff]  ;;  %v17659_v13 = vld [vmem:[#allocation11_spill] sm:$0xff] }
 0x34c   :  { %2420 = vmatpush1.bf16.msra.mxu0 %v17649_v48  ;;  %2461 = vmatpush1.bf16.msra.mxu1 %v17650_v29  ;;  %v17660_v48 = vld [vmem:[#allocation51_spill] sm:$0xff]  ;;  %v17661_v29 = vld [vmem:[#allocation12_spill] sm:$0xff] }
 0x34d   :  { %2421 = vmatprep.subr.bf16.mxu0 %v17651_v51  ;;  %2462 = vmatprep.subr.bf16.mxu1 %v17652_v18  ;;  %v17662_v51 = vld [vmem:[#allocation53_spill] sm:$0xff] }
 0x34e   :  { %v17663_v18 = vld [vmem:[#allocation13_spill] sm:$0xff] }
 0x350   :  { %2422 = vmatpush1.bf16.msra.mxu0 %v17653_v2  ;;  %2463 = vmatpush1.bf16.msra.mxu1 %v17654_v42  ;;  %v17664_v2 = vld [vmem:[#allocation55_spill] sm:$0xff]  ;;  %v17665_v42 = vld [vmem:[#allocation14_spill] sm:$0xff] }
 0x351   :  { %2423 = vmatprep.subr.bf16.mxu0 %v17655_v5  ;;  %2464 = vmatprep.subr.bf16.mxu1 %v17656_v27  ;;  %v17666_v5 = vld [vmem:[#allocation57_spill] sm:$0xff]  ;;  %v17667_v27 = vld [vmem:[#allocation15_spill] sm:$0xff] }
 0x354   :  { %2424 = vmatpush1.bf16.msra.mxu0 %v17657_v17  ;;  %2465 = vmatpush1.bf16.msra.mxu1 %v17658_v33  ;;  %v17668_v17 = vld [vmem:[#allocation59_spill] sm:$0xff]  ;;  %v17669_v33 = vld [vmem:[#allocation16_spill] sm:$0xff] }
 0x355   :  { %2425 = vmatprep.subr.bf16.mxu0 %v17659_v13  ;;  %2466 = vmatprep.subr.bf16.mxu1 %v17660_v48  ;;  %v17670_v13 = vld [vmem:[#allocation61_spill] sm:$0xff] }
 0x356   :  { %v17671_v48 = vld [vmem:[#allocation17_spill] sm:$0xff] }
 0x358   :  { %2426 = vmatpush1.bf16.msra.mxu0 %v17661_v29  ;;  %2467 = vmatpush1.bf16.msra.mxu1 %v17662_v51  ;;  %v17672_v29 = vld [vmem:[#allocation63_spill] sm:$0xff]  ;;  %v17673_v51 = vld [vmem:[#allocation18_spill] sm:$0xff] }
 0x359   :  { %2427 = vmatprep.subr.bf16.mxu0 %v17663_v18  ;;  %2468 = vmatprep.subr.bf16.mxu1 %v17664_v2  ;;  %v17674_v18 = vld [vmem:[#allocation65_spill] sm:$0xff]  ;;  %v17675_v2 = vld [vmem:[#allocation19_spill] sm:$0xff] }
 0x35c   :  { %2428 = vmatpush1.bf16.msra.mxu0 %v17665_v42  ;;  %2469 = vmatpush1.bf16.msra.mxu1 %v17666_v5  ;;  %v17676_v42 = vld [vmem:[#allocation67_spill] sm:$0xff]  ;;  %v17677_v5 = vld [vmem:[#allocation20_spill] sm:$0xff] }
 0x35d   :  { %2429 = vmatprep.subr.bf16.mxu0 %v17667_v27  ;;  %2470 = vmatprep.subr.bf16.mxu1 %v17668_v17  ;;  %v17678_v27 = vld [vmem:[#allocation69_spill] sm:$0xff] }
 0x35e   :  { %v17679_v17 = vld [vmem:[#allocation21_spill] sm:$0xff] }
 0x360   :  { %2430 = vmatpush1.bf16.msra.mxu0 %v17669_v33  ;;  %2471 = vmatpush1.bf16.msra.mxu1 %v17670_v13  ;;  %v17680_v33 = vld [vmem:[#allocation71_spill] sm:$0xff]  ;;  %v17681_v13 = vld [vmem:[#allocation22_spill] sm:$0xff] }
 0x361   :  { %2431 = vmatprep.subr.bf16.mxu0 %v17671_v48  ;;  %2472 = vmatprep.subr.bf16.mxu1 %v17672_v29  ;;  %v17682_v48 = vld [vmem:[#allocation73_spill] sm:$0xff]  ;;  %v17683_v29 = vld [vmem:[#allocation23_spill] sm:$0xff] }
 0x364   :  { %2432 = vmatpush1.bf16.msra.mxu0 %v17673_v51  ;;  %2473 = vmatpush1.bf16.msra.mxu1 %v17674_v18  ;;  %v17684_v51 = vld [vmem:[#allocation75_spill] sm:$0xff]  ;;  %v17685_v18 = vld [vmem:[#allocation24_spill] sm:$0xff] }
 0x365   :  { %2433 = vmatprep.subr.bf16.mxu0 %v17675_v2  ;;  %2474 = vmatprep.subr.bf16.mxu1 %v17676_v42  ;;  %v17686_v2 = vld [vmem:[#allocation77_spill] sm:$0xff] }
 0x366   :  { %v17687_v42 = vld [vmem:[#allocation25_spill] sm:$0xff] }
 0x368   :  { %2434 = vmatpush1.bf16.msra.mxu0 %v17677_v5  ;;  %2475 = vmatpush1.bf16.msra.mxu1 %v17678_v27  ;;  %v17688_v5 = vld [vmem:[#allocation79_spill] sm:$0xff]  ;;  %v17689_v27 = vld [vmem:[#allocation26_spill] sm:$0xff] }
 0x369   :  { %2435 = vmatprep.subr.bf16.mxu0 %v17679_v17  ;;  %2476 = vmatprep.subr.bf16.mxu1 %v17680_v33  ;;  %v17690_v17 = vld [vmem:[#allocation81_spill] sm:$0xff]  ;;  %v17691_v33 = vld [vmem:[#allocation28_spill] sm:$0xff] }
 0x36c   :  { %2436 = vmatpush1.bf16.msra.mxu0 %v17681_v13  ;;  %2477 = vmatpush1.bf16.msra.mxu1 %v17682_v48  ;;  %v17692_v13 = vld [vmem:[#allocation83_spill] sm:$0xff]  ;;  %v17693_v48 = vld [vmem:[#allocation29_spill] sm:$0xff] }
 0x36d   :  { %2437 = vmatprep.subr.bf16.mxu0 %v17683_v29  ;;  %2478 = vmatprep.subr.bf16.mxu1 %v17684_v51  ;;  %v17694_v29 = vld [vmem:[#allocation85_spill] sm:$0xff]  ;;  %v17695_v51 = vld [vmem:[#allocation30_spill] sm:$0xff] }
 0x370   :  { %2438 = vmatpush1.bf16.msra.mxu0 %v17685_v18  ;;  %2479 = vmatpush1.bf16.msra.mxu1 %v17686_v2  ;;  %v17696_v18 = vld [vmem:[#allocation87_spill] sm:$0xff] }
 0x371   :  { %2439 = vmatprep.subr.bf16.mxu0 %v17687_v42  ;;  %2480 = vmatprep.subr.bf16.mxu1 %v17688_v5  ;;  %v17697_v2 = vld [vmem:[#allocation31_spill] sm:$0xff]  ;;  %v17698_v42 = vld [vmem:[#allocation89_spill] sm:$0xff]  ;;  %v17699_v5 = vld [vmem:[#allocation32_spill] sm:$0xff] }
 0x374   :  { %2440 = vmatpush1.bf16.msra.mxu0 %v17689_v27  ;;  %2481 = vmatpush1.bf16.msra.mxu1 %v17690_v17  ;;  %v17700_v27 = vld [vmem:[#allocation91_spill] sm:$0xff]  ;;  %v17701_v17 = vld [vmem:[#allocation33_spill] sm:$0xff] }
 0x375   :  { %2441 = vmatprep.subr.bf16.mxu0 %v17691_v33  ;;  %2482 = vmatprep.subr.bf16.mxu1 %v17692_v13  ;;  %v17702_v33 = vld [vmem:[#allocation93_spill] sm:$0xff]  ;;  %v17703_v13 = vld [vmem:[#allocation34_spill] sm:$0xff] }
 0x378   :  { %2442 = vmatpush1.bf16.msra.mxu0 %v17693_v48  ;;  %2483 = vmatpush1.bf16.msra.mxu1 %v17694_v29  ;;  %v17704_v48 = vld [vmem:[#allocation95_spill] sm:$0xff] }
 0x379   :  { %2443 = vmatprep.subr.bf16.mxu0 %v17695_v51  ;;  %2484 = vmatprep.subr.bf16.mxu1 %v17696_v18  ;;  %v17705_v29 = vld [vmem:[#allocation35_spill] sm:$0xff]  ;;  %v17706_v51 = vld [vmem:[#allocation97_spill] sm:$0xff]  ;;  %v17707_v18 = vld [vmem:[#allocation36_spill] sm:$0xff] }
 0x37c   :  { %2444 = vmatpush1.bf16.msra.mxu0 %v17697_v2  ;;  %2485 = vmatpush1.bf16.msra.mxu1 %v17698_v42  ;;  %v17708_v2 = vld [vmem:[#allocation99_spill] sm:$0xff] }
 0x37d   :  { %2445 = vmatprep.subr.bf16.mxu0 %v17699_v5  ;;  %2486 = vmatprep.subr.bf16.mxu1 %v17700_v27  ;;  %v17709_v5 = vld [vmem:[#allocation119_spill] sm:$0xff] }
 0x380   :  { %2446 = vmatpush1.bf16.msra.mxu0 %v17701_v17  ;;  %2487 = vmatpush1.bf16.msra.mxu1 %v17702_v33  ;;  %v17710_v17 = vld [vmem:[#allocation145_spill] sm:$0xff]  ;;  %v17711_v33 = vld [vmem:[#allocation120_spill] sm:$0xff] }
 0x381   :  { %2447 = vmatprep.subr.bf16.mxu0 %v17703_v13  ;;  %2488 = vmatprep.subr.bf16.mxu1 %v17704_v48  ;;  %v17712_v48 = vld [vmem:[#allocation146_spill] sm:$0xff] }
 0x384   :  { %2448 = vmatpush1.bf16.msra.mxu0 %v17705_v29  ;;  %2489 = vmatpush1.bf16.msra.mxu1 %v17706_v51 }
 0x385   :  { %2499 = vmatprep.subr.bf16.mxu0 %v17707_v18  ;;  %2540 = vmatprep.subr.bf16.mxu1 %v17708_v2 }
 0x3d9   :  { %v2097_v42 = vpop.f32.mrb[32].mxu0 }
 0x3da   :  { %v2227_v10 = vadd.f32 %v2097_v42, %v17709_v5  ;;  %v2138_v27 = vpop.f32.mrb[64].mxu1  ;;  %v2099_v47 = vpop.f32.mrb[33].mxu0 }
 0x3db   :  { %v2229_v35 = vadd.f32 %v2138_v27, %v17710_v17  ;;  %v2228_v23 = vadd.f32 %v2099_v47, %v17711_v33  ;;  %v2140_v13 = vpop.f32.mrb[65].mxu1  ;;  %v2101_v9 = vpop.f32.mrb[34].mxu0 }
 0x3dc   :  { %v2230_v7 = vadd.f32 %v2140_v13, %v17712_v48  ;;  %v2142_v29 = vpop.f32.mrb[66].mxu1  ;;  %v2102_v22 = vpop.f32.mrb[35].mxu0  ;;  %v10417_v14 = vmul.f32 -1.442695, %v2227_v10  ;;  %v17716_v10 = vld [vmem:[#allocation159_spill] sm:$0xff] }
 0x3dd   :  { %v2143_v51 = vpop.f32.mrb[67].mxu1  ;;  %v10419_v18 = vmul.f32 -1.442695, %v2229_v35  ;;  %v10418_v59 = vmul.f32 -1.442695, %v2228_v23  ;;  %v17713_v35 = vld [vmem:[#allocation123_spill] sm:$0xff] }
 0x3de   :  { %v10420_v2 = vmul.f32 -1.442695, %v2230_v7  ;;  %12168 = vpow2.f32 %v10417_v14  ;;  %v17714_v7 = vld [vmem:[#allocation158_spill] sm:$0xff] }
 0x3df   :  { %12170 = vpow2.f32 %v10419_v18  ;;  %v17715_v18 = vld [vmem:[#allocation124_spill] sm:$0xff] }
 0x3e0   :  { %12172 = vpow2.f32 %v10418_v59 }
 0x3e1   :  { %12174 = vpow2.f32 %v10420_v2 }
 0x3e8   :  { %v12169_v42 = vpop.eup %12168 }
 0x3e9   :  { %v12171_v5 = vpop.eup %12170  ;;  %v2241_v47 = vadd.f32 1.0, %v12169_v42 }
 0x3ea   :  { %v12173_v27 = vpop.eup %12172  ;;  %v2253_v33 = vadd.f32 1.0, %v12171_v5 }
 0x3eb   :  { %v12175_v17 = vpop.eup %12174  ;;  %v2242_v9 = vadd.f32 1.0, %v12173_v27  ;;  %12176 = vrcp.f32 %v2241_v47 }
 0x3ec   :  { %v2254_v50 = vadd.f32 1.0, %v12175_v17  ;;  %12178 = vrcp.f32 %v2253_v33 }
 0x3ed   :  { %12180 = vrcp.f32 %v2242_v9 }
 0x3ee   :  { %12182 = vrcp.f32 %v2254_v50 }
 0x3f5   :  { %v12177_v33 = vpop.eup %12176 }
 0x3f6   :  { %v12179_v9 = vpop.eup %12178 }
 0x41a   :  { %v2179_v22 = vpop.f32.mrb[36].mxu0  ;;  %v2220_v29 = vpop.f32.mrb[68].mxu1 }
 0x41b   :  { %v2231_v23 = vadd.f32 %v2179_v22, %v17713_v35  ;;  %v2233_v14 = vadd.f32 %v2220_v29, %v17714_v7  ;;  %v2181_v51 = vpop.f32.mrb[37].mxu0  ;;  %v2222_v59 = vpop.f32.mrb[69].mxu1  ;;  %v2273_v7 = vmul.f32 %v12179_v9, %v13847_v4 }
 0x41c   :  { %v2232_v2 = vadd.f32 %v2181_v51, %v17715_v18  ;;  %v2234_v13 = vadd.f32 %v2222_v59, %v17716_v10  ;;  %v2183_v48 = vpop.f32.mrb[38].mxu0  ;;  %v2224_v42 = vpop.f32.mrb[70].mxu1 }
 0x41d   :  { %12184 = vtanh.f32 %v2231_v23  ;;  %v10421_v5 = vmul.f32 -1.442695, %v2233_v14  ;;  %v2184_v27 = vpop.f32.mrb[39].mxu0  ;;  %v2225_v17 = vpop.f32.mrb[71].mxu1 }
 0x41e   :  { %12186 = vtanh.f32 %v2232_v2  ;;  %v10422_v47 = vmul.f32 -1.442695, %v2234_v13  ;;  %v12181_v22 = vpop.eup %12180 }
 0x41f   :  { %12188 = vpow2.f32 %v10421_v5  ;;  %v12183_v29 = vpop.eup %12182 }
 0x420   :  { %12190 = vpow2.f32 %v10422_v47  ;;  %v2274_v18 = vmul.f32 %v12183_v29, %v13849_v26 }
 0x427   :  { %v12185_v35 = vpop.eup %12184 }
 0x428   :  { %v12187_v50 = vpop.eup %12186  ;;  %v2275_v51 = vmul.f32 %v12185_v35, %v12177_v33 }
 0x429   :  { %v12189_v59 = vpop.eup %12188  ;;  %v2276_v23 = vmul.f32 %v12187_v50, %v12181_v22 }
 0x42a   :  { %v12191_v14 = vpop.eup %12190  ;;  %v14009_v10 = vadd.f32 %v2275_v51, %v2273_v7  ;;  %v2267_v2 = vadd.f32 1.0, %v12189_v59 }
 0x42b   :  { %v14011_v13 = vadd.f32 %v2276_v23, %v2274_v18  ;;  %v2268_v48 = vadd.f32 1.0, %v12191_v14 }
 0x42c   :  { %12192 = vtanh.f32 %v14009_v10 }
 0x42d   :  { %12194 = vrcp.f32 %v2267_v2 }
 0x42e   :  { %12196 = vtanh.f32 %v14011_v13 }
 0x42f   :  { %12198 = vrcp.f32 %v2268_v48 }
 0x436   :  { %v12193_v42 = vpop.eup %12192 }
 0x437   :  { %v12195_v4 = vpop.eup %12194 }
 0x438   :  { %v12197_v5 = vpop.eup %12196  ;;  %v2281_v27 = vmul.f32 %v12195_v4, %v12193_v42 }
 0x439   :  { %v12199_v17 = vpop.eup %12198 }
 0x43a   :  { %v2282_v26 = vmul.f32 %v12199_v17, %v12197_v5  ;;  %v2284_v47 = vcombine.high %v2281_v27, %v2281_v27  ;;  %v2291_v33 = vrot.slane %v2281_v27, %v13689_v28  ;;  %v14019_v51 = vpack.c.bf16 %v2281_v27, %v2281_v27 }
 0x43c   :  { %v2350_v9 = vcombine.high %v2282_v26, %v2282_v26  ;;  %v2357_v22 = vrot.slane %v2282_v26, %v13689_v28  ;;  %v2416_v29 = vpack.c.bf16 %v2282_v26, %v2282_v26  ;;  %v2298_v35 = vrot.slane %v2284_v47, %v13689_v28  ;;  %10423 = vst.sshfl [vmem:[#allocation2 + $0x2] sm:$0x1 pattern:$0x73625140] %v2291_v33 }
 0x43d   :  { %v2299_v50 = vcombine.high %v2291_v33, %v2291_v33  ;;  %v2307_v7 = vrot.slane %v2291_v33, %v13689_v28 }
 0x43e   :  { %v2364_v59 = vrot.slane %v2350_v9, %v13689_v28  ;;  %v2365_v18 = vcombine.high %v2357_v22, %v2357_v22  ;;  %v2373_v23 = vrot.slane %v2357_v22, %v13689_v28  ;;  %10427 = vst.sshfl [vmem:[#allocation2 + $0xd] sm:$0x1 pattern:$0x73625140] %v2357_v22  ;;  %2449 = vmatprep.mubr.bf16.mxu0 %v2416_v29 }
 0x43f   :  { %2490 = vmatprep.mubr.bf16.mxu1 %v2416_v29  ;;  %10425 = vst.sshfl [vmem:[#allocation2 + $0x42] sm:$0x1 pattern:$0x73625140] %v2298_v35  ;;  %v2300_v14 = vcombine.high %v2298_v35, %v2298_v35  ;;  %v2314_v2 = vrot.slane %v2298_v35, %v13689_v28  ;;  %v2321_v48 = vrot.slane %v2299_v50, %v13689_v28 }
 0x440   :  { %v2329_v42 = vcombine.high %v2307_v7, %v2307_v7  ;;  %10424 = vst.sshfl [vmem:[#allocation2 + $0x12] sm:$0x1 pattern:$0x73625140] %v2299_v50  ;;  %2450 = vmatmul.mubr.bf16.vlgmr.msra.gmra.mrb[40].mxu0 %v14019_v51  ;;  %v2366_v4 = vcombine.high %v2364_v59, %v2364_v59  ;;  %v2380_v5 = vrot.slane %v2364_v59, %v13689_v28 }
 0x441   :  { %v2387_v27 = vrot.slane %v2365_v18, %v13689_v28  ;;  %v2395_v17 = vcombine.high %v2373_v23, %v2373_v23  ;;  %10428 = vst.sshfl [vmem:[#allocation2 + $0x1d] sm:$0x1 pattern:$0x73625140] %v2365_v18  ;;  %2491 = vmatmul.mubr.bf16.vlgmr.msra.gmra.mrb[72].mxu1 %v14019_v51  ;;  %v2328_v26 = vrot.slane %v2300_v14, %v13689_v28  ;;  %v17719_v18 = vld [vmem:[#allocation80_spill] sm:$0xff]  ;;  %v17720_v23 = vld [vmem:[#allocation103_spill] sm:$0xff] }
 0x442   :  { %10429 = vst.sshfl [vmem:[#allocation2 + $0x4d] sm:$0x1 pattern:$0x73625140] %v2364_v59  ;;  %v2330_v47 = vcombine.high %v2314_v2, %v2314_v2  ;;  %v2331_v33 = vcombine.high %v2321_v48, %v2321_v48  ;;  %2343 = vst [vmem:[#allocation2 + $0x22] sm:$0x1] %v2329_v42  ;;  %2500 = vmatpush1.bf16.msra.mxu0 %v17520_v41  ;;  %2541 = vmatpush1.bf16.msra.mxu1 %v13191_v30 }
 0x443   :  { %10426 = vst.sshfl [vmem:[#allocation2 + $0x52] sm:$0x1 pattern:$0x73625140] %v2300_v14  ;;  %v2394_v9 = vrot.slane %v2366_v4, %v13689_v28  ;;  %v2396_v22 = vcombine.high %v2380_v5, %v2380_v5  ;;  %v2397_v35 = vcombine.high %v2387_v27, %v2387_v27  ;;  %2409 = vst [vmem:[#allocation2 + $0x2d] sm:$0x1] %v2395_v17  ;;  %2531 = vmatprep.mubr.bf16.mxu0 %v2416_v29 }
 0x444   :  { %10430 = vst.sshfl [vmem:[#allocation2 + $0x5d] sm:$0x1 pattern:$0x73625140] %v2366_v4  ;;  %2572 = vmatprep.mubr.bf16.mxu1 %v2416_v29  ;;  %v2332_v50 = vcombine.high %v2328_v26, %v2328_v26  ;;  %2344 = vst [vmem:[#allocation2 + $0x32] sm:$0x1] %v2331_v33  ;;  %2501 = vmatprep.subr.bf16.mxu0 %v17521_v40 }
 0x445   :  { %2347 = vst [vmem:[#allocation2 + $0x62] sm:$0x1] %v2330_v47  ;;  %2542 = vmatprep.subr.bf16.mxu1 %v13195_v31  ;;  %v2398_v7 = vcombine.high %v2394_v9, %v2394_v9  ;;  %2410 = vst [vmem:[#allocation2 + $0x3d] sm:$0x1] %v2397_v35  ;;  %v17717_v29 = vld [vmem:[#allocation78_spill] sm:$0xff]  ;;  %v17722_v2 = vld [vmem:[#allocation104_spill] sm:$0xff] }
 0x446   :  { %2413 = vst [vmem:[#allocation2 + $0x6d] sm:$0x1] %v2396_v22  ;;  %2348 = vst [vmem:[#allocation2 + $0x72] sm:$0x1] %v2332_v50  ;;  %2502 = vmatpush1.bf16.msra.mxu0 %v17522_v11  ;;  %2543 = vmatpush1.bf16.msra.mxu1 %v13207_v58  ;;  %v17718_v59 = vld [vmem:[#allocation102_spill] sm:$0xff]  ;;  %v17723_v48 = vld [vmem:[#allocation84_spill] sm:$0xff] }
 0x447   :  { %2414 = vst [vmem:[#allocation2 + $0x7d] sm:$0x1] %v2398_v7  ;;  %2503 = vmatprep.subr.bf16.mxu0 %v17523_v21  ;;  %2544 = vmatprep.subr.bf16.mxu1 %v13210_v52  ;;  %v17721_v14 = vld [vmem:[#allocation82_spill] sm:$0xff]  ;;  %v17724_v42 = vld [vmem:[#allocation105_spill] sm:$0xff]  ;;  %v17727_v27 = vld [vmem:[#allocation88_spill] sm:$0xff] }
 0x448   :  { %v17725_v4 = vld [vmem:[#allocation86_spill] sm:$0xff]  ;;  %v17728_v17 = vld [vmem:[#allocation107_spill] sm:$0xff]  ;;  %v17730_v47 = vld [vmem:[#allocation108_spill] sm:$0xff] }
 0x449   :  { %v17726_v5 = vld [vmem:[#allocation106_spill] sm:$0xff]  ;;  %v17731_v33 = vld [vmem:[#allocation92_spill] sm:$0xff]  ;;  %v17732_v9 = vld [vmem:[#allocation109_spill] sm:$0xff] }
 0x44a   :  { %2504 = vmatpush1.bf16.msra.mxu0 %v17524_v49  ;;  %2545 = vmatpush1.bf16.msra.mxu1 %v13222_v44  ;;  %v17729_v26 = vld [vmem:[#allocation90_spill] sm:$0xff]  ;;  %v17735_v50 = vld [vmem:[#allocation96_spill] sm:$0xff]  ;;  %v17736_v7 = vld [vmem:[#allocation111_spill] sm:$0xff] }
 0x44b   :  { %2505 = vmatprep.subr.bf16.mxu0 %v17525_v8  ;;  %2546 = vmatprep.subr.bf16.mxu1 %v13225_v61  ;;  %v17733_v22 = vld [vmem:[#allocation94_spill] sm:$0xff] }
 0x44c   :  { %v17734_v35 = vld [vmem:[#allocation110_spill] sm:$0xff] }
 0x44e   :  { %2506 = vmatpush1.bf16.msra.mxu0 %v17526_v34  ;;  %2547 = vmatpush1.bf16.msra.mxu1 %v13236_v36 }
 0x44f   :  { %2507 = vmatprep.subr.bf16.mxu0 %v17527_v54  ;;  %2548 = vmatprep.subr.bf16.mxu1 %v13239_v19 }
 0x452   :  { %2508 = vmatpush1.bf16.msra.mxu0 %v17528_v25  ;;  %2549 = vmatpush1.bf16.msra.mxu1 %v13250_v39 }
 0x453   :  { %2509 = vmatprep.subr.bf16.mxu0 %v17529_v15  ;;  %2550 = vmatprep.subr.bf16.mxu1 %v13253_v63 }
 0x456   :  { %2510 = vmatpush1.bf16.msra.mxu0 %v17530_v3  ;;  %2551 = vmatpush1.bf16.msra.mxu1 %v13264_v60 }
 0x457   :  { %2511 = vmatprep.subr.bf16.mxu0 %v17531_v1  ;;  %2552 = vmatprep.subr.bf16.mxu1 %v13267_v6 }
 0x45a   :  { %2512 = vmatpush1.bf16.msra.mxu0 %v17532_v56  ;;  %2553 = vmatpush1.bf16.msra.mxu1 %v13278_v45 }
 0x45b   :  { %2513 = vmatprep.subr.bf16.mxu0 %v17533_v37  ;;  %2554 = vmatprep.subr.bf16.mxu1 %v13281_v46 }
 0x45e   :  { %2514 = vmatpush1.bf16.msra.mxu0 %v17534_v32  ;;  %2555 = vmatpush1.bf16.msra.mxu1 %v13292_v53 }
 0x45f   :  { %2515 = vmatprep.subr.bf16.mxu0 %v17535_v57  ;;  %2556 = vmatprep.subr.bf16.mxu1 %v13295_v55 }
 0x462   :  { %2516 = vmatpush1.bf16.msra.mxu0 %v17536_v12  ;;  %2557 = vmatpush1.bf16.msra.mxu1 %v13306_v62 }
 0x463   :  { %2517 = vmatprep.subr.bf16.mxu0 %v17537_v24  ;;  %2558 = vmatprep.subr.bf16.mxu1 %v13309_v0 }
 0x466   :  { %2518 = vmatpush1.bf16.msra.mxu0 %v17538_v38  ;;  %2559 = vmatpush1.bf16.msra.mxu1 %v17620_v20 }
 0x467   :  { %2519 = vmatprep.subr.bf16.mxu0 %v17539_v16  ;;  %2560 = vmatprep.subr.bf16.mxu1 %v17621_v43 }
 0x46a   :  { %2520 = vmatpush1.bf16.msra.mxu0 %v17717_v29  ;;  %2561 = vmatpush1.bf16.msra.mxu1 %v17718_v59 }
 0x46b   :  { %2521 = vmatprep.subr.bf16.mxu0 %v17719_v18  ;;  %2562 = vmatprep.subr.bf16.mxu1 %v17720_v23 }
 0x46e   :  { %2522 = vmatpush1.bf16.msra.mxu0 %v17721_v14  ;;  %2563 = vmatpush1.bf16.msra.mxu1 %v17722_v2 }
 0x46f   :  { %2523 = vmatprep.subr.bf16.mxu0 %v17723_v48  ;;  %2564 = vmatprep.subr.bf16.mxu1 %v17724_v42 }
 0x472   :  { %2524 = vmatpush1.bf16.msra.mxu0 %v17725_v4  ;;  %2565 = vmatpush1.bf16.msra.mxu1 %v17726_v5  ;;  %v17737_v5 = vld [vmem:[#allocation98_spill] sm:$0xff] }
 0x473   :  { %2525 = vmatprep.subr.bf16.mxu0 %v17727_v27  ;;  %2566 = vmatprep.subr.bf16.mxu1 %v17728_v17  ;;  %v17738_v27 = vld [vmem:[#allocation112_spill] sm:$0xff]  ;;  %v17739_v17 = vld [vmem:[#allocation3_spill] sm:$0xff] }
 0x476   :  { %2526 = vmatpush1.bf16.msra.mxu0 %v17729_v26  ;;  %2567 = vmatpush1.bf16.msra.mxu1 %v17730_v47  ;;  %v17740_v26 = vld [vmem:[#allocation27_spill] sm:$0xff] }
 0x477   :  { %2527 = vmatprep.subr.bf16.mxu0 %v17731_v33  ;;  %2568 = vmatprep.subr.bf16.mxu1 %v17732_v9  ;;  %v17741_v9 = vld [vmem:[#allocation4_spill] sm:$0xff]  ;;  %v17750_v33 = vld [vmem:[#allocation45_spill] sm:$0xff] }
 0x47a   :  { %2528 = vmatpush1.bf16.msra.mxu0 %v17733_v22  ;;  %2569 = vmatpush1.bf16.msra.mxu1 %v17734_v35  ;;  %v17742_v22 = vld [vmem:[#allocation37_spill] sm:$0xff] }
 0x47b   :  { %2529 = vmatprep.subr.bf16.mxu0 %v17735_v50  ;;  %2570 = vmatprep.subr.bf16.mxu1 %v17736_v7  ;;  %v17743_v35 = vld [vmem:[#allocation5_spill] sm:$0xff]  ;;  %v17744_v50 = vld [vmem:[#allocation39_spill] sm:$0xff]  ;;  %v17745_v7 = vld [vmem:[#allocation6_spill] sm:$0xff] }
 0x47e   :  { %2530 = vmatpush1.bf16.msra.mxu0 %v17737_v5  ;;  %2571 = vmatpush1.bf16.msra.mxu1 %v17738_v27  ;;  %v17746_v5 = vld [vmem:[#allocation41_spill] sm:$0xff]  ;;  %v17747_v27 = vld [vmem:[#allocation7_spill] sm:$0xff] }
 0x47f   :  { %2771 = vmatprep.subr.bf16.mxu0 %v17739_v17  ;;  %2812 = vmatprep.subr.bf16.mxu1 %v17740_v26  ;;  %v17748_v17 = vld [vmem:[#allocation43_spill] sm:$0xff]  ;;  %v17749_v26 = vld [vmem:[#allocation8_spill] sm:$0xff] }
 0x481   :  { %2532 = vmatmul.mubr.bf16.vlgmr.msra.gmra.mrb[44].mxu0 %v14019_v51  ;;  %2573 = vmatmul.mubr.bf16.vlgmr.msra.gmra.mrb[76].mxu1 %v14019_v51  ;;  %v17751_v51 = vld [vmem:[#allocation9_spill] sm:$0xff] }
 0x482   :  { %2772 = vmatpush1.bf16.msra.mxu0 %v17741_v9  ;;  %2813 = vmatpush1.bf16.msra.mxu1 %v17742_v22  ;;  %v17752_v9 = vld [vmem:[#allocation47_spill] sm:$0xff]  ;;  %v17753_v22 = vld [vmem:[#allocation10_spill] sm:$0xff] }
 0x483   :  { %2773 = vmatprep.subr.bf16.mxu0 %v17743_v35  ;;  %2814 = vmatprep.subr.bf16.mxu1 %v17744_v50  ;;  %v17754_v35 = vld [vmem:[#allocation49_spill] sm:$0xff]  ;;  %v17755_v50 = vld [vmem:[#allocation11_spill] sm:$0xff] }
 0x486   :  { %2774 = vmatpush1.bf16.msra.mxu0 %v17745_v7  ;;  %2815 = vmatpush1.bf16.msra.mxu1 %v17746_v5  ;;  %v17756_v7 = vld [vmem:[#allocation51_spill] sm:$0xff]  ;;  %v17757_v5 = vld [vmem:[#allocation12_spill] sm:$0xff] }
 0x487   :  { %2775 = vmatprep.subr.bf16.mxu0 %v17747_v27  ;;  %2816 = vmatprep.subr.bf16.mxu1 %v17748_v17  ;;  %v17758_v27 = vld [vmem:[#allocation53_spill] sm:$0xff] }
 0x488   :  { %v17759_v17 = vld [vmem:[#allocation13_spill] sm:$0xff] }
 0x48a   :  { %2776 = vmatpush1.bf16.msra.mxu0 %v17749_v26  ;;  %2817 = vmatpush1.bf16.msra.mxu1 %v17750_v33  ;;  %v17760_v26 = vld [vmem:[#allocation55_spill] sm:$0xff]  ;;  %v17761_v33 = vld [vmem:[#allocation14_spill] sm:$0xff] }
 0x48b   :  { %2777 = vmatprep.subr.bf16.mxu0 %v17751_v51  ;;  %2818 = vmatprep.subr.bf16.mxu1 %v17752_v9  ;;  %v17762_v51 = vld [vmem:[#allocation57_spill] sm:$0xff]  ;;  %v17763_v9 = vld [vmem:[#allocation15_spill] sm:$0xff] }
 0x48e   :  { %2778 = vmatpush1.bf16.msra.mxu0 %v17753_v22  ;;  %2819 = vmatpush1.bf16.msra.mxu1 %v17754_v35  ;;  %v17764_v22 = vld [vmem:[#allocation59_spill] sm:$0xff]  ;;  %v17765_v35 = vld [vmem:[#allocation16_spill] sm:$0xff] }
 0x48f   :  { %2779 = vmatprep.subr.bf16.mxu0 %v17755_v50  ;;  %2820 = vmatprep.subr.bf16.mxu1 %v17756_v7  ;;  %v17766_v50 = vld [vmem:[#allocation61_spill] sm:$0xff] }
 0x490   :  { %v17767_v7 = vld [vmem:[#allocation17_spill] sm:$0xff] }
 0x492   :  { %2780 = vmatpush1.bf16.msra.mxu0 %v17757_v5  ;;  %2821 = vmatpush1.bf16.msra.mxu1 %v17758_v27  ;;  %v17768_v5 = vld [vmem:[#allocation63_spill] sm:$0xff]  ;;  %v17769_v27 = vld [vmem:[#allocation18_spill] sm:$0xff] }
 0x493   :  { %2781 = vmatprep.subr.bf16.mxu0 %v17759_v17  ;;  %2822 = vmatprep.subr.bf16.mxu1 %v17760_v26  ;;  %v17770_v17 = vld [vmem:[#allocation65_spill] sm:$0xff]  ;;  %v17771_v26 = vld [vmem:[#allocation19_spill] sm:$0xff] }
 0x496   :  { %2782 = vmatpush1.bf16.msra.mxu0 %v17761_v33  ;;  %2823 = vmatpush1.bf16.msra.mxu1 %v17762_v51  ;;  %v17772_v33 = vld [vmem:[#allocation67_spill] sm:$0xff]  ;;  %v17773_v51 = vld [vmem:[#allocation20_spill] sm:$0xff] }
 0x497   :  { %2783 = vmatprep.subr.bf16.mxu0 %v17763_v9  ;;  %2824 = vmatprep.subr.bf16.mxu1 %v17764_v22  ;;  %v17774_v9 = vld [vmem:[#allocation69_spill] sm:$0xff] }
 0x498   :  { %v17775_v22 = vld [vmem:[#allocation21_spill] sm:$0xff] }
 0x49a   :  { %2784 = vmatpush1.bf16.msra.mxu0 %v17765_v35  ;;  %2825 = vmatpush1.bf16.msra.mxu1 %v17766_v50  ;;  %v17776_v35 = vld [vmem:[#allocation71_spill] sm:$0xff]  ;;  %v17777_v50 = vld [vmem:[#allocation22_spill] sm:$0xff] }
 0x49b   :  { %2785 = vmatprep.subr.bf16.mxu0 %v17767_v7  ;;  %2826 = vmatprep.subr.bf16.mxu1 %v17768_v5  ;;  %v17778_v7 = vld [vmem:[#allocation73_spill] sm:$0xff]  ;;  %v17779_v5 = vld [vmem:[#allocation23_spill] sm:$0xff] }
 0x49e   :  { %2786 = vmatpush1.bf16.msra.mxu0 %v17769_v27  ;;  %2827 = vmatpush1.bf16.msra.mxu1 %v17770_v17  ;;  %v17780_v27 = vld [vmem:[#allocation75_spill] sm:$0xff]  ;;  %v17781_v17 = vld [vmem:[#allocation24_spill] sm:$0xff] }
 0x49f   :  { %2787 = vmatprep.subr.bf16.mxu0 %v17771_v26  ;;  %2828 = vmatprep.subr.bf16.mxu1 %v17772_v33  ;;  %v17782_v26 = vld [vmem:[#allocation77_spill] sm:$0xff] }
 0x4a0   :  { %v17783_v33 = vld [vmem:[#allocation25_spill] sm:$0xff] }
 0x4a2   :  { %2788 = vmatpush1.bf16.msra.mxu0 %v17773_v51  ;;  %2829 = vmatpush1.bf16.msra.mxu1 %v17774_v9  ;;  %v17784_v51 = vld [vmem:[#allocation79_spill] sm:$0xff]  ;;  %v17785_v9 = vld [vmem:[#allocation26_spill] sm:$0xff] }
 0x4a3   :  { %2789 = vmatprep.subr.bf16.mxu0 %v17775_v22  ;;  %2830 = vmatprep.subr.bf16.mxu1 %v17776_v35  ;;  %v17786_v22 = vld [vmem:[#allocation81_spill] sm:$0xff]  ;;  %v17787_v35 = vld [vmem:[#allocation28_spill] sm:$0xff] }
 0x4a6   :  { %2790 = vmatpush1.bf16.msra.mxu0 %v17777_v50  ;;  %2831 = vmatpush1.bf16.msra.mxu1 %v17778_v7  ;;  %v17788_v50 = vld [vmem:[#allocation83_spill] sm:$0xff]  ;;  %v17789_v7 = vld [vmem:[#allocation29_spill] sm:$0xff] }
 0x4a7   :  { %2791 = vmatprep.subr.bf16.mxu0 %v17779_v5  ;;  %2832 = vmatprep.subr.bf16.mxu1 %v17780_v27  ;;  %v17790_v5 = vld [vmem:[#allocation85_spill] sm:$0xff]  ;;  %v17791_v27 = vld [vmem:[#allocation30_spill] sm:$0xff] }
 0x4aa   :  { %2792 = vmatpush1.bf16.msra.mxu0 %v17781_v17  ;;  %2833 = vmatpush1.bf16.msra.mxu1 %v17782_v26  ;;  %v17792_v17 = vld [vmem:[#allocation87_spill] sm:$0xff] }
 0x4ab   :  { %2793 = vmatprep.subr.bf16.mxu0 %v17783_v33  ;;  %2834 = vmatprep.subr.bf16.mxu1 %v17784_v51  ;;  %v17793_v26 = vld [vmem:[#allocation31_spill] sm:$0xff]  ;;  %v17794_v33 = vld [vmem:[#allocation89_spill] sm:$0xff]  ;;  %v17795_v51 = vld [vmem:[#allocation32_spill] sm:$0xff] }
 0x4ae   :  { %2794 = vmatpush1.bf16.msra.mxu0 %v17785_v9  ;;  %2835 = vmatpush1.bf16.msra.mxu1 %v17786_v22  ;;  %v17796_v9 = vld [vmem:[#allocation91_spill] sm:$0xff]  ;;  %v17797_v22 = vld [vmem:[#allocation33_spill] sm:$0xff] }
 0x4af   :  { %2795 = vmatprep.subr.bf16.mxu0 %v17787_v35  ;;  %2836 = vmatprep.subr.bf16.mxu1 %v17788_v50  ;;  %v17798_v35 = vld [vmem:[#allocation93_spill] sm:$0xff]  ;;  %v17799_v50 = vld [vmem:[#allocation34_spill] sm:$0xff] }
 0x4b2   :  { %2796 = vmatpush1.bf16.msra.mxu0 %v17789_v7  ;;  %2837 = vmatpush1.bf16.msra.mxu1 %v17790_v5  ;;  %v17800_v7 = vld [vmem:[#allocation95_spill] sm:$0xff] }
 0x4b3   :  { %2797 = vmatprep.subr.bf16.mxu0 %v17791_v27  ;;  %2838 = vmatprep.subr.bf16.mxu1 %v17792_v17  ;;  %v17801_v5 = vld [vmem:[#allocation35_spill] sm:$0xff]  ;;  %v17802_v27 = vld [vmem:[#allocation97_spill] sm:$0xff]  ;;  %v17803_v17 = vld [vmem:[#allocation36_spill] sm:$0xff] }
 0x4b6   :  { %2798 = vmatpush1.bf16.msra.mxu0 %v17793_v26  ;;  %2839 = vmatpush1.bf16.msra.mxu1 %v17794_v33  ;;  %v17804_v26 = vld [vmem:[#allocation99_spill] sm:$0xff] }
 0x4b7   :  { %2799 = vmatprep.subr.bf16.mxu0 %v17795_v51  ;;  %2840 = vmatprep.subr.bf16.mxu1 %v17796_v9  ;;  %v17805_v51 = vld [vmem:[#allocation121_spill] sm:$0xff] }
 0x4ba   :  { %2800 = vmatpush1.bf16.msra.mxu0 %v17797_v22  ;;  %2841 = vmatpush1.bf16.msra.mxu1 %v17798_v35  ;;  %v17806_v22 = vld [vmem:[#allocation147_spill] sm:$0xff]  ;;  %v17807_v35 = vld [vmem:[#allocation122_spill] sm:$0xff] }
 0x4bb   :  { %2801 = vmatprep.subr.bf16.mxu0 %v17799_v50  ;;  %2842 = vmatprep.subr.bf16.mxu1 %v17800_v7  ;;  %v17808_v7 = vld [vmem:[#allocation148_spill] sm:$0xff] }
 0x4be   :  { %2802 = vmatpush1.bf16.msra.mxu0 %v17801_v5  ;;  %2843 = vmatpush1.bf16.msra.mxu1 %v17802_v27 }
 0x4bf   :  { %2853 = vmatprep.subr.bf16.mxu0 %v17803_v17  ;;  %2894 = vmatprep.subr.bf16.mxu1 %v17804_v26 }
 0x513   :  { %v2451_v33 = vpop.f32.mrb[40].mxu0 }
 0x514   :  { %v2581_v47 = vadd.f32 %v2451_v33, %v17805_v51  ;;  %v2492_v9 = vpop.f32.mrb[72].mxu1  ;;  %v2453_v4 = vpop.f32.mrb[41].mxu0 }
 0x515   :  { %v2583_v42 = vadd.f32 %v2492_v9, %v17806_v22  ;;  %v2582_v48 = vadd.f32 %v2453_v4, %v17807_v35  ;;  %v2494_v50 = vpop.f32.mrb[73].mxu1  ;;  %v2455_v2 = vpop.f32.mrb[42].mxu0 }
 0x516   :  { %v2584_v14 = vadd.f32 %v2494_v50, %v17808_v7  ;;  %v2496_v5 = vpop.f32.mrb[74].mxu1  ;;  %v2456_v23 = vpop.f32.mrb[43].mxu0  ;;  %v10431_v18 = vmul.f32 -1.442695, %v2581_v47  ;;  %v17812_v47 = vld [vmem:[#allocation161_spill] sm:$0xff] }
 0x517   :  { %v2497_v27 = vpop.f32.mrb[75].mxu1  ;;  %v10433_v17 = vmul.f32 -1.442695, %v2583_v42  ;;  %v10432_v59 = vmul.f32 -1.442695, %v2582_v48  ;;  %v17809_v42 = vld [vmem:[#allocation125_spill] sm:$0xff] }
 0x518   :  { %v10434_v26 = vmul.f32 -1.442695, %v2584_v14  ;;  %12200 = vpow2.f32 %v10431_v18  ;;  %v17810_v14 = vld [vmem:[#allocation160_spill] sm:$0xff] }
 0x519   :  { %12202 = vpow2.f32 %v10433_v17  ;;  %v17811_v17 = vld [vmem:[#allocation126_spill] sm:$0xff] }
 0x51a   :  { %12204 = vpow2.f32 %v10432_v59 }
 0x51b   :  { %12206 = vpow2.f32 %v10434_v26 }
 0x522   :  { %v12201_v33 = vpop.eup %12200 }
 0x523   :  { %v12203_v51 = vpop.eup %12202  ;;  %v2595_v4 = vadd.f32 1.0, %v12201_v33 }
 0x524   :  { %v12205_v9 = vpop.eup %12204  ;;  %v2607_v35 = vadd.f32 1.0, %v12203_v51 }
 0x525   :  { %v12207_v22 = vpop.eup %12206  ;;  %v2596_v2 = vadd.f32 1.0, %v12205_v9  ;;  %12208 = vrcp.f32 %v2595_v4 }
 0x526   :  { %v2608_v29 = vadd.f32 1.0, %v12207_v22  ;;  %12210 = vrcp.f32 %v2607_v35 }
 0x527   :  { %12212 = vrcp.f32 %v2596_v2 }
 0x528   :  { %12214 = vrcp.f32 %v2608_v29 }
 0x52f   :  { %v12209_v35 = vpop.eup %12208 }
 0x530   :  { %v12211_v2 = vpop.eup %12210 }
 0x554   :  { %v2533_v23 = vpop.f32.mrb[44].mxu0  ;;  %v2574_v5 = vpop.f32.mrb[76].mxu1 }
 0x555   :  { %v2585_v48 = vadd.f32 %v2533_v23, %v17809_v42  ;;  %v2587_v18 = vadd.f32 %v2574_v5, %v17810_v14  ;;  %v2535_v27 = vpop.f32.mrb[45].mxu0  ;;  %v2576_v59 = vpop.f32.mrb[77].mxu1  ;;  %v2627_v14 = vmul.f32 %v12211_v2, %v14009_v10 }
 0x556   :  { %v2586_v26 = vadd.f32 %v2535_v27, %v17811_v17  ;;  %v2588_v50 = vadd.f32 %v2576_v59, %v17812_v47  ;;  %v2537_v7 = vpop.f32.mrb[46].mxu0  ;;  %v2578_v33 = vpop.f32.mrb[78].mxu1 }
 0x557   :  { %12216 = vtanh.f32 %v2585_v48  ;;  %v10435_v51 = vmul.f32 -1.442695, %v2587_v18  ;;  %v2538_v9 = vpop.f32.mrb[47].mxu0  ;;  %v2579_v22 = vpop.f32.mrb[79].mxu1 }
 0x558   :  { %12218 = vtanh.f32 %v2586_v26  ;;  %v10436_v4 = vmul.f32 -1.442695, %v2588_v50  ;;  %v12213_v23 = vpop.eup %12212 }
 0x559   :  { %12220 = vpow2.f32 %v10435_v51  ;;  %v12215_v5 = vpop.eup %12214 }
 0x55a   :  { %12222 = vpow2.f32 %v10436_v4  ;;  %v2628_v17 = vmul.f32 %v12215_v5, %v14011_v13 }
 0x561   :  { %v12217_v42 = vpop.eup %12216 }
 0x562   :  { %v12219_v29 = vpop.eup %12218  ;;  %v2629_v27 = vmul.f32 %v12217_v42, %v12209_v35 }
 0x563   :  { %v12221_v59 = vpop.eup %12220  ;;  %v2630_v48 = vmul.f32 %v12219_v29, %v12213_v23 }
 0x564   :  { %v12223_v18 = vpop.eup %12222  ;;  %v14171_v47 = vadd.f32 %v2629_v27, %v2627_v14  ;;  %v2621_v26 = vadd.f32 1.0, %v12221_v59 }
 0x565   :  { %v14173_v50 = vadd.f32 %v2630_v48, %v2628_v17  ;;  %v2622_v7 = vadd.f32 1.0, %v12223_v18 }
 0x566   :  { %12224 = vtanh.f32 %v14171_v47 }
 0x567   :  { %12226 = vrcp.f32 %v2621_v26 }
 0x568   :  { %12228 = vtanh.f32 %v14173_v50 }
 0x569   :  { %12230 = vrcp.f32 %v2622_v7 }
 0x570   :  { %v12225_v33 = vpop.eup %12224 }
 0x571   :  { %v12227_v10 = vpop.eup %12226 }
 0x572   :  { %v12229_v51 = vpop.eup %12228  ;;  %v2635_v9 = vmul.f32 %v12227_v10, %v12225_v33 }
 0x573   :  { %v12231_v22 = vpop.eup %12230 }
 0x574   :  { %v2636_v13 = vmul.f32 %v12231_v22, %v12229_v51  ;;  %v2638_v4 = vcombine.high %v2635_v9, %v2635_v9  ;;  %v2645_v35 = vrot.slane %v2635_v9, %v13689_v28  ;;  %v14181_v27 = vpack.c.bf16 %v2635_v9, %v2635_v9 }
 0x576   :  { %v2704_v2 = vcombine.high %v2636_v13, %v2636_v13  ;;  %v2711_v23 = vrot.slane %v2636_v13, %v13689_v28  ;;  %v2770_v5 = vpack.c.bf16 %v2636_v13, %v2636_v13  ;;  %v2652_v42 = vrot.slane %v2638_v4, %v13689_v28  ;;  %10437 = vst.sshfl [vmem:[#allocation2 + $0x3] sm:$0x1 pattern:$0x73625140] %v2645_v35 }
 0x577   :  { %v2653_v29 = vcombine.high %v2645_v35, %v2645_v35  ;;  %v2661_v14 = vrot.slane %v2645_v35, %v13689_v28 }
 0x578   :  { %v2718_v59 = vrot.slane %v2704_v2, %v13689_v28  ;;  %v2719_v17 = vcombine.high %v2711_v23, %v2711_v23  ;;  %v2727_v48 = vrot.slane %v2711_v23, %v13689_v28  ;;  %10441 = vst.sshfl [vmem:[#allocation2 + $0xc] sm:$0x1 pattern:$0x73625140] %v2711_v23  ;;  %2803 = vmatprep.mubr.bf16.mxu0 %v2770_v5 }
 0x579   :  { %2844 = vmatprep.mubr.bf16.mxu1 %v2770_v5  ;;  %10439 = vst.sshfl [vmem:[#allocation2 + $0x43] sm:$0x1 pattern:$0x73625140] %v2652_v42  ;;  %v2654_v18 = vcombine.high %v2652_v42, %v2652_v42  ;;  %v2668_v26 = vrot.slane %v2652_v42, %v13689_v28  ;;  %v2675_v7 = vrot.slane %v2653_v29, %v13689_v28 }
 0x57a   :  { %v2683_v33 = vcombine.high %v2661_v14, %v2661_v14  ;;  %10438 = vst.sshfl [vmem:[#allocation2 + $0x13] sm:$0x1 pattern:$0x73625140] %v2653_v29  ;;  %2804 = vmatmul.mubr.bf16.vlgmr.msra.gmra.mrb[48].mxu0 %v14181_v27  ;;  %v2720_v10 = vcombine.high %v2718_v59, %v2718_v59  ;;  %v2734_v51 = vrot.slane %v2718_v59, %v13689_v28 }
 0x57b   :  { %v2741_v9 = vrot.slane %v2719_v17, %v13689_v28  ;;  %v2749_v22 = vcombine.high %v2727_v48, %v2727_v48  ;;  %10442 = vst.sshfl [vmem:[#allocation2 + $0x1c] sm:$0x1 pattern:$0x73625140] %v2719_v17  ;;  %2845 = vmatmul.mubr.bf16.vlgmr.msra.gmra.mrb[80].mxu1 %v14181_v27  ;;  %v2682_v13 = vrot.slane %v2654_v18, %v13689_v28  ;;  %v17815_v17 = vld [vmem:[#allocation80_spill] sm:$0xff]  ;;  %v17816_v48 = vld [vmem:[#allocation103_spill] sm:$0xff] }
 0x57c   :  { %10443 = vst.sshfl [vmem:[#allocation2 + $0x4c] sm:$0x1 pattern:$0x73625140] %v2718_v59  ;;  %v2684_v4 = vcombine.high %v2668_v26, %v2668_v26  ;;  %v2685_v35 = vcombine.high %v2675_v7, %v2675_v7  ;;  %2697 = vst [vmem:[#allocation2 + $0x23] sm:$0x1] %v2683_v33  ;;  %2854 = vmatpush1.bf16.msra.mxu0 %v17520_v41  ;;  %2895 = vmatpush1.bf16.msra.mxu1 %v13191_v30 }
 0x57d   :  { %10440 = vst.sshfl [vmem:[#allocation2 + $0x53] sm:$0x1 pattern:$0x73625140] %v2654_v18  ;;  %v2748_v2 = vrot.slane %v2720_v10, %v13689_v28  ;;  %v2750_v23 = vcombine.high %v2734_v51, %v2734_v51  ;;  %v2751_v42 = vcombine.high %v2741_v9, %v2741_v9  ;;  %2763 = vst [vmem:[#allocation2 + $0x2c] sm:$0x1] %v2749_v22  ;;  %2885 = vmatprep.mubr.bf16.mxu0 %v2770_v5 }
 0x57e   :  { %10444 = vst.sshfl [vmem:[#allocation2 + $0x5c] sm:$0x1 pattern:$0x73625140] %v2720_v10  ;;  %2926 = vmatprep.mubr.bf16.mxu1 %v2770_v5  ;;  %v2686_v29 = vcombine.high %v2682_v13, %v2682_v13  ;;  %2698 = vst [vmem:[#allocation2 + $0x33] sm:$0x1] %v2685_v35  ;;  %2855 = vmatprep.subr.bf16.mxu0 %v17521_v40 }
 0x57f   :  { %2701 = vst [vmem:[#allocation2 + $0x63] sm:$0x1] %v2684_v4  ;;  %2896 = vmatprep.subr.bf16.mxu1 %v13195_v31  ;;  %v2752_v14 = vcombine.high %v2748_v2, %v2748_v2  ;;  %2764 = vst [vmem:[#allocation2 + $0x3c] sm:$0x1] %v2751_v42  ;;  %v17813_v5 = vld [vmem:[#allocation78_spill] sm:$0xff]  ;;  %v17818_v26 = vld [vmem:[#allocation104_spill] sm:$0xff] }
 0x580   :  { %2767 = vst [vmem:[#allocation2 + $0x6c] sm:$0x1] %v2750_v23  ;;  %2702 = vst [vmem:[#allocation2 + $0x73] sm:$0x1] %v2686_v29  ;;  %2856 = vmatpush1.bf16.msra.mxu0 %v17522_v11  ;;  %2897 = vmatpush1.bf16.msra.mxu1 %v13207_v58  ;;  %v17814_v59 = vld [vmem:[#allocation102_spill] sm:$0xff]  ;;  %v17819_v7 = vld [vmem:[#allocation84_spill] sm:$0xff] }
 0x581   :  { %2768 = vst [vmem:[#allocation2 + $0x7c] sm:$0x1] %v2752_v14  ;;  %2857 = vmatprep.subr.bf16.mxu0 %v17523_v21  ;;  %2898 = vmatprep.subr.bf16.mxu1 %v13210_v52  ;;  %v17817_v18 = vld [vmem:[#allocation82_spill] sm:$0xff]  ;;  %v17820_v33 = vld [vmem:[#allocation105_spill] sm:$0xff]  ;;  %v17823_v9 = vld [vmem:[#allocation88_spill] sm:$0xff] }
 0x582   :  { %v17821_v10 = vld [vmem:[#allocation86_spill] sm:$0xff]  ;;  %v17824_v22 = vld [vmem:[#allocation107_spill] sm:$0xff]  ;;  %v17826_v4 = vld [vmem:[#allocation108_spill] sm:$0xff] }
 0x583   :  { %v17822_v51 = vld [vmem:[#allocation106_spill] sm:$0xff]  ;;  %v17827_v35 = vld [vmem:[#allocation92_spill] sm:$0xff]  ;;  %v17828_v2 = vld [vmem:[#allocation109_spill] sm:$0xff] }
 0x584   :  { %2858 = vmatpush1.bf16.msra.mxu0 %v17524_v49  ;;  %2899 = vmatpush1.bf16.msra.mxu1 %v13222_v44  ;;  %v17825_v13 = vld [vmem:[#allocation90_spill] sm:$0xff]  ;;  %v17831_v29 = vld [vmem:[#allocation96_spill] sm:$0xff]  ;;  %v17832_v14 = vld [vmem:[#allocation111_spill] sm:$0xff] }
 0x585   :  { %2859 = vmatprep.subr.bf16.mxu0 %v17525_v8  ;;  %2900 = vmatprep.subr.bf16.mxu1 %v13225_v61  ;;  %v17829_v23 = vld [vmem:[#allocation94_spill] sm:$0xff] }
 0x586   :  { %v17830_v42 = vld [vmem:[#allocation110_spill] sm:$0xff] }
 0x588   :  { %2860 = vmatpush1.bf16.msra.mxu0 %v17526_v34  ;;  %2901 = vmatpush1.bf16.msra.mxu1 %v13236_v36 }
 0x589   :  { %2861 = vmatprep.subr.bf16.mxu0 %v17527_v54  ;;  %2902 = vmatprep.subr.bf16.mxu1 %v13239_v19 }
 0x58c   :  { %2862 = vmatpush1.bf16.msra.mxu0 %v17528_v25  ;;  %2903 = vmatpush1.bf16.msra.mxu1 %v13250_v39 }
 0x58d   :  { %2863 = vmatprep.subr.bf16.mxu0 %v17529_v15  ;;  %2904 = vmatprep.subr.bf16.mxu1 %v13253_v63 }
 0x590   :  { %2864 = vmatpush1.bf16.msra.mxu0 %v17530_v3  ;;  %2905 = vmatpush1.bf16.msra.mxu1 %v13264_v60 }
 0x591   :  { %2865 = vmatprep.subr.bf16.mxu0 %v17531_v1  ;;  %2906 = vmatprep.subr.bf16.mxu1 %v13267_v6 }
 0x594   :  { %2866 = vmatpush1.bf16.msra.mxu0 %v17532_v56  ;;  %2907 = vmatpush1.bf16.msra.mxu1 %v13278_v45 }
 0x595   :  { %2867 = vmatprep.subr.bf16.mxu0 %v17533_v37  ;;  %2908 = vmatprep.subr.bf16.mxu1 %v13281_v46 }
 0x598   :  { %2868 = vmatpush1.bf16.msra.mxu0 %v17534_v32  ;;  %2909 = vmatpush1.bf16.msra.mxu1 %v13292_v53 }
 0x599   :  { %2869 = vmatprep.subr.bf16.mxu0 %v17535_v57  ;;  %2910 = vmatprep.subr.bf16.mxu1 %v13295_v55 }
 0x59c   :  { %2870 = vmatpush1.bf16.msra.mxu0 %v17536_v12  ;;  %2911 = vmatpush1.bf16.msra.mxu1 %v13306_v62 }
 0x59d   :  { %2871 = vmatprep.subr.bf16.mxu0 %v17537_v24  ;;  %2912 = vmatprep.subr.bf16.mxu1 %v13309_v0 }
 0x5a0   :  { %2872 = vmatpush1.bf16.msra.mxu0 %v17538_v38  ;;  %2913 = vmatpush1.bf16.msra.mxu1 %v17620_v20 }
 0x5a1   :  { %2873 = vmatprep.subr.bf16.mxu0 %v17539_v16  ;;  %2914 = vmatprep.subr.bf16.mxu1 %v17621_v43 }
 0x5a4   :  { %2874 = vmatpush1.bf16.msra.mxu0 %v17813_v5  ;;  %2915 = vmatpush1.bf16.msra.mxu1 %v17814_v59 }
 0x5a5   :  { %2875 = vmatprep.subr.bf16.mxu0 %v17815_v17  ;;  %2916 = vmatprep.subr.bf16.mxu1 %v17816_v48 }
 0x5a8   :  { %2876 = vmatpush1.bf16.msra.mxu0 %v17817_v18  ;;  %2917 = vmatpush1.bf16.msra.mxu1 %v17818_v26 }
 0x5a9   :  { %2877 = vmatprep.subr.bf16.mxu0 %v17819_v7  ;;  %2918 = vmatprep.subr.bf16.mxu1 %v17820_v33 }
 0x5ac   :  { %2878 = vmatpush1.bf16.msra.mxu0 %v17821_v10  ;;  %2919 = vmatpush1.bf16.msra.mxu1 %v17822_v51  ;;  %v17833_v51 = vld [vmem:[#allocation98_spill] sm:$0xff] }
 0x5ad   :  { %2879 = vmatprep.subr.bf16.mxu0 %v17823_v9  ;;  %2920 = vmatprep.subr.bf16.mxu1 %v17824_v22  ;;  %v17834_v9 = vld [vmem:[#allocation112_spill] sm:$0xff]  ;;  %v17835_v22 = vld [vmem:[#allocation3_spill] sm:$0xff] }
 0x5b0   :  { %2880 = vmatpush1.bf16.msra.mxu0 %v17825_v13  ;;  %2921 = vmatpush1.bf16.msra.mxu1 %v17826_v4  ;;  %v17836_v13 = vld [vmem:[#allocation27_spill] sm:$0xff] }
 0x5b1   :  { %2881 = vmatprep.subr.bf16.mxu0 %v17827_v35  ;;  %2922 = vmatprep.subr.bf16.mxu1 %v17828_v2  ;;  %v17837_v2 = vld [vmem:[#allocation4_spill] sm:$0xff]  ;;  %v17846_v35 = vld [vmem:[#allocation45_spill] sm:$0xff] }
 0x5b4   :  { %2882 = vmatpush1.bf16.msra.mxu0 %v17829_v23  ;;  %2923 = vmatpush1.bf16.msra.mxu1 %v17830_v42  ;;  %v17838_v23 = vld [vmem:[#allocation37_spill] sm:$0xff] }
 0x5b5   :  { %2883 = vmatprep.subr.bf16.mxu0 %v17831_v29  ;;  %2924 = vmatprep.subr.bf16.mxu1 %v17832_v14  ;;  %v17839_v42 = vld [vmem:[#allocation5_spill] sm:$0xff]  ;;  %v17840_v29 = vld [vmem:[#allocation39_spill] sm:$0xff]  ;;  %v17841_v14 = vld [vmem:[#allocation6_spill] sm:$0xff] }
 0x5b8   :  { %2884 = vmatpush1.bf16.msra.mxu0 %v17833_v51  ;;  %2925 = vmatpush1.bf16.msra.mxu1 %v17834_v9  ;;  %v17842_v51 = vld [vmem:[#allocation41_spill] sm:$0xff]  ;;  %v17843_v9 = vld [vmem:[#allocation7_spill] sm:$0xff] }
 0x5b9   :  { %3125 = vmatprep.subr.bf16.mxu0 %v17835_v22  ;;  %3166 = vmatprep.subr.bf16.mxu1 %v17836_v13  ;;  %v17844_v22 = vld [vmem:[#allocation43_spill] sm:$0xff]  ;;  %v17845_v13 = vld [vmem:[#allocation8_spill] sm:$0xff] }
 0x5bb   :  { %2886 = vmatmul.mubr.bf16.vlgmr.msra.gmra.mrb[52].mxu0 %v14181_v27  ;;  %2927 = vmatmul.mubr.bf16.vlgmr.msra.gmra.mrb[84].mxu1 %v14181_v27  ;;  %v17847_v27 = vld [vmem:[#allocation9_spill] sm:$0xff] }
 0x5bc   :  { %3126 = vmatpush1.bf16.msra.mxu0 %v17837_v2  ;;  %3167 = vmatpush1.bf16.msra.mxu1 %v17838_v23  ;;  %v17848_v2 = vld [vmem:[#allocation47_spill] sm:$0xff]  ;;  %v17849_v23 = vld [vmem:[#allocation10_spill] sm:$0xff] }
 0x5bd   :  { %3127 = vmatprep.subr.bf16.mxu0 %v17839_v42  ;;  %3168 = vmatprep.subr.bf16.mxu1 %v17840_v29  ;;  %v17850_v42 = vld [vmem:[#allocation49_spill] sm:$0xff]  ;;  %v17851_v29 = vld [vmem:[#allocation11_spill] sm:$0xff] }
 0x5c0   :  { %3128 = vmatpush1.bf16.msra.mxu0 %v17841_v14  ;;  %3169 = vmatpush1.bf16.msra.mxu1 %v17842_v51  ;;  %v17852_v14 = vld [vmem:[#allocation51_spill] sm:$0xff]  ;;  %v17853_v51 = vld [vmem:[#allocation12_spill] sm:$0xff] }
 0x5c1   :  { %3129 = vmatprep.subr.bf16.mxu0 %v17843_v9  ;;  %3170 = vmatprep.subr.bf16.mxu1 %v17844_v22  ;;  %v17854_v9 = vld [vmem:[#allocation53_spill] sm:$0xff] }
 0x5c2   :  { %v17855_v22 = vld [vmem:[#allocation13_spill] sm:$0xff] }
 0x5c4   :  { %3130 = vmatpush1.bf16.msra.mxu0 %v17845_v13  ;;  %3171 = vmatpush1.bf16.msra.mxu1 %v17846_v35  ;;  %v17856_v13 = vld [vmem:[#allocation55_spill] sm:$0xff]  ;;  %v17857_v35 = vld [vmem:[#allocation14_spill] sm:$0xff] }
 0x5c5   :  { %3131 = vmatprep.subr.bf16.mxu0 %v17847_v27  ;;  %3172 = vmatprep.subr.bf16.mxu1 %v17848_v2  ;;  %v17858_v27 = vld [vmem:[#allocation57_spill] sm:$0xff]  ;;  %v17859_v2 = vld [vmem:[#allocation15_spill] sm:$0xff] }
 0x5c8   :  { %3132 = vmatpush1.bf16.msra.mxu0 %v17849_v23  ;;  %3173 = vmatpush1.bf16.msra.mxu1 %v17850_v42  ;;  %v17860_v23 = vld [vmem:[#allocation59_spill] sm:$0xff]  ;;  %v17861_v42 = vld [vmem:[#allocation16_spill] sm:$0xff] }
 0x5c9   :  { %3133 = vmatprep.subr.bf16.mxu0 %v17851_v29  ;;  %3174 = vmatprep.subr.bf16.mxu1 %v17852_v14  ;;  %v17862_v29 = vld [vmem:[#allocation61_spill] sm:$0xff] }
 0x5ca   :  { %v17863_v14 = vld [vmem:[#allocation17_spill] sm:$0xff] }
 0x5cc   :  { %3134 = vmatpush1.bf16.msra.mxu0 %v17853_v51  ;;  %3175 = vmatpush1.bf16.msra.mxu1 %v17854_v9  ;;  %v17864_v51 = vld [vmem:[#allocation63_spill] sm:$0xff]  ;;  %v17865_v9 = vld [vmem:[#allocation18_spill] sm:$0xff] }
 0x5cd   :  { %3135 = vmatprep.subr.bf16.mxu0 %v17855_v22  ;;  %3176 = vmatprep.subr.bf16.mxu1 %v17856_v13  ;;  %v17866_v22 = vld [vmem:[#allocation65_spill] sm:$0xff]  ;;  %v17867_v13 = vld [vmem:[#allocation19_spill] sm:$0xff] }
 0x5d0   :  { %3136 = vmatpush1.bf16.msra.mxu0 %v17857_v35  ;;  %3177 = vmatpush1.bf16.msra.mxu1 %v17858_v27  ;;  %v17868_v35 = vld [vmem:[#allocation67_spill] sm:$0xff]  ;;  %v17869_v27 = vld [vmem:[#allocation20_spill] sm:$0xff] }
 0x5d1   :  { %3137 = vmatprep.subr.bf16.mxu0 %v17859_v2  ;;  %3178 = vmatprep.subr.bf16.mxu1 %v17860_v23  ;;  %v17870_v2 = vld [vmem:[#allocation69_spill] sm:$0xff] }
 0x5d2   :  { %v17871_v23 = vld [vmem:[#allocation21_spill] sm:$0xff] }
 0x5d4   :  { %3138 = vmatpush1.bf16.msra.mxu0 %v17861_v42  ;;  %3179 = vmatpush1.bf16.msra.mxu1 %v17862_v29  ;;  %v17872_v42 = vld [vmem:[#allocation71_spill] sm:$0xff]  ;;  %v17873_v29 = vld [vmem:[#allocation22_spill] sm:$0xff] }
 0x5d5   :  { %3139 = vmatprep.subr.bf16.mxu0 %v17863_v14  ;;  %3180 = vmatprep.subr.bf16.mxu1 %v17864_v51  ;;  %v17874_v14 = vld [vmem:[#allocation73_spill] sm:$0xff]  ;;  %v17875_v51 = vld [vmem:[#allocation23_spill] sm:$0xff] }
 0x5d8   :  { %3140 = vmatpush1.bf16.msra.mxu0 %v17865_v9  ;;  %3181 = vmatpush1.bf16.msra.mxu1 %v17866_v22  ;;  %v17876_v9 = vld [vmem:[#allocation75_spill] sm:$0xff]  ;;  %v17877_v22 = vld [vmem:[#allocation24_spill] sm:$0xff] }
 0x5d9   :  { %3141 = vmatprep.subr.bf16.mxu0 %v17867_v13  ;;  %3182 = vmatprep.subr.bf16.mxu1 %v17868_v35  ;;  %v17878_v13 = vld [vmem:[#allocation77_spill] sm:$0xff] }
 0x5da   :  { %v17879_v35 = vld [vmem:[#allocation25_spill] sm:$0xff] }
 0x5dc   :  { %3142 = vmatpush1.bf16.msra.mxu0 %v17869_v27  ;;  %3183 = vmatpush1.bf16.msra.mxu1 %v17870_v2  ;;  %v17880_v27 = vld [vmem:[#allocation79_spill] sm:$0xff]  ;;  %v17881_v2 = vld [vmem:[#allocation26_spill] sm:$0xff] }
 0x5dd   :  { %3143 = vmatprep.subr.bf16.mxu0 %v17871_v23  ;;  %3184 = vmatprep.subr.bf16.mxu1 %v17872_v42  ;;  %v17882_v23 = vld [vmem:[#allocation81_spill] sm:$0xff]  ;;  %v17883_v42 = vld [vmem:[#allocation28_spill] sm:$0xff] }
 0x5e0   :  { %3144 = vmatpush1.bf16.msra.mxu0 %v17873_v29  ;;  %3185 = vmatpush1.bf16.msra.mxu1 %v17874_v14  ;;  %v17884_v29 = vld [vmem:[#allocation83_spill] sm:$0xff]  ;;  %v17885_v14 = vld [vmem:[#allocation29_spill] sm:$0xff] }
 0x5e1   :  { %3145 = vmatprep.subr.bf16.mxu0 %v17875_v51  ;;  %3186 = vmatprep.subr.bf16.mxu1 %v17876_v9  ;;  %v17886_v51 = vld [vmem:[#allocation85_spill] sm:$0xff]  ;;  %v17887_v9 = vld [vmem:[#allocation30_spill] sm:$0xff] }
 0x5e4   :  { %3146 = vmatpush1.bf16.msra.mxu0 %v17877_v22  ;;  %3187 = vmatpush1.bf16.msra.mxu1 %v17878_v13  ;;  %v17888_v22 = vld [vmem:[#allocation87_spill] sm:$0xff] }
 0x5e5   :  { %3147 = vmatprep.subr.bf16.mxu0 %v17879_v35  ;;  %3188 = vmatprep.subr.bf16.mxu1 %v17880_v27  ;;  %v17889_v13 = vld [vmem:[#allocation31_spill] sm:$0xff]  ;;  %v17890_v35 = vld [vmem:[#allocation89_spill] sm:$0xff]  ;;  %v17891_v27 = vld [vmem:[#allocation32_spill] sm:$0xff] }
 0x5e8   :  { %3148 = vmatpush1.bf16.msra.mxu0 %v17881_v2  ;;  %3189 = vmatpush1.bf16.msra.mxu1 %v17882_v23  ;;  %v17892_v2 = vld [vmem:[#allocation91_spill] sm:$0xff]  ;;  %v17893_v23 = vld [vmem:[#allocation33_spill] sm:$0xff] }
 0x5e9   :  { %3149 = vmatprep.subr.bf16.mxu0 %v17883_v42  ;;  %3190 = vmatprep.subr.bf16.mxu1 %v17884_v29  ;;  %v17894_v42 = vld [vmem:[#allocation93_spill] sm:$0xff]  ;;  %v17895_v29 = vld [vmem:[#allocation34_spill] sm:$0xff] }
 0x5ec   :  { %3150 = vmatpush1.bf16.msra.mxu0 %v17885_v14  ;;  %3191 = vmatpush1.bf16.msra.mxu1 %v17886_v51  ;;  %v17896_v14 = vld [vmem:[#allocation95_spill] sm:$0xff] }
 0x5ed   :  { %3151 = vmatprep.subr.bf16.mxu0 %v17887_v9  ;;  %3192 = vmatprep.subr.bf16.mxu1 %v17888_v22  ;;  %v17897_v51 = vld [vmem:[#allocation35_spill] sm:$0xff]  ;;  %v17898_v9 = vld [vmem:[#allocation97_spill] sm:$0xff]  ;;  %v17899_v22 = vld [vmem:[#allocation36_spill] sm:$0xff] }
 0x5f0   :  { %3152 = vmatpush1.bf16.msra.mxu0 %v17889_v13  ;;  %3193 = vmatpush1.bf16.msra.mxu1 %v17890_v35  ;;  %v17900_v13 = vld [vmem:[#allocation99_spill] sm:$0xff] }
 0x5f1   :  { %3153 = vmatprep.subr.bf16.mxu0 %v17891_v27  ;;  %3194 = vmatprep.subr.bf16.mxu1 %v17892_v2  ;;  %v17901_v27 = vld [vmem:[#allocation127_spill] sm:$0xff] }
 0x5f4   :  { %3154 = vmatpush1.bf16.msra.mxu0 %v17893_v23  ;;  %3195 = vmatpush1.bf16.msra.mxu1 %v17894_v42  ;;  %v17902_v23 = vld [vmem:[#allocation149_spill] sm:$0xff]  ;;  %v17903_v42 = vld [vmem:[#allocation128_spill] sm:$0xff] }
 0x5f5   :  { %3155 = vmatprep.subr.bf16.mxu0 %v17895_v29  ;;  %3196 = vmatprep.subr.bf16.mxu1 %v17896_v14  ;;  %v17904_v14 = vld [vmem:[#allocation150_spill] sm:$0xff] }
 0x5f8   :  { %3156 = vmatpush1.bf16.msra.mxu0 %v17897_v51  ;;  %3197 = vmatpush1.bf16.msra.mxu1 %v17898_v9 }
 0x5f9   :  { %3207 = vmatprep.subr.bf16.mxu0 %v17899_v22  ;;  %3248 = vmatprep.subr.bf16.mxu1 %v17900_v13 }
 0x64d   :  { %v2805_v35 = vpop.f32.mrb[48].mxu0 }
 0x64e   :  { %v2935_v4 = vadd.f32 %v2805_v35, %v17901_v27  ;;  %v2846_v2 = vpop.f32.mrb[80].mxu1  ;;  %v2807_v10 = vpop.f32.mrb[49].mxu0 }
 0x64f   :  { %v2937_v33 = vadd.f32 %v2846_v2, %v17902_v23  ;;  %v2936_v7 = vadd.f32 %v2807_v10, %v17903_v42  ;;  %v2848_v29 = vpop.f32.mrb[81].mxu1  ;;  %v2809_v26 = vpop.f32.mrb[50].mxu0 }
 0x650   :  { %v2938_v18 = vadd.f32 %v2848_v29, %v17904_v14  ;;  %v2850_v51 = vpop.f32.mrb[82].mxu1  ;;  %v2810_v48 = vpop.f32.mrb[51].mxu0  ;;  %v10445_v17 = vmul.f32 -1.442695, %v2935_v4  ;;  %v17908_v4 = vld [vmem:[#allocation163_spill] sm:$0xff] }
 0x651   :  { %v2851_v9 = vpop.f32.mrb[83].mxu1  ;;  %v10447_v22 = vmul.f32 -1.442695, %v2937_v33  ;;  %v10446_v59 = vmul.f32 -1.442695, %v2936_v7  ;;  %v17905_v33 = vld [vmem:[#allocation131_spill] sm:$0xff] }
 0x652   :  { %v10448_v13 = vmul.f32 -1.442695, %v2938_v18  ;;  %12232 = vpow2.f32 %v10445_v17  ;;  %v17906_v18 = vld [vmem:[#allocation162_spill] sm:$0xff] }
 0x653   :  { %12234 = vpow2.f32 %v10447_v22  ;;  %v17907_v22 = vld [vmem:[#allocation132_spill] sm:$0xff] }
 0x654   :  { %12236 = vpow2.f32 %v10446_v59 }
 0x655   :  { %12238 = vpow2.f32 %v10448_v13 }
 0x65c   :  { %v12233_v35 = vpop.eup %12232 }
 0x65d   :  { %v12235_v27 = vpop.eup %12234  ;;  %v2949_v10 = vadd.f32 1.0, %v12233_v35 }
 0x65e   :  { %v12237_v2 = vpop.eup %12236  ;;  %v2961_v42 = vadd.f32 1.0, %v12235_v27 }
 0x65f   :  { %v12239_v23 = vpop.eup %12238  ;;  %v2950_v26 = vadd.f32 1.0, %v12237_v2  ;;  %12240 = vrcp.f32 %v2949_v10 }
 0x660   :  { %v2962_v5 = vadd.f32 1.0, %v12239_v23  ;;  %12242 = vrcp.f32 %v2961_v42 }
 0x661   :  { %12244 = vrcp.f32 %v2950_v26 }
 0x662   :  { %12246 = vrcp.f32 %v2962_v5 }
 0x669   :  { %v12241_v42 = vpop.eup %12240 }
 0x66a   :  { %v12243_v26 = vpop.eup %12242 }
 0x68e   :  { %v2887_v48 = vpop.f32.mrb[52].mxu0  ;;  %v2928_v51 = vpop.f32.mrb[84].mxu1 }
 0x68f   :  { %v2939_v7 = vadd.f32 %v2887_v48, %v17905_v33  ;;  %v2941_v17 = vadd.f32 %v2928_v51, %v17906_v18  ;;  %v2889_v9 = vpop.f32.mrb[53].mxu0  ;;  %v2930_v59 = vpop.f32.mrb[85].mxu1  ;;  %v2981_v18 = vmul.f32 %v12243_v26, %v14171_v47 }
 0x690   :  { %v2940_v13 = vadd.f32 %v2889_v9, %v17907_v22  ;;  %v2942_v29 = vadd.f32 %v2930_v59, %v17908_v4  ;;  %v2891_v14 = vpop.f32.mrb[54].mxu0  ;;  %v2932_v35 = vpop.f32.mrb[86].mxu1 }
 0x691   :  { %12248 = vtanh.f32 %v2939_v7  ;;  %v10449_v27 = vmul.f32 -1.442695, %v2941_v17  ;;  %v2892_v2 = vpop.f32.mrb[55].mxu0  ;;  %v2933_v23 = vpop.f32.mrb[87].mxu1 }
 0x692   :  { %12250 = vtanh.f32 %v2940_v13  ;;  %v10450_v10 = vmul.f32 -1.442695, %v2942_v29  ;;  %v12245_v48 = vpop.eup %12244 }
 0x693   :  { %12252 = vpow2.f32 %v10449_v27  ;;  %v12247_v51 = vpop.eup %12246 }
 0x694   :  { %12254 = vpow2.f32 %v10450_v10  ;;  %v2982_v22 = vmul.f32 %v12247_v51, %v14173_v50 }
 0x69b   :  { %v12249_v33 = vpop.eup %12248 }
 0x69c   :  { %v12251_v5 = vpop.eup %12250  ;;  %v2983_v9 = vmul.f32 %v12249_v33, %v12241_v42 }
 0x69d   :  { %v12253_v59 = vpop.eup %12252  ;;  %v2984_v7 = vmul.f32 %v12251_v5, %v12245_v48 }
 0x69e   :  { %v12255_v17 = vpop.eup %12254  ;;  %v14333_v4 = vadd.f32 %v2983_v9, %v2981_v18  ;;  %v2975_v13 = vadd.f32 1.0, %v12253_v59 }
 0x69f   :  { %v14335_v29 = vadd.f32 %v2984_v7, %v2982_v22  ;;  %v2976_v14 = vadd.f32 1.0, %v12255_v17 }
 0x6a0   :  { %12256 = vtanh.f32 %v14333_v4 }
 0x6a1   :  { %12258 = vrcp.f32 %v2975_v13 }
 0x6a2   :  { %12260 = vtanh.f32 %v14335_v29 }
 0x6a3   :  { %12262 = vrcp.f32 %v2976_v14 }
 0x6aa   :  { %v12257_v35 = vpop.eup %12256 }
 0x6ab   :  { %v12259_v47 = vpop.eup %12258 }
 0x6ac   :  { %v12261_v27 = vpop.eup %12260  ;;  %v2989_v2 = vmul.f32 %v12259_v47, %v12257_v35 }
 0x6ad   :  { %v12263_v23 = vpop.eup %12262 }
 0x6ae   :  { %v2990_v50 = vmul.f32 %v12263_v23, %v12261_v27  ;;  %v2992_v10 = vcombine.high %v2989_v2, %v2989_v2  ;;  %v2999_v42 = vrot.slane %v2989_v2, %v13689_v28  ;;  %v14343_v9 = vpack.c.bf16 %v2989_v2, %v2989_v2 }
 0x6b0   :  { %v3058_v26 = vcombine.high %v2990_v50, %v2990_v50  ;;  %v3065_v48 = vrot.slane %v2990_v50, %v13689_v28  ;;  %v3124_v51 = vpack.c.bf16 %v2990_v50, %v2990_v50  ;;  %v3006_v33 = vrot.slane %v2992_v10, %v13689_v28  ;;  %10451 = vst.sshfl [vmem:[#allocation2 + $0x4] sm:$0x1 pattern:$0x73625140] %v2999_v42 }
 0x6b1   :  { %v3007_v5 = vcombine.high %v2999_v42, %v2999_v42  ;;  %v3015_v18 = vrot.slane %v2999_v42, %v13689_v28 }
 0x6b2   :  { %v3072_v59 = vrot.slane %v3058_v26, %v13689_v28  ;;  %v3073_v22 = vcombine.high %v3065_v48, %v3065_v48  ;;  %v3081_v7 = vrot.slane %v3065_v48, %v13689_v28  ;;  %10455 = vst.sshfl [vmem:[#allocation2 + $0xb] sm:$0x1 pattern:$0x73625140] %v3065_v48  ;;  %3157 = vmatprep.mubr.bf16.mxu0 %v3124_v51 }
 0x6b3   :  { %3198 = vmatprep.mubr.bf16.mxu1 %v3124_v51  ;;  %10453 = vst.sshfl [vmem:[#allocation2 + $0x44] sm:$0x1 pattern:$0x73625140] %v3006_v33  ;;  %v3008_v17 = vcombine.high %v3006_v33, %v3006_v33  ;;  %v3022_v13 = vrot.slane %v3006_v33, %v13689_v28  ;;  %v3029_v14 = vrot.slane %v3007_v5, %v13689_v28 }
 0x6b4   :  { %v3037_v35 = vcombine.high %v3015_v18, %v3015_v18  ;;  %10452 = vst.sshfl [vmem:[#allocation2 + $0x14] sm:$0x1 pattern:$0x73625140] %v3007_v5  ;;  %3158 = vmatmul.mubr.bf16.vlgmr.msra.gmra.mrb[56].mxu0 %v14343_v9  ;;  %v3074_v47 = vcombine.high %v3072_v59, %v3072_v59  ;;  %v3088_v27 = vrot.slane %v3072_v59, %v13689_v28 }
 0x6b5   :  { %v3095_v2 = vrot.slane %v3073_v22, %v13689_v28  ;;  %v3103_v23 = vcombine.high %v3081_v7, %v3081_v7  ;;  %10456 = vst.sshfl [vmem:[#allocation2 + $0x1b] sm:$0x1 pattern:$0x73625140] %v3073_v22  ;;  %3199 = vmatmul.mubr.bf16.vlgmr.msra.gmra.mrb[88].mxu1 %v14343_v9  ;;  %v3036_v50 = vrot.slane %v3008_v17, %v13689_v28  ;;  %v17911_v22 = vld [vmem:[#allocation80_spill] sm:$0xff]  ;;  %v17912_v7 = vld [vmem:[#allocation103_spill] sm:$0xff] }
 0x6b6   :  { %10457 = vst.sshfl [vmem:[#allocation2 + $0x4b] sm:$0x1 pattern:$0x73625140] %v3072_v59  ;;  %v3038_v10 = vcombine.high %v3022_v13, %v3022_v13  ;;  %v3039_v42 = vcombine.high %v3029_v14, %v3029_v14  ;;  %3051 = vst [vmem:[#allocation2 + $0x24] sm:$0x1] %v3037_v35  ;;  %3208 = vmatpush1.bf16.msra.mxu0 %v17520_v41  ;;  %3249 = vmatpush1.bf16.msra.mxu1 %v13191_v30 }
 0x6b7   :  { %10454 = vst.sshfl [vmem:[#allocation2 + $0x54] sm:$0x1 pattern:$0x73625140] %v3008_v17  ;;  %v3102_v26 = vrot.slane %v3074_v47, %v13689_v28  ;;  %v3104_v48 = vcombine.high %v3088_v27, %v3088_v27  ;;  %v3105_v33 = vcombine.high %v3095_v2, %v3095_v2  ;;  %3117 = vst [vmem:[#allocation2 + $0x2b] sm:$0x1] %v3103_v23  ;;  %3239 = vmatprep.mubr.bf16.mxu0 %v3124_v51 }
 0x6b8   :  { %10458 = vst.sshfl [vmem:[#allocation2 + $0x5b] sm:$0x1 pattern:$0x73625140] %v3074_v47  ;;  %3280 = vmatprep.mubr.bf16.mxu1 %v3124_v51  ;;  %v3040_v5 = vcombine.high %v3036_v50, %v3036_v50  ;;  %3052 = vst [vmem:[#allocation2 + $0x34] sm:$0x1] %v3039_v42  ;;  %3209 = vmatprep.subr.bf16.mxu0 %v17521_v40 }
 0x6b9   :  { %3055 = vst [vmem:[#allocation2 + $0x64] sm:$0x1] %v3038_v10  ;;  %3250 = vmatprep.subr.bf16.mxu1 %v13195_v31  ;;  %v3106_v18 = vcombine.high %v3102_v26, %v3102_v26  ;;  %3118 = vst [vmem:[#allocation2 + $0x3b] sm:$0x1] %v3105_v33  ;;  %v17909_v51 = vld [vmem:[#allocation78_spill] sm:$0xff]  ;;  %v17914_v13 = vld [vmem:[#allocation104_spill] sm:$0xff] }
 0x6ba   :  { %3121 = vst [vmem:[#allocation2 + $0x6b] sm:$0x1] %v3104_v48  ;;  %3056 = vst [vmem:[#allocation2 + $0x74] sm:$0x1] %v3040_v5  ;;  %3210 = vmatpush1.bf16.msra.mxu0 %v17522_v11  ;;  %3251 = vmatpush1.bf16.msra.mxu1 %v13207_v58  ;;  %v17910_v59 = vld [vmem:[#allocation102_spill] sm:$0xff]  ;;  %v17915_v14 = vld [vmem:[#allocation84_spill] sm:$0xff] }
 0x6bb   :  { %3122 = vst [vmem:[#allocation2 + $0x7b] sm:$0x1] %v3106_v18  ;;  %3211 = vmatprep.subr.bf16.mxu0 %v17523_v21  ;;  %3252 = vmatprep.subr.bf16.mxu1 %v13210_v52  ;;  %v17913_v17 = vld [vmem:[#allocation82_spill] sm:$0xff]  ;;  %v17916_v35 = vld [vmem:[#allocation105_spill] sm:$0xff]  ;;  %v17919_v2 = vld [vmem:[#allocation88_spill] sm:$0xff] }
 0x6bc   :  { %v17917_v47 = vld [vmem:[#allocation86_spill] sm:$0xff]  ;;  %v17920_v23 = vld [vmem:[#allocation107_spill] sm:$0xff]  ;;  %v17922_v10 = vld [vmem:[#allocation108_spill] sm:$0xff] }
 0x6bd   :  { %v17918_v27 = vld [vmem:[#allocation106_spill] sm:$0xff]  ;;  %v17923_v42 = vld [vmem:[#allocation92_spill] sm:$0xff]  ;;  %v17924_v26 = vld [vmem:[#allocation109_spill] sm:$0xff] }
 0x6be   :  { %3212 = vmatpush1.bf16.msra.mxu0 %v17524_v49  ;;  %3253 = vmatpush1.bf16.msra.mxu1 %v13222_v44  ;;  %v17921_v50 = vld [vmem:[#allocation90_spill] sm:$0xff]  ;;  %v17927_v5 = vld [vmem:[#allocation96_spill] sm:$0xff]  ;;  %v17928_v18 = vld [vmem:[#allocation111_spill] sm:$0xff] }
 0x6bf   :  { %3213 = vmatprep.subr.bf16.mxu0 %v17525_v8  ;;  %3254 = vmatprep.subr.bf16.mxu1 %v13225_v61  ;;  %v17925_v48 = vld [vmem:[#allocation94_spill] sm:$0xff] }
 0x6c0   :  { %v17926_v33 = vld [vmem:[#allocation110_spill] sm:$0xff] }
 0x6c2   :  { %3214 = vmatpush1.bf16.msra.mxu0 %v17526_v34  ;;  %3255 = vmatpush1.bf16.msra.mxu1 %v13236_v36 }
 0x6c3   :  { %3215 = vmatprep.subr.bf16.mxu0 %v17527_v54  ;;  %3256 = vmatprep.subr.bf16.mxu1 %v13239_v19 }
 0x6c6   :  { %3216 = vmatpush1.bf16.msra.mxu0 %v17528_v25  ;;  %3257 = vmatpush1.bf16.msra.mxu1 %v13250_v39 }
 0x6c7   :  { %3217 = vmatprep.subr.bf16.mxu0 %v17529_v15  ;;  %3258 = vmatprep.subr.bf16.mxu1 %v13253_v63 }
 0x6ca   :  { %3218 = vmatpush1.bf16.msra.mxu0 %v17530_v3  ;;  %3259 = vmatpush1.bf16.msra.mxu1 %v13264_v60 }
 0x6cb   :  { %3219 = vmatprep.subr.bf16.mxu0 %v17531_v1  ;;  %3260 = vmatprep.subr.bf16.mxu1 %v13267_v6 }
 0x6ce   :  { %3220 = vmatpush1.bf16.msra.mxu0 %v17532_v56  ;;  %3261 = vmatpush1.bf16.msra.mxu1 %v13278_v45 }
 0x6cf   :  { %3221 = vmatprep.subr.bf16.mxu0 %v17533_v37  ;;  %3262 = vmatprep.subr.bf16.mxu1 %v13281_v46 }
 0x6d2   :  { %3222 = vmatpush1.bf16.msra.mxu0 %v17534_v32  ;;  %3263 = vmatpush1.bf16.msra.mxu1 %v13292_v53 }
 0x6d3   :  { %3223 = vmatprep.subr.bf16.mxu0 %v17535_v57  ;;  %3264 = vmatprep.subr.bf16.mxu1 %v13295_v55 }
 0x6d6   :  { %3224 = vmatpush1.bf16.msra.mxu0 %v17536_v12  ;;  %3265 = vmatpush1.bf16.msra.mxu1 %v13306_v62 }
 0x6d7   :  { %3225 = vmatprep.subr.bf16.mxu0 %v17537_v24  ;;  %3266 = vmatprep.subr.bf16.mxu1 %v13309_v0 }
 0x6da   :  { %3226 = vmatpush1.bf16.msra.mxu0 %v17538_v38  ;;  %3267 = vmatpush1.bf16.msra.mxu1 %v17620_v20 }
 0x6db   :  { %3227 = vmatprep.subr.bf16.mxu0 %v17539_v16  ;;  %3268 = vmatprep.subr.bf16.mxu1 %v17621_v43 }
 0x6de   :  { %3228 = vmatpush1.bf16.msra.mxu0 %v17909_v51  ;;  %3269 = vmatpush1.bf16.msra.mxu1 %v17910_v59 }
 0x6df   :  { %3229 = vmatprep.subr.bf16.mxu0 %v17911_v22  ;;  %3270 = vmatprep.subr.bf16.mxu1 %v17912_v7 }
 0x6e2   :  { %3230 = vmatpush1.bf16.msra.mxu0 %v17913_v17  ;;  %3271 = vmatpush1.bf16.msra.mxu1 %v17914_v13 }
 0x6e3   :  { %3231 = vmatprep.subr.bf16.mxu0 %v17915_v14  ;;  %3272 = vmatprep.subr.bf16.mxu1 %v17916_v35 }
 0x6e6   :  { %3232 = vmatpush1.bf16.msra.mxu0 %v17917_v47  ;;  %3273 = vmatpush1.bf16.msra.mxu1 %v17918_v27  ;;  %v17929_v27 = vld [vmem:[#allocation98_spill] sm:$0xff] }
 0x6e7   :  { %3233 = vmatprep.subr.bf16.mxu0 %v17919_v2  ;;  %3274 = vmatprep.subr.bf16.mxu1 %v17920_v23  ;;  %v17930_v2 = vld [vmem:[#allocation112_spill] sm:$0xff]  ;;  %v17931_v23 = vld [vmem:[#allocation3_spill] sm:$0xff] }
 0x6ea   :  { %3234 = vmatpush1.bf16.msra.mxu0 %v17921_v50  ;;  %3275 = vmatpush1.bf16.msra.mxu1 %v17922_v10  ;;  %v17932_v50 = vld [vmem:[#allocation27_spill] sm:$0xff] }
 0x6eb   :  { %3235 = vmatprep.subr.bf16.mxu0 %v17923_v42  ;;  %3276 = vmatprep.subr.bf16.mxu1 %v17924_v26  ;;  %v17933_v26 = vld [vmem:[#allocation4_spill] sm:$0xff]  ;;  %v17942_v42 = vld [vmem:[#allocation45_spill] sm:$0xff] }
 0x6ee   :  { %3236 = vmatpush1.bf16.msra.mxu0 %v17925_v48  ;;  %3277 = vmatpush1.bf16.msra.mxu1 %v17926_v33  ;;  %v17934_v48 = vld [vmem:[#allocation37_spill] sm:$0xff] }
 0x6ef   :  { %3237 = vmatprep.subr.bf16.mxu0 %v17927_v5  ;;  %3278 = vmatprep.subr.bf16.mxu1 %v17928_v18  ;;  %v17935_v33 = vld [vmem:[#allocation5_spill] sm:$0xff]  ;;  %v17936_v5 = vld [vmem:[#allocation39_spill] sm:$0xff]  ;;  %v17937_v18 = vld [vmem:[#allocation6_spill] sm:$0xff] }
 0x6f2   :  { %3238 = vmatpush1.bf16.msra.mxu0 %v17929_v27  ;;  %3279 = vmatpush1.bf16.msra.mxu1 %v17930_v2  ;;  %v17938_v27 = vld [vmem:[#allocation41_spill] sm:$0xff]  ;;  %v17939_v2 = vld [vmem:[#allocation7_spill] sm:$0xff] }
 0x6f3   :  { %3479 = vmatprep.subr.bf16.mxu0 %v17931_v23  ;;  %3520 = vmatprep.subr.bf16.mxu1 %v17932_v50  ;;  %v17940_v23 = vld [vmem:[#allocation43_spill] sm:$0xff]  ;;  %v17941_v50 = vld [vmem:[#allocation8_spill] sm:$0xff] }
 0x6f5   :  { %3240 = vmatmul.mubr.bf16.vlgmr.msra.gmra.mrb[60].mxu0 %v14343_v9  ;;  %3281 = vmatmul.mubr.bf16.vlgmr.msra.gmra.mrb[92].mxu1 %v14343_v9  ;;  %v17943_v9 = vld [vmem:[#allocation9_spill] sm:$0xff] }
 0x6f6   :  { %3480 = vmatpush1.bf16.msra.mxu0 %v17933_v26  ;;  %3521 = vmatpush1.bf16.msra.mxu1 %v17934_v48  ;;  %v17944_v26 = vld [vmem:[#allocation47_spill] sm:$0xff]  ;;  %v17945_v48 = vld [vmem:[#allocation10_spill] sm:$0xff] }
 0x6f7   :  { %3481 = vmatprep.subr.bf16.mxu0 %v17935_v33  ;;  %3522 = vmatprep.subr.bf16.mxu1 %v17936_v5  ;;  %v17946_v33 = vld [vmem:[#allocation49_spill] sm:$0xff]  ;;  %v17947_v5 = vld [vmem:[#allocation11_spill] sm:$0xff] }
 0x6fa   :  { %3482 = vmatpush1.bf16.msra.mxu0 %v17937_v18  ;;  %3523 = vmatpush1.bf16.msra.mxu1 %v17938_v27  ;;  %v17948_v18 = vld [vmem:[#allocation51_spill] sm:$0xff]  ;;  %v17949_v27 = vld [vmem:[#allocation12_spill] sm:$0xff] }
 0x6fb   :  { %3483 = vmatprep.subr.bf16.mxu0 %v17939_v2  ;;  %3524 = vmatprep.subr.bf16.mxu1 %v17940_v23  ;;  %v17950_v2 = vld [vmem:[#allocation53_spill] sm:$0xff] }
 0x6fc   :  { %v17951_v23 = vld [vmem:[#allocation13_spill] sm:$0xff] }
 0x6fe   :  { %3484 = vmatpush1.bf16.msra.mxu0 %v17941_v50  ;;  %3525 = vmatpush1.bf16.msra.mxu1 %v17942_v42  ;;  %v17952_v50 = vld [vmem:[#allocation55_spill] sm:$0xff]  ;;  %v17953_v42 = vld [vmem:[#allocation14_spill] sm:$0xff] }
 0x6ff   :  { %3485 = vmatprep.subr.bf16.mxu0 %v17943_v9  ;;  %3526 = vmatprep.subr.bf16.mxu1 %v17944_v26  ;;  %v17954_v9 = vld [vmem:[#allocation57_spill] sm:$0xff]  ;;  %v17955_v26 = vld [vmem:[#allocation15_spill] sm:$0xff] }
 0x702   :  { %3486 = vmatpush1.bf16.msra.mxu0 %v17945_v48  ;;  %3527 = vmatpush1.bf16.msra.mxu1 %v17946_v33  ;;  %v17956_v48 = vld [vmem:[#allocation59_spill] sm:$0xff]  ;;  %v17957_v33 = vld [vmem:[#allocation16_spill] sm:$0xff] }
 0x703   :  { %3487 = vmatprep.subr.bf16.mxu0 %v17947_v5  ;;  %3528 = vmatprep.subr.bf16.mxu1 %v17948_v18  ;;  %v17958_v5 = vld [vmem:[#allocation61_spill] sm:$0xff] }
 0x704   :  { %v17959_v18 = vld [vmem:[#allocation17_spill] sm:$0xff] }
 0x706   :  { %3488 = vmatpush1.bf16.msra.mxu0 %v17949_v27  ;;  %3529 = vmatpush1.bf16.msra.mxu1 %v17950_v2  ;;  %v17960_v27 = vld [vmem:[#allocation63_spill] sm:$0xff]  ;;  %v17961_v2 = vld [vmem:[#allocation18_spill] sm:$0xff] }
 0x707   :  { %3489 = vmatprep.subr.bf16.mxu0 %v17951_v23  ;;  %3530 = vmatprep.subr.bf16.mxu1 %v17952_v50  ;;  %v17962_v23 = vld [vmem:[#allocation65_spill] sm:$0xff]  ;;  %v17963_v50 = vld [vmem:[#allocation19_spill] sm:$0xff] }
 0x70a   :  { %3490 = vmatpush1.bf16.msra.mxu0 %v17953_v42  ;;  %3531 = vmatpush1.bf16.msra.mxu1 %v17954_v9  ;;  %v17964_v42 = vld [vmem:[#allocation67_spill] sm:$0xff]  ;;  %v17965_v9 = vld [vmem:[#allocation20_spill] sm:$0xff] }
 0x70b   :  { %3491 = vmatprep.subr.bf16.mxu0 %v17955_v26  ;;  %3532 = vmatprep.subr.bf16.mxu1 %v17956_v48  ;;  %v17966_v26 = vld [vmem:[#allocation69_spill] sm:$0xff] }
 0x70c   :  { %v17967_v48 = vld [vmem:[#allocation21_spill] sm:$0xff] }
 0x70e   :  { %3492 = vmatpush1.bf16.msra.mxu0 %v17957_v33  ;;  %3533 = vmatpush1.bf16.msra.mxu1 %v17958_v5  ;;  %v17968_v33 = vld [vmem:[#allocation71_spill] sm:$0xff]  ;;  %v17969_v5 = vld [vmem:[#allocation22_spill] sm:$0xff] }
 0x70f   :  { %3493 = vmatprep.subr.bf16.mxu0 %v17959_v18  ;;  %3534 = vmatprep.subr.bf16.mxu1 %v17960_v27  ;;  %v17970_v18 = vld [vmem:[#allocation73_spill] sm:$0xff]  ;;  %v17971_v27 = vld [vmem:[#allocation23_spill] sm:$0xff] }
 0x712   :  { %3494 = vmatpush1.bf16.msra.mxu0 %v17961_v2  ;;  %3535 = vmatpush1.bf16.msra.mxu1 %v17962_v23  ;;  %v17972_v2 = vld [vmem:[#allocation75_spill] sm:$0xff]  ;;  %v17973_v23 = vld [vmem:[#allocation24_spill] sm:$0xff] }
 0x713   :  { %3495 = vmatprep.subr.bf16.mxu0 %v17963_v50  ;;  %3536 = vmatprep.subr.bf16.mxu1 %v17964_v42  ;;  %v17974_v50 = vld [vmem:[#allocation77_spill] sm:$0xff] }
 0x714   :  { %v17975_v42 = vld [vmem:[#allocation25_spill] sm:$0xff] }
 0x716   :  { %3496 = vmatpush1.bf16.msra.mxu0 %v17965_v9  ;;  %3537 = vmatpush1.bf16.msra.mxu1 %v17966_v26  ;;  %v17976_v9 = vld [vmem:[#allocation79_spill] sm:$0xff]  ;;  %v17977_v26 = vld [vmem:[#allocation26_spill] sm:$0xff] }
 0x717   :  { %3497 = vmatprep.subr.bf16.mxu0 %v17967_v48  ;;  %3538 = vmatprep.subr.bf16.mxu1 %v17968_v33  ;;  %v17978_v48 = vld [vmem:[#allocation81_spill] sm:$0xff]  ;;  %v17979_v33 = vld [vmem:[#allocation28_spill] sm:$0xff] }
 0x71a   :  { %3498 = vmatpush1.bf16.msra.mxu0 %v17969_v5  ;;  %3539 = vmatpush1.bf16.msra.mxu1 %v17970_v18  ;;  %v17980_v5 = vld [vmem:[#allocation83_spill] sm:$0xff]  ;;  %v17981_v18 = vld [vmem:[#allocation29_spill] sm:$0xff] }
 0x71b   :  { %3499 = vmatprep.subr.bf16.mxu0 %v17971_v27  ;;  %3540 = vmatprep.subr.bf16.mxu1 %v17972_v2  ;;  %v17982_v27 = vld [vmem:[#allocation85_spill] sm:$0xff]  ;;  %v17983_v2 = vld [vmem:[#allocation30_spill] sm:$0xff] }
 0x71e   :  { %3500 = vmatpush1.bf16.msra.mxu0 %v17973_v23  ;;  %3541 = vmatpush1.bf16.msra.mxu1 %v17974_v50  ;;  %v17984_v23 = vld [vmem:[#allocation87_spill] sm:$0xff] }
 0x71f   :  { %3501 = vmatprep.subr.bf16.mxu0 %v17975_v42  ;;  %3542 = vmatprep.subr.bf16.mxu1 %v17976_v9  ;;  %v17985_v50 = vld [vmem:[#allocation31_spill] sm:$0xff]  ;;  %v17986_v42 = vld [vmem:[#allocation89_spill] sm:$0xff]  ;;  %v17987_v9 = vld [vmem:[#allocation32_spill] sm:$0xff] }
 0x722   :  { %3502 = vmatpush1.bf16.msra.mxu0 %v17977_v26  ;;  %3543 = vmatpush1.bf16.msra.mxu1 %v17978_v48  ;;  %v17988_v26 = vld [vmem:[#allocation91_spill] sm:$0xff]  ;;  %v17989_v48 = vld [vmem:[#allocation33_spill] sm:$0xff] }
 0x723   :  { %3503 = vmatprep.subr.bf16.mxu0 %v17979_v33  ;;  %3544 = vmatprep.subr.bf16.mxu1 %v17980_v5  ;;  %v17990_v33 = vld [vmem:[#allocation93_spill] sm:$0xff]  ;;  %v17991_v5 = vld [vmem:[#allocation34_spill] sm:$0xff] }
 0x726   :  { %3504 = vmatpush1.bf16.msra.mxu0 %v17981_v18  ;;  %3545 = vmatpush1.bf16.msra.mxu1 %v17982_v27  ;;  %v17992_v18 = vld [vmem:[#allocation95_spill] sm:$0xff] }
 0x727   :  { %3505 = vmatprep.subr.bf16.mxu0 %v17983_v2  ;;  %3546 = vmatprep.subr.bf16.mxu1 %v17984_v23  ;;  %v17993_v27 = vld [vmem:[#allocation35_spill] sm:$0xff]  ;;  %v17994_v2 = vld [vmem:[#allocation97_spill] sm:$0xff]  ;;  %v17995_v23 = vld [vmem:[#allocation36_spill] sm:$0xff] }
 0x72a   :  { %3506 = vmatpush1.bf16.msra.mxu0 %v17985_v50  ;;  %3547 = vmatpush1.bf16.msra.mxu1 %v17986_v42  ;;  %v17996_v50 = vld [vmem:[#allocation99_spill] sm:$0xff] }
 0x72b   :  { %3507 = vmatprep.subr.bf16.mxu0 %v17987_v9  ;;  %3548 = vmatprep.subr.bf16.mxu1 %v17988_v26  ;;  %v17997_v9 = vld [vmem:[#allocation129_spill] sm:$0xff] }
 0x72e   :  { %3508 = vmatpush1.bf16.msra.mxu0 %v17989_v48  ;;  %3549 = vmatpush1.bf16.msra.mxu1 %v17990_v33  ;;  %v17998_v48 = vld [vmem:[#allocation151_spill] sm:$0xff]  ;;  %v17999_v33 = vld [vmem:[#allocation130_spill] sm:$0xff] }
 0x72f   :  { %3509 = vmatprep.subr.bf16.mxu0 %v17991_v5  ;;  %3550 = vmatprep.subr.bf16.mxu1 %v17992_v18  ;;  %v18000_v18 = vld [vmem:[#allocation152_spill] sm:$0xff] }
 0x732   :  { %3510 = vmatpush1.bf16.msra.mxu0 %v17993_v27  ;;  %3551 = vmatpush1.bf16.msra.mxu1 %v17994_v2 }
 0x733   :  { %3561 = vmatprep.subr.bf16.mxu0 %v17995_v23  ;;  %3602 = vmatprep.subr.bf16.mxu1 %v17996_v50 }
 0x787   :  { %v3159_v42 = vpop.f32.mrb[56].mxu0 }
 0x788   :  { %v3289_v10 = vadd.f32 %v3159_v42, %v17997_v9  ;;  %v3200_v26 = vpop.f32.mrb[88].mxu1  ;;  %v3161_v47 = vpop.f32.mrb[57].mxu0 }
 0x789   :  { %v3291_v35 = vadd.f32 %v3200_v26, %v17998_v48  ;;  %v3290_v14 = vadd.f32 %v3161_v47, %v17999_v33  ;;  %v3202_v5 = vpop.f32.mrb[89].mxu1  ;;  %v3163_v13 = vpop.f32.mrb[58].mxu0 }
 0x78a   :  { %v3292_v17 = vadd.f32 %v3202_v5, %v18000_v18  ;;  %v3204_v27 = vpop.f32.mrb[90].mxu1  ;;  %v3164_v7 = vpop.f32.mrb[59].mxu0  ;;  %v10459_v22 = vmul.f32 -1.442695, %v3289_v10  ;;  %v18004_v10 = vld [vmem:[#allocation165_spill] sm:$0xff] }
 0x78b   :  { %v3205_v2 = vpop.f32.mrb[91].mxu1  ;;  %v10461_v23 = vmul.f32 -1.442695, %v3291_v35  ;;  %v10460_v59 = vmul.f32 -1.442695, %v3290_v14  ;;  %v18001_v35 = vld [vmem:[#allocation133_spill] sm:$0xff] }
 0x78c   :  { %v10462_v50 = vmul.f32 -1.442695, %v3292_v17  ;;  %12264 = vpow2.f32 %v10459_v22  ;;  %v18002_v17 = vld [vmem:[#allocation164_spill] sm:$0xff] }
 0x78d   :  { %12266 = vpow2.f32 %v10461_v23  ;;  %v18003_v23 = vld [vmem:[#allocation134_spill] sm:$0xff] }
 0x78e   :  { %12268 = vpow2.f32 %v10460_v59 }
 0x78f   :  { %12270 = vpow2.f32 %v10462_v50 }
 0x796   :  { %v12265_v42 = vpop.eup %12264 }
 0x797   :  { %v12267_v9 = vpop.eup %12266  ;;  %v3303_v47 = vadd.f32 1.0, %v12265_v42 }
 0x798   :  { %v12269_v26 = vpop.eup %12268  ;;  %v3315_v33 = vadd.f32 1.0, %v12267_v9 }
 0x799   :  { %v12271_v48 = vpop.eup %12270  ;;  %v3304_v13 = vadd.f32 1.0, %v12269_v26  ;;  %12272 = vrcp.f32 %v3303_v47 }
 0x79a   :  { %v3316_v51 = vadd.f32 1.0, %v12271_v48  ;;  %12274 = vrcp.f32 %v3315_v33 }
 0x79b   :  { %12276 = vrcp.f32 %v3304_v13 }
 0x79c   :  { %12278 = vrcp.f32 %v3316_v51 }
 0x7a3   :  { %v12273_v33 = vpop.eup %12272 }
 0x7a4   :  { %v12275_v13 = vpop.eup %12274 }
 0x7c8   :  { %v3241_v7 = vpop.f32.mrb[60].mxu0  ;;  %v3282_v27 = vpop.f32.mrb[92].mxu1 }
 0x7c9   :  { %v3293_v14 = vadd.f32 %v3241_v7, %v18001_v35  ;;  %v3295_v22 = vadd.f32 %v3282_v27, %v18002_v17  ;;  %v3243_v2 = vpop.f32.mrb[61].mxu0  ;;  %v3284_v59 = vpop.f32.mrb[93].mxu1  ;;  %v3335_v17 = vmul.f32 %v12275_v13, %v14333_v4 }
 0x7ca   :  { %v3294_v50 = vadd.f32 %v3243_v2, %v18003_v23  ;;  %v3296_v5 = vadd.f32 %v3284_v59, %v18004_v10  ;;  %v3245_v18 = vpop.f32.mrb[62].mxu0  ;;  %v3286_v42 = vpop.f32.mrb[94].mxu1 }
 0x7cb   :  { %12280 = vtanh.f32 %v3293_v14  ;;  %v10463_v9 = vmul.f32 -1.442695, %v3295_v22  ;;  %v3246_v26 = vpop.f32.mrb[63].mxu0  ;;  %v3287_v48 = vpop.f32.mrb[95].mxu1 }
 0x7cc   :  { %12282 = vtanh.f32 %v3294_v50  ;;  %v10464_v47 = vmul.f32 -1.442695, %v3296_v5  ;;  %v12277_v7 = vpop.eup %12276 }
 0x7cd   :  { %12284 = vpow2.f32 %v10463_v9  ;;  %v12279_v27 = vpop.eup %12278 }
 0x7ce   :  { %12286 = vpow2.f32 %v10464_v47  ;;  %v3336_v23 = vmul.f32 %v12279_v27, %v14335_v29 }
 0x7d5   :  { %v12281_v35 = vpop.eup %12280 }
 0x7d6   :  { %v12283_v51 = vpop.eup %12282  ;;  %v3337_v2 = vmul.f32 %v12281_v35, %v12273_v33 }
 0x7d7   :  { %v12285_v59 = vpop.eup %12284  ;;  %v3338_v14 = vmul.f32 %v12283_v51, %v12277_v7 }
 0x7d8   :  { %v12287_v22 = vpop.eup %12286  ;;  %v14495_v10 = vadd.f32 %v3337_v2, %v3335_v17  ;;  %v3329_v50 = vadd.f32 1.0, %v12285_v59 }
 0x7d9   :  { %v14497_v5 = vadd.f32 %v3338_v14, %v3336_v23  ;;  %v3330_v18 = vadd.f32 1.0, %v12287_v22 }
 0x7da   :  { %12288 = vtanh.f32 %v14495_v10 }
 0x7db   :  { %12290 = vrcp.f32 %v3329_v50 }
 0x7dc   :  { %12292 = vtanh.f32 %v14497_v5 }
 0x7dd   :  { %12294 = vrcp.f32 %v3330_v18 }
 0x7e4   :  { %v12289_v42 = vpop.eup %12288 }
 0x7e5   :  { %v12291_v4 = vpop.eup %12290 }
 0x7e6   :  { %v12293_v9 = vpop.eup %12292  ;;  %v3343_v26 = vmul.f32 %v12291_v4, %v12289_v42 }
 0x7e7   :  { %v12295_v48 = vpop.eup %12294 }
 0x7e8   :  { %v3344_v29 = vmul.f32 %v12295_v48, %v12293_v9  ;;  %v3346_v47 = vcombine.high %v3343_v26, %v3343_v26  ;;  %v3353_v33 = vrot.slane %v3343_v26, %v13689_v28  ;;  %v14505_v2 = vpack.c.bf16 %v3343_v26, %v3343_v26 }
 0x7ea   :  { %v3412_v13 = vcombine.high %v3344_v29, %v3344_v29  ;;  %v3419_v7 = vrot.slane %v3344_v29, %v13689_v28  ;;  %v3478_v27 = vpack.c.bf16 %v3344_v29, %v3344_v29  ;;  %v3360_v35 = vrot.slane %v3346_v47, %v13689_v28  ;;  %10465 = vst.sshfl [vmem:[#allocation2 + $0x5] sm:$0x1 pattern:$0x73625140] %v3353_v33 }
 0x7eb   :  { %v3361_v51 = vcombine.high %v3353_v33, %v3353_v33  ;;  %v3369_v17 = vrot.slane %v3353_v33, %v13689_v28 }
 0x7ec   :  { %v3426_v59 = vrot.slane %v3412_v13, %v13689_v28  ;;  %v3427_v23 = vcombine.high %v3419_v7, %v3419_v7  ;;  %v3435_v14 = vrot.slane %v3419_v7, %v13689_v28  ;;  %10469 = vst.sshfl [vmem:[#allocation2 + $0xa] sm:$0x1 pattern:$0x73625140] %v3419_v7  ;;  %3511 = vmatprep.mubr.bf16.mxu0 %v3478_v27 }
 0x7ed   :  { %3552 = vmatprep.mubr.bf16.mxu1 %v3478_v27  ;;  %10467 = vst.sshfl [vmem:[#allocation2 + $0x45] sm:$0x1 pattern:$0x73625140] %v3360_v35  ;;  %v3362_v22 = vcombine.high %v3360_v35, %v3360_v35  ;;  %v3376_v50 = vrot.slane %v3360_v35, %v13689_v28  ;;  %v3383_v18 = vrot.slane %v3361_v51, %v13689_v28 }
 0x7ee   :  { %v3391_v42 = vcombine.high %v3369_v17, %v3369_v17  ;;  %10466 = vst.sshfl [vmem:[#allocation2 + $0x15] sm:$0x1 pattern:$0x73625140] %v3361_v51  ;;  %3512 = vmatmul.mubr.bf16.vlgmr.msra.gmra.mrb[64].mxu0 %v14505_v2  ;;  %v3428_v4 = vcombine.high %v3426_v59, %v3426_v59  ;;  %v3442_v9 = vrot.slane %v3426_v59, %v13689_v28 }
 0x7ef   :  { %v3449_v26 = vrot.slane %v3427_v23, %v13689_v28  ;;  %v3457_v48 = vcombine.high %v3435_v14, %v3435_v14  ;;  %10470 = vst.sshfl [vmem:[#allocation2 + $0x1a] sm:$0x1 pattern:$0x73625140] %v3427_v23  ;;  %3553 = vmatmul.mubr.bf16.vlgmr.msra.gmra.mrb[96].mxu1 %v14505_v2  ;;  %v3390_v29 = vrot.slane %v3362_v22, %v13689_v28  ;;  %v18007_v23 = vld [vmem:[#allocation80_spill] sm:$0xff]  ;;  %v18008_v14 = vld [vmem:[#allocation103_spill] sm:$0xff] }
 0x7f0   :  { %10471 = vst.sshfl [vmem:[#allocation2 + $0x4a] sm:$0x1 pattern:$0x73625140] %v3426_v59  ;;  %v3392_v47 = vcombine.high %v3376_v50, %v3376_v50  ;;  %v3393_v33 = vcombine.high %v3383_v18, %v3383_v18  ;;  %3405 = vst [vmem:[#allocation2 + $0x25] sm:$0x1] %v3391_v42  ;;  %3562 = vmatpush1.bf16.msra.mxu0 %v17520_v41  ;;  %3603 = vmatpush1.bf16.msra.mxu1 %v13191_v30 }
 0x7f1   :  { %10468 = vst.sshfl [vmem:[#allocation2 + $0x55] sm:$0x1 pattern:$0x73625140] %v3362_v22  ;;  %v3456_v13 = vrot.slane %v3428_v4, %v13689_v28  ;;  %v3458_v7 = vcombine.high %v3442_v9, %v3442_v9  ;;  %v3459_v35 = vcombine.high %v3449_v26, %v3449_v26  ;;  %3471 = vst [vmem:[#allocation2 + $0x2a] sm:$0x1] %v3457_v48  ;;  %3593 = vmatprep.mubr.bf16.mxu0 %v3478_v27 }
 0x7f2   :  { %10472 = vst.sshfl [vmem:[#allocation2 + $0x5a] sm:$0x1 pattern:$0x73625140] %v3428_v4  ;;  %3634 = vmatprep.mubr.bf16.mxu1 %v3478_v27  ;;  %v3394_v51 = vcombine.high %v3390_v29, %v3390_v29  ;;  %3406 = vst [vmem:[#allocation2 + $0x35] sm:$0x1] %v3393_v33  ;;  %3563 = vmatprep.subr.bf16.mxu0 %v17521_v40 }
 0x7f3   :  { %3409 = vst [vmem:[#allocation2 + $0x65] sm:$0x1] %v3392_v47  ;;  %3604 = vmatprep.subr.bf16.mxu1 %v13195_v31  ;;  %v3460_v17 = vcombine.high %v3456_v13, %v3456_v13  ;;  %3472 = vst [vmem:[#allocation2 + $0x3a] sm:$0x1] %v3459_v35  ;;  %v18005_v27 = vld [vmem:[#allocation78_spill] sm:$0xff]  ;;  %v18010_v50 = vld [vmem:[#allocation104_spill] sm:$0xff] }
 0x7f4   :  { %3475 = vst [vmem:[#allocation2 + $0x6a] sm:$0x1] %v3458_v7  ;;  %3410 = vst [vmem:[#allocation2 + $0x75] sm:$0x1] %v3394_v51  ;;  %3564 = vmatpush1.bf16.msra.mxu0 %v17522_v11  ;;  %3605 = vmatpush1.bf16.msra.mxu1 %v13207_v58  ;;  %v18006_v59 = vld [vmem:[#allocation102_spill] sm:$0xff]  ;;  %v18011_v18 = vld [vmem:[#allocation84_spill] sm:$0xff] }
 0x7f5   :  { %3476 = vst [vmem:[#allocation2 + $0x7a] sm:$0x1] %v3460_v17  ;;  %3565 = vmatprep.subr.bf16.mxu0 %v17523_v21  ;;  %3606 = vmatprep.subr.bf16.mxu1 %v13210_v52  ;;  %v18009_v22 = vld [vmem:[#allocation82_spill] sm:$0xff]  ;;  %v18012_v42 = vld [vmem:[#allocation105_spill] sm:$0xff]  ;;  %v18015_v26 = vld [vmem:[#allocation88_spill] sm:$0xff] }
 0x7f6   :  { %v18013_v4 = vld [vmem:[#allocation86_spill] sm:$0xff]  ;;  %v18016_v48 = vld [vmem:[#allocation107_spill] sm:$0xff]  ;;  %v18018_v47 = vld [vmem:[#allocation108_spill] sm:$0xff] }
 0x7f7   :  { %v18014_v9 = vld [vmem:[#allocation106_spill] sm:$0xff]  ;;  %v18019_v33 = vld [vmem:[#allocation92_spill] sm:$0xff]  ;;  %v18020_v13 = vld [vmem:[#allocation109_spill] sm:$0xff] }
 0x7f8   :  { %3566 = vmatpush1.bf16.msra.mxu0 %v17524_v49  ;;  %3607 = vmatpush1.bf16.msra.mxu1 %v13222_v44  ;;  %v18017_v29 = vld [vmem:[#allocation90_spill] sm:$0xff]  ;;  %v18023_v51 = vld [vmem:[#allocation96_spill] sm:$0xff]  ;;  %v18024_v17 = vld [vmem:[#allocation111_spill] sm:$0xff] }
 0x7f9   :  { %3567 = vmatprep.subr.bf16.mxu0 %v17525_v8  ;;  %3608 = vmatprep.subr.bf16.mxu1 %v13225_v61  ;;  %v18021_v7 = vld [vmem:[#allocation94_spill] sm:$0xff] }
 0x7fa   :  { %v18022_v35 = vld [vmem:[#allocation110_spill] sm:$0xff] }
 0x7fc   :  { %3568 = vmatpush1.bf16.msra.mxu0 %v17526_v34  ;;  %3609 = vmatpush1.bf16.msra.mxu1 %v13236_v36 }
 0x7fd   :  { %3569 = vmatprep.subr.bf16.mxu0 %v17527_v54  ;;  %3610 = vmatprep.subr.bf16.mxu1 %v13239_v19 }
 0x800   :  { %3570 = vmatpush1.bf16.msra.mxu0 %v17528_v25  ;;  %3611 = vmatpush1.bf16.msra.mxu1 %v13250_v39 }
 0x801   :  { %3571 = vmatprep.subr.bf16.mxu0 %v17529_v15  ;;  %3612 = vmatprep.subr.bf16.mxu1 %v13253_v63 }
 0x804   :  { %3572 = vmatpush1.bf16.msra.mxu0 %v17530_v3  ;;  %3613 = vmatpush1.bf16.msra.mxu1 %v13264_v60 }
 0x805   :  { %3573 = vmatprep.subr.bf16.mxu0 %v17531_v1  ;;  %3614 = vmatprep.subr.bf16.mxu1 %v13267_v6 }
 0x808   :  { %3574 = vmatpush1.bf16.msra.mxu0 %v17532_v56  ;;  %3615 = vmatpush1.bf16.msra.mxu1 %v13278_v45 }
 0x809   :  { %3575 = vmatprep.subr.bf16.mxu0 %v17533_v37  ;;  %3616 = vmatprep.subr.bf16.mxu1 %v13281_v46 }
 0x80c   :  { %3576 = vmatpush1.bf16.msra.mxu0 %v17534_v32  ;;  %3617 = vmatpush1.bf16.msra.mxu1 %v13292_v53 }
 0x80d   :  { %3577 = vmatprep.subr.bf16.mxu0 %v17535_v57  ;;  %3618 = vmatprep.subr.bf16.mxu1 %v13295_v55 }
 0x810   :  { %3578 = vmatpush1.bf16.msra.mxu0 %v17536_v12  ;;  %3619 = vmatpush1.bf16.msra.mxu1 %v13306_v62 }
 0x811   :  { %3579 = vmatprep.subr.bf16.mxu0 %v17537_v24  ;;  %3620 = vmatprep.subr.bf16.mxu1 %v13309_v0 }
 0x814   :  { %3580 = vmatpush1.bf16.msra.mxu0 %v17538_v38  ;;  %3621 = vmatpush1.bf16.msra.mxu1 %v17620_v20 }
 0x815   :  { %3581 = vmatprep.subr.bf16.mxu0 %v17539_v16  ;;  %3622 = vmatprep.subr.bf16.mxu1 %v17621_v43 }
 0x818   :  { %3582 = vmatpush1.bf16.msra.mxu0 %v18005_v27  ;;  %3623 = vmatpush1.bf16.msra.mxu1 %v18006_v59 }
 0x819   :  { %3583 = vmatprep.subr.bf16.mxu0 %v18007_v23  ;;  %3624 = vmatprep.subr.bf16.mxu1 %v18008_v14 }
 0x81c   :  { %3584 = vmatpush1.bf16.msra.mxu0 %v18009_v22  ;;  %3625 = vmatpush1.bf16.msra.mxu1 %v18010_v50 }
 0x81d   :  { %3585 = vmatprep.subr.bf16.mxu0 %v18011_v18  ;;  %3626 = vmatprep.subr.bf16.mxu1 %v18012_v42 }
 0x820   :  { %3586 = vmatpush1.bf16.msra.mxu0 %v18013_v4  ;;  %3627 = vmatpush1.bf16.msra.mxu1 %v18014_v9  ;;  %v18025_v9 = vld [vmem:[#allocation98_spill] sm:$0xff] }
 0x821   :  { %3587 = vmatprep.subr.bf16.mxu0 %v18015_v26  ;;  %3628 = vmatprep.subr.bf16.mxu1 %v18016_v48  ;;  %v18026_v26 = vld [vmem:[#allocation112_spill] sm:$0xff]  ;;  %v18027_v48 = vld [vmem:[#allocation3_spill] sm:$0xff] }
 0x824   :  { %3588 = vmatpush1.bf16.msra.mxu0 %v18017_v29  ;;  %3629 = vmatpush1.bf16.msra.mxu1 %v18018_v47  ;;  %v18028_v29 = vld [vmem:[#allocation27_spill] sm:$0xff] }
 0x825   :  { %3589 = vmatprep.subr.bf16.mxu0 %v18019_v33  ;;  %3630 = vmatprep.subr.bf16.mxu1 %v18020_v13  ;;  %v18029_v13 = vld [vmem:[#allocation4_spill] sm:$0xff]  ;;  %v18038_v33 = vld [vmem:[#allocation45_spill] sm:$0xff] }
 0x828   :  { %3590 = vmatpush1.bf16.msra.mxu0 %v18021_v7  ;;  %3631 = vmatpush1.bf16.msra.mxu1 %v18022_v35  ;;  %v18030_v7 = vld [vmem:[#allocation37_spill] sm:$0xff] }
 0x829   :  { %3591 = vmatprep.subr.bf16.mxu0 %v18023_v51  ;;  %3632 = vmatprep.subr.bf16.mxu1 %v18024_v17  ;;  %v18031_v35 = vld [vmem:[#allocation5_spill] sm:$0xff]  ;;  %v18032_v51 = vld [vmem:[#allocation39_spill] sm:$0xff]  ;;  %v18033_v17 = vld [vmem:[#allocation6_spill] sm:$0xff] }
 0x82c   :  { %3592 = vmatpush1.bf16.msra.mxu0 %v18025_v9  ;;  %3633 = vmatpush1.bf16.msra.mxu1 %v18026_v26  ;;  %v18034_v9 = vld [vmem:[#allocation41_spill] sm:$0xff]  ;;  %v18035_v26 = vld [vmem:[#allocation7_spill] sm:$0xff] }
 0x82d   :  { %3833 = vmatprep.subr.bf16.mxu0 %v18027_v48  ;;  %3874 = vmatprep.subr.bf16.mxu1 %v18028_v29  ;;  %v18036_v48 = vld [vmem:[#allocation43_spill] sm:$0xff]  ;;  %v18037_v29 = vld [vmem:[#allocation8_spill] sm:$0xff] }
 0x82f   :  { %3594 = vmatmul.mubr.bf16.vlgmr.msra.gmra.mrb[68].mxu0 %v14505_v2  ;;  %3635 = vmatmul.mubr.bf16.vlgmr.msra.gmra.mrb[100].mxu1 %v14505_v2  ;;  %v18039_v2 = vld [vmem:[#allocation9_spill] sm:$0xff] }
 0x830   :  { %3834 = vmatpush1.bf16.msra.mxu0 %v18029_v13  ;;  %3875 = vmatpush1.bf16.msra.mxu1 %v18030_v7  ;;  %v18040_v13 = vld [vmem:[#allocation47_spill] sm:$0xff]  ;;  %v18041_v7 = vld [vmem:[#allocation10_spill] sm:$0xff] }
 0x831   :  { %3835 = vmatprep.subr.bf16.mxu0 %v18031_v35  ;;  %3876 = vmatprep.subr.bf16.mxu1 %v18032_v51  ;;  %v18042_v35 = vld [vmem:[#allocation49_spill] sm:$0xff]  ;;  %v18043_v51 = vld [vmem:[#allocation11_spill] sm:$0xff] }
 0x834   :  { %3836 = vmatpush1.bf16.msra.mxu0 %v18033_v17  ;;  %3877 = vmatpush1.bf16.msra.mxu1 %v18034_v9  ;;  %v18044_v17 = vld [vmem:[#allocation51_spill] sm:$0xff]  ;;  %v18045_v9 = vld [vmem:[#allocation12_spill] sm:$0xff] }
 0x835   :  { %3837 = vmatprep.subr.bf16.mxu0 %v18035_v26  ;;  %3878 = vmatprep.subr.bf16.mxu1 %v18036_v48  ;;  %v18046_v26 = vld [vmem:[#allocation53_spill] sm:$0xff] }
 0x836   :  { %v18047_v48 = vld [vmem:[#allocation13_spill] sm:$0xff] }
 0x838   :  { %3838 = vmatpush1.bf16.msra.mxu0 %v18037_v29  ;;  %3879 = vmatpush1.bf16.msra.mxu1 %v18038_v33  ;;  %v18048_v29 = vld [vmem:[#allocation55_spill] sm:$0xff]  ;;  %v18049_v33 = vld [vmem:[#allocation14_spill] sm:$0xff] }
 0x839   :  { %3839 = vmatprep.subr.bf16.mxu0 %v18039_v2  ;;  %3880 = vmatprep.subr.bf16.mxu1 %v18040_v13  ;;  %v18050_v2 = vld [vmem:[#allocation57_spill] sm:$0xff]  ;;  %v18051_v13 = vld [vmem:[#allocation15_spill] sm:$0xff] }
 0x83c   :  { %3840 = vmatpush1.bf16.msra.mxu0 %v18041_v7  ;;  %3881 = vmatpush1.bf16.msra.mxu1 %v18042_v35  ;;  %v18052_v7 = vld [vmem:[#allocation59_spill] sm:$0xff]  ;;  %v18053_v35 = vld [vmem:[#allocation16_spill] sm:$0xff] }
 0x83d   :  { %3841 = vmatprep.subr.bf16.mxu0 %v18043_v51  ;;  %3882 = vmatprep.subr.bf16.mxu1 %v18044_v17  ;;  %v18054_v51 = vld [vmem:[#allocation61_spill] sm:$0xff] }
 0x83e   :  { %v18055_v17 = vld [vmem:[#allocation17_spill] sm:$0xff] }
 0x840   :  { %3842 = vmatpush1.bf16.msra.mxu0 %v18045_v9  ;;  %3883 = vmatpush1.bf16.msra.mxu1 %v18046_v26  ;;  %v18056_v9 = vld [vmem:[#allocation63_spill] sm:$0xff]  ;;  %v18057_v26 = vld [vmem:[#allocation18_spill] sm:$0xff] }
 0x841   :  { %3843 = vmatprep.subr.bf16.mxu0 %v18047_v48  ;;  %3884 = vmatprep.subr.bf16.mxu1 %v18048_v29  ;;  %v18058_v48 = vld [vmem:[#allocation65_spill] sm:$0xff]  ;;  %v18059_v29 = vld [vmem:[#allocation19_spill] sm:$0xff] }
 0x844   :  { %3844 = vmatpush1.bf16.msra.mxu0 %v18049_v33  ;;  %3885 = vmatpush1.bf16.msra.mxu1 %v18050_v2  ;;  %v18060_v33 = vld [vmem:[#allocation67_spill] sm:$0xff]  ;;  %v18061_v2 = vld [vmem:[#allocation20_spill] sm:$0xff] }
 0x845   :  { %3845 = vmatprep.subr.bf16.mxu0 %v18051_v13  ;;  %3886 = vmatprep.subr.bf16.mxu1 %v18052_v7  ;;  %v18062_v13 = vld [vmem:[#allocation69_spill] sm:$0xff] }
 0x846   :  { %v18063_v7 = vld [vmem:[#allocation21_spill] sm:$0xff] }
 0x848   :  { %3846 = vmatpush1.bf16.msra.mxu0 %v18053_v35  ;;  %3887 = vmatpush1.bf16.msra.mxu1 %v18054_v51  ;;  %v18064_v35 = vld [vmem:[#allocation71_spill] sm:$0xff]  ;;  %v18065_v51 = vld [vmem:[#allocation22_spill] sm:$0xff] }
 0x849   :  { %3847 = vmatprep.subr.bf16.mxu0 %v18055_v17  ;;  %3888 = vmatprep.subr.bf16.mxu1 %v18056_v9  ;;  %v18066_v17 = vld [vmem:[#allocation73_spill] sm:$0xff]  ;;  %v18067_v9 = vld [vmem:[#allocation23_spill] sm:$0xff] }
 0x84c   :  { %3848 = vmatpush1.bf16.msra.mxu0 %v18057_v26  ;;  %3889 = vmatpush1.bf16.msra.mxu1 %v18058_v48  ;;  %v18068_v26 = vld [vmem:[#allocation75_spill] sm:$0xff]  ;;  %v18069_v48 = vld [vmem:[#allocation24_spill] sm:$0xff] }
 0x84d   :  { %3849 = vmatprep.subr.bf16.mxu0 %v18059_v29  ;;  %3890 = vmatprep.subr.bf16.mxu1 %v18060_v33  ;;  %v18070_v29 = vld [vmem:[#allocation77_spill] sm:$0xff] }
 0x84e   :  { %v18071_v33 = vld [vmem:[#allocation25_spill] sm:$0xff] }
 0x850   :  { %3850 = vmatpush1.bf16.msra.mxu0 %v18061_v2  ;;  %3891 = vmatpush1.bf16.msra.mxu1 %v18062_v13  ;;  %v18072_v2 = vld [vmem:[#allocation79_spill] sm:$0xff]  ;;  %v18073_v13 = vld [vmem:[#allocation26_spill] sm:$0xff] }
 0x851   :  { %3851 = vmatprep.subr.bf16.mxu0 %v18063_v7  ;;  %3892 = vmatprep.subr.bf16.mxu1 %v18064_v35  ;;  %v18074_v7 = vld [vmem:[#allocation81_spill] sm:$0xff]  ;;  %v18075_v35 = vld [vmem:[#allocation28_spill] sm:$0xff] }
 0x854   :  { %3852 = vmatpush1.bf16.msra.mxu0 %v18065_v51  ;;  %3893 = vmatpush1.bf16.msra.mxu1 %v18066_v17  ;;  %v18076_v51 = vld [vmem:[#allocation83_spill] sm:$0xff]  ;;  %v18077_v17 = vld [vmem:[#allocation29_spill] sm:$0xff] }
 0x855   :  { %3853 = vmatprep.subr.bf16.mxu0 %v18067_v9  ;;  %3894 = vmatprep.subr.bf16.mxu1 %v18068_v26  ;;  %v18078_v9 = vld [vmem:[#allocation85_spill] sm:$0xff]  ;;  %v18079_v26 = vld [vmem:[#allocation30_spill] sm:$0xff] }
 0x858   :  { %3854 = vmatpush1.bf16.msra.mxu0 %v18069_v48  ;;  %3895 = vmatpush1.bf16.msra.mxu1 %v18070_v29  ;;  %v18080_v48 = vld [vmem:[#allocation87_spill] sm:$0xff] }
 0x859   :  { %3855 = vmatprep.subr.bf16.mxu0 %v18071_v33  ;;  %3896 = vmatprep.subr.bf16.mxu1 %v18072_v2  ;;  %v18081_v29 = vld [vmem:[#allocation31_spill] sm:$0xff]  ;;  %v18082_v33 = vld [vmem:[#allocation89_spill] sm:$0xff]  ;;  %v18083_v2 = vld [vmem:[#allocation32_spill] sm:$0xff] }
 0x85c   :  { %3856 = vmatpush1.bf16.msra.mxu0 %v18073_v13  ;;  %3897 = vmatpush1.bf16.msra.mxu1 %v18074_v7  ;;  %v18084_v13 = vld [vmem:[#allocation91_spill] sm:$0xff]  ;;  %v18085_v7 = vld [vmem:[#allocation33_spill] sm:$0xff] }
 0x85d   :  { %3857 = vmatprep.subr.bf16.mxu0 %v18075_v35  ;;  %3898 = vmatprep.subr.bf16.mxu1 %v18076_v51  ;;  %v18086_v35 = vld [vmem:[#allocation93_spill] sm:$0xff]  ;;  %v18087_v51 = vld [vmem:[#allocation34_spill] sm:$0xff] }
 0x860   :  { %3858 = vmatpush1.bf16.msra.mxu0 %v18077_v17  ;;  %3899 = vmatpush1.bf16.msra.mxu1 %v18078_v9  ;;  %v18088_v17 = vld [vmem:[#allocation95_spill] sm:$0xff] }
 0x861   :  { %3859 = vmatprep.subr.bf16.mxu0 %v18079_v26  ;;  %3900 = vmatprep.subr.bf16.mxu1 %v18080_v48  ;;  %v18089_v9 = vld [vmem:[#allocation35_spill] sm:$0xff]  ;;  %v18090_v26 = vld [vmem:[#allocation97_spill] sm:$0xff]  ;;  %v18091_v48 = vld [vmem:[#allocation36_spill] sm:$0xff] }
 0x864   :  { %3860 = vmatpush1.bf16.msra.mxu0 %v18081_v29  ;;  %3901 = vmatpush1.bf16.msra.mxu1 %v18082_v33  ;;  %v18092_v29 = vld [vmem:[#allocation99_spill] sm:$0xff] }
 0x865   :  { %3861 = vmatprep.subr.bf16.mxu0 %v18083_v2  ;;  %3902 = vmatprep.subr.bf16.mxu1 %v18084_v13  ;;  %v18093_v2 = vld [vmem:[#allocation135_spill] sm:$0xff] }
 0x868   :  { %3862 = vmatpush1.bf16.msra.mxu0 %v18085_v7  ;;  %3903 = vmatpush1.bf16.msra.mxu1 %v18086_v35  ;;  %v18094_v7 = vld [vmem:[#allocation153_spill] sm:$0xff]  ;;  %v18095_v35 = vld [vmem:[#allocation136_spill] sm:$0xff] }
 0x869   :  { %3863 = vmatprep.subr.bf16.mxu0 %v18087_v51  ;;  %3904 = vmatprep.subr.bf16.mxu1 %v18088_v17  ;;  %v18096_v17 = vld [vmem:[#allocation154_spill] sm:$0xff] }
 0x86c   :  { %3864 = vmatpush1.bf16.msra.mxu0 %v18089_v9  ;;  %3905 = vmatpush1.bf16.msra.mxu1 %v18090_v26 }
 0x86d   :  { %3915 = vmatprep.subr.bf16.mxu0 %v18091_v48  ;;  %3956 = vmatprep.subr.bf16.mxu1 %v18092_v29 }
 0x8c1   :  { %v3513_v33 = vpop.f32.mrb[64].mxu0 }
 0x8c2   :  { %v3643_v47 = vadd.f32 %v3513_v33, %v18093_v2  ;;  %v3554_v13 = vpop.f32.mrb[96].mxu1  ;;  %v3515_v4 = vpop.f32.mrb[65].mxu0 }
 0x8c3   :  { %v3645_v42 = vadd.f32 %v3554_v13, %v18094_v7  ;;  %v3644_v18 = vadd.f32 %v3515_v4, %v18095_v35  ;;  %v3556_v51 = vpop.f32.mrb[97].mxu1  ;;  %v3517_v50 = vpop.f32.mrb[66].mxu0 }
 0x8c4   :  { %v3646_v22 = vadd.f32 %v3556_v51, %v18096_v17  ;;  %v3558_v9 = vpop.f32.mrb[98].mxu1  ;;  %v3518_v14 = vpop.f32.mrb[67].mxu0  ;;  %v10473_v23 = vmul.f32 -1.442695, %v3643_v47  ;;  %v18099_v17 = vld [vmem:[#allocation140_spill] sm:$0xff] }
 0x8c5   :  { %v3559_v26 = vpop.f32.mrb[99].mxu1  ;;  %v10475_v48 = vmul.f32 -1.442695, %v3645_v42  ;;  %v10474_v59 = vmul.f32 -1.442695, %v3644_v18  ;;  %v18097_v42 = vld [vmem:[#allocation139_spill] sm:$0xff] }
 0x8c6   :  { %v10476_v29 = vmul.f32 -1.442695, %v3646_v22  ;;  %12296 = vpow2.f32 %v10473_v23  ;;  %v18098_v22 = vld [vmem:[#allocation166_spill] sm:$0xff]  ;;  %v18100_v26 = vld [vmem:[#allocation167_spill] sm:$0xff] }
 0x8c7   :  { %12298 = vpow2.f32 %v10475_v48 }
 0x8c8   :  { %12300 = vpow2.f32 %v10474_v59 }
 0x8c9   :  { %12302 = vpow2.f32 %v10476_v29 }
 0x8d0   :  { %v12297_v33 = vpop.eup %12296 }
 0x8d1   :  { %v12299_v2 = vpop.eup %12298  ;;  %v3657_v4 = vadd.f32 1.0, %v12297_v33 }
 0x8d2   :  { %v12301_v13 = vpop.eup %12300  ;;  %v3669_v35 = vadd.f32 1.0, %v12299_v2 }
 0x8d3   :  { %v12303_v7 = vpop.eup %12302  ;;  %v3658_v50 = vadd.f32 1.0, %v12301_v13  ;;  %12304 = vrcp.f32 %v3657_v4 }
 0x8d4   :  { %v3670_v27 = vadd.f32 1.0, %v12303_v7  ;;  %12306 = vrcp.f32 %v3669_v35 }
 0x8d5   :  { %12308 = vrcp.f32 %v3658_v50 }
 0x8d6   :  { %12310 = vrcp.f32 %v3670_v27 }
 0x8dd   :  { %v12305_v35 = vpop.eup %12304 }
 0x8de   :  { %v12307_v50 = vpop.eup %12306 }
 0x902   :  { %v3595_v14 = vpop.f32.mrb[68].mxu0  ;;  %v3636_v51 = vpop.f32.mrb[100].mxu1 }
 0x903   :  { %v3647_v18 = vadd.f32 %v3595_v14, %v18097_v42  ;;  %v3649_v23 = vadd.f32 %v3636_v51, %v18098_v22  ;;  %v3597_v47 = vpop.f32.mrb[69].mxu0  ;;  %v3638_v59 = vpop.f32.mrb[101].mxu1  ;;  %v3689_v22 = vmul.f32 %v12307_v50, %v14495_v10 }
 0x904   :  { %v3648_v9 = vadd.f32 %v3597_v47, %v18099_v17  ;;  %v3650_v48 = vadd.f32 %v3638_v59, %v18100_v26  ;;  %v3599_v29 = vpop.f32.mrb[70].mxu0  ;;  %v3640_v33 = vpop.f32.mrb[102].mxu1 }
 0x905   :  { %12312 = vtanh.f32 %v3647_v18  ;;  %v10477_v2 = vmul.f32 -1.442695, %v3649_v23  ;;  %v3600_v13 = vpop.f32.mrb[71].mxu0  ;;  %v3641_v7 = vpop.f32.mrb[103].mxu1 }
 0x906   :  { %12314 = vtanh.f32 %v3648_v9  ;;  %v10478_v4 = vmul.f32 -1.442695, %v3650_v48  ;;  %v12309_v14 = vpop.eup %12308 }
 0x907   :  { %12316 = vpow2.f32 %v10477_v2  ;;  %v12311_v51 = vpop.eup %12310 }
 0x908   :  { %12318 = vpow2.f32 %v10478_v4  ;;  %v3690_v17 = vmul.f32 %v12311_v51, %v14497_v5 }
 0x90f   :  { %v12313_v42 = vpop.eup %12312 }
 0x910   :  { %v12315_v27 = vpop.eup %12314  ;;  %v3691_v47 = vmul.f32 %v12313_v42, %v12305_v35 }
 0x911   :  { %v12317_v59 = vpop.eup %12316  ;;  %v3692_v18 = vmul.f32 %v12315_v27, %v12309_v14 }
 0x912   :  { %v12319_v23 = vpop.eup %12318  ;;  %v14657_v26 = vadd.f32 %v3691_v47, %v3689_v22  ;;  %v3683_v9 = vadd.f32 1.0, %v12317_v59 }
 0x913   :  { %v14659_v48 = vadd.f32 %v3692_v18, %v3690_v17  ;;  %v3684_v29 = vadd.f32 1.0, %v12319_v23 }
 0x914   :  { %12320 = vtanh.f32 %v14657_v26 }
 0x915   :  { %12322 = vrcp.f32 %v3683_v9 }
 0x916   :  { %12324 = vtanh.f32 %v14659_v48 }
 0x917   :  { %12326 = vrcp.f32 %v3684_v29 }
 0x91e   :  { %v12321_v33 = vpop.eup %12320 }
 0x91f   :  { %v12323_v10 = vpop.eup %12322 }
 0x920   :  { %v12325_v2 = vpop.eup %12324  ;;  %v3697_v13 = vmul.f32 %v12323_v10, %v12321_v33 }
 0x921   :  { %v12327_v7 = vpop.eup %12326 }
 0x922   :  { %v3698_v5 = vmul.f32 %v12327_v7, %v12325_v2  ;;  %v3700_v4 = vcombine.high %v3697_v13, %v3697_v13  ;;  %v3707_v35 = vrot.slane %v3697_v13, %v13689_v28  ;;  %v14667_v47 = vpack.c.bf16 %v3697_v13, %v3697_v13 }
 0x924   :  { %v3766_v50 = vcombine.high %v3698_v5, %v3698_v5  ;;  %v3773_v14 = vrot.slane %v3698_v5, %v13689_v28  ;;  %v3832_v51 = vpack.c.bf16 %v3698_v5, %v3698_v5  ;;  %v3714_v42 = vrot.slane %v3700_v4, %v13689_v28  ;;  %10479 = vst.sshfl [vmem:[#allocation2 + $0x6] sm:$0x1 pattern:$0x73625140] %v3707_v35 }
 0x925   :  { %v3715_v27 = vcombine.high %v3707_v35, %v3707_v35  ;;  %v3723_v22 = vrot.slane %v3707_v35, %v13689_v28 }
 0x926   :  { %v3780_v59 = vrot.slane %v3766_v50, %v13689_v28  ;;  %v3781_v17 = vcombine.high %v3773_v14, %v3773_v14  ;;  %v3789_v18 = vrot.slane %v3773_v14, %v13689_v28  ;;  %10483 = vst.sshfl [vmem:[#allocation2 + $0x9] sm:$0x1 pattern:$0x73625140] %v3773_v14  ;;  %3865 = vmatprep.mubr.bf16.mxu0 %v3832_v51 }
 0x927   :  { %3906 = vmatprep.mubr.bf16.mxu1 %v3832_v51  ;;  %10481 = vst.sshfl [vmem:[#allocation2 + $0x46] sm:$0x1 pattern:$0x73625140] %v3714_v42  ;;  %v3716_v23 = vcombine.high %v3714_v42, %v3714_v42  ;;  %v3730_v9 = vrot.slane %v3714_v42, %v13689_v28  ;;  %v3737_v29 = vrot.slane %v3715_v27, %v13689_v28 }
 0x928   :  { %v3745_v33 = vcombine.high %v3723_v22, %v3723_v22  ;;  %10480 = vst.sshfl [vmem:[#allocation2 + $0x16] sm:$0x1 pattern:$0x73625140] %v3715_v27  ;;  %3866 = vmatmul.mubr.bf16.vlgmr.msra.gmra.mrb[72].mxu0 %v14667_v47  ;;  %v3782_v10 = vcombine.high %v3780_v59, %v3780_v59  ;;  %v3796_v2 = vrot.slane %v3780_v59, %v13689_v28 }
 0x929   :  { %v3803_v13 = vrot.slane %v3781_v17, %v13689_v28  ;;  %v3811_v7 = vcombine.high %v3789_v18, %v3789_v18  ;;  %10484 = vst.sshfl [vmem:[#allocation2 + $0x19] sm:$0x1 pattern:$0x73625140] %v3781_v17  ;;  %3907 = vmatmul.mubr.bf16.vlgmr.msra.gmra.mrb[104].mxu1 %v14667_v47  ;;  %v3744_v5 = vrot.slane %v3716_v23, %v13689_v28  ;;  %v11322_v17 = vld [vmem:[%s17105_s3 + $0x1d0] ss:$8 sps:$4 sm:$0xff]  }
 0x92a   :  { %10485 = vst.sshfl [vmem:[#allocation2 + $0x49] sm:$0x1 pattern:$0x73625140] %v3780_v59  ;;  %v3746_v4 = vcombine.high %v3730_v9, %v3730_v9  ;;  %v3747_v35 = vcombine.high %v3737_v29, %v3737_v29  ;;  %3759 = vst [vmem:[#allocation2 + $0x26] sm:$0x1] %v3745_v33  ;;  %3916 = vmatpush1.bf16.msra.mxu0 %v17520_v41  ;;  %3957 = vmatpush1.bf16.msra.mxu1 %v13191_v30 }
 0x92b   :  { %10482 = vst.sshfl [vmem:[#allocation2 + $0x56] sm:$0x1 pattern:$0x73625140] %v3716_v23  ;;  %v3810_v50 = vrot.slane %v3782_v10, %v13689_v28  ;;  %v3812_v14 = vcombine.high %v3796_v2, %v3796_v2  ;;  %v3813_v42 = vcombine.high %v3803_v13, %v3803_v13  ;;  %3825 = vst [vmem:[#allocation2 + $0x29] sm:$0x1] %v3811_v7  ;;  %3947 = vmatprep.mubr.bf16.mxu0 %v3832_v51 }
 0x92c   :  { %10486 = vst.sshfl [vmem:[#allocation2 + $0x59] sm:$0x1 pattern:$0x73625140] %v3782_v10  ;;  %3988 = vmatprep.mubr.bf16.mxu1 %v3832_v51  ;;  %v3748_v27 = vcombine.high %v3744_v5, %v3744_v5  ;;  %3760 = vst [vmem:[#allocation2 + $0x36] sm:$0x1] %v3747_v35  ;;  %3917 = vmatprep.subr.bf16.mxu0 %v17521_v40 }
 0x92d   :  { %3763 = vst [vmem:[#allocation2 + $0x66] sm:$0x1] %v3746_v4  ;;  %3958 = vmatprep.subr.bf16.mxu1 %v13195_v31  ;;  %v3814_v22 = vcombine.high %v3810_v50, %v3810_v50  ;;  %3826 = vst [vmem:[#allocation2 + $0x39] sm:$0x1] %v3813_v42  ;;  %v18101_v30 = vld [vmem:[#allocation78_spill] sm:$0xff]  ;;  %v18119_v41 = vld [vmem:[#allocation96_spill] sm:$0xff] }
 0x92e   :  { %3829 = vst [vmem:[#allocation2 + $0x69] sm:$0x1] %v3812_v14  ;;  %3764 = vst [vmem:[#allocation2 + $0x76] sm:$0x1] %v3748_v27  ;;  %3918 = vmatpush1.bf16.msra.mxu0 %v17522_v11  ;;  %3959 = vmatpush1.bf16.msra.mxu1 %v13207_v58  ;;  %v18102_v31 = vld [vmem:[#allocation102_spill] sm:$0xff]  ;;  %v18103_v58 = vld [vmem:[#allocation80_spill] sm:$0xff] }
 0x92f   :  { %3830 = vst [vmem:[#allocation2 + $0x79] sm:$0x1] %v3814_v22  ;;  %3919 = vmatprep.subr.bf16.mxu0 %v17523_v21  ;;  %3960 = vmatprep.subr.bf16.mxu1 %v13210_v52  ;;  %v18104_v52 = vld [vmem:[#allocation103_spill] sm:$0xff]  ;;  %v18121_v11 = vld [vmem:[#allocation98_spill] sm:$0xff]  ;;  %v18122_v21 = vld [vmem:[#allocation112_spill] sm:$0xff] }
 0x930   :  { %v18120_v40 = vld [vmem:[#allocation111_spill] sm:$0xff]  ;;  %v11321_v59 = vld [vmem:[%s17105_s3 + $0xd0] ss:$8 sps:$4 sm:$0xff]  }
 0x931   :  { %v11319_v51 = vld [vmem:[%s17105_s3 + $0x40] ss:$8 sps:$4 sm:$0xff]   ;;  %v11323_v18 = vld [vmem:[%s17105_s3 + $0x50] ss:$8 sps:$4 sm:$0xff]  }
 0x932   :  { %3920 = vmatpush1.bf16.msra.mxu0 %v17524_v49  ;;  %3961 = vmatpush1.bf16.msra.mxu1 %v13222_v44  ;;  %v18105_v44 = vld [vmem:[#allocation82_spill] sm:$0xff]  ;;  %v11301_v49 = vld [vmem:[%s17105_s3 + $0x80] ss:$8 sps:$4 sm:$0xff]   ;;  %v18123_v50 = vld [vmem:[#allocation137_spill] sm:$0xff] }
 0x933   :  { %3921 = vmatprep.subr.bf16.mxu0 %v17525_v8  ;;  %3962 = vmatprep.subr.bf16.mxu1 %v13225_v61  ;;  %v18106_v61 = vld [vmem:[#allocation104_spill] sm:$0xff]  ;;  %v11324_v23 = vld [vmem:[%s17105_s3 + $0x150] ss:$8 sps:$4 sm:$0xff]   ;;  %v18124_v22 = vld [vmem:[#allocation155_spill] sm:$0xff] }
 0x934   :  { %v11302_v8 = vld [vmem:[%s17105_s3 + $0x180] ss:$8 sps:$4 sm:$0xff]   ;;  %v11329_v2 = vld [vmem:[%s17105_s3 + $0xf0] ss:$8 sps:$4 sm:$0xff]  }
 0x935   :  { %v11325_v9 = vld [vmem:[%s17105_s3 + $0xe0] ss:$8 sps:$4 sm:$0xff]   ;;  %v11330_v13 = vld [vmem:[%s17105_s3 + $0x1f0] ss:$8 sps:$4 sm:$0xff]  }
 0x936   :  { %3922 = vmatpush1.bf16.msra.mxu0 %v17526_v34  ;;  %3963 = vmatpush1.bf16.msra.mxu1 %v13236_v36  ;;  %v18107_v36 = vld [vmem:[#allocation84_spill] sm:$0xff]  ;;  %v11331_v7 = vld [vmem:[%s17105_s3 + $0x70] ss:$8 sps:$4 sm:$0xff]  }
 0x937   :  { %3923 = vmatprep.subr.bf16.mxu0 %v17527_v54  ;;  %3964 = vmatprep.subr.bf16.mxu1 %v13239_v19  ;;  %v18108_v19 = vld [vmem:[#allocation105_spill] sm:$0xff]  ;;  %v11303_v34 = vld [vmem:[%s17105_s3] ss:$8 sps:$4 sm:$0xff]  }
 0x938   :  { %v11304_v54 = vld [vmem:[%s17105_s3 + $0x100] ss:$8 sps:$4 sm:$0xff]   ;;  %v11332_v5 = vld [vmem:[%s17105_s3 + $0x170] ss:$8 sps:$4 sm:$0xff]  }
 0x939   :  { %v11326_v29 = vld [vmem:[%s17105_s3 + $0x1e0] ss:$8 sps:$4 sm:$0xff]  }
 0x93a   :  { %3924 = vmatpush1.bf16.msra.mxu0 %v17528_v25  ;;  %3965 = vmatpush1.bf16.msra.mxu1 %v13250_v39  ;;  %v18109_v39 = vld [vmem:[#allocation86_spill] sm:$0xff]  ;;  %v11327_v33 = vld [vmem:[%s17105_s3 + $0x60] ss:$8 sps:$4 sm:$0xff]  }
 0x93b   :  { %3925 = vmatprep.subr.bf16.mxu0 %v17529_v15  ;;  %3966 = vmatprep.subr.bf16.mxu1 %v13253_v63  ;;  %v18110_v63 = vld [vmem:[#allocation106_spill] sm:$0xff]  ;;  %v11328_v10 = vld [vmem:[%s17105_s3 + $0x160] ss:$8 sps:$4 sm:$0xff]  }
 0x93c   :  { %v11305_v25 = vld [vmem:[%s17105_s3 + $0x90] ss:$8 sps:$4 sm:$0xff]  }
 0x93d   :  { %v11306_v15 = vld [vmem:[%s17105_s3 + $0x190] ss:$8 sps:$4 sm:$0xff]  }
 0x93e   :  { %3926 = vmatpush1.bf16.msra.mxu0 %v17530_v3  ;;  %3967 = vmatpush1.bf16.msra.mxu1 %v13264_v60  ;;  %v18111_v60 = vld [vmem:[#allocation88_spill] sm:$0xff]  ;;  %v11307_v3 = vld [vmem:[%s17105_s3 + $0x10] ss:$8 sps:$4 sm:$0xff]  }
 0x93f   :  { %3927 = vmatprep.subr.bf16.mxu0 %v17531_v1  ;;  %3968 = vmatprep.subr.bf16.mxu1 %v13267_v6  ;;  %v18112_v6 = vld [vmem:[#allocation107_spill] sm:$0xff]  ;;  %v11308_v1 = vld [vmem:[%s17105_s3 + $0x110] ss:$8 sps:$4 sm:$0xff]  }
 0x940   :  { %v14842_v4 = vld [vmem:[%s17105_s3 + $0x208] ss:$8 sps:$4 sm:$0xff]  }
 0x942   :  { %3928 = vmatpush1.bf16.msra.mxu0 %v17532_v56  ;;  %3969 = vmatpush1.bf16.msra.mxu1 %v13278_v45  ;;  %v18113_v45 = vld [vmem:[#allocation90_spill] sm:$0xff]  ;;  %v11309_v56 = vld [vmem:[%s17105_s3 + $0xa0] ss:$8 sps:$4 sm:$0xff]  }
 0x943   :  { %3929 = vmatprep.subr.bf16.mxu0 %v17533_v37  ;;  %3970 = vmatprep.subr.bf16.mxu1 %v13281_v46  ;;  %v18114_v46 = vld [vmem:[#allocation108_spill] sm:$0xff] }
 0x944   :  { %v11310_v37 = vld [vmem:[%s17105_s3 + $0x1a0] ss:$8 sps:$4 sm:$0xff]  }
 0x946   :  { %3930 = vmatpush1.bf16.msra.mxu0 %v17534_v32  ;;  %3971 = vmatpush1.bf16.msra.mxu1 %v13292_v53  ;;  %v18115_v53 = vld [vmem:[#allocation92_spill] sm:$0xff] }
 0x947   :  { %3931 = vmatprep.subr.bf16.mxu0 %v17535_v57  ;;  %3972 = vmatprep.subr.bf16.mxu1 %v13295_v55  ;;  %v18116_v55 = vld [vmem:[#allocation109_spill] sm:$0xff]  ;;  %v11311_v32 = vld [vmem:[%s17105_s3 + $0x20] ss:$8 sps:$4 sm:$0xff]  }
 0x948   :  { %v11312_v57 = vld [vmem:[%s17105_s3 + $0x120] ss:$8 sps:$4 sm:$0xff]  }
 0x94a   :  { %3932 = vmatpush1.bf16.msra.mxu0 %v17536_v12  ;;  %3973 = vmatpush1.bf16.msra.mxu1 %v13306_v62  ;;  %v18117_v62 = vld [vmem:[#allocation94_spill] sm:$0xff] }
 0x94b   :  { %3933 = vmatprep.subr.bf16.mxu0 %v17537_v24  ;;  %3974 = vmatprep.subr.bf16.mxu1 %v13309_v0  ;;  %v18118_v0 = vld [vmem:[#allocation110_spill] sm:$0xff] }
 0x94c   :  { %v11313_v12 = vld [vmem:[%s17105_s3 + $0xb0] ss:$8 sps:$4 sm:$0xff]  }
 0x94d   :  { %v11314_v24 = vld [vmem:[%s17105_s3 + $0x1b0] ss:$8 sps:$4 sm:$0xff]  }
 0x94e   :  { %3934 = vmatpush1.bf16.msra.mxu0 %v17538_v38  ;;  %3975 = vmatpush1.bf16.msra.mxu1 %v17620_v20  ;;  %v11315_v38 = vld [vmem:[%s17105_s3 + $0x30] ss:$8 sps:$4 sm:$0xff]   ;;  %v11317_v20 = vld [vmem:[%s17105_s3 + $0xc0] ss:$8 sps:$4 sm:$0xff]  }
 0x94f   :  { %3935 = vmatprep.subr.bf16.mxu0 %v17539_v16  ;;  %3976 = vmatprep.subr.bf16.mxu1 %v17621_v43  ;;  %v11316_v16 = vld [vmem:[%s17105_s3 + $0x130] ss:$8 sps:$4 sm:$0xff]   ;;  %v11318_v43 = vld [vmem:[%s17105_s3 + $0x1c0] ss:$8 sps:$4 sm:$0xff]  }
 0x952   :  { %3936 = vmatpush1.bf16.msra.mxu0 %v18101_v30  ;;  %3977 = vmatpush1.bf16.msra.mxu1 %v18102_v31  ;;  %v18125_v31 = vld [vmem:[#allocation138_spill] sm:$0xff] }
 0x953   :  { %3937 = vmatprep.subr.bf16.mxu0 %v18103_v58  ;;  %3978 = vmatprep.subr.bf16.mxu1 %v18104_v52 }
 0x956   :  { %3938 = vmatpush1.bf16.msra.mxu0 %v18105_v44  ;;  %3979 = vmatpush1.bf16.msra.mxu1 %v18106_v61  ;;  %v18126_v61 = vld [vmem:[#allocation156_spill] sm:$0xff] }
 0x957   :  { %3939 = vmatprep.subr.bf16.mxu0 %v18107_v36  ;;  %3980 = vmatprep.subr.bf16.mxu1 %v18108_v19 }
 0x95a   :  { %3940 = vmatpush1.bf16.msra.mxu0 %v18109_v39  ;;  %3981 = vmatpush1.bf16.msra.mxu1 %v18110_v63 }
 0x95b   :  { %3941 = vmatprep.subr.bf16.mxu0 %v18111_v60  ;;  %3982 = vmatprep.subr.bf16.mxu1 %v18112_v6 }
 0x95e   :  { %3942 = vmatpush1.bf16.msra.mxu0 %v18113_v45  ;;  %3983 = vmatpush1.bf16.msra.mxu1 %v18114_v46 }
 0x95f   :  { %3943 = vmatprep.subr.bf16.mxu0 %v18115_v53  ;;  %3984 = vmatprep.subr.bf16.mxu1 %v18116_v55 }
 0x962   :  { %3944 = vmatpush1.bf16.msra.mxu0 %v18117_v62  ;;  %3985 = vmatpush1.bf16.msra.mxu1 %v18118_v0 }
 0x963   :  { %3945 = vmatprep.subr.bf16.mxu0 %v18119_v41  ;;  %3986 = vmatprep.subr.bf16.mxu1 %v18120_v40 }
 0x966   :  { %3946 = vmatpush1.bf16.msra.mxu0 %v18121_v11  ;;  %3987 = vmatpush1.bf16.msra.mxu1 %v18122_v21 }
 0x967   :  { %11078 = vmatprep.subr.bf16.mxu0 %v11301_v49  ;;  %11118 = vmatprep.subr.bf16.mxu1 %v11302_v8 }
 0x969   :  { %3948 = vmatmul.mubr.bf16.vlgmr.msra.gmra.mrb[76].mxu0 %v14667_v47  ;;  %3989 = vmatmul.mubr.bf16.vlgmr.msra.gmra.mrb[108].mxu1 %v14667_v47  ;;  %v11320_v47 = vld [vmem:[%s17105_s3 + $0x140] ss:$8 sps:$4 sm:$0xff]  }
 0x96a   :  { %11079 = vmatpush3.bf16.msra.mxu0 %v11303_v34  ;;  %11119 = vmatpush3.bf16.msra.mxu1 %v11304_v54  ;;  %v18127_v34 = vld [vmem:[#allocation141_spill] sm:$0xff] }
 0x96b   :  { %11080 = vmatprep.subr.bf16.mxu0 %v11305_v25  ;;  %11120 = vmatprep.subr.bf16.mxu1 %v11306_v15  ;;  %v18128_v25 = vld [vmem:[#allocation168_spill] sm:$0xff] }
 0x96e   :  { %11081 = vmatpush3.bf16.msra.mxu0 %v11307_v3  ;;  %11121 = vmatpush3.bf16.msra.mxu1 %v11308_v1 }
 0x96f   :  { %11082 = vmatprep.subr.bf16.mxu0 %v11309_v56  ;;  %11122 = vmatprep.subr.bf16.mxu1 %v11310_v37  ;;  %v18129_v56 = vld [vmem:[#allocation142_spill] sm:$0xff] }
 0x972   :  { %11083 = vmatpush3.bf16.msra.mxu0 %v11311_v32  ;;  %11123 = vmatpush3.bf16.msra.mxu1 %v11312_v57  ;;  %v18130_v32 = vld [vmem:[#allocation169_spill] sm:$0xff] }
 0x973   :  { %11084 = vmatprep.subr.bf16.mxu0 %v11313_v12  ;;  %11124 = vmatprep.subr.bf16.mxu1 %v11314_v24 }
 0x976   :  { %11085 = vmatpush3.bf16.msra.mxu0 %v11315_v38  ;;  %11125 = vmatpush3.bf16.msra.mxu1 %v11316_v16 }
 0x977   :  { %11086 = vmatprep.subr.bf16.mxu0 %v11317_v20  ;;  %11126 = vmatprep.subr.bf16.mxu1 %v11318_v43 }
 0x97a   :  { %11087 = vmatpush3.bf16.msra.mxu0 %v11319_v51  ;;  %11127 = vmatpush3.bf16.msra.mxu1 %v11320_v47 }
 0x97b   :  { %11088 = vmatprep.subr.bf16.mxu0 %v11321_v59  ;;  %11128 = vmatprep.subr.bf16.mxu1 %v11322_v17 }
 0x97e   :  { %11089 = vmatpush3.bf16.msra.mxu0 %v11323_v18  ;;  %11129 = vmatpush3.bf16.msra.mxu1 %v11324_v23 }
 0x97f   :  { %11090 = vmatprep.subr.bf16.mxu0 %v11325_v9  ;;  %11130 = vmatprep.subr.bf16.mxu1 %v11326_v29 }
 0x982   :  { %11091 = vmatpush3.bf16.msra.mxu0 %v11327_v33  ;;  %11131 = vmatpush3.bf16.msra.mxu1 %v11328_v10 }
 0x983   :  { %11092 = vmatprep.subr.bf16.mxu0 %v11329_v2  ;;  %11132 = vmatprep.subr.bf16.mxu1 %v11330_v13 }
 0x986   :  { %11093 = vmatpush3.bf16.msra.mxu0 %v11331_v7  ;;  %11133 = vmatpush3.bf16.msra.mxu1 %v11332_v5 }
 0x987   :  { %11193 = vmatprep.subr.bf16.mxu0 %v14842_v4 }
 0x9fb   :  { %v3867_v35 = vpop.f32.mrb[72].mxu0 }
 0x9fc   :  { %v3997_v14 = vadd.f32 %v3867_v35, %v18123_v50  ;;  %v3908_v42 = vpop.f32.mrb[104].mxu1  ;;  %v3869_v27 = vpop.f32.mrb[73].mxu0 }
 0x9fd   :  { %v3999_v30 = vadd.f32 %v3908_v42, %v18124_v22  ;;  %v3998_v58 = vadd.f32 %v3869_v27, %v18125_v31  ;;  %v3910_v52 = vpop.f32.mrb[105].mxu1  ;;  %v3871_v44 = vpop.f32.mrb[74].mxu0 }
 0x9fe   :  { %v4000_v36 = vadd.f32 %v3910_v52, %v18126_v61  ;;  %v3912_v19 = vpop.f32.mrb[106].mxu1  ;;  %v3872_v39 = vpop.f32.mrb[75].mxu0  ;;  %v10487_v60 = vmul.f32 -1.442695, %v3997_v14 }
 0x9ff   :  { %v3913_v63 = vpop.f32.mrb[107].mxu1  ;;  %v10489_v6 = vmul.f32 -1.442695, %v3999_v30  ;;  %v10488_v45 = vmul.f32 -1.442695, %v3998_v58  ;;  %v18131_v19 = vlaneseq }
 0xa00   :  { %v10490_v46 = vmul.f32 -1.442695, %v4000_v36  ;;  %12328 = vpow2.f32 %v10487_v60  ;;  %v18132_v63 = vld [vmem:[#allocation113_spill] sm:$0xff] }
 0xa01   :  { %12330 = vpow2.f32 %v10489_v6  ;;  %v14860_v39 = vand.u32 127, %v18131_v19  ;;  %v5078_v60 = vadd.s32 100, %v18132_v63  ;;  %v18133_v63 = vld [vmem:[#allocation114_spill] sm:$0xff] }
 0xa02   :  { %12332 = vpow2.f32 %v10488_v45 }
 0xa03   :  { %12334 = vpow2.f32 %v10490_v46  ;;  %vm5079_vm1 = vcmp.eq.s32.totalorder %v14860_v39, %v5078_v60  ;;  %vm5099_vm3 = vcmp.eq.s32.totalorder %v14860_v39, 108  ;;  %vm5173_vm4 = vcmp.eq.s32.totalorder %v14860_v39, 109  ;;  %v11339_v39 = vld [vmem:[%s17106_s2 + $0x4] ss:$16 sps:$4 sm:$0xff]  }
 0xa0a   :  { %v12329_v53 = vpop.eup %12328 }
 0xa0b   :  { %v12331_v55 = vpop.eup %12330  ;;  %v4011_v41 = vadd.f32 1.0, %v12329_v53 }
 0xa0c   :  { %v12333_v62 = vpop.eup %12332  ;;  %v4023_v40 = vadd.f32 1.0, %v12331_v55 }
 0xa0d   :  { %v12335_v0 = vpop.eup %12334  ;;  %v4012_v11 = vadd.f32 1.0, %v12333_v62  ;;  %12336 = vrcp.f32 %v4011_v41 }
 0xa0e   :  { %v4024_v21 = vadd.f32 1.0, %v12335_v0  ;;  %12338 = vrcp.f32 %v4023_v40 }
 0xa0f   :  { %12340 = vrcp.f32 %v4012_v11 }
 0xa10   :  { %12342 = vrcp.f32 %v4024_v21 }
 0xa17   :  { %v12337_v51 = vpop.eup %12336 }
 0xa18   :  { %v12339_v47 = vpop.eup %12338 }
 0xa19   :  { %v12341_v59 = vpop.eup %12340  ;;  %v4043_v9 = vmul.f32 %v12339_v47, %v14657_v26 }
 0xa1a   :  { %v12343_v17 = vpop.eup %12342 }
 0xa1b   :  { %v4044_v10 = vmul.f32 %v12343_v17, %v14659_v48 }
 0xa3c   :  { %v3949_v49 = vpop.f32.mrb[76].mxu0  ;;  %v3990_v8 = vpop.f32.mrb[108].mxu1 }
 0xa3d   :  { %v4001_v54 = vadd.f32 %v3949_v49, %v18127_v34  ;;  %v4003_v15 = vadd.f32 %v3990_v8, %v18128_v25  ;;  %v3951_v3 = vpop.f32.mrb[77].mxu0  ;;  %v3992_v1 = vpop.f32.mrb[109].mxu1 }
 0xa3e   :  { %v4002_v37 = vadd.f32 %v3951_v3, %v18129_v56  ;;  %v4004_v57 = vadd.f32 %v3992_v1, %v18130_v32  ;;  %v3953_v12 = vpop.f32.mrb[78].mxu0  ;;  %v3994_v24 = vpop.f32.mrb[110].mxu1  ;;  %v12398_v32 = vmov 0.0  }
 0xa3f   :  { %12344 = vtanh.f32 %v4001_v54  ;;  %v10491_v38 = vmul.f32 -1.442695, %v4003_v15  ;;  %v3954_v16 = vpop.f32.mrb[79].mxu0  ;;  %v3995_v20 = vpop.f32.mrb[111].mxu1 }
 0xa40   :  { %12346 = vtanh.f32 %v4002_v37  ;;  %v10492_v43 = vmul.f32 -1.442695, %v4004_v57  ;;  %v14873_v57 = vsel %vm5079_vm1, 1.0, %v12398_v32 }
 0xa41   :  { %12348 = vpow2.f32 %v10491_v38 }
 0xa42   :  { %12350 = vpow2.f32 %v10492_v43 }
 0xa49   :  { %v12345_v18 = vpop.eup %12344 }
 0xa4a   :  { %v12347_v23 = vpop.eup %12346  ;;  %v4045_v29 = vmul.f32 %v12345_v18, %v12337_v51 }
 0xa4b   :  { %v12349_v33 = vpop.eup %12348  ;;  %v4046_v2 = vmul.f32 %v12347_v23, %v12341_v59 }
 0xa4c   :  { %v12351_v13 = vpop.eup %12350  ;;  %v4047_v7 = vadd.f32 %v4045_v29, %v4043_v9  ;;  %v4037_v5 = vadd.f32 1.0, %v12349_v33  ;;  %v11334_v29 = vld [vmem:[%s17105_s3 + $0x218] ss:$8 sps:$4 sm:$0xff]  }
 0xa4d   :  { %v4048_v35 = vadd.f32 %v4046_v2, %v4044_v10  ;;  %v4038_v50 = vadd.f32 1.0, %v12351_v13 }
 0xa4e   :  { %12352 = vtanh.f32 %v4047_v7 }
 0xa4f   :  { %12354 = vrcp.f32 %v4037_v5 }
 0xa50   :  { %12356 = vtanh.f32 %v4048_v35 }
 0xa51   :  { %12358 = vrcp.f32 %v4038_v50  ;;  %v11335_v50 = vld [vmem:[%s17105_s3 + $0x228] ss:$8 sps:$4 sm:$0xff]  }
 0xa58   :  { %v12353_v14 = vpop.eup %12352 }
 0xa59   :  { %v12355_v42 = vpop.eup %12354 }
 0xa5a   :  { %v12357_v27 = vpop.eup %12356  ;;  %v4051_v22 = vmul.f32 %v12355_v42, %v12353_v14 }
 0xa5b   :  { %v12359_v30 = vpop.eup %12358 }
 0xa5c   :  { %v4054_v26 = vcombine.high %v4051_v22, %v4051_v22  ;;  %v4061_v31 = vrot.slane %v4051_v22, %v13689_v28  ;;  %v4052_v58 = vmul.f32 %v12359_v30, %v12357_v27 }
 0xa5e   :  { %v4068_v48 = vrot.slane %v4054_v26, %v13689_v28  ;;  %v4069_v52 = vcombine.high %v4061_v31, %v4061_v31  ;;  %v4077_v44 = vrot.slane %v4061_v31, %v13689_v28  ;;  %10493 = vst.sshfl [vmem:[#allocation2 + $0x7] sm:$0x1 pattern:$0x73625140] %v4061_v31  ;;  %v4120_v61 = vcombine.high %v4052_v58, %v4052_v58 }
 0xa5f   :  { %v4127_v36 = vrot.slane %v4052_v58, %v13689_v28 }
 0xa60   :  { %v4070_v6 = vcombine.high %v4068_v48, %v4068_v48  ;;  %v4084_v45 = vrot.slane %v4068_v48, %v13689_v28  ;;  %v4091_v46 = vrot.slane %v4069_v52, %v13689_v28  ;;  %v4099_v53 = vcombine.high %v4077_v44, %v4077_v44  ;;  %10494 = vst.sshfl [vmem:[#allocation2 + $0x17] sm:$0x1 pattern:$0x73625140] %v4069_v52  ;;  %v4779_v52 = vld [vmem:[%s17105_s3 + $0x200] sm:$0x1] }
 0xa61   :  { %10495 = vst.sshfl [vmem:[#allocation2 + $0x47] sm:$0x1 pattern:$0x73625140] %v4068_v48  ;;  %v4134_v55 = vrot.slane %v4120_v61, %v13689_v28  ;;  %v4135_v62 = vcombine.high %v4127_v36, %v4127_v36  ;;  %v4143_v0 = vrot.slane %v4127_v36, %v13689_v28  ;;  %v4780_v44 = vunpack.c.l.bf16 %v4779_v52 }
 0xa62   :  { %10497 = vst.sshfl [vmem:[#allocation2 + $0x8] sm:$0x1 pattern:$0x73625140] %v4127_v36  ;;  %v4098_v41 = vrot.slane %v4070_v6, %v13689_v28  ;;  %v4100_v40 = vcombine.high %v4084_v45, %v4084_v45  ;;  %v4101_v11 = vcombine.high %v4091_v46, %v4091_v46  ;;  %4113 = vst [vmem:[#allocation2 + $0x27] sm:$0x1] %v4099_v53 }
 0xa63   :  { %10496 = vst.sshfl [vmem:[#allocation2 + $0x57] sm:$0x1 pattern:$0x73625140] %v4070_v6  ;;  %v4136_v21 = vcombine.high %v4134_v55, %v4134_v55  ;;  %v4150_v49 = vrot.slane %v4134_v55, %v13689_v28  ;;  %v4157_v8 = vrot.slane %v4135_v62, %v13689_v28  ;;  %v4165_v34 = vcombine.high %v4143_v0, %v4143_v0 }
 0xa64   :  { %10498 = vst.sshfl [vmem:[#allocation2 + $0x18] sm:$0x1 pattern:$0x73625140] %v4135_v62  ;;  %v4102_v54 = vcombine.high %v4098_v41, %v4098_v41  ;;  %4114 = vst [vmem:[#allocation2 + $0x37] sm:$0x1] %v4101_v11  ;;  %v14932_v60 = vrot.slane %v4780_v44, %v18133_v63 }
 0xa65   :  { %10499 = vst.sshfl [vmem:[#allocation2 + $0x48] sm:$0x1 pattern:$0x73625140] %v4134_v55  ;;  %4117 = vst [vmem:[#allocation2 + $0x67] sm:$0x1] %v4100_v40  ;;  %v4164_v25 = vrot.slane %v4136_v21, %v13689_v28  ;;  %v4166_v15 = vcombine.high %v4150_v49, %v4150_v49  ;;  %v4167_v3 = vcombine.high %v4157_v8, %v4157_v8 }
 0xa66   :  { %4179 = vst [vmem:[#allocation2 + $0x28] sm:$0x1] %v4165_v34  ;;  %10500 = vst.sshfl [vmem:[#allocation2 + $0x58] sm:$0x1 pattern:$0x73625140] %v4136_v21 }
 0xa67   :  { %4118 = vst [vmem:[#allocation2 + $0x77] sm:$0x1] %v4102_v54  ;;  %v4168_v1 = vcombine.high %v4164_v25, %v4164_v25  ;;  %4180 = vst [vmem:[#allocation2 + $0x38] sm:$0x1] %v4167_v3  ;;  %v4187_v56 = vld [vmem:[#allocation2 + $0x10] sm:$0xff]  ;;  %v14887_v17 = vld [vmem:[#allocation2] sm:$0xff] }
 0xa68   :  { %4183 = vst [vmem:[#allocation2 + $0x68] sm:$0x1] %v4166_v15  ;;  %v4193_v37 = vld [vmem:[#allocation2 + $0x40] sm:$0xff]  ;;  %v14876_v12 = vadd.f32 %v14873_v57, %v4187_v56  ;;  %v4201_v9 = vpack.c.bf16 %v4187_v56, %v14887_v17 }
 0xa69   :  { %v14879_v24 = vadd.f32 %v14873_v57, %v4193_v37  ;;  %4184 = vst [vmem:[#allocation2 + $0x78] sm:$0x1] %v4168_v1  ;;  %v4189_v38 = vld [vmem:[#allocation2 + $0x20] sm:$0xff]  ;;  %v4186_v20 = vld [vmem:[#allocation2 + $0x8] sm:$0xff] }
 0xa6a   :  { %v4195_v16 = vld [vmem:[#allocation2 + $0x50] sm:$0xff]  ;;  %v14882_v51 = vadd.f32 %v14873_v57, %v4189_v38 }
 0xa6b   :  { %v4188_v43 = vld [vmem:[#allocation2 + $0x18] sm:$0xff]  ;;  %v14885_v47 = vadd.f32 %v14873_v57, %v4195_v16  ;;  %v4191_v18 = vld [vmem:[#allocation2 + $0x30] sm:$0xff]  ;;  %v4205_v26 = vpack.c.bf16 %v4195_v16, %v4193_v37 }
 0xa6c   :  { %v4202_v59 = vpack.c.bf16 %v4188_v43, %v4186_v20  ;;  %5317 = vmatprep.subr.mxu1 %v4188_v43  ;;  %v4197_v23 = vld [vmem:[#allocation2 + $0x60] sm:$0xff]  ;;  %v14894_v33 = vadd.f32 %v14873_v57, %v4191_v18  ;;  %v4203_v42 = vpack.c.bf16 %v4191_v18, %v4189_v38  ;;  %v14914_v27 = vld [vmem:[#allocation2 + $0x48] sm:$0xff] }
 0xa6d   :  { %v14897_v10 = vadd.f32 %v14873_v57, %v4197_v23  ;;  %v14899_v13 = vld [vmem:[#allocation2 + $0x28] sm:$0xff]  ;;  %v14912_v14 = vld [vmem:[#allocation2 + $0x58] sm:$0xff] }
 0xa6e   :  { %4369 = vmatprep.mubr.bf16.mxu0 %v4202_v59  ;;  %4923 = vmatprep.mubr.bf16.mxu1 %v4202_v59  ;;  %v4199_v2 = vld [vmem:[#allocation2 + $0x70] sm:$0xff]  ;;  %v14901_v7 = vld [vmem:[#allocation2 + $0x38] sm:$0xff]  ;;  %v4206_v22 = vpack.c.bf16 %v14912_v14, %v14914_v27 }
 0xa6f   :  { %4370 = vmatmul.mubr.bf16.vlgmr.msra.gmra.mrb[80].mxu0 %v4201_v9  ;;  %4924 = vmatmul.mubr.bf16.vlgmr.msra.gmra.mrb[112].mxu1 %v4201_v9  ;;  %v14904_v5 = vadd.f32 %v14873_v57, %v4199_v2  ;;  %v4204_v35 = vpack.c.bf16 %v14901_v7, %v14899_v13  ;;  %v14923_v31 = vld [vmem:[#allocation2 + $0x68] sm:$0xff]  ;;  %v4207_v48 = vpack.c.bf16 %v4199_v2, %v4197_v23 }
 0xa70   :  { %11194 = vmatpush3.bf16.msra.mxu0 %v14842_v4  ;;  %v11336_v4 = vld [vmem:[%s17105_s3 + $0x238] ss:$8 sps:$4 sm:$0xff]  }
 0xa71   :  { %11195 = vmatprep.subr.bf16.mxu0 %v11334_v29  ;;  %4377 = vmatprep.mubr.bf16.mxu0 %v4204_v35  ;;  %v14921_v30 = vld [vmem:[#allocation2 + $0x78] sm:$0xff] }
 0xa72   :  { %4931 = vmatprep.mubr.bf16.mxu1 %v4204_v35  ;;  %v4208_v58 = vpack.c.bf16 %v14921_v30, %v14923_v31 }
 0xa74   :  { %11196 = vmatpush3.bf16.msra.mxu0 %v11334_v29 }
 0xa75   :  { %11197 = vmatprep.subr.bf16.mxu0 %v11335_v50 }
 0xa77   :  { %4378 = vmatmul.mubr.bf16.gmra.mrb[84].mxu0 %v4203_v42  ;;  %4932 = vmatmul.mubr.bf16.gmra.mrb[116].mxu1 %v4203_v42 }
 0xa78   :  { %11198 = vmatpush3.bf16.msra.mxu0 %v11335_v50  ;;  %4385 = vmatprep.mubr.bf16.mxu0 %v4206_v22 }
 0xa79   :  { %4939 = vmatprep.mubr.bf16.mxu1 %v4206_v22  ;;  %11199 = vmatprep.subr.bf16.mxu0 %v11336_v4 }
 0xa7c   :  { %11200 = vmatpush3.bf16.msra.mxu0 %v11336_v4 }
 0xa7d   :  { %5243 = vmatprep.subr.mxu0 %v4186_v20 }
 0xa7f   :  { %4386 = vmatmul.mubr.bf16.gmra.mrb[88].mxu0 %v4205_v26  ;;  %4940 = vmatmul.mubr.bf16.gmra.mrb[120].mxu1 %v4205_v26 }
 0xa80   :  { %4393 = vmatprep.mubr.bf16.mxu0 %v4208_v58  ;;  %4947 = vmatprep.mubr.bf16.mxu1 %v4208_v58 }
 0xa87   :  { %4394 = vmatmul.mubr.bf16.gmra.mrb[92].mxu0 %v4207_v48  ;;  %4948 = vmatmul.mubr.bf16.gmra.mrb[124].mxu1 %v4207_v48 }
 0xa88   :  { %5381 = vmatprep.mubr.f32.mxu1 %v12398_v32 }
 0xb42   :  { %v11094_v61 = vpop.f32.mrb[80].mxu0  ;;  %v11134_v36 = vpop.f32.mrb[112].mxu1 }
 0xb43   :  { %v11095_v6 = vpop.f32.mrb[81].mxu0  ;;  %v11135_v45 = vpop.f32.mrb[113].mxu1 }
 0xb44   :  { %v11136_v46 = vadd.f32 %v11135_v45, %v11134_v36  ;;  %v11097_v53 = vpop.f32.mrb[82].mxu0  ;;  %v11137_v55 = vpop.f32.mrb[114].mxu1  ;;  %v11096_v62 = vadd.f32 %v11095_v6, %v11094_v61 }
 0xb45   :  { %v11098_v0 = vpop.f32.mrb[83].mxu0  ;;  %v11138_v41 = vpop.f32.mrb[115].mxu1 }
 0xb46   :  { %v4926_v40 = vadd.f32 %v11136_v46, %v14932_v60  ;;  %v11139_v11 = vadd.f32 %v11138_v41, %v11137_v55  ;;  %4402 = vxpose.xlu1.b32.start.end [1/1] (short) (narrow) %v11096_v62, 8  ;;  %v11099_v21 = vadd.f32 %v11098_v0, %v11097_v53 }
 0xb48   :  { %v4929_v49 = vadd.f32 %v11139_v11, %v14932_v60  ;;  %4434 = vxpose.xlu0.b32.start.end [1/1] (short) (narrow) %v11099_v21, 8  ;;  %v4956_v8 = vmax.f32 %v4926_v40, 0.0 }
 0xb4a   :  { %v4957_v34 = vmax.f32 %v4929_v49, 0.0  ;;  %v11100_v54 = vpop.f32.mrb[84].mxu0  ;;  %v11140_v25 = vpop.f32.mrb[116].mxu1 }
 0xb4b   :  { %v11101_v15 = vpop.f32.mrb[85].mxu0  ;;  %v11141_v3 = vpop.f32.mrb[117].mxu1 }
 0xb4c   :  { %v4964_v1 = vpack.c.bf16 %v4957_v34, %v4956_v8  ;;  %v11102_v56 = vadd.f32 %v11101_v15, %v11100_v54  ;;  %v11142_v37 = vadd.f32 %v11141_v3, %v11140_v25  ;;  %v11103_v38 = vpop.f32.mrb[86].mxu0  ;;  %v11143_v16 = vpop.f32.mrb[118].mxu1 }
 0xb4d   :  { %v11104_v20 = vpop.f32.mrb[87].mxu0  ;;  %v11144_v43 = vpop.f32.mrb[119].mxu1 }
 0xb4e   :  { %v4934_v59 = vadd.f32 %v11142_v37, %v14932_v60  ;;  %v11105_v18 = vadd.f32 %v11104_v20, %v11103_v38  ;;  %v11145_v23 = vadd.f32 %v11144_v43, %v11143_v16  ;;  %4466 = vxpose.xlu0.b32.start.end [1/1] (short) (narrow) %v11102_v56, 8  ;;  %11201 = vmatprep.mubr.msk.bf16.mxu0 %vm410_vm0, %v4964_v1  ;;  %v18134_v20 = vmov 0  }
 0xb4f   :  { %v12399_v43 = vmov 1  }
 0xb50   :  { %v4937_v9 = vadd.f32 %v11145_v23, %v14932_v60  ;;  %4498 = vxpose.xlu1.b32.start.end [1/1] (short) (narrow) %v11105_v18, 8  ;;  %v4958_v29 = vmax.f32 %v4934_v59, 0.0 }
 0xb52   :  { %v4959_v2 = vmax.f32 %v4937_v9, 0.0  ;;  %v11106_v35 = vpop.f32.mrb[88].mxu0  ;;  %v11146_v50 = vpop.f32.mrb[120].mxu1 }
 0xb53   :  { %v11107_v42 = vpop.f32.mrb[89].mxu0  ;;  %v11147_v4 = vpop.f32.mrb[121].mxu1 }
 0xb54   :  { %v4965_v22 = vpack.c.bf16 %v4959_v2, %v4958_v29  ;;  %v11108_v26 = vadd.f32 %v11107_v42, %v11106_v35  ;;  %v11148_v58 = vadd.f32 %v11147_v4, %v11146_v50  ;;  %v11109_v48 = vpop.f32.mrb[90].mxu0  ;;  %v11149_v52 = vpop.f32.mrb[122].mxu1 }
 0xb55   :  { %v11110_v44 = vpop.f32.mrb[91].mxu0  ;;  %v11150_v61 = vpop.f32.mrb[123].mxu1 }
 0xb56   :  { %v4942_v36 = vadd.f32 %v11148_v58, %v14932_v60  ;;  %v11111_v6 = vadd.f32 %v11110_v44, %v11109_v48  ;;  %v11151_v45 = vadd.f32 %v11150_v61, %v11149_v52  ;;  %4530 = vxpose.xlu0.b32.start.end [1/1] (short) (narrow) %v11108_v26, 8  ;;  %11202 = vmatmul.mubr.msk.bf16.vlgmr.msra.gmra.mrb[96].mxu0 %vm410_vm0, %v4965_v22  ;;  %v4789_v44 = vld [vmem:[%s17105_s3 + $0x248] sm:$0x1] }
 0xb57   :  { %v4790_v61 = vunpack.c.l.bf16 %v4789_v44 }
 0xb58   :  { %v4945_v46 = vadd.f32 %v11151_v45, %v14932_v60  ;;  %4562 = vxpose.xlu1.b32.start.end [1/1] (short) (narrow) %v11111_v6, 8  ;;  %v4960_v53 = vmax.f32 %v4942_v36, 0.0 }
 0xb59   :  { %v4971_v36 = vrot.slane %v4790_v61, %v18133_v63 }
 0xb5a   :  { %v4961_v55 = vmax.f32 %v4945_v46, 0.0  ;;  %v11112_v62 = vpop.f32.mrb[92].mxu0  ;;  %v11152_v0 = vpop.f32.mrb[124].mxu1 }
 0xb5b   :  { %v11113_v41 = vpop.f32.mrb[93].mxu0  ;;  %v11153_v40 = vpop.f32.mrb[125].mxu1 }
 0xb5c   :  { %v4966_v11 = vpack.c.bf16 %v4961_v55, %v4960_v53  ;;  %v11114_v21 = vadd.f32 %v11113_v41, %v11112_v62  ;;  %v11154_v49 = vadd.f32 %v11153_v40, %v11152_v0  ;;  %v11115_v8 = vpop.f32.mrb[94].mxu0  ;;  %v11155_v34 = vpop.f32.mrb[126].mxu1 }
 0xb5d   :  { %v11116_v54 = vpop.f32.mrb[95].mxu0  ;;  %v11156_v25 = vpop.f32.mrb[127].mxu1 }
 0xb5e   :  { %v4950_v15 = vadd.f32 %v11154_v49, %v14932_v60  ;;  %v11117_v3 = vadd.f32 %v11116_v54, %v11115_v8  ;;  %v11157_v1 = vadd.f32 %v11156_v25, %v11155_v34  ;;  %11205 = vmatprep.mubr.msk.bf16.mxu0 %vm410_vm0, %v4966_v11  ;;  %4594 = vxpose.xlu0.b32.start.end [1/1] (short) (narrow) %v11114_v21, 8 }
 0xb60   :  { %v4953_v56 = vadd.f32 %v11157_v1, %v14932_v60  ;;  %4626 = vxpose.xlu1.b32.start.end [1/1] (short) (narrow) %v11117_v3, 8  ;;  %v4962_v37 = vmax.f32 %v4950_v15, 0.0 }
 0xb62   :  { %v4963_v38 = vmax.f32 %v4953_v56, 0.0 }
 0xb64   :  { %v4967_v16 = vpack.c.bf16 %v4963_v38, %v4962_v37 }
 0xb66   :  { %11206 = vmatmul.mubr.msk.bf16.gmra.mrb[100].mxu0 %vm410_vm0, %v4967_v16 }
 0xb67   :  { %5307 = vmatprep.mubr.f32.mxu0 %v12398_v32 }
 0xb7e   :  { %11284 = vset.pattern.permute.xlu1 %v18134_v20 }
 0xb87   :  { %11289 = vset.pattern.permute.xlu0 %v12399_v43 }
 0xbc6   :  { %v4418_v59 = vpop.trf.xlu1 }
 0xbc7   :  { %v4659_v18 = vsel %vm4658_vm2, %v4418_v59, -inf }
 0xbc8   :  { %v4450_v23 = vpop.trf.xlu0  ;;  %4660 = vmax.xlane.f32.xlu1 %v4659_v18 }
 0xbc9   :  { %v4662_v60 = vsel %vm4658_vm2, %v4450_v23, -inf }
 0xbca   :  { %4663 = vmax.xlane.f32.xlu0 %v4662_v60 }
 0xbce   :  { %v4482_v9 = vpop.trf.xlu0 }
 0xbcf   :  { %v4665_v29 = vsel %vm4658_vm2, %v4482_v9, -inf }
 0xbd0   :  { %4666 = vmax.xlane.f32.xlu1 %v4665_v29  ;;  %v4514_v2 = vpop.trf.xlu1 }
 0xbd1   :  { %v4668_v35 = vsel %vm4658_vm2, %v4514_v2, -inf }
 0xbd4   :  { %4669 = vmax.xlane.f32.xlu1 %v4668_v35 }
 0xbd6   :  { %v14953_v50 = vpop.trf.xlu0 }
 0xbd7   :  { %v4671_v42 = vsel %vm4658_vm2, %v14953_v50, -inf }
 0xbd8   :  { %v14957_v4 = vpop.trf.xlu1  ;;  %4672 = vmax.xlane.f32.xlu0 %v4671_v42 }
 0xbd9   :  { %v4674_v22 = vsel %vm4658_vm2, %v14957_v4, -inf }
 0xbda   :  { %4675 = vmax.xlane.f32.xlu1 %v4674_v22 }
 0xbde   :  { %v14961_v26 = vpop.trf.xlu0 }
 0xbdf   :  { %v4677_v58 = vsel %vm4658_vm2, %v14961_v26, -inf }
 0xbe0   :  { %v14965_v48 = vpop.trf.xlu1  ;;  %4678 = vmax.xlane.f32.xlu0 %v4677_v58 }
 0xbe1   :  { %v4680_v52 = vsel %vm4658_vm2, %v14965_v48, -inf }
 0xbe2   :  { %4681 = vmax.xlane.f32.xlu1 %v4680_v52 }
 0xc29   :  { %v11203_v6 = vpop.f32.mrb[96].mxu0 }
 0xc2a   :  { %v5051_v45 = vadd.f32 %v11203_v6, %v4971_v36  ;;  %v5042_v46 = vpop.f32.mrb[97].mxu0 }
 0xc2b   :  { %v11204_v53 = vpop.f32.mrb[98].mxu0  ;;  %v5043_v62 = vadd.f32 %v5042_v46, %v4971_v36 }
 0xc2c   :  { %v5045_v55 = vpop.f32.mrb[99].mxu0  ;;  %5113 = vperm.xlu1 %11284, %v5051_v45   ;;  %v5054_v54 = vadd.f32 %v11204_v53, %v4971_v36 }
 0xc2d   :  { %v5046_v25 = vadd.f32 %v5045_v55, %v4971_v36 }
 0xc30   :  { %11285 = vset.pattern.permute.xlu1 %v12399_v43 }
 0xc31   :  { %5184 = vperm.xlu1 %11285, %v5051_v45  }
 0xc35   :  { %11286 = vset.pattern.permute.xlu1 %v18134_v20 }
 0xc36   :  { %5103 = vperm.xlu1 %11286, %v5043_v62  }
 0xc39   :  { %v11207_v0 = vpop.f32.mrb[100].mxu0 }
 0xc3a   :  { %v14975_v41 = vadd.f32 %v11207_v0, %v4971_v36  ;;  %v5058_v40 = vpop.f32.mrb[101].mxu0  ;;  %11287 = vset.pattern.permute.xlu1 %v12399_v43 }
 0xc3b   :  { %v14978_v11 = vadd.f32 %v5058_v40, %v4971_v36  ;;  %v11208_v21 = vpop.f32.mrb[102].mxu0  ;;  %5176 = vperm.xlu1 %11287, %v5043_v62  }
 0xc3c   :  { %v14980_v49 = vadd.f32 %v11208_v21, %v4971_v36  ;;  %v5061_v8 = vpop.f32.mrb[103].mxu0 }
 0xc3d   :  { %v5062_v34 = vadd.f32 %v5061_v8, %v4971_v36 }
 0xc3f   :  { %11288 = vset.pattern.permute.xlu1 %v18134_v20 }
 0xc40   :  { %5118 = vperm.xlu1 %11288, %v5054_v54  }
 0xc44   :  { %11291 = vset.pattern.permute.xlu1 %v12399_v43 }
 0xc45   :  { %5180 = vperm.xlu1 %11291, %v5046_v25  }
 0xc49   :  { %11292 = vset.pattern.permute.xlu1 %v18134_v20 }
 0xc55   :  { %v4661_v15 = vpop.xlane.xlu1 %4660 }
 0xc56   :  { %v4683_v3 = vsub.f32 %v4418_v59, %v4661_v15 }
 0xc57   :  { %v4664_v1 = vpop.xlane.xlu0 %4663 }
 0xc58   :  { %v4691_v56 = vmul.f32 1.442695, %v4683_v3  ;;  %v4684_v37 = vsub.f32 %v4450_v23, %v4664_v1 }
 0xc5a   :  { %12360 = vpow2.f32 %v4691_v56  ;;  %v4693_v38 = vmul.f32 1.442695, %v4684_v37 }
 0xc5c   :  { %12362 = vpow2.f32 %v4693_v38 }
 0xc5d   :  { %v4667_v16 = vpop.xlane.xlu1 %4666 }
 0xc5e   :  { %v4685_v18 = vsub.f32 %v4482_v9, %v4667_v16  ;;  %v5083_v16 = vadd.f32 %v14873_v57, %v14887_v17 }
 0xc60   :  { %v4695_v60 = vmul.f32 1.442695, %v4685_v18 }
 0xc61   :  { %v4670_v29 = vpop.xlane.xlu1 %4669 }
 0xc62   :  { %12364 = vpow2.f32 %v4695_v60  ;;  %v4686_v35 = vsub.f32 %v4514_v2, %v4670_v29 }
 0xc64   :  { %v14985_v42 = vpop.eup %12360  ;;  %v4697_v22 = vmul.f32 1.442695, %v4686_v35 }
 0xc65   :  { %v4707_v58 = vsel %vm4658_vm2, %v14985_v42, 0.0  ;;  %v4673_v46 = vpop.xlane.xlu0 %4672 }
 0xc66   :  { %v14989_v52 = vpop.eup %12362  ;;  %12366 = vpow2.f32 %v4697_v22  ;;  %4708 = vadd.xlane.f32.xlu0 %v4707_v58  ;;  %v4687_v53 = vsub.f32 %v14953_v50, %v4673_v46 }
 0xc67   :  { %v4676_v59 = vpop.xlane.xlu1 %4675  ;;  %v4710_v9 = vsel %vm4658_vm2, %v14989_v52, 0.0 }
 0xc68   :  { %v4688_v23 = vsub.f32 %v14957_v4, %v4676_v59  ;;  %v4699_v55 = vmul.f32 1.442695, %v4687_v53 }
 0xc6a   :  { %v4701_v44 = vmul.f32 1.442695, %v4688_v23  ;;  %4711 = vadd.xlane.f32.xlu0 %v4710_v9 }
 0xc6c   :  { %v14994_v61 = vpop.eup %12364  ;;  %12368 = vpow2.f32 %v4701_v44 }
 0xc6d   :  { %v4713_v2 = vsel %vm4658_vm2, %v14994_v61, 0.0  ;;  %12370 = vpow2.f32 %v4699_v55  ;;  %v4679_v0 = vpop.xlane.xlu0 %4678 }
 0xc6e   :  { %4714 = vadd.xlane.f32.xlu1 %v4713_v2  ;;  %v4689_v21 = vsub.f32 %v14961_v26, %v4679_v0 }
 0xc6f   :  { %v4682_v8 = vpop.xlane.xlu1 %4681 }
 0xc70   :  { %v14998_v36 = vpop.eup %12366 }
 0xc71   :  { %v4716_v6 = vsel %vm4658_vm2, %v14998_v36, 0.0 }
 0xc72   :  { %4717 = vadd.xlane.f32.xlu1 %v4716_v6 }
 0xc76   :  { %v15002_v45 = vpop.eup %12368 }
 0xc77   :  { %v4722_v4 = vsel %vm4658_vm2, %v15002_v45, 0.0  ;;  %v15012_v62 = vpop.eup %12370 }
 0xc78   :  { %4723 = vadd.xlane.f32.xlu1 %v4722_v4  ;;  %v4719_v40 = vsel %vm4658_vm2, %v15012_v62, 0.0 }
 0xc80   :  { %5188 = vperm.xlu0 %11289, %v5054_v54   ;;  %v4703_v54 = vmul.f32 1.442695, %v4689_v21 }
 0xc82   :  { %12372 = vpow2.f32 %v4703_v54 }
 0xc84   :  { %11290 = vset.pattern.permute.xlu0 %v18134_v20 }
 0xc85   :  { %5108 = vperm.xlu0 %11290, %v5046_v25   ;;  %v4690_v25 = vsub.f32 %v14965_v48, %v4682_v8 }
 0xc87   :  { %v4705_v15 = vmul.f32 1.442695, %v4690_v25 }
 0xc89   :  { %5123 = vperm.xlu1 %11292, %v14978_v11   ;;  %11293 = vset.pattern.permute.xlu0 %v12399_v43  ;;  %12374 = vpow2.f32 %v4705_v15 }
 0xc8c   :  { %v15025_v48 = vpop.eup %12372 }
 0xc8d   :  { %5138 = vperm.xlu1 %11292, %v14980_v49  }
 0xc91   :  { %5128 = vperm.xlu1 %11292, %v5062_v34  }
 0xc93   :  { %v15034_v29 = vpop.eup %12374 }
 0xc94   :  { %v4728_v57 = vsel %vm4658_vm2, %v15034_v29, 0.0 }
 0xc95   :  { %11295 = vset.pattern.permute.xlu1 %v12399_v43 }
 0xc96   :  { %5196 = vperm.xlu1 %11295, %v5062_v34  }
 0xca4   :  { %4720 = vadd.xlane.f32.xlu0 %v4719_v40 }
 0xcab   :  { %v5114_v50 = vpop.permute.xlu1 %5113 }
 0xcac   :  { %v5145_v34 = vsel %vm5099_vm3, %v5114_v50, 0.0 }
 0xcad   :  { %v5161_v3 = vadd.f32 %v5145_v34, %v14882_v51  ;;  %v4725_v51 = vsel %vm4658_vm2, %v15025_v48, 0.0 }
 0xcb0   :  { %v5185_v1 = vpop.permute.xlu1 %5184 }
 0xcb1   :  { %v5211_v26 = vsel %vm5173_vm4, %v5185_v1, 0.0 }
 0xcb2   :  { %v5227_v56 = vadd.f32 %v5211_v26, %v5161_v3 }
 0xcb5   :  { %v5104_v37 = vpop.permute.xlu1 %5103 }
 0xcb6   :  { %v5141_v38 = vsel %vm5099_vm3, %v5104_v37, 0.0 }
 0xcb7   :  { %v5157_v18 = vadd.f32 %v5141_v38, %v5083_v16 }
 0xcba   :  { %v5177_v60 = vpop.permute.xlu1 %5176  ;;  %5192 = vperm.xlu0 %11293, %v14978_v11   ;;  %4726 = vadd.xlane.f32.xlu1 %v4725_v51 }
 0xcbb   :  { %v5207_v35 = vsel %vm5173_vm4, %v5177_v60, 0.0 }
 0xcbc   :  { %v5223_v22 = vadd.f32 %v5207_v35, %v5157_v18 }
 0xcbe   :  { %5244 = vmatpush1.msra.mxu0 %v5223_v22  ;;  %11294 = vset.pattern.permute.xlu0 %v18134_v20 }
 0xcbf   :  { %4729 = vadd.xlane.f32.xlu1 %v4728_v57  ;;  %5539 = vmatprep.subr.mxu0 %v14914_v27  ;;  %v5119_v17 = vpop.permute.xlu1 %5118 }
 0xcc0   :  { %5133 = vperm.xlu0 %11294, %v14975_v41   ;;  %v5147_v46 = vsel %vm5099_vm3, %v5119_v17, 0.0 }
 0xcc4   :  { %11296 = vset.pattern.permute.xlu0 %v12399_v43  ;;  %v5181_v58 = vpop.permute.xlu1 %5180 }
 0xcc5   :  { %5204 = vperm.xlu0 %11296, %v14980_v49   ;;  %v5209_v4 = vsel %vm5173_vm4, %v5181_v58, 0.0 }
 0xcd0   :  { %5200 = vperm.xlu1 %11295, %v14975_v41  }
 0xcf3   :  { %v4709_v11 = vpop.xlane.xlu0 %4708 }
 0xcf4   :  { %12376 = vrcp.f32 %v4709_v11 }
 0xcf7   :  { %v4712_v59 = vpop.xlane.xlu0 %4711 }
 0xcf8   :  { %12378 = vrcp.f32 %v4712_v59 }
 0xcfb   :  { %v4715_v20 = vpop.xlane.xlu1 %4714 }
 0xcfc   :  { %12380 = vrcp.f32 %v4715_v20  ;;  %v11342_v20 = vld [vmem:[%s17106_s2 + $0xc] ss:$16 sps:$4 sm:$0xff]  }
 0xcfe   :  { %v12377_v23 = vpop.eup %12376 }
 0xcff   :  { %v4732_v9 = vmul.f32 %v12377_v23, %v14985_v42  ;;  %v5189_v27 = vpop.permute.xlu0 %5188  ;;  %v4718_v44 = vpop.xlane.xlu1 %4717  ;;  %v11345_v23 = vld [vmem:[%s17106_s2 + $0x24] ss:$16 sps:$4 sm:$0xff]  }
 0xd00   :  { %12382 = vrcp.f32 %v4718_v44  ;;  %v5213_v40 = vsel %vm5173_vm4, %v5189_v27, 0.0  ;;  %v11348_v27 = vld [vmem:[%s17106_s2 + $0x2c] ss:$16 sps:$4 sm:$0xff]   ;;  %v11351_v44 = vld [vmem:[%s17106_s2 + $0x44] ss:$16 sps:$4 sm:$0xff]  }
 0xd01   :  { %10541 = vmatmul.mubr.msk.f32.vlgmr.msra.gmra.mrb[104].mxu0 %vm5239_vm5, %v4732_v9  ;;  %v11346_v9 = vld [vmem:[%s17106_s2 + $0x28] ss:$16 sps:$4 sm:$0xff]  }
 0xd02   :  { %5603 = vmatprep.mubr.f32.mxu0 %v12398_v32  ;;  %v12379_v2 = vpop.eup %12378 }
 0xd03   :  { %v4734_v53 = vmul.f32 %v12379_v2, %v14989_v52  ;;  %v11357_v2 = vld [vmem:[%s17106_s2 + $0x64] ss:$16 sps:$4 sm:$0xff]  }
 0xd04   :  { %v5109_v43 = vpop.permute.xlu0 %5108 }
 0xd05   :  { %v5143_v41 = vsel %vm5099_vm3, %v5109_v43, 0.0  ;;  %v4724_v49 = vpop.xlane.xlu1 %4723  ;;  %v11349_v43 = vld [vmem:[%s17106_s2 + $0x40] ss:$16 sps:$4 sm:$0xff]  }
 0xd06   :  { %v5159_v6 = vadd.f32 %v5143_v41, %v14876_v12  ;;  %v12381_v0 = vpop.eup %12380  ;;  %12384 = vrcp.f32 %v4724_v49  ;;  %v5163_v12 = vadd.f32 %v5147_v46, %v14894_v33  ;;  %v11354_v41 = vld [vmem:[%s17106_s2 + $0x4c] ss:$16 sps:$4 sm:$0xff]   ;;  %v11352_v49 = vld [vmem:[%s17106_s2 + $0x48] ss:$16 sps:$4 sm:$0xff]   ;;  %v11363_v46 = vld [vmem:[%s17106_s2 + $0x84] ss:$16 sps:$4 sm:$0xff]  }
 0xd07   :  { %v4736_v21 = vmul.f32 %v12381_v0, %v14994_v61  ;;  %v11364_v0 = vld [vmem:[%s17106_s2 + $0x88] ss:$16 sps:$4 sm:$0xff]  }
 0xd08   :  { %v5225_v42 = vadd.f32 %v5209_v4, %v5159_v6  ;;  %v5229_v54 = vadd.f32 %v5213_v40, %v5163_v12  ;;  %v11360_v6 = vld [vmem:[%s17106_s2 + $0x6c] ss:$16 sps:$4 sm:$0xff]   ;;  %v11355_v4 = vld [vmem:[%s17106_s2 + $0x60] ss:$16 sps:$4 sm:$0xff]   ;;  %v11369_v40 = vld [vmem:[%s17106_s2 + $0xa4] ss:$16 sps:$4 sm:$0xff]  }
 0xd09   :  { %v5124_v55 = vpop.permute.xlu1 %5123  ;;  %v11367_v12 = vld [vmem:[%s17106_s2 + $0xa0] ss:$16 sps:$4 sm:$0xff]  }
 0xd0a   :  { %5318 = vmatpush1.msra.mxu1 %v5225_v42  ;;  %v12383_v52 = vpop.eup %12382  ;;  %v5149_v3 = vsel %vm5099_vm3, %v5124_v55, 0.0  ;;  %v11358_v42 = vld [vmem:[%s17106_s2 + $0x68] ss:$16 sps:$4 sm:$0xff]   ;;  %v11361_v55 = vld [vmem:[%s17106_s2 + $0x80] ss:$16 sps:$4 sm:$0xff]  }
 0xd0b   :  { %10542 = vmatmul.mubr.msk.f32.vlgmr.msra.gmra.mrb[128].mxu1 %vm5239_vm5, %v4734_v53  ;;  %5391 = vmatprep.subr.mxu1 %v14899_v13  ;;  %v4738_v25 = vmul.f32 %v12383_v52, %v14998_v36  ;;  %v11366_v53 = vld [vmem:[%s17106_s2 + $0x8c] ss:$16 sps:$4 sm:$0xff]   ;;  %v11375_v52 = vld [vmem:[%s17106_s2 + $0xc4] ss:$16 sps:$4 sm:$0xff]  }
 0xd0c   :  { %5392 = vmatpush1.msra.mxu1 %v5227_v56  ;;  %5455 = vmatprep.mubr.f32.mxu1 %v12398_v32 }
 0xd0d   :  { %v5139_v8 = vpop.permute.xlu1 %5138  ;;  %5465 = vmatprep.subr.mxu1 %v14901_v7 }
 0xd0e   :  { %v5155_v38 = vsel %vm5099_vm3, %v5139_v8, 0.0  ;;  %v11370_v8 = vld [vmem:[%s17106_s2 + $0xa8] ss:$16 sps:$4 sm:$0xff]  }
 0xd0f   :  { %10543 = vmatmul.mubr.msk.f32.vlgmr.msra.gmra.mrb[130].mxu1 %vm5239_vm5, %v4736_v21  ;;  %v11372_v21 = vld [vmem:[%s17106_s2 + $0xac] ss:$16 sps:$4 sm:$0xff]  }
 0xd10   :  { %5466 = vmatpush1.msra.mxu1 %v5229_v54  ;;  %5529 = vmatprep.mubr.f32.mxu1 %v12398_v32  ;;  %v12385_v7 = vpop.eup %12384  ;;  %v11378_v54 = vld [vmem:[%s17106_s2 + $0xcc] ss:$16 sps:$4 sm:$0xff]  }
 0xd11   :  { %5613 = vmatprep.subr.mxu1 %v14912_v14  ;;  %v5129_v33 = vpop.permute.xlu1 %5128  ;;  %v4742_v36 = vmul.f32 %v12385_v7, %v15002_v45  ;;  %v11384_v7 = vld [vmem:[%s17106_s2 + $0xec] ss:$16 sps:$4 sm:$0xff]  }
 0xd12   :  { %v5151_v13 = vsel %vm5099_vm3, %v5129_v33, 0.0  ;;  %v11376_v33 = vld [vmem:[%s17106_s2 + $0xc8] ss:$16 sps:$4 sm:$0xff]  }
 0xd13   :  { %10544 = vmatmul.mubr.msk.f32.vlgmr.msra.gmra.mrb[132].mxu1 %vm5239_vm5, %v4738_v25  ;;  %v5167_v61 = vadd.f32 %v5151_v13, %v14885_v47  ;;  %v5165_v47 = vadd.f32 %v5149_v3, %v14879_v24  ;;  %v5171_v24 = vadd.f32 %v5155_v38, %v14904_v5  ;;  %v11373_v25 = vld [vmem:[%s17106_s2 + $0xc0] ss:$16 sps:$4 sm:$0xff]   ;;  %v11381_v13 = vld [vmem:[%s17106_s2 + $0xe4] ss:$16 sps:$4 sm:$0xff]  }
 0xd14   :  { %5677 = vmatprep.mubr.f32.mxu1 %v12398_v32  ;;  %v11393_v3 = vld [vmem:[%s17106_s2 + $0x124] ss:$16 sps:$4 sm:$0xff]  }
 0xd15   :  { %v5197_v50 = vpop.permute.xlu1 %5196  ;;  %v11405_v38 = vld [vmem:[%s17106_s2 + $0x164] ss:$16 sps:$4 sm:$0xff]  }
 0xd16   :  { %v5217_v34 = vsel %vm5173_vm4, %v5197_v50, 0.0  ;;  %v11382_v50 = vld [vmem:[%s17106_s2 + $0xe8] ss:$16 sps:$4 sm:$0xff]  }
 0xd17   :  { %v5233_v15 = vadd.f32 %v5217_v34, %v5167_v61  ;;  %v11379_v61 = vld [vmem:[%s17106_s2 + $0xe0] ss:$16 sps:$4 sm:$0xff]  }
 0xd18   :  { %v11385_v34 = vld [vmem:[%s17106_s2 + $0x100] ss:$16 sps:$4 sm:$0xff]  }
 0xd19   :  { %5614 = vmatpush1.msra.mxu1 %v5233_v15  ;;  %v11387_v15 = vld [vmem:[%s17106_s2 + $0x104] ss:$16 sps:$4 sm:$0xff]  }
 0xd1a   :  { %10546 = vmatmul.mubr.msk.f32.vlgmr.msra.gmra.mrb[134].mxu1 %vm5239_vm5, %v4742_v36  ;;  %5761 = vmatprep.subr.mxu1 %v14921_v30  ;;  %v11388_v36 = vld [vmem:[%s17106_s2 + $0x108] ss:$16 sps:$4 sm:$0xff]  }
 0xd1b   :  { %5825 = vmatprep.mubr.f32.mxu1 %v12398_v32 }
 0xd31   :  { %v4721_v14 = vpop.xlane.xlu0 %4720 }
 0xd32   :  { %12386 = vrcp.f32 %v4721_v14  ;;  %v11390_v14 = vld [vmem:[%s17106_s2 + $0x10c] ss:$16 sps:$4 sm:$0xff]  }
 0xd39   :  { %v5193_v1 = vpop.permute.xlu0 %5192 }
 0xd3a   :  { %v5215_v26 = vsel %vm5173_vm4, %v5193_v1, 0.0  ;;  %v11391_v1 = vld [vmem:[%s17106_s2 + $0x120] ss:$16 sps:$4 sm:$0xff]  }
 0xd3b   :  { %v5231_v56 = vadd.f32 %v5215_v26, %v5165_v47  ;;  %v11396_v47 = vld [vmem:[%s17106_s2 + $0x12c] ss:$16 sps:$4 sm:$0xff]   ;;  %v11394_v26 = vld [vmem:[%s17106_s2 + $0x128] ss:$16 sps:$4 sm:$0xff]  }
 0xd3c   :  { %v12387_v45 = vpop.eup %12386 }
 0xd3d   :  { %v4740_v37 = vmul.f32 %v12387_v45, %v15012_v62  ;;  %5540 = vmatpush1.msra.mxu0 %v5231_v56  ;;  %v11399_v56 = vld [vmem:[%s17106_s2 + $0x144] ss:$16 sps:$4 sm:$0xff]   ;;  %v11402_v45 = vld [vmem:[%s17106_s2 + $0x14c] ss:$16 sps:$4 sm:$0xff]  }
 0xd3e   :  { %5687 = vmatprep.subr.mxu0 %v14923_v31 }
 0xd3f   :  { %v5134_v30 = vpop.permute.xlu0 %5133  ;;  %10545 = vmatmul.mubr.msk.f32.vlgmr.msra.gmra.mrb[106].mxu0 %vm5239_vm5, %v4740_v37  ;;  %v11397_v37 = vld [vmem:[%s17106_s2 + $0x140] ss:$16 sps:$4 sm:$0xff]  }
 0xd40   :  { %5751 = vmatprep.mubr.f32.mxu0 %v12398_v32  ;;  %v5153_v31 = vsel %vm5099_vm3, %v5134_v30, 0.0  ;;  %v11400_v30 = vld [vmem:[%s17106_s2 + $0x148] ss:$16 sps:$4 sm:$0xff]  }
 0xd41   :  { %v5169_v35 = vadd.f32 %v5153_v31, %v14897_v10  ;;  %v11337_v10 = vld [vmem:[%s17106_s2] ss:$16 sps:$4 sm:$0xff]   ;;  %v11412_v31 = vld [vmem:[%s17106_s2 + $0x188] ss:$16 sps:$4 sm:$0xff]  }
 0xd44   :  { %v5205_v16 = vpop.permute.xlu0 %5204 }
 0xd45   :  { %v5221_v51 = vsel %vm5173_vm4, %v5205_v16, 0.0  ;;  %v11403_v16 = vld [vmem:[%s17106_s2 + $0x160] ss:$16 sps:$4 sm:$0xff]  }
 0xd46   :  { %v5237_v18 = vadd.f32 %v5221_v51, %v5171_v24  ;;  %v11408_v24 = vld [vmem:[%s17106_s2 + $0x16c] ss:$16 sps:$4 sm:$0xff]   ;;  %v11406_v51 = vld [vmem:[%s17106_s2 + $0x168] ss:$16 sps:$4 sm:$0xff]  }
 0xd47   :  { %v4727_v60 = vpop.xlane.xlu1 %4726 }
 0xd48   :  { %12388 = vrcp.f32 %v4727_v60  ;;  %5762 = vmatpush1.msra.mxu1 %v5237_v18  ;;  %v11411_v18 = vld [vmem:[%s17106_s2 + $0x184] ss:$16 sps:$4 sm:$0xff]   ;;  %v11414_v60 = vld [vmem:[%s17106_s2 + $0x18c] ss:$16 sps:$4 sm:$0xff]  }
 0xd49   :  { %6370 = vmatprep.subr.bf16.mxu1 %v11342_v20  ;;  %v11432_v20 = vld [vmem:[%s17106_s2 + $0x1ec] ss:$16 sps:$4 sm:$0xff]  }
 0xd4c   :  { %v4730_v62 = vpop.xlane.xlu1 %4729 }
 0xd4d   :  { %12390 = vrcp.f32 %v4730_v62  ;;  %v11409_v62 = vld [vmem:[%s17106_s2 + $0x180] ss:$16 sps:$4 sm:$0xff]  }
 0xd50   :  { %v5201_v22 = vpop.permute.xlu1 %5200 }
 0xd51   :  { %v5219_v57 = vsel %vm5173_vm4, %v5201_v22, 0.0  ;;  %v11420_v22 = vld [vmem:[%s17106_s2 + $0x1ac] ss:$16 sps:$4 sm:$0xff]  }
 0xd52   :  { %v12389_v5 = vpop.eup %12388  ;;  %v5235_v17 = vadd.f32 %v5219_v57, %v5169_v35  ;;  %v11417_v35 = vld [vmem:[%s17106_s2 + $0x1a4] ss:$16 sps:$4 sm:$0xff]   ;;  %v11415_v57 = vld [vmem:[%s17106_s2 + $0x1a0] ss:$16 sps:$4 sm:$0xff]  }
 0xd53   :  { %v4744_v11 = vmul.f32 %v12389_v5, %v15025_v48  ;;  %v11340_v48 = vld [vmem:[%s17106_s2 + $0x8] ss:$16 sps:$4 sm:$0xff]  }
 0xd54   :  { %5688 = vmatpush1.msra.mxu0 %v5235_v17  ;;  %v11418_v5 = vld [vmem:[%s17106_s2 + $0x1a8] ss:$16 sps:$4 sm:$0xff]   ;;  %v11423_v17 = vld [vmem:[%s17106_s2 + $0x1c4] ss:$16 sps:$4 sm:$0xff]  }
 0xd55   :  { %10547 = vmatmul.mubr.msk.f32.vlgmr.msra.gmra.mrb[108].mxu0 %vm5239_vm5, %v4744_v11  ;;  %6329 = vmatprep.subr.bf16.mxu0 %v11339_v39  ;;  %v11426_v11 = vld [vmem:[%s17106_s2 + $0x1cc] ss:$16 sps:$4 sm:$0xff]   ;;  %v11429_v39 = vld [vmem:[%s17106_s2 + $0x1e4] ss:$16 sps:$4 sm:$0xff]  }
 0xd56   :  { %6330 = vmatpush1.bf16.msra.mxu0 %v11337_v10  ;;  %v11427_v10 = vld [vmem:[%s17106_s2 + $0x1e0] ss:$16 sps:$4 sm:$0xff]  }
 0xd57   :  { %v12391_v58 = vpop.eup %12390  ;;  %6331 = vmatprep.subr.bf16.mxu0 %v11345_v23  ;;  %v11438_v23 = vld [vmem:[%s17106_s2 + $0x20c] ss:$16 sps:$4 sm:$0xff]  }
 0xd58   :  { %v4746_v59 = vmul.f32 %v12391_v58, %v15034_v29  ;;  %v11343_v29 = vld [vmem:[%s17106_s2 + $0x20] ss:$16 sps:$4 sm:$0xff]  }
 0xd59   :  { %v11421_v58 = vld [vmem:[%s17106_s2 + $0x1c0] ss:$16 sps:$4 sm:$0xff]  }
 0xd5a   :  { %10548 = vmatmul.mubr.msk.f32.vlgmr.msra.gmra.mrb[136].mxu1 %vm5239_vm5, %v4746_v59  ;;  %6332 = vmatpush1.bf16.msra.mxu0 %v11343_v29  ;;  %v11424_v59 = vld [vmem:[%s17106_s2 + $0x1c8] ss:$16 sps:$4 sm:$0xff]   ;;  %v11435_v29 = vld [vmem:[%s17106_s2 + $0x204] ss:$16 sps:$4 sm:$0xff]  }
 0xd5b   :  { %6371 = vmatpush1.bf16.msra.mxu1 %v11340_v48  ;;  %6333 = vmatprep.subr.bf16.mxu0 %v11351_v44  ;;  %v11430_v48 = vld [vmem:[%s17106_s2 + $0x1e8] ss:$16 sps:$4 sm:$0xff]  }
 0xd5c   :  { %6372 = vmatprep.subr.bf16.mxu1 %v11348_v27 }
 0xd5e   :  { %6334 = vmatpush1.bf16.msra.mxu0 %v11349_v43 }
 0xd5f   :  { %6373 = vmatpush1.bf16.msra.mxu1 %v11346_v9  ;;  %6335 = vmatprep.subr.bf16.mxu0 %v11357_v2 }
 0xd60   :  { %6374 = vmatprep.subr.bf16.mxu1 %v11354_v41 }
 0xd62   :  { %6336 = vmatpush1.bf16.msra.mxu0 %v11355_v4 }
 0xd63   :  { %6375 = vmatpush1.bf16.msra.mxu1 %v11352_v49  ;;  %6337 = vmatprep.subr.bf16.mxu0 %v11363_v46 }
 0xd64   :  { %6376 = vmatprep.subr.bf16.mxu1 %v11360_v6 }
 0xd66   :  { %6338 = vmatpush1.bf16.msra.mxu0 %v11361_v55 }
 0xd67   :  { %6377 = vmatpush1.bf16.msra.mxu1 %v11358_v42  ;;  %6339 = vmatprep.subr.bf16.mxu0 %v11369_v40 }
 0xd68   :  { %6378 = vmatprep.subr.bf16.mxu1 %v11366_v53 }
 0xd6a   :  { %6340 = vmatpush1.bf16.msra.mxu0 %v11367_v12 }
 0xd6b   :  { %6379 = vmatpush1.bf16.msra.mxu1 %v11364_v0  ;;  %6341 = vmatprep.subr.bf16.mxu0 %v11375_v52 }
 0xd6c   :  { %6380 = vmatprep.subr.bf16.mxu1 %v11372_v21 }
 0xd6e   :  { %6342 = vmatpush1.bf16.msra.mxu0 %v11373_v25 }
 0xd6f   :  { %6381 = vmatpush1.bf16.msra.mxu1 %v11370_v8  ;;  %6343 = vmatprep.subr.bf16.mxu0 %v11381_v13 }
 0xd70   :  { %6382 = vmatprep.subr.bf16.mxu1 %v11378_v54 }
 0xd72   :  { %6344 = vmatpush1.bf16.msra.mxu0 %v11379_v61 }
 0xd73   :  { %6383 = vmatpush1.bf16.msra.mxu1 %v11376_v33  ;;  %6345 = vmatprep.subr.bf16.mxu0 %v11387_v15 }
 0xd74   :  { %6384 = vmatprep.subr.bf16.mxu1 %v11384_v7 }
 0xd76   :  { %6346 = vmatpush1.bf16.msra.mxu0 %v11385_v34 }
 0xd77   :  { %6385 = vmatpush1.bf16.msra.mxu1 %v11382_v50  ;;  %6347 = vmatprep.subr.bf16.mxu0 %v11393_v3 }
 0xd78   :  { %6386 = vmatprep.subr.bf16.mxu1 %v11390_v14 }
 0xd7a   :  { %6348 = vmatpush1.bf16.msra.mxu0 %v11391_v1 }
 0xd7b   :  { %6387 = vmatpush1.bf16.msra.mxu1 %v11388_v36  ;;  %6349 = vmatprep.subr.bf16.mxu0 %v11399_v56 }
 0xd7c   :  { %6388 = vmatprep.subr.bf16.mxu1 %v11396_v47 }
 0xd7e   :  { %6350 = vmatpush1.bf16.msra.mxu0 %v11397_v37 }
 0xd7f   :  { %6389 = vmatpush1.bf16.msra.mxu1 %v11394_v26  ;;  %6351 = vmatprep.subr.bf16.mxu0 %v11405_v38 }
 0xd80   :  { %6390 = vmatprep.subr.bf16.mxu1 %v11402_v45 }
 0xd82   :  { %6352 = vmatpush1.bf16.msra.mxu0 %v11403_v16 }
 0xd83   :  { %6391 = vmatpush1.bf16.msra.mxu1 %v11400_v30  ;;  %6353 = vmatprep.subr.bf16.mxu0 %v11411_v18 }
 0xd84   :  { %6392 = vmatprep.subr.bf16.mxu1 %v11408_v24 }
 0xd86   :  { %6354 = vmatpush1.bf16.msra.mxu0 %v11409_v62 }
 0xd87   :  { %6393 = vmatpush1.bf16.msra.mxu1 %v11406_v51  ;;  %6355 = vmatprep.subr.bf16.mxu0 %v11417_v35 }
 0xd88   :  { %6394 = vmatprep.subr.bf16.mxu1 %v11414_v60 }
 0xd8a   :  { %6356 = vmatpush1.bf16.msra.mxu0 %v11415_v57 }
 0xd8b   :  { %6395 = vmatpush1.bf16.msra.mxu1 %v11412_v31  ;;  %6357 = vmatprep.subr.bf16.mxu0 %v11423_v17 }
 0xd8c   :  { %6396 = vmatprep.subr.bf16.mxu1 %v11420_v22 }
 0xd8e   :  { %6358 = vmatpush1.bf16.msra.mxu0 %v11421_v58 }
 0xd8f   :  { %6397 = vmatpush1.bf16.msra.mxu1 %v11418_v5  ;;  %6359 = vmatprep.subr.bf16.mxu0 %v11429_v39 }
 0xd90   :  { %6398 = vmatprep.subr.bf16.mxu1 %v11426_v11 }
 0xd92   :  { %6360 = vmatpush1.bf16.msra.mxu0 %v11427_v10 }
 0xd93   :  { %6399 = vmatpush1.bf16.msra.mxu1 %v11424_v59  ;;  %6831 = vmatprep.subr.bf16.mxu0 %v11435_v29 }
 0xd94   :  { %6400 = vmatprep.subr.bf16.mxu1 %v11432_v20 }
 0xd97   :  { %6401 = vmatpush1.bf16.msra.mxu1 %v11430_v48 }
 0xd98   :  { %6872 = vmatprep.subr.bf16.mxu1 %v11438_v23 }
 0xdd4   :  { %v5309_v9 = vpop.f32.mrb[104].mxu0 }
 0xdd5   :  { %10099 = vst [vmem:[%s17107_s4] sm:$0x7f] %v5309_v9  ;;  %v5311_v27 = vpop.f32.mrb[105].mxu0  ;;  %v5858_v44 = vpack.c.bf16 %v5309_v9, %v5309_v9 }
 0xdd6   :  { %10100 = vst [vmem:[%s17107_s4 + $0x8] sm:$0x7f] %v5311_v27  ;;  %v5859_v43 = vpack.c.bf16 %v5311_v27, %v5311_v27 }
 0xdd7   :  { %v15307_v41 = vunpack.c.l.b16 %v5858_v44 }
 0xdd8   :  { %v15309_v49 = vunpack.c.l.b16 %v5859_v43 }
 0xdd9   :  { %v6479_v53 = vrot.slane %v15307_v41, 1  ;;  %v6981_v21 = vrot.slane %v15307_v41, 2  ;;  %v7483_v59 = vrot.slane %v15307_v41, 3 }
 0xdda   :  { %v6493_v40 = vrot.slane %v15309_v49, 1  ;;  %v6995_v12 = vrot.slane %v15309_v49, 2  ;;  %v7497_v33 = vrot.slane %v15309_v49, 3 }
 0xdde   :  { %v5383_v2 = vpop.f32.mrb[128].mxu1 }
 0xddf   :  { %v5860_v6 = vpack.c.bf16 %v5383_v2, %v5383_v2  ;;  %10101 = vst [vmem:[%s17107_s4 + $0x10] sm:$0x7f] %v5383_v2  ;;  %v5385_v4 = vpop.f32.mrb[129].mxu1 }
 0xde0   :  { %v5861_v42 = vpack.c.bf16 %v5385_v4, %v5385_v4  ;;  %10102 = vst [vmem:[%s17107_s4 + $0x18] sm:$0x7f] %v5385_v4 }
 0xde1   :  { %v15317_v46 = vunpack.c.l.b16 %v5860_v6 }
 0xde2   :  { %v15320_v55 = vunpack.c.l.b16 %v5861_v42  ;;  %v5457_v0 = vpop.f32.mrb[130].mxu1 }
 0xde3   :  { %v5862_v8 = vpack.c.bf16 %v5457_v0, %v5457_v0  ;;  %10103 = vst [vmem:[%s17107_s4 + $0x20] sm:$0x7f] %v5457_v0  ;;  %v5459_v52 = vpop.f32.mrb[131].mxu1  ;;  %v5970_v54 = vrot.slane %v15317_v46, 7  ;;  %v6480_v25 = vsel %vm5971_vm6, %v15317_v46, %v6479_v53  ;;  %v6982_v36 = vrot.slane %v15317_v46, 1 }
 0xde4   :  { %v5863_v13 = vpack.c.bf16 %v5459_v52, %v5459_v52  ;;  %10104 = vst [vmem:[%s17107_s4 + $0x28] sm:$0x7f] %v5459_v52  ;;  %v5991_v7 = vrot.slane %v15320_v55, 7  ;;  %v6494_v61 = vsel %vm5971_vm6, %v15320_v55, %v6493_v40  ;;  %v6996_v50 = vrot.slane %v15320_v55, 1 }
 0xde5   :  { %v15339_v34 = vunpack.c.l.b16 %v5862_v8  ;;  %v5972_v15 = vsel %vm5971_vm6, %v5970_v54, %v15307_v41  ;;  %v7498_v14 = vrot.slane %v15320_v55, 2  ;;  %v6983_v30 = vsel %vm5971_vm6, %v6982_v36, %v6981_v21 }
 0xde6   :  { %v15345_v3 = vunpack.c.l.b16 %v5863_v13  ;;  %v5531_v47 = vpop.f32.mrb[132].mxu1  ;;  %v5992_v1 = vsel %vm5971_vm6, %v5991_v7, %v15309_v49  ;;  %v6997_v26 = vsel %vm5971_vm6, %v6996_v50, %v6995_v12  ;;  %v7484_v44 = vrot.slane %v15317_v46, 2 }
 0xde7   :  { %v5864_v56 = vpack.c.bf16 %v5531_v47, %v5531_v47  ;;  %10105 = vst [vmem:[%s17107_s4 + $0x30] sm:$0x7f] %v5531_v47  ;;  %v5533_v45 = vpop.f32.mrb[133].mxu1  ;;  %v5973_v37 = vrot.slane %v15339_v34, 6  ;;  %v7499_v38 = vsel %vm5971_vm6, %v7498_v14, %v7497_v33  ;;  %v6481_v18 = vrot.slane %v15339_v34, 7 }
 0xde8   :  { %v5865_v24 = vpack.c.bf16 %v5533_v45, %v5533_v45  ;;  %10106 = vst [vmem:[%s17107_s4 + $0x38] sm:$0x7f] %v5533_v45  ;;  %v5993_v16 = vrot.slane %v15345_v3, 6  ;;  %v6495_v51 = vrot.slane %v15345_v3, 7  ;;  %v6998_v31 = vsel %vm5974_vm7, %v15345_v3, %v6997_v26 }
 0xde9   :  { %v15362_v60 = vunpack.c.l.b16 %v5864_v56  ;;  %v5975_v62 = vsel %vm5974_vm7, %v5973_v37, %v5972_v15  ;;  %v6984_v35 = vsel %vm5974_vm7, %v15339_v34, %v6983_v30  ;;  %v6482_v17 = vsel %vm5974_vm7, %v6481_v18, %v6480_v25 }
 0xdea   :  { %v15369_v22 = vunpack.c.l.b16 %v5865_v24  ;;  %v5994_v57 = vsel %vm5974_vm7, %v5993_v16, %v5992_v1  ;;  %v6496_v5 = vsel %vm5974_vm7, %v6495_v51, %v6494_v61  ;;  %v7500_v27 = vrot.slane %v15345_v3, 1 }
 0xdeb   :  { %v5976_v11 = vrot.slane %v15362_v60, 5  ;;  %v6483_v58 = vrot.slane %v15362_v60, 6  ;;  %v6985_v20 = vrot.slane %v15362_v60, 7  ;;  %v7485_v0 = vsel %vm5971_vm6, %v7484_v44, %v7483_v59 }
 0xdec   :  { %v5995_v10 = vrot.slane %v15369_v22, 5  ;;  %v6497_v39 = vrot.slane %v15369_v22, 6  ;;  %v6999_v48 = vrot.slane %v15369_v22, 7  ;;  %v7501_v53 = vsel %vm5974_vm7, %v7500_v27, %v7499_v38 }
 0xded   :  { %v5679_v29 = vpop.f32.mrb[134].mxu1  ;;  %v15382_v23 = vsel %vm5977_vm8, %v5976_v11, %v5975_v62  ;;  %v15385_v9 = vsel %vm5977_vm8, %v6483_v58, %v6482_v17  ;;  %v15405_v42 = vsel %vm5977_vm8, %v6985_v20, %v6984_v35  ;;  %v15411_v40 = vsel %vm5977_vm8, %v15369_v22, %v7501_v53 }
 0xdee   :  { %10109 = vst [vmem:[%s17107_s4 + $0x50] sm:$0x7f] %v5679_v29  ;;  %v5681_v43 = vpop.f32.mrb[135].mxu1  ;;  %v15393_v2 = vsel %vm5977_vm8, %v5995_v10, %v5994_v57  ;;  %v15396_v6 = vsel %vm5977_vm8, %v6497_v39, %v6496_v5  ;;  %v15399_v4 = vsel %vm5977_vm8, %v6999_v48, %v6998_v31  ;;  %v7486_v12 = vrot.slane %v15339_v34, 1 }
 0xdef   :  { %10110 = vst [vmem:[%s17107_s4 + $0x58] sm:$0x7f] %v5681_v43  ;;  %v7999_v21 = vrot.slane %v15309_v49, 4  ;;  %v8000_v8 = vrot.slane %v15320_v55, 3  ;;  %v8002_v52 = vrot.slane %v15345_v3, 2  ;;  %v8004_v54 = vrot.slane %v15369_v22, 1 }
 0xdf0   :  { %v7986_v25 = vrot.slane %v15317_v46, 3  ;;  %v7487_v33 = vsel %vm5974_vm7, %v7486_v12, %v7485_v0  ;;  %v7985_v50 = vrot.slane %v15307_v41, 4  ;;  %v7988_v14 = vrot.slane %v15339_v34, 2 }
 0xdf1   :  { %v8001_v13 = vsel %vm5971_vm6, %v8000_v8, %v7999_v21  ;;  %v15423_v7 = vsel %vm5977_vm8, %v15362_v60, %v7487_v33  ;;  %v7990_v47 = vrot.slane %v15362_v60, 1  ;;  %v8501_v1 = vrot.slane %v15309_v49, 5 }
 0xdf2   :  { %v8003_v61 = vsel %vm5974_vm7, %v8002_v52, %v8001_v13  ;;  %v7987_v36 = vsel %vm5971_vm6, %v7986_v25, %v7985_v50  ;;  %v8502_v26 = vrot.slane %v15320_v55, 4  ;;  %v8504_v45 = vrot.slane %v15345_v3, 3 }
 0xdf3   :  { %v15428_v15 = vsel %vm5977_vm8, %v8004_v54, %v8003_v61  ;;  %v7989_v56 = vsel %vm5974_vm7, %v7988_v14, %v7987_v36  ;;  %v8487_v37 = vrot.slane %v15307_v41, 5  ;;  %v8506_v24 = vrot.slane %v15369_v22, 2 }
 0xdf4   :  { %v7991_v30 = vsel %vm5977_vm8, %v7990_v47, %v7989_v56  ;;  %v8503_v38 = vsel %vm5971_vm6, %v8502_v26, %v8501_v1  ;;  %v9003_v16 = vrot.slane %v15309_v49, 6  ;;  %v8488_v18 = vrot.slane %v15317_v46, 4 }
 0xdf5   :  { %v8505_v51 = vsel %vm5974_vm7, %v8504_v45, %v8503_v38  ;;  %v8490_v62 = vrot.slane %v15339_v34, 3  ;;  %v8492_v31 = vrot.slane %v15362_v60, 2  ;;  %v9004_v57 = vrot.slane %v15320_v55, 5 }
 0xdf6   :  { %v15447_v35 = vsel %vm5977_vm8, %v8506_v24, %v8505_v51  ;;  %v9006_v5 = vrot.slane %v15345_v3, 4  ;;  %v9008_v17 = vrot.slane %v15369_v22, 3  ;;  %v8489_v11 = vsel %vm5971_vm6, %v8488_v18, %v8487_v37 }
 0xdf7   :  { %v8491_v49 = vsel %vm5974_vm7, %v8490_v62, %v8489_v11  ;;  %v9005_v58 = vsel %vm5971_vm6, %v9004_v57, %v9003_v16  ;;  %v8989_v59 = vrot.slane %v15307_v41, 6  ;;  %v8990_v10 = vrot.slane %v15317_v46, 5 }
 0xdf8   :  { %v15458_v39 = vsel %vm5977_vm8, %v8492_v31, %v8491_v49  ;;  %v9007_v48 = vsel %vm5974_vm7, %v9006_v5, %v9005_v58  ;;  %v8992_v55 = vrot.slane %v15339_v34, 4  ;;  %v8994_v3 = vrot.slane %v15362_v60, 3 }
 0xdf9   :  { %v15464_v22 = vsel %vm5977_vm8, %v9008_v17, %v9007_v48  ;;  %v8991_v20 = vsel %vm5971_vm6, %v8990_v10, %v8989_v59  ;;  %v5868_v46 = vpack.c.bf16 %v5679_v29, %v5679_v29  ;;  %v5869_v44 = vpack.c.bf16 %v5681_v43, %v5681_v43 }
 0xdfa   :  { %v8993_v27 = vsel %vm5974_vm7, %v8992_v55, %v8991_v20 }
 0xdfb   :  { %v15469_v41 = vsel %vm5977_vm8, %v8994_v3, %v8993_v27  ;;  %v15471_v53 = vunpack.c.l.b16 %v5868_v46  ;;  %v5965_v0 = vunpack.c.l.b16 %v5869_v44 }
 0xdfd   :  { %v5999_v8 = vrot.slane %v5965_v0, 3  ;;  %v5982_v29 = vrot.slane %v15471_v53, 3  ;;  %v6487_v43 = vrot.slane %v15471_v53, 4  ;;  %v6501_v54 = vrot.slane %v5965_v0, 4 }
 0xdfe   :  { %v7003_v25 = vrot.slane %v5965_v0, 5  ;;  %v6989_v33 = vrot.slane %v15471_v53, 5  ;;  %v7505_v61 = vrot.slane %v5965_v0, 6  ;;  %v7491_v50 = vrot.slane %v15471_v53, 6 }
 0xdff   :  { %v8007_v36 = vrot.slane %v5965_v0, 7  ;;  %v7993_v26 = vrot.slane %v15471_v53, 7 }
 0xe12   :  { %v5605_v12 = vpop.f32.mrb[106].mxu0 }
 0xe13   :  { %v5866_v21 = vpack.c.bf16 %v5605_v12, %v5605_v12  ;;  %10107 = vst [vmem:[%s17107_s4 + $0x40] sm:$0x7f] %v5605_v12  ;;  %v5607_v34 = vpop.f32.mrb[107].mxu0 }
 0xe14   :  { %v5867_v60 = vpack.c.bf16 %v5607_v34, %v5607_v34  ;;  %10108 = vst [vmem:[%s17107_s4 + $0x48] sm:$0x7f] %v5607_v34 }
 0xe15   :  { %v5962_v52 = vunpack.c.l.b16 %v5866_v21  ;;  %v8998_v21 = vrot.slane %v15471_v53, 1 }
 0xe16   :  { %v5963_v13 = vunpack.c.l.b16 %v5867_v60 }
 0xe17   :  { %v5979_v14 = vrot.slane %v5962_v52, 4  ;;  %v6485_v47 = vrot.slane %v5962_v52, 5  ;;  %v7992_v1 = vsel %vm5980_vm9, %v5962_v52, %v7991_v30  ;;  %v6987_v38 = vrot.slane %v5962_v52, 6 }
 0xe18   :  { %v5997_v56 = vrot.slane %v5963_v13, 4  ;;  %v6499_v45 = vrot.slane %v5963_v13, 5  ;;  %v7001_v37 = vrot.slane %v5963_v13, 6  ;;  %v7503_v51 = vrot.slane %v5963_v13, 7 }
 0xe19   :  { %v5981_v24 = vsel %vm5980_vm9, %v5979_v14, %v15382_v23  ;;  %v6486_v16 = vsel %vm5980_vm9, %v6485_v47, %v15385_v9  ;;  %v7489_v18 = vrot.slane %v5962_v52, 7  ;;  %v6988_v9 = vsel %vm5980_vm9, %v6987_v38, %v15405_v42 }
 0xe1a   :  { %v5998_v62 = vsel %vm5980_vm9, %v5997_v56, %v15393_v2  ;;  %v5984_v31 = vsel %vm5983_vm10, %v5982_v29, %v5981_v24  ;;  %v6500_v30 = vsel %vm5980_vm9, %v6499_v45, %v15396_v6  ;;  %v6488_v57 = vsel %vm5983_vm10, %v6487_v43, %v6486_v16 }
 0xe1b   :  { %v6000_v5 = vsel %vm5983_vm10, %v5999_v8, %v5998_v62  ;;  %v6502_v17 = vsel %vm5983_vm10, %v6501_v54, %v6500_v30  ;;  %v7002_v23 = vsel %vm5980_vm9, %v7001_v37, %v15399_v4  ;;  %v6990_v2 = vsel %vm5983_vm10, %v6989_v33, %v6988_v9  ;;  %v11433_v9 = vld [vmem:[%s17106_s2 + $0x200] ss:$16 sps:$4 sm:$0xff]  }
 0xe1c   :  { %v7004_v11 = vsel %vm5983_vm10, %v7003_v25, %v7002_v23  ;;  %v7504_v49 = vsel %vm5980_vm9, %v7503_v51, %v15411_v40  ;;  %v7490_v6 = vsel %vm5980_vm9, %v7489_v18, %v15423_v7  ;;  %v8006_v4 = vsel %vm5980_vm9, %v5963_v13, %v15428_v15 }
 0xe1d   :  { %v7506_v58 = vsel %vm5983_vm10, %v7505_v61, %v7504_v49  ;;  %v7492_v59 = vsel %vm5983_vm10, %v7491_v50, %v7490_v6  ;;  %v15512_v10 = vsel %vm5983_vm10, %v7993_v26, %v7992_v1  ;;  %v15515_v42 = vsel %vm5983_vm10, %v8007_v36, %v8006_v4 }
 0xe1e   :  { %v8508_v48 = vrot.slane %v5963_v13, 1  ;;  %v8494_v55 = vrot.slane %v5962_v52, 1  ;;  %v9010_v3 = vrot.slane %v5963_v13, 2  ;;  %v9012_v40 = vrot.slane %v5965_v0, 1 }
 0xe1f   :  { %v8996_v15 = vrot.slane %v5962_v52, 2 }
 0xe20   :  { %v8509_v7 = vsel %vm5980_vm9, %v8508_v48, %v15447_v35  ;;  %v8495_v20 = vsel %vm5980_vm9, %v8494_v55, %v15458_v39  ;;  %v9011_v27 = vsel %vm5980_vm9, %v9010_v3, %v15464_v22  ;;  %v11441_v55 = vld [vmem:[%s17106_s2 + $0x224] ss:$16 sps:$4 sm:$0xff]  }
 0xe21   :  { %v15524_v46 = vsel %vm5983_vm10, %v5965_v0, %v8509_v7  ;;  %v15528_v44 = vsel %vm5983_vm10, %v15471_v53, %v8495_v20  ;;  %v15531_v12 = vsel %vm5983_vm10, %v9012_v40, %v9011_v27  ;;  %v8997_v35 = vsel %vm5980_vm9, %v8996_v15, %v15469_v41  ;;  %v11439_v27 = vld [vmem:[%s17106_s2 + $0x220] ss:$16 sps:$4 sm:$0xff]   ;;  %v11442_v15 = vld [vmem:[%s17106_s2 + $0x228] ss:$16 sps:$4 sm:$0xff]  }
 0xe22   :  { %v15537_v39 = vsel %vm5983_vm10, %v8998_v21, %v8997_v35  ;;  %v11444_v21 = vld [vmem:[%s17106_s2 + $0x22c] ss:$16 sps:$4 sm:$0xff]  }
 0xe28   :  { %v5753_v22 = vpop.f32.mrb[108].mxu0 }
 0xe29   :  { %v5870_v34 = vpack.c.bf16 %v5753_v22, %v5753_v22  ;;  %10111 = vst [vmem:[%s17107_s4 + $0x60] sm:$0x7f] %v5753_v22  ;;  %v5755_v0 = vpop.f32.mrb[109].mxu0 }
 0xe2a   :  { %v5871_v60 = vpack.c.bf16 %v5755_v0, %v5755_v0  ;;  %10112 = vst [vmem:[%s17107_s4 + $0x68] sm:$0x7f] %v5755_v0 }
 0xe2b   :  { %v15545_v8 = vunpack.c.l.b16 %v5870_v34 }
 0xe2c   :  { %v15547_v53 = vunpack.c.l.b16 %v5871_v60  ;;  %v11447_v60 = vld [vmem:[%s17106_s2 + $0x244] ss:$16 sps:$4 sm:$0xff]  }
 0xe2d   :  { %v5827_v41 = vpop.f32.mrb[136].mxu1  ;;  %v5985_v29 = vrot.slane %v15545_v8, 2  ;;  %v6489_v43 = vrot.slane %v15545_v8, 3  ;;  %v6991_v52 = vrot.slane %v15545_v8, 4  ;;  %v7493_v54 = vrot.slane %v15545_v8, 5 }
 0xe2e   :  { %v5872_v25 = vpack.c.bf16 %v5827_v41, %v5827_v41  ;;  %10113 = vst [vmem:[%s17107_s4 + $0x70] sm:$0x7f] %v5827_v41  ;;  %v5829_v33 = vpop.f32.mrb[137].mxu1  ;;  %v6001_v13 = vrot.slane %v15547_v53, 2  ;;  %v6503_v61 = vrot.slane %v15547_v53, 3  ;;  %v7005_v50 = vrot.slane %v15547_v53, 4 }
 0xe2f   :  { %v5873_v36 = vpack.c.bf16 %v5829_v33, %v5829_v33  ;;  %10114 = vst [vmem:[%s17107_s4 + $0x78] sm:$0x7f] %v5829_v33  ;;  %v5987_v14 = vsel %vm5986_vm11, %v5985_v29, %v5984_v31  ;;  %v6490_v47 = vsel %vm5986_vm11, %v6489_v43, %v6488_v57  ;;  %v6992_v1 = vsel %vm5986_vm11, %v6991_v52, %v6990_v2  ;;  %v11450_v41 = vld [vmem:[%s17106_s2 + $0x24c] ss:$16 sps:$4 sm:$0xff]  }
 0xe30   :  { %v15565_v26 = vunpack.c.l.b16 %v5872_v25  ;;  %v6002_v56 = vsel %vm5986_vm11, %v6001_v13, %v6000_v5  ;;  %v6504_v45 = vsel %vm5986_vm11, %v6503_v61, %v6502_v17  ;;  %v7006_v37 = vsel %vm5986_vm11, %v7005_v50, %v7004_v11  ;;  %v11436_v11 = vld [vmem:[%s17106_s2 + $0x208] ss:$16 sps:$4 sm:$0xff]   ;;  %v11445_v13 = vld [vmem:[%s17106_s2 + $0x240] ss:$16 sps:$4 sm:$0xff]  }
 0xe31   :  { %v15570_v38 = vunpack.c.l.b16 %v5873_v36  ;;  %v7507_v24 = vrot.slane %v15547_v53, 5  ;;  %v7494_v16 = vsel %vm5986_vm11, %v7493_v54, %v7492_v59  ;;  %v8009_v51 = vrot.slane %v15547_v53, 6  ;;  %v11448_v61 = vld [vmem:[%s17106_s2 + $0x248] ss:$16 sps:$4 sm:$0xff]  }
 0xe32   :  { %v5988_v18 = vrot.slane %v15565_v26, 1  ;;  %v6491_v62 = vrot.slane %v15565_v26, 2  ;;  %v6993_v31 = vrot.slane %v15565_v26, 3  ;;  %v7495_v30 = vrot.slane %v15565_v26, 4 }
 0xe33   :  { %v6003_v57 = vrot.slane %v15570_v38, 1  ;;  %v6505_v5 = vrot.slane %v15570_v38, 2  ;;  %v7007_v17 = vrot.slane %v15570_v38, 3  ;;  %v7508_v23 = vsel %vm5986_vm11, %v7507_v24, %v7506_v58  ;;  %v11457_v24 = vld [vmem:[%s17106_s2 + $0x280] ss:$16 sps:$4 sm:$0xff]  }
 0xe34   :  { %v5990_v2 = vsel %vm5989_vm12, %v5988_v18, %v5987_v14  ;;  %v15591_v49 = vsel %vm5989_vm12, %v6491_v62, %v6490_v47  ;;  %v15594_v6 = vsel %vm5989_vm12, %v6993_v31, %v6992_v1  ;;  %v15597_v59 = vsel %vm5989_vm12, %v7495_v30, %v7494_v16  ;;  %v11453_v14 = vld [vmem:[%s17106_s2 + $0x264] ss:$16 sps:$4 sm:$0xff]   ;;  %v11456_v47 = vld [vmem:[%s17106_s2 + $0x26c] ss:$16 sps:$4 sm:$0xff]   ;;  %v11460_v16 = vld [vmem:[%s17106_s2 + $0x288] ss:$16 sps:$4 sm:$0xff]  }
 0xe35   :  { %v6004_v58 = vsel %vm5989_vm12, %v6003_v57, %v6002_v56  ;;  %v6506_v4 = vsel %vm5989_vm12, %v6505_v5, %v6504_v45  ;;  %v15605_v3 = vsel %vm5989_vm12, %v7007_v17, %v7006_v37  ;;  %v6005_v40 = vpack.c.b16 %v5990_v2, %v5990_v2  ;;  %v11454_v56 = vld [vmem:[%s17106_s2 + $0x268] ss:$16 sps:$4 sm:$0xff]   ;;  %v11459_v37 = vld [vmem:[%s17106_s2 + $0x284] ss:$16 sps:$4 sm:$0xff]   ;;  %v11468_v18 = vld [vmem:[%s17106_s2 + $0x2ac] ss:$16 sps:$4 sm:$0xff]  }
 0xe36   :  { %v6006_v48 = vpack.c.b16 %v6004_v58, %v6004_v58  ;;  %v7509_v7 = vrot.slane %v15570_v38, 4  ;;  %v8010_v20 = vsel %vm5986_vm11, %v8009_v51, %v15515_v42  ;;  %v8011_v35 = vrot.slane %v15570_v38, 5  ;;  %v11465_v51 = vld [vmem:[%s17106_s2 + $0x2a4] ss:$16 sps:$4 sm:$0xff]   ;;  %v11463_v62 = vld [vmem:[%s17106_s2 + $0x2a0] ss:$16 sps:$4 sm:$0xff]  }
 0xe37   :  { %v7995_v22 = vrot.slane %v15545_v8, 6  ;;  %v9014_v42 = vsel %vm5986_vm11, %v15547_v53, %v15531_v12  ;;  %v9000_v34 = vsel %vm5986_vm11, %v15545_v8, %v15537_v39  ;;  %v6508_v0 = vpack.c.b16 %v6506_v4, %v6506_v4  ;;  %v11466_v31 = vld [vmem:[%s17106_s2 + $0x2a8] ss:$16 sps:$4 sm:$0xff]   ;;  %v11471_v30 = vld [vmem:[%s17106_s2 + $0x2c4] ss:$16 sps:$4 sm:$0xff]  }
 0xe38   :  { %6361 = vmatprep.mubr.bf16.mxu0 %v6006_v48  ;;  %6402 = vmatprep.mubr.bf16.mxu1 %v6006_v48  ;;  %v15634_v29 = vsel %vm5989_vm12, %v7509_v7, %v7508_v23  ;;  %v7997_v12 = vrot.slane %v15565_v26, 5  ;;  %v8511_v43 = vrot.slane %v15547_v53, 7  ;;  %v15639_v39 = vsel %vm5989_vm12, %v8011_v35, %v8010_v20  ;;  %v11474_v57 = vld [vmem:[%s17106_s2 + $0x2cc] ss:$16 sps:$4 sm:$0xff]   ;;  %v11469_v5 = vld [vmem:[%s17106_s2 + $0x2c0] ss:$16 sps:$4 sm:$0xff]  }
 0xe39   :  { %6362 = vmatmul.mubr.bf16.vlgmr.msra.gmra.mrb[112].mxu0 %v6005_v40  ;;  %6403 = vmatmul.mubr.bf16.vlgmr.msra.gmra.mrb[140].mxu1 %v6005_v40  ;;  %v7996_v52 = vsel %vm5986_vm11, %v7995_v22, %v15512_v10  ;;  %v8513_v54 = vrot.slane %v15570_v38, 6  ;;  %v8497_v53 = vrot.slane %v15545_v8, 7  ;;  %v9015_v8 = vrot.slane %v15570_v38, 7  ;;  %v11462_v38 = vld [vmem:[%s17106_s2 + $0x28c] ss:$16 sps:$4 sm:$0xff]  }
 0xe3a   :  { %6832 = vmatpush1.bf16.msra.mxu0 %v11433_v9  ;;  %6873 = vmatpush1.bf16.msra.mxu1 %v11436_v11  ;;  %v15645_v25 = vsel %vm5989_vm12, %v7997_v12, %v7996_v52  ;;  %v8512_v33 = vsel %vm5986_vm11, %v8511_v43, %v15524_v46  ;;  %v8499_v46 = vrot.slane %v15565_v26, 6  ;;  %v9001_v36 = vrot.slane %v15565_v26, 7  ;;  %v11451_v26 = vld [vmem:[%s17106_s2 + $0x260] ss:$16 sps:$4 sm:$0xff]   ;;  %v11472_v17 = vld [vmem:[%s17106_s2 + $0x2c8] ss:$16 sps:$4 sm:$0xff]  }
 0xe3b   :  { %6863 = vmatprep.mubr.bf16.mxu0 %v6508_v0  ;;  %6904 = vmatprep.mubr.bf16.mxu1 %v6508_v0  ;;  %v15654_v10 = vsel %vm5989_vm12, %v8513_v54, %v8512_v33  ;;  %v8498_v50 = vsel %vm5986_vm11, %v8497_v53, %v15528_v44  ;;  %v15674_v1 = vsel %vm5989_vm12, %v9015_v8, %v9014_v42  ;;  %v11477_v23 = vld [vmem:[%s17106_s2 + $0x2e4] ss:$16 sps:$4 sm:$0xff]   ;;  %v11480_v9 = vld [vmem:[%s17106_s2 + $0x2ec] ss:$16 sps:$4 sm:$0xff]   ;;  %v11475_v11 = vld [vmem:[%s17106_s2 + $0x2e0] ss:$16 sps:$4 sm:$0xff]  }
 0xe3c   :  { %6833 = vmatprep.subr.bf16.mxu0 %v11441_v55  ;;  %6874 = vmatprep.subr.bf16.mxu1 %v11444_v21  ;;  %v15671_v44 = vsel %vm5989_vm12, %v8499_v46, %v8498_v50  ;;  %v15683_v45 = vsel %vm5989_vm12, %v9001_v36, %v9000_v34  ;;  %v11478_v2 = vld [vmem:[%s17106_s2 + $0x2e8] ss:$16 sps:$4 sm:$0xff]   ;;  %v11483_v58 = vld [vmem:[%s17106_s2 + $0x304] ss:$16 sps:$4 sm:$0xff]   ;;  %v11486_v4 = vld [vmem:[%s17106_s2 + $0x30c] ss:$16 sps:$4 sm:$0xff]  }
 0xe3d   :  { %v11481_v48 = vld [vmem:[%s17106_s2 + $0x300] ss:$16 sps:$4 sm:$0xff]   ;;  %v11484_v55 = vld [vmem:[%s17106_s2 + $0x308] ss:$16 sps:$4 sm:$0xff]   ;;  %v11489_v40 = vld [vmem:[%s17106_s2 + $0x324] ss:$16 sps:$4 sm:$0xff]  }
 0xe3e   :  { %6834 = vmatpush1.bf16.msra.mxu0 %v11439_v27  ;;  %6875 = vmatpush1.bf16.msra.mxu1 %v11442_v15  ;;  %v11492_v7 = vld [vmem:[%s17106_s2 + $0x32c] ss:$16 sps:$4 sm:$0xff]   ;;  %v11487_v20 = vld [vmem:[%s17106_s2 + $0x320] ss:$16 sps:$4 sm:$0xff]   ;;  %v11490_v27 = vld [vmem:[%s17106_s2 + $0x328] ss:$16 sps:$4 sm:$0xff]  }
 0xe3f   :  { %6835 = vmatprep.subr.bf16.mxu0 %v11447_v60  ;;  %6876 = vmatprep.subr.bf16.mxu1 %v11450_v41  ;;  %v11495_v15 = vld [vmem:[%s17106_s2 + $0x344] ss:$16 sps:$4 sm:$0xff]   ;;  %v11498_v21 = vld [vmem:[%s17106_s2 + $0x34c] ss:$16 sps:$4 sm:$0xff]   ;;  %v11493_v35 = vld [vmem:[%s17106_s2 + $0x340] ss:$16 sps:$4 sm:$0xff]  }
 0xe40   :  { %v11496_v22 = vld [vmem:[%s17106_s2 + $0x348] ss:$16 sps:$4 sm:$0xff]   ;;  %v11501_v42 = vld [vmem:[%s17106_s2 + $0x364] ss:$16 sps:$4 sm:$0xff]   ;;  %v11504_v34 = vld [vmem:[%s17106_s2 + $0x36c] ss:$16 sps:$4 sm:$0xff]  }
 0xe41   :  { %v11499_v0 = vld [vmem:[%s17106_s2 + $0x360] ss:$16 sps:$4 sm:$0xff]   ;;  %v11502_v60 = vld [vmem:[%s17106_s2 + $0x368] ss:$16 sps:$4 sm:$0xff]   ;;  %v11507_v41 = vld [vmem:[%s17106_s2 + $0x384] ss:$16 sps:$4 sm:$0xff]  }
 0xe42   :  { %6836 = vmatpush1.bf16.msra.mxu0 %v11445_v13  ;;  %6877 = vmatpush1.bf16.msra.mxu1 %v11448_v61  ;;  %v11510_v12 = vld [vmem:[%s17106_s2 + $0x38c] ss:$16 sps:$4 sm:$0xff]   ;;  %v11505_v43 = vld [vmem:[%s17106_s2 + $0x380] ss:$16 sps:$4 sm:$0xff]   ;;  %v11508_v52 = vld [vmem:[%s17106_s2 + $0x388] ss:$16 sps:$4 sm:$0xff]  }
 0xe43   :  { %6837 = vmatprep.subr.bf16.mxu0 %v11453_v14  ;;  %6878 = vmatprep.subr.bf16.mxu1 %v11456_v47  ;;  %v11513_v54 = vld [vmem:[%s17106_s2 + $0x3a4] ss:$16 sps:$4 sm:$0xff]   ;;  %v11516_v33 = vld [vmem:[%s17106_s2 + $0x3ac] ss:$16 sps:$4 sm:$0xff]   ;;  %v11511_v53 = vld [vmem:[%s17106_s2 + $0x3a0] ss:$16 sps:$4 sm:$0xff]  }
 0xe44   :  { %v11514_v13 = vld [vmem:[%s17106_s2 + $0x3a8] ss:$16 sps:$4 sm:$0xff]   ;;  %v11519_v61 = vld [vmem:[%s17106_s2 + $0x3c4] ss:$16 sps:$4 sm:$0xff]   ;;  %v11522_v50 = vld [vmem:[%s17106_s2 + $0x3cc] ss:$16 sps:$4 sm:$0xff]  }
 0xe45   :  { %v11517_v46 = vld [vmem:[%s17106_s2 + $0x3c0] ss:$16 sps:$4 sm:$0xff]   ;;  %v11520_v8 = vld [vmem:[%s17106_s2 + $0x3c8] ss:$16 sps:$4 sm:$0xff]   ;;  %v11525_v36 = vld [vmem:[%s17106_s2 + $0x3e4] ss:$16 sps:$4 sm:$0xff]  }
 0xe46   :  { %6838 = vmatpush1.bf16.msra.mxu0 %v11451_v26  ;;  %6879 = vmatpush1.bf16.msra.mxu1 %v11454_v56  ;;  %v11528_v14 = vld [vmem:[%s17106_s2 + $0x3ec] ss:$16 sps:$4 sm:$0xff]   ;;  %v11523_v47 = vld [vmem:[%s17106_s2 + $0x3e0] ss:$16 sps:$4 sm:$0xff]   ;;  %v11526_v26 = vld [vmem:[%s17106_s2 + $0x3e8] ss:$16 sps:$4 sm:$0xff]  }
 0xe47   :  { %6839 = vmatprep.subr.bf16.mxu0 %v11459_v37  ;;  %6880 = vmatprep.subr.bf16.mxu1 %v11462_v38  ;;  %v11531_v56 = vld [vmem:[%s17106_s2 + $0x404] ss:$16 sps:$4 sm:$0xff]   ;;  %v11534_v37 = vld [vmem:[%s17106_s2 + $0x40c] ss:$16 sps:$4 sm:$0xff]   ;;  %v11529_v38 = vld [vmem:[%s17106_s2 + $0x400] ss:$16 sps:$4 sm:$0xff]  }
 0xe4a   :  { %6840 = vmatpush1.bf16.msra.mxu0 %v11457_v24  ;;  %6881 = vmatpush1.bf16.msra.mxu1 %v11460_v16  ;;  %v6507_v24 = vpack.c.b16 %v15591_v49, %v15591_v49  ;;  %v11532_v16 = vld [vmem:[%s17106_s2 + $0x408] ss:$16 sps:$4 sm:$0xff]   ;;  %v11535_v49 = vld [vmem:[%s17106_s2 + $0x420] ss:$16 sps:$4 sm:$0xff]  }
 0xe4b   :  { %6841 = vmatprep.subr.bf16.mxu0 %v11465_v51  ;;  %6882 = vmatprep.subr.bf16.mxu1 %v11468_v18  ;;  %v7010_v51 = vpack.c.b16 %v15605_v3, %v15605_v3  ;;  %v11537_v18 = vld [vmem:[%s17106_s2 + $0x424] ss:$16 sps:$4 sm:$0xff]   ;;  %v11538_v3 = vld [vmem:[%s17106_s2 + $0x428] ss:$16 sps:$4 sm:$0xff]  }
 0xe4e   :  { %6842 = vmatpush1.bf16.msra.mxu0 %v11463_v62  ;;  %6883 = vmatpush1.bf16.msra.mxu1 %v11466_v31  ;;  %v11540_v62 = vld [vmem:[%s17106_s2 + $0x42c] ss:$16 sps:$4 sm:$0xff]   ;;  %v11543_v31 = vld [vmem:[%s17106_s2 + $0x444] ss:$16 sps:$4 sm:$0xff]  }
 0xe4f   :  { %6843 = vmatprep.subr.bf16.mxu0 %v11471_v30  ;;  %6884 = vmatprep.subr.bf16.mxu1 %v11474_v57  ;;  %v11546_v30 = vld [vmem:[%s17106_s2 + $0x44c] ss:$16 sps:$4 sm:$0xff]   ;;  %v11541_v57 = vld [vmem:[%s17106_s2 + $0x440] ss:$16 sps:$4 sm:$0xff]  }
 0xe52   :  { %6844 = vmatpush1.bf16.msra.mxu0 %v11469_v5  ;;  %6885 = vmatpush1.bf16.msra.mxu1 %v11472_v17  ;;  %v11544_v5 = vld [vmem:[%s17106_s2 + $0x448] ss:$16 sps:$4 sm:$0xff]   ;;  %v11549_v17 = vld [vmem:[%s17106_s2 + $0x464] ss:$16 sps:$4 sm:$0xff]  }
 0xe53   :  { %6845 = vmatprep.subr.bf16.mxu0 %v11477_v23  ;;  %6886 = vmatprep.subr.bf16.mxu1 %v11480_v9  ;;  %v11552_v23 = vld [vmem:[%s17106_s2 + $0x46c] ss:$16 sps:$4 sm:$0xff]   ;;  %v11547_v9 = vld [vmem:[%s17106_s2 + $0x460] ss:$16 sps:$4 sm:$0xff]  }
 0xe56   :  { %6846 = vmatpush1.bf16.msra.mxu0 %v11475_v11  ;;  %6887 = vmatpush1.bf16.msra.mxu1 %v11478_v2  ;;  %v11550_v11 = vld [vmem:[%s17106_s2 + $0x468] ss:$16 sps:$4 sm:$0xff]   ;;  %v11555_v2 = vld [vmem:[%s17106_s2 + $0x484] ss:$16 sps:$4 sm:$0xff]  }
 0xe57   :  { %6847 = vmatprep.subr.bf16.mxu0 %v11483_v58  ;;  %6888 = vmatprep.subr.bf16.mxu1 %v11486_v4  ;;  %v11558_v58 = vld [vmem:[%s17106_s2 + $0x48c] ss:$16 sps:$4 sm:$0xff]   ;;  %v11553_v4 = vld [vmem:[%s17106_s2 + $0x480] ss:$16 sps:$4 sm:$0xff]  }
 0xe5a   :  { %6848 = vmatpush1.bf16.msra.mxu0 %v11481_v48  ;;  %6889 = vmatpush1.bf16.msra.mxu1 %v11484_v55  ;;  %v11556_v48 = vld [vmem:[%s17106_s2 + $0x488] ss:$16 sps:$4 sm:$0xff]   ;;  %v11561_v55 = vld [vmem:[%s17106_s2 + $0x4a4] ss:$16 sps:$4 sm:$0xff]  }
 0xe5b   :  { %6849 = vmatprep.subr.bf16.mxu0 %v11489_v40  ;;  %6890 = vmatprep.subr.bf16.mxu1 %v11492_v7  ;;  %v11564_v40 = vld [vmem:[%s17106_s2 + $0x4ac] ss:$16 sps:$4 sm:$0xff]   ;;  %v11559_v7 = vld [vmem:[%s17106_s2 + $0x4a0] ss:$16 sps:$4 sm:$0xff]  }
 0xe5e   :  { %6850 = vmatpush1.bf16.msra.mxu0 %v11487_v20  ;;  %6891 = vmatpush1.bf16.msra.mxu1 %v11490_v27  ;;  %v11562_v20 = vld [vmem:[%s17106_s2 + $0x4a8] ss:$16 sps:$4 sm:$0xff]   ;;  %v11567_v27 = vld [vmem:[%s17106_s2 + $0x4c4] ss:$16 sps:$4 sm:$0xff]  }
 0xe5f   :  { %6851 = vmatprep.subr.bf16.mxu0 %v11495_v15  ;;  %6892 = vmatprep.subr.bf16.mxu1 %v11498_v21  ;;  %v11570_v15 = vld [vmem:[%s17106_s2 + $0x4cc] ss:$16 sps:$4 sm:$0xff]   ;;  %v11565_v21 = vld [vmem:[%s17106_s2 + $0x4c0] ss:$16 sps:$4 sm:$0xff]  }
 0xe62   :  { %6852 = vmatpush1.bf16.msra.mxu0 %v11493_v35  ;;  %6893 = vmatpush1.bf16.msra.mxu1 %v11496_v22  ;;  %v11568_v35 = vld [vmem:[%s17106_s2 + $0x4c8] ss:$16 sps:$4 sm:$0xff]   ;;  %v11573_v22 = vld [vmem:[%s17106_s2 + $0x4e4] ss:$16 sps:$4 sm:$0xff]  }
 0xe63   :  { %6853 = vmatprep.subr.bf16.mxu0 %v11501_v42  ;;  %6894 = vmatprep.subr.bf16.mxu1 %v11504_v34  ;;  %v11576_v42 = vld [vmem:[%s17106_s2 + $0x4ec] ss:$16 sps:$4 sm:$0xff]   ;;  %v11571_v34 = vld [vmem:[%s17106_s2 + $0x4e0] ss:$16 sps:$4 sm:$0xff]  }
 0xe66   :  { %6854 = vmatpush1.bf16.msra.mxu0 %v11499_v0  ;;  %6895 = vmatpush1.bf16.msra.mxu1 %v11502_v60  ;;  %v11574_v0 = vld [vmem:[%s17106_s2 + $0x4e8] ss:$16 sps:$4 sm:$0xff]   ;;  %v11579_v60 = vld [vmem:[%s17106_s2 + $0x504] ss:$16 sps:$4 sm:$0xff]  }
 0xe67   :  { %6855 = vmatprep.subr.bf16.mxu0 %v11507_v41  ;;  %6896 = vmatprep.subr.bf16.mxu1 %v11510_v12  ;;  %v11582_v41 = vld [vmem:[%s17106_s2 + $0x50c] ss:$16 sps:$4 sm:$0xff]   ;;  %v11577_v12 = vld [vmem:[%s17106_s2 + $0x500] ss:$16 sps:$4 sm:$0xff]  }
 0xe6a   :  { %6856 = vmatpush1.bf16.msra.mxu0 %v11505_v43  ;;  %6897 = vmatpush1.bf16.msra.mxu1 %v11508_v52  ;;  %v11580_v43 = vld [vmem:[%s17106_s2 + $0x508] ss:$16 sps:$4 sm:$0xff]   ;;  %v11585_v52 = vld [vmem:[%s17106_s2 + $0x524] ss:$16 sps:$4 sm:$0xff]  }
 0xe6b   :  { %6857 = vmatprep.subr.bf16.mxu0 %v11513_v54  ;;  %6898 = vmatprep.subr.bf16.mxu1 %v11516_v33  ;;  %v11588_v54 = vld [vmem:[%s17106_s2 + $0x52c] ss:$16 sps:$4 sm:$0xff]   ;;  %v11583_v33 = vld [vmem:[%s17106_s2 + $0x520] ss:$16 sps:$4 sm:$0xff]  }
 0xe6e   :  { %6858 = vmatpush1.bf16.msra.mxu0 %v11511_v53  ;;  %6899 = vmatpush1.bf16.msra.mxu1 %v11514_v13  ;;  %v11586_v53 = vld [vmem:[%s17106_s2 + $0x528] ss:$16 sps:$4 sm:$0xff]   ;;  %v11591_v13 = vld [vmem:[%s17106_s2 + $0x544] ss:$16 sps:$4 sm:$0xff]  }
 0xe6f   :  { %6859 = vmatprep.subr.bf16.mxu0 %v11519_v61  ;;  %6900 = vmatprep.subr.bf16.mxu1 %v11522_v50  ;;  %v11594_v61 = vld [vmem:[%s17106_s2 + $0x54c] ss:$16 sps:$4 sm:$0xff]   ;;  %v11589_v50 = vld [vmem:[%s17106_s2 + $0x540] ss:$16 sps:$4 sm:$0xff]  }
 0xe72   :  { %6860 = vmatpush1.bf16.msra.mxu0 %v11517_v46  ;;  %6901 = vmatpush1.bf16.msra.mxu1 %v11520_v8  ;;  %v11592_v46 = vld [vmem:[%s17106_s2 + $0x548] ss:$16 sps:$4 sm:$0xff]   ;;  %v11597_v8 = vld [vmem:[%s17106_s2 + $0x564] ss:$16 sps:$4 sm:$0xff]  }
 0xe73   :  { %6861 = vmatprep.subr.bf16.mxu0 %v11525_v36  ;;  %6902 = vmatprep.subr.bf16.mxu1 %v11528_v14  ;;  %v11600_v36 = vld [vmem:[%s17106_s2 + $0x56c] ss:$16 sps:$4 sm:$0xff]   ;;  %v11595_v14 = vld [vmem:[%s17106_s2 + $0x560] ss:$16 sps:$4 sm:$0xff]  }
 0xe76   :  { %6862 = vmatpush1.bf16.msra.mxu0 %v11523_v47  ;;  %6903 = vmatpush1.bf16.msra.mxu1 %v11526_v26  ;;  %v11598_v47 = vld [vmem:[%s17106_s2 + $0x568] ss:$16 sps:$4 sm:$0xff]   ;;  %v11603_v26 = vld [vmem:[%s17106_s2 + $0x584] ss:$16 sps:$4 sm:$0xff]  }
 0xe77   :  { %7333 = vmatprep.subr.bf16.mxu0 %v11531_v56  ;;  %7374 = vmatprep.subr.bf16.mxu1 %v11534_v37  ;;  %v11606_v56 = vld [vmem:[%s17106_s2 + $0x58c] ss:$16 sps:$4 sm:$0xff]   ;;  %v11601_v37 = vld [vmem:[%s17106_s2 + $0x580] ss:$16 sps:$4 sm:$0xff]  }
 0xe79   :  { %6864 = vmatmul.mubr.bf16.vlgmr.msra.gmra.mrb[112].mxu0 %v6507_v24  ;;  %6905 = vmatmul.mubr.bf16.vlgmr.msra.gmra.mrb[140].mxu1 %v6507_v24  ;;  %v11609_v24 = vld [vmem:[%s17106_s2 + $0x5a4] ss:$16 sps:$4 sm:$0xff]  }
 0xe7a   :  { %7334 = vmatpush1.bf16.msra.mxu0 %v11529_v38  ;;  %7365 = vmatprep.mubr.bf16.mxu0 %v7010_v51  ;;  %v11604_v38 = vld [vmem:[%s17106_s2 + $0x588] ss:$16 sps:$4 sm:$0xff]  }
 0xe7b   :  { %7375 = vmatpush1.bf16.msra.mxu1 %v11532_v16  ;;  %7406 = vmatprep.mubr.bf16.mxu1 %v7010_v51  ;;  %v11612_v16 = vld [vmem:[%s17106_s2 + $0x5ac] ss:$16 sps:$4 sm:$0xff]   ;;  %v11607_v51 = vld [vmem:[%s17106_s2 + $0x5a0] ss:$16 sps:$4 sm:$0xff]  }
 0xe7c   :  { %7335 = vmatprep.subr.bf16.mxu0 %v11537_v18  ;;  %7376 = vmatprep.subr.bf16.mxu1 %v11540_v62  ;;  %v11610_v18 = vld [vmem:[%s17106_s2 + $0x5a8] ss:$16 sps:$4 sm:$0xff]   ;;  %v11615_v62 = vld [vmem:[%s17106_s2 + $0x5c4] ss:$16 sps:$4 sm:$0xff]  }
 0xe7e   :  { %7336 = vmatpush1.bf16.msra.mxu0 %v11535_v49  ;;  %v11618_v49 = vld [vmem:[%s17106_s2 + $0x5cc] ss:$16 sps:$4 sm:$0xff]  }
 0xe7f   :  { %7377 = vmatpush1.bf16.msra.mxu1 %v11538_v3  ;;  %7337 = vmatprep.subr.bf16.mxu0 %v11543_v31  ;;  %v11613_v3 = vld [vmem:[%s17106_s2 + $0x5c0] ss:$16 sps:$4 sm:$0xff]   ;;  %v11616_v31 = vld [vmem:[%s17106_s2 + $0x5c8] ss:$16 sps:$4 sm:$0xff]  }
 0xe80   :  { %7378 = vmatprep.subr.bf16.mxu1 %v11546_v30  ;;  %v11621_v30 = vld [vmem:[%s17106_s2 + $0x5e4] ss:$16 sps:$4 sm:$0xff]  }
 0xe82   :  { %7338 = vmatpush1.bf16.msra.mxu0 %v11541_v57  ;;  %v11624_v57 = vld [vmem:[%s17106_s2 + $0x5ec] ss:$16 sps:$4 sm:$0xff]  }
 0xe83   :  { %7379 = vmatpush1.bf16.msra.mxu1 %v11544_v5  ;;  %7339 = vmatprep.subr.bf16.mxu0 %v11549_v17  ;;  %v11619_v5 = vld [vmem:[%s17106_s2 + $0x5e0] ss:$16 sps:$4 sm:$0xff]   ;;  %v11622_v17 = vld [vmem:[%s17106_s2 + $0x5e8] ss:$16 sps:$4 sm:$0xff]  }
 0xe84   :  { %7380 = vmatprep.subr.bf16.mxu1 %v11552_v23  ;;  %v11627_v23 = vld [vmem:[%s17106_s2 + $0x604] ss:$16 sps:$4 sm:$0xff]  }
 0xe86   :  { %7340 = vmatpush1.bf16.msra.mxu0 %v11547_v9  ;;  %v11630_v9 = vld [vmem:[%s17106_s2 + $0x60c] ss:$16 sps:$4 sm:$0xff]  }
 0xe87   :  { %7381 = vmatpush1.bf16.msra.mxu1 %v11550_v11  ;;  %7341 = vmatprep.subr.bf16.mxu0 %v11555_v2  ;;  %v11625_v11 = vld [vmem:[%s17106_s2 + $0x600] ss:$16 sps:$4 sm:$0xff]   ;;  %v7009_v2 = vpack.c.b16 %v15594_v6, %v15594_v6 }
 0xe88   :  { %7382 = vmatprep.subr.bf16.mxu1 %v11558_v58  ;;  %v11628_v58 = vld [vmem:[%s17106_s2 + $0x608] ss:$16 sps:$4 sm:$0xff]   ;;  %v11631_v6 = vld [vmem:[%s17106_s2 + $0x620] ss:$16 sps:$4 sm:$0xff]  }
 0xe8a   :  { %7342 = vmatpush1.bf16.msra.mxu0 %v11553_v4  ;;  %v11633_v4 = vld [vmem:[%s17106_s2 + $0x624] ss:$16 sps:$4 sm:$0xff]  }
 0xe8b   :  { %7383 = vmatpush1.bf16.msra.mxu1 %v11556_v48  ;;  %7343 = vmatprep.subr.bf16.mxu0 %v11561_v55  ;;  %v7512_v48 = vpack.c.b16 %v15634_v29, %v15634_v29  ;;  %v11636_v55 = vld [vmem:[%s17106_s2 + $0x62c] ss:$16 sps:$4 sm:$0xff]   ;;  %v11639_v29 = vld [vmem:[%s17106_s2 + $0x644] ss:$16 sps:$4 sm:$0xff]  }
 0xe8c   :  { %7384 = vmatprep.subr.bf16.mxu1 %v11564_v40  ;;  %v11634_v40 = vld [vmem:[%s17106_s2 + $0x628] ss:$16 sps:$4 sm:$0xff]  }
 0xe8e   :  { %7344 = vmatpush1.bf16.msra.mxu0 %v11559_v7  ;;  %v11642_v7 = vld [vmem:[%s17106_s2 + $0x64c] ss:$16 sps:$4 sm:$0xff]  }
 0xe8f   :  { %7385 = vmatpush1.bf16.msra.mxu1 %v11562_v20  ;;  %7345 = vmatprep.subr.bf16.mxu0 %v11567_v27  ;;  %v11637_v20 = vld [vmem:[%s17106_s2 + $0x640] ss:$16 sps:$4 sm:$0xff]   ;;  %v11640_v27 = vld [vmem:[%s17106_s2 + $0x648] ss:$16 sps:$4 sm:$0xff]  }
 0xe90   :  { %7386 = vmatprep.subr.bf16.mxu1 %v11570_v15  ;;  %v11645_v15 = vld [vmem:[%s17106_s2 + $0x664] ss:$16 sps:$4 sm:$0xff]  }
 0xe92   :  { %7346 = vmatpush1.bf16.msra.mxu0 %v11565_v21  ;;  %v11648_v21 = vld [vmem:[%s17106_s2 + $0x66c] ss:$16 sps:$4 sm:$0xff]  }
 0xe93   :  { %7387 = vmatpush1.bf16.msra.mxu1 %v11568_v35  ;;  %7347 = vmatprep.subr.bf16.mxu0 %v11573_v22  ;;  %v11643_v35 = vld [vmem:[%s17106_s2 + $0x660] ss:$16 sps:$4 sm:$0xff]   ;;  %v11646_v22 = vld [vmem:[%s17106_s2 + $0x668] ss:$16 sps:$4 sm:$0xff]  }
 0xe94   :  { %7388 = vmatprep.subr.bf16.mxu1 %v11576_v42  ;;  %v11651_v42 = vld [vmem:[%s17106_s2 + $0x684] ss:$16 sps:$4 sm:$0xff]  }
 0xe96   :  { %7348 = vmatpush1.bf16.msra.mxu0 %v11571_v34  ;;  %v11654_v34 = vld [vmem:[%s17106_s2 + $0x68c] ss:$16 sps:$4 sm:$0xff]  }
 0xe97   :  { %7389 = vmatpush1.bf16.msra.mxu1 %v11574_v0  ;;  %7349 = vmatprep.subr.bf16.mxu0 %v11579_v60  ;;  %v11649_v0 = vld [vmem:[%s17106_s2 + $0x680] ss:$16 sps:$4 sm:$0xff]   ;;  %v11652_v60 = vld [vmem:[%s17106_s2 + $0x688] ss:$16 sps:$4 sm:$0xff]  }
 0xe98   :  { %7390 = vmatprep.subr.bf16.mxu1 %v11582_v41  ;;  %v11657_v41 = vld [vmem:[%s17106_s2 + $0x6a4] ss:$16 sps:$4 sm:$0xff]  }
 0xe9a   :  { %7350 = vmatpush1.bf16.msra.mxu0 %v11577_v12  ;;  %v11660_v12 = vld [vmem:[%s17106_s2 + $0x6ac] ss:$16 sps:$4 sm:$0xff]  }
 0xe9b   :  { %7391 = vmatpush1.bf16.msra.mxu1 %v11580_v43  ;;  %7351 = vmatprep.subr.bf16.mxu0 %v11585_v52  ;;  %v11655_v43 = vld [vmem:[%s17106_s2 + $0x6a0] ss:$16 sps:$4 sm:$0xff]   ;;  %v11658_v52 = vld [vmem:[%s17106_s2 + $0x6a8] ss:$16 sps:$4 sm:$0xff]  }
 0xe9c   :  { %7392 = vmatprep.subr.bf16.mxu1 %v11588_v54  ;;  %v11663_v54 = vld [vmem:[%s17106_s2 + $0x6c4] ss:$16 sps:$4 sm:$0xff]  }
 0xe9e   :  { %7352 = vmatpush1.bf16.msra.mxu0 %v11583_v33  ;;  %v11666_v33 = vld [vmem:[%s17106_s2 + $0x6cc] ss:$16 sps:$4 sm:$0xff]  }
 0xe9f   :  { %7393 = vmatpush1.bf16.msra.mxu1 %v11586_v53  ;;  %7353 = vmatprep.subr.bf16.mxu0 %v11591_v13  ;;  %v11661_v53 = vld [vmem:[%s17106_s2 + $0x6c0] ss:$16 sps:$4 sm:$0xff]   ;;  %v11664_v13 = vld [vmem:[%s17106_s2 + $0x6c8] ss:$16 sps:$4 sm:$0xff]  }
 0xea0   :  { %7394 = vmatprep.subr.bf16.mxu1 %v11594_v61  ;;  %v11669_v61 = vld [vmem:[%s17106_s2 + $0x6e4] ss:$16 sps:$4 sm:$0xff]  }
 0xea2   :  { %7354 = vmatpush1.bf16.msra.mxu0 %v11589_v50  ;;  %v11672_v50 = vld [vmem:[%s17106_s2 + $0x6ec] ss:$16 sps:$4 sm:$0xff]  }
 0xea3   :  { %7395 = vmatpush1.bf16.msra.mxu1 %v11592_v46  ;;  %7355 = vmatprep.subr.bf16.mxu0 %v11597_v8  ;;  %v11667_v46 = vld [vmem:[%s17106_s2 + $0x6e0] ss:$16 sps:$4 sm:$0xff]   ;;  %v11670_v8 = vld [vmem:[%s17106_s2 + $0x6e8] ss:$16 sps:$4 sm:$0xff]  }
 0xea4   :  { %7396 = vmatprep.subr.bf16.mxu1 %v11600_v36  ;;  %v11675_v36 = vld [vmem:[%s17106_s2 + $0x704] ss:$16 sps:$4 sm:$0xff]  }
 0xea6   :  { %7356 = vmatpush1.bf16.msra.mxu0 %v11595_v14  ;;  %v11678_v14 = vld [vmem:[%s17106_s2 + $0x70c] ss:$16 sps:$4 sm:$0xff]  }
 0xea7   :  { %7397 = vmatpush1.bf16.msra.mxu1 %v11598_v47  ;;  %7357 = vmatprep.subr.bf16.mxu0 %v11603_v26  ;;  %v11673_v47 = vld [vmem:[%s17106_s2 + $0x700] ss:$16 sps:$4 sm:$0xff]   ;;  %v11676_v26 = vld [vmem:[%s17106_s2 + $0x708] ss:$16 sps:$4 sm:$0xff]  }
 0xea8   :  { %7398 = vmatprep.subr.bf16.mxu1 %v11606_v56  ;;  %v11681_v56 = vld [vmem:[%s17106_s2 + $0x724] ss:$16 sps:$4 sm:$0xff]  }
 0xeaa   :  { %7358 = vmatpush1.bf16.msra.mxu0 %v11601_v37  ;;  %v11684_v37 = vld [vmem:[%s17106_s2 + $0x72c] ss:$16 sps:$4 sm:$0xff]  }
 0xeab   :  { %7399 = vmatpush1.bf16.msra.mxu1 %v11604_v38  ;;  %7359 = vmatprep.subr.bf16.mxu0 %v11609_v24  ;;  %v11679_v38 = vld [vmem:[%s17106_s2 + $0x720] ss:$16 sps:$4 sm:$0xff]   ;;  %v11682_v24 = vld [vmem:[%s17106_s2 + $0x728] ss:$16 sps:$4 sm:$0xff]  }
 0xeac   :  { %7400 = vmatprep.subr.bf16.mxu1 %v11612_v16  ;;  %v11687_v16 = vld [vmem:[%s17106_s2 + $0x744] ss:$16 sps:$4 sm:$0xff]  }
 0xeae   :  { %7360 = vmatpush1.bf16.msra.mxu0 %v11607_v51  ;;  %v11690_v51 = vld [vmem:[%s17106_s2 + $0x74c] ss:$16 sps:$4 sm:$0xff]  }
 0xeaf   :  { %7401 = vmatpush1.bf16.msra.mxu1 %v11610_v18  ;;  %7361 = vmatprep.subr.bf16.mxu0 %v11615_v62  ;;  %v11685_v18 = vld [vmem:[%s17106_s2 + $0x740] ss:$16 sps:$4 sm:$0xff]   ;;  %v11688_v62 = vld [vmem:[%s17106_s2 + $0x748] ss:$16 sps:$4 sm:$0xff]  }
 0xeb0   :  { %7402 = vmatprep.subr.bf16.mxu1 %v11618_v49  ;;  %v11693_v49 = vld [vmem:[%s17106_s2 + $0x764] ss:$16 sps:$4 sm:$0xff]  }
 0xeb2   :  { %7362 = vmatpush1.bf16.msra.mxu0 %v11613_v3  ;;  %v11696_v3 = vld [vmem:[%s17106_s2 + $0x76c] ss:$16 sps:$4 sm:$0xff]  }
 0xeb3   :  { %7403 = vmatpush1.bf16.msra.mxu1 %v11616_v31  ;;  %7363 = vmatprep.subr.bf16.mxu0 %v11621_v30  ;;  %v11691_v31 = vld [vmem:[%s17106_s2 + $0x760] ss:$16 sps:$4 sm:$0xff]   ;;  %v11694_v30 = vld [vmem:[%s17106_s2 + $0x768] ss:$16 sps:$4 sm:$0xff]  }
 0xeb4   :  { %7404 = vmatprep.subr.bf16.mxu1 %v11624_v57  ;;  %v11699_v57 = vld [vmem:[%s17106_s2 + $0x784] ss:$16 sps:$4 sm:$0xff]  }
 0xeb6   :  { %7364 = vmatpush1.bf16.msra.mxu0 %v11619_v5  ;;  %v11702_v5 = vld [vmem:[%s17106_s2 + $0x78c] ss:$16 sps:$4 sm:$0xff]  }
 0xeb7   :  { %7405 = vmatpush1.bf16.msra.mxu1 %v11622_v17  ;;  %7835 = vmatprep.subr.bf16.mxu0 %v11627_v23  ;;  %v11697_v17 = vld [vmem:[%s17106_s2 + $0x780] ss:$16 sps:$4 sm:$0xff]   ;;  %v11700_v23 = vld [vmem:[%s17106_s2 + $0x788] ss:$16 sps:$4 sm:$0xff]  }
 0xeb8   :  { %7876 = vmatprep.subr.bf16.mxu1 %v11630_v9  ;;  %v11705_v9 = vld [vmem:[%s17106_s2 + $0x7a4] ss:$16 sps:$4 sm:$0xff]  }
 0xeb9   :  { %7366 = vmatmul.mubr.bf16.vlgmr.msra.gmra.mrb[112].mxu0 %v7009_v2 }
 0xeba   :  { %7407 = vmatmul.mubr.bf16.vlgmr.msra.gmra.mrb[140].mxu1 %v7009_v2  ;;  %7836 = vmatpush1.bf16.msra.mxu0 %v11625_v11  ;;  %v11708_v11 = vld [vmem:[%s17106_s2 + $0x7ac] ss:$16 sps:$4 sm:$0xff]   ;;  %v11703_v2 = vld [vmem:[%s17106_s2 + $0x7a0] ss:$16 sps:$4 sm:$0xff]  }
 0xebb   :  { %7867 = vmatprep.mubr.bf16.mxu0 %v7512_v48  ;;  %7877 = vmatpush1.bf16.msra.mxu1 %v11628_v58  ;;  %v11706_v58 = vld [vmem:[%s17106_s2 + $0x7a8] ss:$16 sps:$4 sm:$0xff]  }
 0xebc   :  { %7908 = vmatprep.mubr.bf16.mxu1 %v7512_v48  ;;  %7837 = vmatprep.subr.bf16.mxu0 %v11633_v4  ;;  %v11711_v4 = vld [vmem:[%s17106_s2 + $0x7c4] ss:$16 sps:$4 sm:$0xff]   ;;  %v11714_v48 = vld [vmem:[%s17106_s2 + $0x7cc] ss:$16 sps:$4 sm:$0xff]  }
 0xebd   :  { %7878 = vmatprep.subr.bf16.mxu1 %v11636_v55  ;;  %v11709_v55 = vld [vmem:[%s17106_s2 + $0x7c0] ss:$16 sps:$4 sm:$0xff]  }
 0xebe   :  { %7838 = vmatpush1.bf16.msra.mxu0 %v11631_v6  ;;  %v11712_v6 = vld [vmem:[%s17106_s2 + $0x7c8] ss:$16 sps:$4 sm:$0xff]  }
 0xebf   :  { %7879 = vmatpush1.bf16.msra.mxu1 %v11634_v40  ;;  %7839 = vmatprep.subr.bf16.mxu0 %v11639_v29  ;;  %v11717_v40 = vld [vmem:[%s17106_s2 + $0x7e4] ss:$16 sps:$4 sm:$0xff]   ;;  %v11720_v29 = vld [vmem:[%s17106_s2 + $0x7ec] ss:$16 sps:$4 sm:$0xff]  }
 0xec0   :  { %7880 = vmatprep.subr.bf16.mxu1 %v11642_v7  ;;  %v11715_v7 = vld [vmem:[%s17106_s2 + $0x7e0] ss:$16 sps:$4 sm:$0xff]  }
 0xec2   :  { %7840 = vmatpush1.bf16.msra.mxu0 %v11637_v20  ;;  %v11718_v20 = vld [vmem:[%s17106_s2 + $0x7e8] ss:$16 sps:$4 sm:$0xff]  }
 0xec3   :  { %7881 = vmatpush1.bf16.msra.mxu1 %v11640_v27  ;;  %7841 = vmatprep.subr.bf16.mxu0 %v11645_v15  ;;  %v11723_v27 = vld [vmem:[%s17106_s2 + $0x804] ss:$16 sps:$4 sm:$0xff]   ;;  %v11726_v15 = vld [vmem:[%s17106_s2 + $0x80c] ss:$16 sps:$4 sm:$0xff]  }
 0xec4   :  { %7882 = vmatprep.subr.bf16.mxu1 %v11648_v21  ;;  %v11721_v21 = vld [vmem:[%s17106_s2 + $0x800] ss:$16 sps:$4 sm:$0xff]  }
 0xec6   :  { %7842 = vmatpush1.bf16.msra.mxu0 %v11643_v35  ;;  %v7511_v35 = vpack.c.b16 %v15597_v59, %v15597_v59  ;;  %v11727_v59 = vld [vmem:[%s17106_s2 + $0x820] ss:$16 sps:$4 sm:$0xff]  }
 0xec7   :  { %7883 = vmatpush1.bf16.msra.mxu1 %v11646_v22  ;;  %7843 = vmatprep.subr.bf16.mxu0 %v11651_v42  ;;  %v11724_v22 = vld [vmem:[%s17106_s2 + $0x808] ss:$16 sps:$4 sm:$0xff]   ;;  %v11729_v42 = vld [vmem:[%s17106_s2 + $0x824] ss:$16 sps:$4 sm:$0xff]  }
 0xec8   :  { %7884 = vmatprep.subr.bf16.mxu1 %v11654_v34  ;;  %v8014_v34 = vpack.c.b16 %v15639_v39, %v15639_v39  ;;  %v11735_v39 = vld [vmem:[%s17106_s2 + $0x844] ss:$16 sps:$4 sm:$0xff]  }
 0xeca   :  { %7844 = vmatpush1.bf16.msra.mxu0 %v11649_v0  ;;  %v11732_v0 = vld [vmem:[%s17106_s2 + $0x82c] ss:$16 sps:$4 sm:$0xff]  }
 0xecb   :  { %7885 = vmatpush1.bf16.msra.mxu1 %v11652_v60  ;;  %7845 = vmatprep.subr.bf16.mxu0 %v11657_v41  ;;  %v11730_v60 = vld [vmem:[%s17106_s2 + $0x828] ss:$16 sps:$4 sm:$0xff]   ;;  %v11738_v41 = vld [vmem:[%s17106_s2 + $0x84c] ss:$16 sps:$4 sm:$0xff]  }
 0xecc   :  { %7886 = vmatprep.subr.bf16.mxu1 %v11660_v12  ;;  %v11733_v12 = vld [vmem:[%s17106_s2 + $0x840] ss:$16 sps:$4 sm:$0xff]  }
 0xece   :  { %7846 = vmatpush1.bf16.msra.mxu0 %v11655_v43  ;;  %v11736_v43 = vld [vmem:[%s17106_s2 + $0x848] ss:$16 sps:$4 sm:$0xff]  }
 0xecf   :  { %7887 = vmatpush1.bf16.msra.mxu1 %v11658_v52  ;;  %7847 = vmatprep.subr.bf16.mxu0 %v11663_v54  ;;  %v11741_v52 = vld [vmem:[%s17106_s2 + $0x864] ss:$16 sps:$4 sm:$0xff]   ;;  %v11744_v54 = vld [vmem:[%s17106_s2 + $0x86c] ss:$16 sps:$4 sm:$0xff]  }
 0xed0   :  { %7888 = vmatprep.subr.bf16.mxu1 %v11666_v33  ;;  %v11739_v33 = vld [vmem:[%s17106_s2 + $0x860] ss:$16 sps:$4 sm:$0xff]  }
 0xed2   :  { %7848 = vmatpush1.bf16.msra.mxu0 %v11661_v53  ;;  %v11742_v53 = vld [vmem:[%s17106_s2 + $0x868] ss:$16 sps:$4 sm:$0xff]  }
 0xed3   :  { %7889 = vmatpush1.bf16.msra.mxu1 %v11664_v13  ;;  %7849 = vmatprep.subr.bf16.mxu0 %v11669_v61  ;;  %v11747_v13 = vld [vmem:[%s17106_s2 + $0x884] ss:$16 sps:$4 sm:$0xff]   ;;  %v11750_v61 = vld [vmem:[%s17106_s2 + $0x88c] ss:$16 sps:$4 sm:$0xff]  }
 0xed4   :  { %7890 = vmatprep.subr.bf16.mxu1 %v11672_v50  ;;  %v11745_v50 = vld [vmem:[%s17106_s2 + $0x880] ss:$16 sps:$4 sm:$0xff]  }
 0xed6   :  { %7850 = vmatpush1.bf16.msra.mxu0 %v11667_v46  ;;  %v11748_v46 = vld [vmem:[%s17106_s2 + $0x888] ss:$16 sps:$4 sm:$0xff]  }
 0xed7   :  { %7891 = vmatpush1.bf16.msra.mxu1 %v11670_v8  ;;  %7851 = vmatprep.subr.bf16.mxu0 %v11675_v36  ;;  %v11753_v8 = vld [vmem:[%s17106_s2 + $0x8a4] ss:$16 sps:$4 sm:$0xff]   ;;  %v11756_v36 = vld [vmem:[%s17106_s2 + $0x8ac] ss:$16 sps:$4 sm:$0xff]  }
 0xed8   :  { %7892 = vmatprep.subr.bf16.mxu1 %v11678_v14  ;;  %v11751_v14 = vld [vmem:[%s17106_s2 + $0x8a0] ss:$16 sps:$4 sm:$0xff]  }
 0xeda   :  { %7852 = vmatpush1.bf16.msra.mxu0 %v11673_v47  ;;  %v11754_v47 = vld [vmem:[%s17106_s2 + $0x8a8] ss:$16 sps:$4 sm:$0xff]  }
 0xedb   :  { %7893 = vmatpush1.bf16.msra.mxu1 %v11676_v26  ;;  %7853 = vmatprep.subr.bf16.mxu0 %v11681_v56  ;;  %v11759_v26 = vld [vmem:[%s17106_s2 + $0x8c4] ss:$16 sps:$4 sm:$0xff]   ;;  %v11762_v56 = vld [vmem:[%s17106_s2 + $0x8cc] ss:$16 sps:$4 sm:$0xff]  }
 0xedc   :  { %7894 = vmatprep.subr.bf16.mxu1 %v11684_v37  ;;  %v11757_v37 = vld [vmem:[%s17106_s2 + $0x8c0] ss:$16 sps:$4 sm:$0xff]  }
 0xede   :  { %7854 = vmatpush1.bf16.msra.mxu0 %v11679_v38  ;;  %v11760_v38 = vld [vmem:[%s17106_s2 + $0x8c8] ss:$16 sps:$4 sm:$0xff]  }
 0xedf   :  { %7895 = vmatpush1.bf16.msra.mxu1 %v11682_v24  ;;  %7855 = vmatprep.subr.bf16.mxu0 %v11687_v16  ;;  %v11765_v24 = vld [vmem:[%s17106_s2 + $0x8e4] ss:$16 sps:$4 sm:$0xff]   ;;  %v11768_v16 = vld [vmem:[%s17106_s2 + $0x8ec] ss:$16 sps:$4 sm:$0xff]  }
 0xee0   :  { %7896 = vmatprep.subr.bf16.mxu1 %v11690_v51  ;;  %v11763_v51 = vld [vmem:[%s17106_s2 + $0x8e0] ss:$16 sps:$4 sm:$0xff]  }
 0xee2   :  { %7856 = vmatpush1.bf16.msra.mxu0 %v11685_v18  ;;  %v11766_v18 = vld [vmem:[%s17106_s2 + $0x8e8] ss:$16 sps:$4 sm:$0xff]  }
 0xee3   :  { %7897 = vmatpush1.bf16.msra.mxu1 %v11688_v62  ;;  %7857 = vmatprep.subr.bf16.mxu0 %v11693_v49  ;;  %v11771_v62 = vld [vmem:[%s17106_s2 + $0x904] ss:$16 sps:$4 sm:$0xff]   ;;  %v11774_v49 = vld [vmem:[%s17106_s2 + $0x90c] ss:$16 sps:$4 sm:$0xff]  }
 0xee4   :  { %7898 = vmatprep.subr.bf16.mxu1 %v11696_v3  ;;  %v11769_v3 = vld [vmem:[%s17106_s2 + $0x900] ss:$16 sps:$4 sm:$0xff]  }
 0xee6   :  { %7858 = vmatpush1.bf16.msra.mxu0 %v11691_v31  ;;  %v11772_v31 = vld [vmem:[%s17106_s2 + $0x908] ss:$16 sps:$4 sm:$0xff]  }
 0xee7   :  { %7899 = vmatpush1.bf16.msra.mxu1 %v11694_v30  ;;  %7859 = vmatprep.subr.bf16.mxu0 %v11699_v57  ;;  %v11777_v30 = vld [vmem:[%s17106_s2 + $0x924] ss:$16 sps:$4 sm:$0xff]   ;;  %v11780_v57 = vld [vmem:[%s17106_s2 + $0x92c] ss:$16 sps:$4 sm:$0xff]  }
 0xee8   :  { %7900 = vmatprep.subr.bf16.mxu1 %v11702_v5  ;;  %v11775_v5 = vld [vmem:[%s17106_s2 + $0x920] ss:$16 sps:$4 sm:$0xff]  }
 0xeea   :  { %7860 = vmatpush1.bf16.msra.mxu0 %v11697_v17  ;;  %v11778_v17 = vld [vmem:[%s17106_s2 + $0x928] ss:$16 sps:$4 sm:$0xff]  }
 0xeeb   :  { %7901 = vmatpush1.bf16.msra.mxu1 %v11700_v23  ;;  %7861 = vmatprep.subr.bf16.mxu0 %v11705_v9  ;;  %v11783_v23 = vld [vmem:[%s17106_s2 + $0x944] ss:$16 sps:$4 sm:$0xff]   ;;  %v11786_v9 = vld [vmem:[%s17106_s2 + $0x94c] ss:$16 sps:$4 sm:$0xff]  }
 0xeec   :  { %7902 = vmatprep.subr.bf16.mxu1 %v11708_v11  ;;  %v11781_v11 = vld [vmem:[%s17106_s2 + $0x940] ss:$16 sps:$4 sm:$0xff]  }
 0xeee   :  { %7862 = vmatpush1.bf16.msra.mxu0 %v11703_v2  ;;  %v11784_v2 = vld [vmem:[%s17106_s2 + $0x948] ss:$16 sps:$4 sm:$0xff]  }
 0xeef   :  { %7903 = vmatpush1.bf16.msra.mxu1 %v11706_v58  ;;  %7863 = vmatprep.subr.bf16.mxu0 %v11711_v4  ;;  %v11789_v58 = vld [vmem:[%s17106_s2 + $0x964] ss:$16 sps:$4 sm:$0xff]   ;;  %v11792_v4 = vld [vmem:[%s17106_s2 + $0x96c] ss:$16 sps:$4 sm:$0xff]  }
 0xef0   :  { %7904 = vmatprep.subr.bf16.mxu1 %v11714_v48  ;;  %v11787_v48 = vld [vmem:[%s17106_s2 + $0x960] ss:$16 sps:$4 sm:$0xff]  }
 0xef2   :  { %7864 = vmatpush1.bf16.msra.mxu0 %v11709_v55  ;;  %v11790_v55 = vld [vmem:[%s17106_s2 + $0x968] ss:$16 sps:$4 sm:$0xff]  }
 0xef3   :  { %7905 = vmatpush1.bf16.msra.mxu1 %v11712_v6  ;;  %7865 = vmatprep.subr.bf16.mxu0 %v11717_v40  ;;  %v11795_v6 = vld [vmem:[%s17106_s2 + $0x984] ss:$16 sps:$4 sm:$0xff]   ;;  %v11798_v40 = vld [vmem:[%s17106_s2 + $0x98c] ss:$16 sps:$4 sm:$0xff]  }
 0xef4   :  { %7906 = vmatprep.subr.bf16.mxu1 %v11720_v29  ;;  %v11793_v29 = vld [vmem:[%s17106_s2 + $0x980] ss:$16 sps:$4 sm:$0xff]  }
 0xef6   :  { %7866 = vmatpush1.bf16.msra.mxu0 %v11715_v7  ;;  %v11796_v7 = vld [vmem:[%s17106_s2 + $0x988] ss:$16 sps:$4 sm:$0xff]  }
 0xef7   :  { %7907 = vmatpush1.bf16.msra.mxu1 %v11718_v20  ;;  %8337 = vmatprep.subr.bf16.mxu0 %v11723_v27  ;;  %v11801_v20 = vld [vmem:[%s17106_s2 + $0x9a4] ss:$16 sps:$4 sm:$0xff]   ;;  %v11804_v27 = vld [vmem:[%s17106_s2 + $0x9ac] ss:$16 sps:$4 sm:$0xff]  }
 0xef8   :  { %8378 = vmatprep.subr.bf16.mxu1 %v11726_v15  ;;  %v11799_v15 = vld [vmem:[%s17106_s2 + $0x9a0] ss:$16 sps:$4 sm:$0xff]  }
 0xef9   :  { %7868 = vmatmul.mubr.bf16.vlgmr.msra.gmra.mrb[112].mxu0 %v7511_v35 }
 0xefa   :  { %7909 = vmatmul.mubr.bf16.vlgmr.msra.gmra.mrb[140].mxu1 %v7511_v35  ;;  %8338 = vmatpush1.bf16.msra.mxu0 %v11721_v21  ;;  %v11802_v21 = vld [vmem:[%s17106_s2 + $0x9a8] ss:$16 sps:$4 sm:$0xff]   ;;  %v11807_v35 = vld [vmem:[%s17106_s2 + $0x9c4] ss:$16 sps:$4 sm:$0xff]  }
 0xefb   :  { %8369 = vmatprep.mubr.bf16.mxu0 %v8014_v34  ;;  %8379 = vmatpush1.bf16.msra.mxu1 %v11724_v22  ;;  %v11810_v22 = vld [vmem:[%s17106_s2 + $0x9cc] ss:$16 sps:$4 sm:$0xff]  }
 0xefc   :  { %8410 = vmatprep.mubr.bf16.mxu1 %v8014_v34  ;;  %8339 = vmatprep.subr.bf16.mxu0 %v11729_v42  ;;  %v11805_v42 = vld [vmem:[%s17106_s2 + $0x9c0] ss:$16 sps:$4 sm:$0xff]   ;;  %v11808_v34 = vld [vmem:[%s17106_s2 + $0x9c8] ss:$16 sps:$4 sm:$0xff]  }
 0xefd   :  { %8380 = vmatprep.subr.bf16.mxu1 %v11732_v0  ;;  %v11813_v0 = vld [vmem:[%s17106_s2 + $0x9e4] ss:$16 sps:$4 sm:$0xff]  }
 0xefe   :  { %8340 = vmatpush1.bf16.msra.mxu0 %v11727_v59  ;;  %v11816_v59 = vld [vmem:[%s17106_s2 + $0x9ec] ss:$16 sps:$4 sm:$0xff]  }
 0xeff   :  { %8381 = vmatpush1.bf16.msra.mxu1 %v11730_v60  ;;  %8341 = vmatprep.subr.bf16.mxu0 %v11735_v39  ;;  %v11811_v60 = vld [vmem:[%s17106_s2 + $0x9e0] ss:$16 sps:$4 sm:$0xff]   ;;  %v11814_v39 = vld [vmem:[%s17106_s2 + $0x9e8] ss:$16 sps:$4 sm:$0xff]  }
 0xf00   :  { %8382 = vmatprep.subr.bf16.mxu1 %v11738_v41  ;;  %v11819_v41 = vld [vmem:[%s17106_s2 + $0xa04] ss:$16 sps:$4 sm:$0xff]  }
 0xf02   :  { %8342 = vmatpush1.bf16.msra.mxu0 %v11733_v12  ;;  %v11822_v12 = vld [vmem:[%s17106_s2 + $0xa0c] ss:$16 sps:$4 sm:$0xff]  }
 0xf03   :  { %8383 = vmatpush1.bf16.msra.mxu1 %v11736_v43  ;;  %8343 = vmatprep.subr.bf16.mxu0 %v11741_v52  ;;  %v11817_v43 = vld [vmem:[%s17106_s2 + $0xa00] ss:$16 sps:$4 sm:$0xff]   ;;  %v8013_v52 = vpack.c.b16 %v15645_v25, %v15645_v25 }
 0xf04   :  { %8384 = vmatprep.subr.bf16.mxu1 %v11744_v54  ;;  %v11820_v54 = vld [vmem:[%s17106_s2 + $0xa08] ss:$16 sps:$4 sm:$0xff]   ;;  %v11823_v25 = vld [vmem:[%s17106_s2 + $0xa20] ss:$16 sps:$4 sm:$0xff]  }
 0xf06   :  { %8344 = vmatpush1.bf16.msra.mxu0 %v11739_v33  ;;  %v11825_v33 = vld [vmem:[%s17106_s2 + $0xa24] ss:$16 sps:$4 sm:$0xff]  }
 0xf07   :  { %8385 = vmatpush1.bf16.msra.mxu1 %v11742_v53  ;;  %8345 = vmatprep.subr.bf16.mxu0 %v11747_v13  ;;  %v8516_v53 = vpack.c.b16 %v15654_v10, %v15654_v10  ;;  %v11828_v13 = vld [vmem:[%s17106_s2 + $0xa2c] ss:$16 sps:$4 sm:$0xff]   ;;  %v11831_v10 = vld [vmem:[%s17106_s2 + $0xa44] ss:$16 sps:$4 sm:$0xff]  }
 0xf08   :  { %8386 = vmatprep.subr.bf16.mxu1 %v11750_v61  ;;  %v11826_v61 = vld [vmem:[%s17106_s2 + $0xa28] ss:$16 sps:$4 sm:$0xff]  }
 0xf0a   :  { %8346 = vmatpush1.bf16.msra.mxu0 %v11745_v50  ;;  %v11834_v50 = vld [vmem:[%s17106_s2 + $0xa4c] ss:$16 sps:$4 sm:$0xff]  }
 0xf0b   :  { %8387 = vmatpush1.bf16.msra.mxu1 %v11748_v46  ;;  %8347 = vmatprep.subr.bf16.mxu0 %v11753_v8  ;;  %v11829_v46 = vld [vmem:[%s17106_s2 + $0xa40] ss:$16 sps:$4 sm:$0xff]   ;;  %v11832_v8 = vld [vmem:[%s17106_s2 + $0xa48] ss:$16 sps:$4 sm:$0xff]  }
 0xf0c   :  { %8388 = vmatprep.subr.bf16.mxu1 %v11756_v36  ;;  %v11837_v36 = vld [vmem:[%s17106_s2 + $0xa64] ss:$16 sps:$4 sm:$0xff]  }
 0xf0e   :  { %8348 = vmatpush1.bf16.msra.mxu0 %v11751_v14  ;;  %v11840_v14 = vld [vmem:[%s17106_s2 + $0xa6c] ss:$16 sps:$4 sm:$0xff]  }
 0xf0f   :  { %8389 = vmatpush1.bf16.msra.mxu1 %v11754_v47  ;;  %8349 = vmatprep.subr.bf16.mxu0 %v11759_v26  ;;  %v11835_v47 = vld [vmem:[%s17106_s2 + $0xa60] ss:$16 sps:$4 sm:$0xff]   ;;  %v11838_v26 = vld [vmem:[%s17106_s2 + $0xa68] ss:$16 sps:$4 sm:$0xff]  }
 0xf10   :  { %8390 = vmatprep.subr.bf16.mxu1 %v11762_v56  ;;  %v11843_v56 = vld [vmem:[%s17106_s2 + $0xa84] ss:$16 sps:$4 sm:$0xff]  }
 0xf12   :  { %8350 = vmatpush1.bf16.msra.mxu0 %v11757_v37  ;;  %v11846_v37 = vld [vmem:[%s17106_s2 + $0xa8c] ss:$16 sps:$4 sm:$0xff]  }
 0xf13   :  { %8391 = vmatpush1.bf16.msra.mxu1 %v11760_v38  ;;  %8351 = vmatprep.subr.bf16.mxu0 %v11765_v24  ;;  %v11841_v38 = vld [vmem:[%s17106_s2 + $0xa80] ss:$16 sps:$4 sm:$0xff]   ;;  %v11844_v24 = vld [vmem:[%s17106_s2 + $0xa88] ss:$16 sps:$4 sm:$0xff]  }
 0xf14   :  { %8392 = vmatprep.subr.bf16.mxu1 %v11768_v16  ;;  %v11849_v16 = vld [vmem:[%s17106_s2 + $0xaa4] ss:$16 sps:$4 sm:$0xff]  }
 0xf16   :  { %8352 = vmatpush1.bf16.msra.mxu0 %v11763_v51  ;;  %v11852_v51 = vld [vmem:[%s17106_s2 + $0xaac] ss:$16 sps:$4 sm:$0xff]  }
 0xf17   :  { %8393 = vmatpush1.bf16.msra.mxu1 %v11766_v18  ;;  %8353 = vmatprep.subr.bf16.mxu0 %v11771_v62  ;;  %v11847_v18 = vld [vmem:[%s17106_s2 + $0xaa0] ss:$16 sps:$4 sm:$0xff]   ;;  %v11850_v62 = vld [vmem:[%s17106_s2 + $0xaa8] ss:$16 sps:$4 sm:$0xff]  }
 0xf18   :  { %8394 = vmatprep.subr.bf16.mxu1 %v11774_v49  ;;  %v11855_v49 = vld [vmem:[%s17106_s2 + $0xac4] ss:$16 sps:$4 sm:$0xff]  }
 0xf1a   :  { %8354 = vmatpush1.bf16.msra.mxu0 %v11769_v3  ;;  %v11858_v3 = vld [vmem:[%s17106_s2 + $0xacc] ss:$16 sps:$4 sm:$0xff]  }
 0xf1b   :  { %8395 = vmatpush1.bf16.msra.mxu1 %v11772_v31  ;;  %8355 = vmatprep.subr.bf16.mxu0 %v11777_v30  ;;  %v11853_v31 = vld [vmem:[%s17106_s2 + $0xac0] ss:$16 sps:$4 sm:$0xff]   ;;  %v11856_v30 = vld [vmem:[%s17106_s2 + $0xac8] ss:$16 sps:$4 sm:$0xff]  }
 0xf1c   :  { %8396 = vmatprep.subr.bf16.mxu1 %v11780_v57  ;;  %v11861_v57 = vld [vmem:[%s17106_s2 + $0xae4] ss:$16 sps:$4 sm:$0xff]  }
 0xf1e   :  { %8356 = vmatpush1.bf16.msra.mxu0 %v11775_v5  ;;  %v11864_v5 = vld [vmem:[%s17106_s2 + $0xaec] ss:$16 sps:$4 sm:$0xff]  }
 0xf1f   :  { %8397 = vmatpush1.bf16.msra.mxu1 %v11778_v17  ;;  %8357 = vmatprep.subr.bf16.mxu0 %v11783_v23  ;;  %v11859_v17 = vld [vmem:[%s17106_s2 + $0xae0] ss:$16 sps:$4 sm:$0xff]   ;;  %v11862_v23 = vld [vmem:[%s17106_s2 + $0xae8] ss:$16 sps:$4 sm:$0xff]  }
 0xf20   :  { %8398 = vmatprep.subr.bf16.mxu1 %v11786_v9  ;;  %v11867_v9 = vld [vmem:[%s17106_s2 + $0xb04] ss:$16 sps:$4 sm:$0xff]  }
 0xf22   :  { %8358 = vmatpush1.bf16.msra.mxu0 %v11781_v11  ;;  %v11870_v11 = vld [vmem:[%s17106_s2 + $0xb0c] ss:$16 sps:$4 sm:$0xff]  }
 0xf23   :  { %8399 = vmatpush1.bf16.msra.mxu1 %v11784_v2  ;;  %8359 = vmatprep.subr.bf16.mxu0 %v11789_v58  ;;  %v11865_v2 = vld [vmem:[%s17106_s2 + $0xb00] ss:$16 sps:$4 sm:$0xff]   ;;  %v11868_v58 = vld [vmem:[%s17106_s2 + $0xb08] ss:$16 sps:$4 sm:$0xff]  }
 0xf24   :  { %8400 = vmatprep.subr.bf16.mxu1 %v11792_v4  ;;  %v11873_v4 = vld [vmem:[%s17106_s2 + $0xb24] ss:$16 sps:$4 sm:$0xff]  }
 0xf26   :  { %8360 = vmatpush1.bf16.msra.mxu0 %v11787_v48  ;;  %v11876_v48 = vld [vmem:[%s17106_s2 + $0xb2c] ss:$16 sps:$4 sm:$0xff]  }
 0xf27   :  { %8401 = vmatpush1.bf16.msra.mxu1 %v11790_v55  ;;  %8361 = vmatprep.subr.bf16.mxu0 %v11795_v6  ;;  %v11871_v55 = vld [vmem:[%s17106_s2 + $0xb20] ss:$16 sps:$4 sm:$0xff]   ;;  %v11874_v6 = vld [vmem:[%s17106_s2 + $0xb28] ss:$16 sps:$4 sm:$0xff]  }
 0xf28   :  { %8402 = vmatprep.subr.bf16.mxu1 %v11798_v40  ;;  %v11879_v40 = vld [vmem:[%s17106_s2 + $0xb44] ss:$16 sps:$4 sm:$0xff]  }
 0xf2a   :  { %8362 = vmatpush1.bf16.msra.mxu0 %v11793_v29  ;;  %v11882_v29 = vld [vmem:[%s17106_s2 + $0xb4c] ss:$16 sps:$4 sm:$0xff]  }
 0xf2b   :  { %8403 = vmatpush1.bf16.msra.mxu1 %v11796_v7  ;;  %8363 = vmatprep.subr.bf16.mxu0 %v11801_v20  ;;  %v11877_v7 = vld [vmem:[%s17106_s2 + $0xb40] ss:$16 sps:$4 sm:$0xff]   ;;  %v11880_v20 = vld [vmem:[%s17106_s2 + $0xb48] ss:$16 sps:$4 sm:$0xff]  }
 0xf2c   :  { %8404 = vmatprep.subr.bf16.mxu1 %v11804_v27  ;;  %v11885_v27 = vld [vmem:[%s17106_s2 + $0xb64] ss:$16 sps:$4 sm:$0xff]  }
 0xf2e   :  { %8364 = vmatpush1.bf16.msra.mxu0 %v11799_v15  ;;  %v11888_v15 = vld [vmem:[%s17106_s2 + $0xb6c] ss:$16 sps:$4 sm:$0xff]  }
 0xf2f   :  { %8405 = vmatpush1.bf16.msra.mxu1 %v11802_v21  ;;  %8365 = vmatprep.subr.bf16.mxu0 %v11807_v35  ;;  %v11883_v21 = vld [vmem:[%s17106_s2 + $0xb60] ss:$16 sps:$4 sm:$0xff]   ;;  %v11886_v35 = vld [vmem:[%s17106_s2 + $0xb68] ss:$16 sps:$4 sm:$0xff]  }
 0xf30   :  { %8406 = vmatprep.subr.bf16.mxu1 %v11810_v22  ;;  %v11891_v22 = vld [vmem:[%s17106_s2 + $0xb84] ss:$16 sps:$4 sm:$0xff]  }
 0xf32   :  { %8366 = vmatpush1.bf16.msra.mxu0 %v11805_v42  ;;  %v11894_v42 = vld [vmem:[%s17106_s2 + $0xb8c] ss:$16 sps:$4 sm:$0xff]  }
 0xf33   :  { %8407 = vmatpush1.bf16.msra.mxu1 %v11808_v34  ;;  %8367 = vmatprep.subr.bf16.mxu0 %v11813_v0  ;;  %v11889_v34 = vld [vmem:[%s17106_s2 + $0xb80] ss:$16 sps:$4 sm:$0xff]   ;;  %v11892_v0 = vld [vmem:[%s17106_s2 + $0xb88] ss:$16 sps:$4 sm:$0xff]  }
 0xf34   :  { %8408 = vmatprep.subr.bf16.mxu1 %v11816_v59  ;;  %v11897_v59 = vld [vmem:[%s17106_s2 + $0xba4] ss:$16 sps:$4 sm:$0xff]  }
 0xf36   :  { %8368 = vmatpush1.bf16.msra.mxu0 %v11811_v60  ;;  %v11900_v60 = vld [vmem:[%s17106_s2 + $0xbac] ss:$16 sps:$4 sm:$0xff]  }
 0xf37   :  { %8409 = vmatpush1.bf16.msra.mxu1 %v11814_v39  ;;  %8839 = vmatprep.subr.bf16.mxu0 %v11819_v41  ;;  %v11895_v39 = vld [vmem:[%s17106_s2 + $0xba0] ss:$16 sps:$4 sm:$0xff]   ;;  %v11898_v41 = vld [vmem:[%s17106_s2 + $0xba8] ss:$16 sps:$4 sm:$0xff]  }
 0xf38   :  { %8880 = vmatprep.subr.bf16.mxu1 %v11822_v12  ;;  %v11903_v12 = vld [vmem:[%s17106_s2 + $0xbc4] ss:$16 sps:$4 sm:$0xff]  }
 0xf39   :  { %8370 = vmatmul.mubr.bf16.vlgmr.msra.gmra.mrb[112].mxu0 %v8013_v52 }
 0xf3a   :  { %8411 = vmatmul.mubr.bf16.vlgmr.msra.gmra.mrb[140].mxu1 %v8013_v52  ;;  %8840 = vmatpush1.bf16.msra.mxu0 %v11817_v43  ;;  %v11906_v43 = vld [vmem:[%s17106_s2 + $0xbcc] ss:$16 sps:$4 sm:$0xff]   ;;  %v11901_v52 = vld [vmem:[%s17106_s2 + $0xbc0] ss:$16 sps:$4 sm:$0xff]  }
 0xf3b   :  { %8871 = vmatprep.mubr.bf16.mxu0 %v8516_v53  ;;  %8881 = vmatpush1.bf16.msra.mxu1 %v11820_v54  ;;  %v11904_v54 = vld [vmem:[%s17106_s2 + $0xbc8] ss:$16 sps:$4 sm:$0xff]  }
 0xf3c   :  { %8912 = vmatprep.mubr.bf16.mxu1 %v8516_v53  ;;  %8841 = vmatprep.subr.bf16.mxu0 %v11825_v33  ;;  %v11909_v33 = vld [vmem:[%s17106_s2 + $0xbe4] ss:$16 sps:$4 sm:$0xff]   ;;  %v11912_v53 = vld [vmem:[%s17106_s2 + $0xbec] ss:$16 sps:$4 sm:$0xff]  }
 0xf3d   :  { %8882 = vmatprep.subr.bf16.mxu1 %v11828_v13  ;;  %v11907_v13 = vld [vmem:[%s17106_s2 + $0xbe0] ss:$16 sps:$4 sm:$0xff]  }
 0xf3e   :  { %8842 = vmatpush1.bf16.msra.mxu0 %v11823_v25  ;;  %v11910_v25 = vld [vmem:[%s17106_s2 + $0xbe8] ss:$16 sps:$4 sm:$0xff]  }
 0xf3f   :  { %8883 = vmatpush1.bf16.msra.mxu1 %v11826_v61  ;;  %8843 = vmatprep.subr.bf16.mxu0 %v11831_v10  ;;  %v11915_v61 = vld [vmem:[%s17106_s2 + $0xc04] ss:$16 sps:$4 sm:$0xff]   ;;  %v11918_v10 = vld [vmem:[%s17106_s2 + $0xc0c] ss:$16 sps:$4 sm:$0xff]  }
 0xf40   :  { %8884 = vmatprep.subr.bf16.mxu1 %v11834_v50  ;;  %v11913_v50 = vld [vmem:[%s17106_s2 + $0xc00] ss:$16 sps:$4 sm:$0xff]  }
 0xf42   :  { %8844 = vmatpush1.bf16.msra.mxu0 %v11829_v46  ;;  %v8515_v46 = vpack.c.b16 %v15671_v44, %v15671_v44  ;;  %v11919_v44 = vld [vmem:[%s17106_s2 + $0xc20] ss:$16 sps:$4 sm:$0xff]  }
 0xf43   :  { %8885 = vmatpush1.bf16.msra.mxu1 %v11832_v8  ;;  %8845 = vmatprep.subr.bf16.mxu0 %v11837_v36  ;;  %v11916_v8 = vld [vmem:[%s17106_s2 + $0xc08] ss:$16 sps:$4 sm:$0xff]   ;;  %v11921_v36 = vld [vmem:[%s17106_s2 + $0xc24] ss:$16 sps:$4 sm:$0xff]  }
 0xf44   :  { %8886 = vmatprep.subr.bf16.mxu1 %v11840_v14  ;;  %v9018_v14 = vpack.c.b16 %v15674_v1, %v15674_v1  ;;  %v11927_v1 = vld [vmem:[%s17106_s2 + $0xc44] ss:$16 sps:$4 sm:$0xff]  }
 0xf46   :  { %8846 = vmatpush1.bf16.msra.mxu0 %v11835_v47  ;;  %v11924_v47 = vld [vmem:[%s17106_s2 + $0xc2c] ss:$16 sps:$4 sm:$0xff]  }
 0xf47   :  { %8887 = vmatpush1.bf16.msra.mxu1 %v11838_v26  ;;  %8847 = vmatprep.subr.bf16.mxu0 %v11843_v56  ;;  %v11922_v26 = vld [vmem:[%s17106_s2 + $0xc28] ss:$16 sps:$4 sm:$0xff]   ;;  %v11930_v56 = vld [vmem:[%s17106_s2 + $0xc4c] ss:$16 sps:$4 sm:$0xff]  }
 0xf48   :  { %8888 = vmatprep.subr.bf16.mxu1 %v11846_v37  ;;  %v11925_v37 = vld [vmem:[%s17106_s2 + $0xc40] ss:$16 sps:$4 sm:$0xff]  }
 0xf4a   :  { %8848 = vmatpush1.bf16.msra.mxu0 %v11841_v38  ;;  %v11928_v38 = vld [vmem:[%s17106_s2 + $0xc48] ss:$16 sps:$4 sm:$0xff]  }
 0xf4b   :  { %8889 = vmatpush1.bf16.msra.mxu1 %v11844_v24  ;;  %8849 = vmatprep.subr.bf16.mxu0 %v11849_v16  ;;  %v11933_v24 = vld [vmem:[%s17106_s2 + $0xc64] ss:$16 sps:$4 sm:$0xff]   ;;  %v11936_v16 = vld [vmem:[%s17106_s2 + $0xc6c] ss:$16 sps:$4 sm:$0xff]  }
 0xf4c   :  { %8890 = vmatprep.subr.bf16.mxu1 %v11852_v51  ;;  %v11931_v51 = vld [vmem:[%s17106_s2 + $0xc60] ss:$16 sps:$4 sm:$0xff]  }
 0xf4e   :  { %8850 = vmatpush1.bf16.msra.mxu0 %v11847_v18  ;;  %v11934_v18 = vld [vmem:[%s17106_s2 + $0xc68] ss:$16 sps:$4 sm:$0xff]  }
 0xf4f   :  { %8891 = vmatpush1.bf16.msra.mxu1 %v11850_v62  ;;  %8851 = vmatprep.subr.bf16.mxu0 %v11855_v49  ;;  %v11939_v62 = vld [vmem:[%s17106_s2 + $0xc84] ss:$16 sps:$4 sm:$0xff]   ;;  %v11942_v49 = vld [vmem:[%s17106_s2 + $0xc8c] ss:$16 sps:$4 sm:$0xff]  }
 0xf50   :  { %8892 = vmatprep.subr.bf16.mxu1 %v11858_v3  ;;  %v11937_v3 = vld [vmem:[%s17106_s2 + $0xc80] ss:$16 sps:$4 sm:$0xff]  }
 0xf52   :  { %8852 = vmatpush1.bf16.msra.mxu0 %v11853_v31  ;;  %v11940_v31 = vld [vmem:[%s17106_s2 + $0xc88] ss:$16 sps:$4 sm:$0xff]  }
 0xf53   :  { %8893 = vmatpush1.bf16.msra.mxu1 %v11856_v30  ;;  %8853 = vmatprep.subr.bf16.mxu0 %v11861_v57  ;;  %v11945_v30 = vld [vmem:[%s17106_s2 + $0xca4] ss:$16 sps:$4 sm:$0xff]   ;;  %v11948_v57 = vld [vmem:[%s17106_s2 + $0xcac] ss:$16 sps:$4 sm:$0xff]  }
 0xf54   :  { %8894 = vmatprep.subr.bf16.mxu1 %v11864_v5  ;;  %v11943_v5 = vld [vmem:[%s17106_s2 + $0xca0] ss:$16 sps:$4 sm:$0xff]  }
 0xf56   :  { %8854 = vmatpush1.bf16.msra.mxu0 %v11859_v17  ;;  %v11946_v17 = vld [vmem:[%s17106_s2 + $0xca8] ss:$16 sps:$4 sm:$0xff]  }
 0xf57   :  { %8895 = vmatpush1.bf16.msra.mxu1 %v11862_v23  ;;  %8855 = vmatprep.subr.bf16.mxu0 %v11867_v9  ;;  %v11951_v23 = vld [vmem:[%s17106_s2 + $0xcc4] ss:$16 sps:$4 sm:$0xff]   ;;  %v11954_v9 = vld [vmem:[%s17106_s2 + $0xccc] ss:$16 sps:$4 sm:$0xff]  }
 0xf58   :  { %8896 = vmatprep.subr.bf16.mxu1 %v11870_v11  ;;  %v11949_v11 = vld [vmem:[%s17106_s2 + $0xcc0] ss:$16 sps:$4 sm:$0xff]  }
 0xf5a   :  { %8856 = vmatpush1.bf16.msra.mxu0 %v11865_v2  ;;  %v11952_v2 = vld [vmem:[%s17106_s2 + $0xcc8] ss:$16 sps:$4 sm:$0xff]  }
 0xf5b   :  { %8897 = vmatpush1.bf16.msra.mxu1 %v11868_v58  ;;  %8857 = vmatprep.subr.bf16.mxu0 %v11873_v4  ;;  %v11957_v58 = vld [vmem:[%s17106_s2 + $0xce4] ss:$16 sps:$4 sm:$0xff]   ;;  %v11960_v4 = vld [vmem:[%s17106_s2 + $0xcec] ss:$16 sps:$4 sm:$0xff]  }
 0xf5c   :  { %8898 = vmatprep.subr.bf16.mxu1 %v11876_v48  ;;  %v11955_v48 = vld [vmem:[%s17106_s2 + $0xce0] ss:$16 sps:$4 sm:$0xff]  }
 0xf5e   :  { %8858 = vmatpush1.bf16.msra.mxu0 %v11871_v55  ;;  %v11958_v55 = vld [vmem:[%s17106_s2 + $0xce8] ss:$16 sps:$4 sm:$0xff]  }
 0xf5f   :  { %8899 = vmatpush1.bf16.msra.mxu1 %v11874_v6  ;;  %8859 = vmatprep.subr.bf16.mxu0 %v11879_v40  ;;  %v11963_v6 = vld [vmem:[%s17106_s2 + $0xd04] ss:$16 sps:$4 sm:$0xff]   ;;  %v11966_v40 = vld [vmem:[%s17106_s2 + $0xd0c] ss:$16 sps:$4 sm:$0xff]  }
 0xf60   :  { %8900 = vmatprep.subr.bf16.mxu1 %v11882_v29  ;;  %v11961_v29 = vld [vmem:[%s17106_s2 + $0xd00] ss:$16 sps:$4 sm:$0xff]  }
 0xf62   :  { %8860 = vmatpush1.bf16.msra.mxu0 %v11877_v7  ;;  %v11964_v7 = vld [vmem:[%s17106_s2 + $0xd08] ss:$16 sps:$4 sm:$0xff]  }
 0xf63   :  { %8901 = vmatpush1.bf16.msra.mxu1 %v11880_v20  ;;  %8861 = vmatprep.subr.bf16.mxu0 %v11885_v27  ;;  %v11969_v20 = vld [vmem:[%s17106_s2 + $0xd24] ss:$16 sps:$4 sm:$0xff]   ;;  %v11972_v27 = vld [vmem:[%s17106_s2 + $0xd2c] ss:$16 sps:$4 sm:$0xff]  }
 0xf64   :  { %8902 = vmatprep.subr.bf16.mxu1 %v11888_v15  ;;  %v11967_v15 = vld [vmem:[%s17106_s2 + $0xd20] ss:$16 sps:$4 sm:$0xff]  }
 0xf66   :  { %8862 = vmatpush1.bf16.msra.mxu0 %v11883_v21  ;;  %v11970_v21 = vld [vmem:[%s17106_s2 + $0xd28] ss:$16 sps:$4 sm:$0xff]  }
 0xf67   :  { %8903 = vmatpush1.bf16.msra.mxu1 %v11886_v35  ;;  %8863 = vmatprep.subr.bf16.mxu0 %v11891_v22  ;;  %v11975_v35 = vld [vmem:[%s17106_s2 + $0xd44] ss:$16 sps:$4 sm:$0xff]   ;;  %v11978_v22 = vld [vmem:[%s17106_s2 + $0xd4c] ss:$16 sps:$4 sm:$0xff]  }
 0xf68   :  { %8904 = vmatprep.subr.bf16.mxu1 %v11894_v42  ;;  %v11973_v42 = vld [vmem:[%s17106_s2 + $0xd40] ss:$16 sps:$4 sm:$0xff]  }
 0xf6a   :  { %8864 = vmatpush1.bf16.msra.mxu0 %v11889_v34  ;;  %v11976_v34 = vld [vmem:[%s17106_s2 + $0xd48] ss:$16 sps:$4 sm:$0xff]  }
 0xf6b   :  { %8905 = vmatpush1.bf16.msra.mxu1 %v11892_v0  ;;  %8865 = vmatprep.subr.bf16.mxu0 %v11897_v59  ;;  %v11981_v0 = vld [vmem:[%s17106_s2 + $0xd64] ss:$16 sps:$4 sm:$0xff]   ;;  %v11984_v59 = vld [vmem:[%s17106_s2 + $0xd6c] ss:$16 sps:$4 sm:$0xff]  }
 0xf6c   :  { %8906 = vmatprep.subr.bf16.mxu1 %v11900_v60  ;;  %v11979_v60 = vld [vmem:[%s17106_s2 + $0xd60] ss:$16 sps:$4 sm:$0xff]  }
 0xf6e   :  { %8866 = vmatpush1.bf16.msra.mxu0 %v11895_v39  ;;  %v11982_v39 = vld [vmem:[%s17106_s2 + $0xd68] ss:$16 sps:$4 sm:$0xff]  }
 0xf6f   :  { %8907 = vmatpush1.bf16.msra.mxu1 %v11898_v41  ;;  %8867 = vmatprep.subr.bf16.mxu0 %v11903_v12  ;;  %v11987_v41 = vld [vmem:[%s17106_s2 + $0xd84] ss:$16 sps:$4 sm:$0xff]   ;;  %v11990_v12 = vld [vmem:[%s17106_s2 + $0xd8c] ss:$16 sps:$4 sm:$0xff]  }
 0xf70   :  { %8908 = vmatprep.subr.bf16.mxu1 %v11906_v43  ;;  %v11985_v43 = vld [vmem:[%s17106_s2 + $0xd80] ss:$16 sps:$4 sm:$0xff]  }
 0xf72   :  { %8868 = vmatpush1.bf16.msra.mxu0 %v11901_v52  ;;  %v11988_v52 = vld [vmem:[%s17106_s2 + $0xd88] ss:$16 sps:$4 sm:$0xff]  }
 0xf73   :  { %8909 = vmatpush1.bf16.msra.mxu1 %v11904_v54  ;;  %8869 = vmatprep.subr.bf16.mxu0 %v11909_v33  ;;  %v11993_v54 = vld [vmem:[%s17106_s2 + $0xda4] ss:$16 sps:$4 sm:$0xff]   ;;  %v11996_v33 = vld [vmem:[%s17106_s2 + $0xdac] ss:$16 sps:$4 sm:$0xff]  }
 0xf74   :  { %8910 = vmatprep.subr.bf16.mxu1 %v11912_v53  ;;  %v11991_v53 = vld [vmem:[%s17106_s2 + $0xda0] ss:$16 sps:$4 sm:$0xff]  }
 0xf76   :  { %8870 = vmatpush1.bf16.msra.mxu0 %v11907_v13  ;;  %v11994_v13 = vld [vmem:[%s17106_s2 + $0xda8] ss:$16 sps:$4 sm:$0xff]  }
 0xf77   :  { %8911 = vmatpush1.bf16.msra.mxu1 %v11910_v25  ;;  %9341 = vmatprep.subr.bf16.mxu0 %v11915_v61  ;;  %v11999_v25 = vld [vmem:[%s17106_s2 + $0xdc4] ss:$16 sps:$4 sm:$0xff]   ;;  %v12002_v61 = vld [vmem:[%s17106_s2 + $0xdcc] ss:$16 sps:$4 sm:$0xff]  }
 0xf78   :  { %9382 = vmatprep.subr.bf16.mxu1 %v11918_v10  ;;  %v11997_v10 = vld [vmem:[%s17106_s2 + $0xdc0] ss:$16 sps:$4 sm:$0xff]  }
 0xf79   :  { %8872 = vmatmul.mubr.bf16.vlgmr.msra.gmra.mrb[112].mxu0 %v8515_v46 }
 0xf7a   :  { %8913 = vmatmul.mubr.bf16.vlgmr.msra.gmra.mrb[140].mxu1 %v8515_v46  ;;  %9342 = vmatpush1.bf16.msra.mxu0 %v11913_v50  ;;  %v12000_v50 = vld [vmem:[%s17106_s2 + $0xdc8] ss:$16 sps:$4 sm:$0xff]   ;;  %v12005_v46 = vld [vmem:[%s17106_s2 + $0xde4] ss:$16 sps:$4 sm:$0xff]  }
 0xf7b   :  { %9373 = vmatprep.mubr.bf16.mxu0 %v9018_v14  ;;  %9383 = vmatpush1.bf16.msra.mxu1 %v11916_v8  ;;  %v12008_v8 = vld [vmem:[%s17106_s2 + $0xdec] ss:$16 sps:$4 sm:$0xff]  }
 0xf7c   :  { %9414 = vmatprep.mubr.bf16.mxu1 %v9018_v14  ;;  %9343 = vmatprep.subr.bf16.mxu0 %v11921_v36  ;;  %v12003_v36 = vld [vmem:[%s17106_s2 + $0xde0] ss:$16 sps:$4 sm:$0xff]   ;;  %v12006_v14 = vld [vmem:[%s17106_s2 + $0xde8] ss:$16 sps:$4 sm:$0xff]  }
 0xf7d   :  { %9384 = vmatprep.subr.bf16.mxu1 %v11924_v47  ;;  %v12011_v47 = vld [vmem:[%s17105_s3 + $0x254] ss:$8 sps:$4 sm:$0xff]  }
 0xf7e   :  { %9344 = vmatpush1.bf16.msra.mxu0 %v11919_v44  ;;  %v12009_v44 = vld [vmem:[%s17105_s3 + $0x250] ss:$8 sps:$4 sm:$0xff]  }
 0xf7f   :  { %9385 = vmatpush1.bf16.msra.mxu1 %v11922_v26  ;;  %9345 = vmatprep.subr.bf16.mxu0 %v11927_v1  ;;  %v9017_v26 = vpack.c.b16 %v15683_v45, %v15683_v45  ;;  %v12014_v1 = vld [vmem:[%s17105_s3 + $0x264] ss:$8 sps:$4 sm:$0xff]   ;;  %v12015_v45 = vld [vmem:[%s17105_s3 + $0x270] ss:$8 sps:$4 sm:$0xff]  }
 0xf80   :  { %9386 = vmatprep.subr.bf16.mxu1 %v11930_v56  ;;  %v12012_v56 = vld [vmem:[%s17105_s3 + $0x260] ss:$8 sps:$4 sm:$0xff]  }
 0xf82   :  { %9346 = vmatpush1.bf16.msra.mxu0 %v11925_v37  ;;  %v12017_v37 = vld [vmem:[%s17105_s3 + $0x274] ss:$8 sps:$4 sm:$0xff]  }
 0xf83   :  { %9387 = vmatpush1.bf16.msra.mxu1 %v11928_v38  ;;  %9347 = vmatprep.subr.bf16.mxu0 %v11933_v24  ;;  %v12020_v38 = vld [vmem:[%s17105_s3 + $0x284] ss:$8 sps:$4 sm:$0xff]   ;;  %v12018_v24 = vld [vmem:[%s17105_s3 + $0x280] ss:$8 sps:$4 sm:$0xff]  }
 0xf84   :  { %9388 = vmatprep.subr.bf16.mxu1 %v11936_v16  ;;  %v12023_v16 = vld [vmem:[%s17105_s3 + $0x294] ss:$8 sps:$4 sm:$0xff]  }
 0xf86   :  { %9348 = vmatpush1.bf16.msra.mxu0 %v11931_v51  ;;  %v12021_v51 = vld [vmem:[%s17105_s3 + $0x290] ss:$8 sps:$4 sm:$0xff]  }
 0xf87   :  { %9389 = vmatpush1.bf16.msra.mxu1 %v11934_v18  ;;  %9349 = vmatprep.subr.bf16.mxu0 %v11939_v62  ;;  %v12026_v18 = vld [vmem:[%s17105_s3 + $0x2a4] ss:$8 sps:$4 sm:$0xff]   ;;  %v12024_v62 = vld [vmem:[%s17105_s3 + $0x2a0] ss:$8 sps:$4 sm:$0xff]  }
 0xf88   :  { %9390 = vmatprep.subr.bf16.mxu1 %v11942_v49  ;;  %v12029_v49 = vld [vmem:[%s17105_s3 + $0x2b4] ss:$8 sps:$4 sm:$0xff]  }
 0xf8a   :  { %9350 = vmatpush1.bf16.msra.mxu0 %v11937_v3  ;;  %v12027_v3 = vld [vmem:[%s17105_s3 + $0x2b0] ss:$8 sps:$4 sm:$0xff]  }
 0xf8b   :  { %9391 = vmatpush1.bf16.msra.mxu1 %v11940_v31  ;;  %9351 = vmatprep.subr.bf16.mxu0 %v11945_v30  ;;  %v12032_v31 = vld [vmem:[%s17105_s3 + $0x2c4] ss:$8 sps:$4 sm:$0xff]   ;;  %v12030_v30 = vld [vmem:[%s17105_s3 + $0x2c0] ss:$8 sps:$4 sm:$0xff]  }
 0xf8c   :  { %9392 = vmatprep.subr.bf16.mxu1 %v11948_v57  ;;  %v12035_v57 = vld [vmem:[%s17105_s3 + $0x2d4] ss:$8 sps:$4 sm:$0xff]  }
 0xf8e   :  { %9352 = vmatpush1.bf16.msra.mxu0 %v11943_v5  ;;  %v12033_v5 = vld [vmem:[%s17105_s3 + $0x2d0] ss:$8 sps:$4 sm:$0xff]  }
 0xf8f   :  { %9393 = vmatpush1.bf16.msra.mxu1 %v11946_v17  ;;  %9353 = vmatprep.subr.bf16.mxu0 %v11951_v23  ;;  %v12038_v17 = vld [vmem:[%s17105_s3 + $0x2e4] ss:$8 sps:$4 sm:$0xff]   ;;  %v12036_v23 = vld [vmem:[%s17105_s3 + $0x2e0] ss:$8 sps:$4 sm:$0xff]  }
 0xf90   :  { %9394 = vmatprep.subr.bf16.mxu1 %v11954_v9  ;;  %v12041_v9 = vld [vmem:[%s17105_s3 + $0x2f4] ss:$8 sps:$4 sm:$0xff]  }
 0xf92   :  { %9354 = vmatpush1.bf16.msra.mxu0 %v11949_v11  ;;  %v12039_v11 = vld [vmem:[%s17105_s3 + $0x2f0] ss:$8 sps:$4 sm:$0xff]  }
 0xf93   :  { %9395 = vmatpush1.bf16.msra.mxu1 %v11952_v2  ;;  %9355 = vmatprep.subr.bf16.mxu0 %v11957_v58  ;;  %v12044_v2 = vld [vmem:[%s17105_s3 + $0x304] ss:$8 sps:$4 sm:$0xff]   ;;  %v12042_v58 = vld [vmem:[%s17105_s3 + $0x300] ss:$8 sps:$4 sm:$0xff]  }
 0xf94   :  { %9396 = vmatprep.subr.bf16.mxu1 %v11960_v4  ;;  %v12047_v4 = vld [vmem:[%s17105_s3 + $0x314] ss:$8 sps:$4 sm:$0xff]  }
 0xf96   :  { %9356 = vmatpush1.bf16.msra.mxu0 %v11955_v48  ;;  %v12045_v48 = vld [vmem:[%s17105_s3 + $0x310] ss:$8 sps:$4 sm:$0xff]  }
 0xf97   :  { %9397 = vmatpush1.bf16.msra.mxu1 %v11958_v55  ;;  %9357 = vmatprep.subr.bf16.mxu0 %v11963_v6  ;;  %v12050_v55 = vld [vmem:[%s17105_s3 + $0x324] ss:$8 sps:$4 sm:$0xff]   ;;  %v12048_v6 = vld [vmem:[%s17105_s3 + $0x320] ss:$8 sps:$4 sm:$0xff]  }
 0xf98   :  { %9398 = vmatprep.subr.bf16.mxu1 %v11966_v40  ;;  %v12051_v40 = vld [vmem:[%s17105_s3 + $0x330] ss:$8 sps:$4 sm:$0xff]  }
 0xf9a   :  { %9358 = vmatpush1.bf16.msra.mxu0 %v11961_v29  ;;  %v12053_v29 = vld [vmem:[%s17105_s3 + $0x334] ss:$8 sps:$4 sm:$0xff]  }
 0xf9b   :  { %9399 = vmatpush1.bf16.msra.mxu1 %v11964_v7  ;;  %9359 = vmatprep.subr.bf16.mxu0 %v11969_v20  ;;  %v12056_v7 = vld [vmem:[%s17105_s3 + $0x344] ss:$8 sps:$4 sm:$0xff]   ;;  %v12054_v20 = vld [vmem:[%s17105_s3 + $0x340] ss:$8 sps:$4 sm:$0xff]  }
 0xf9c   :  { %9400 = vmatprep.subr.bf16.mxu1 %v11972_v27  ;;  %v12059_v27 = vld [vmem:[%s17105_s3 + $0x354] ss:$8 sps:$4 sm:$0xff]  }
 0xf9e   :  { %9360 = vmatpush1.bf16.msra.mxu0 %v11967_v15  ;;  %v12084_v15 = vld [vmem:[%s17105_s3 + $0x468] ss:$8 sps:$4 sm:$0xff]  }
 0xf9f   :  { %9401 = vmatpush1.bf16.msra.mxu1 %v11970_v21  ;;  %9361 = vmatprep.subr.bf16.mxu0 %v11975_v35  ;;  %v12085_v21 = vld [vmem:[%s17105_s3 + $0x3e8] ss:$8 sps:$4 sm:$0xff]   ;;  %v12086_v35 = vld [vmem:[%s17105_s3 + $0x478] ss:$8 sps:$4 sm:$0xff]  }
 0xfa0   :  { %9402 = vmatprep.subr.bf16.mxu1 %v11978_v22  ;;  %v12087_v22 = vld [vmem:[%s17105_s3 + $0x3f8] ss:$8 sps:$4 sm:$0xff]  }
 0xfa2   :  { %9362 = vmatpush1.bf16.msra.mxu0 %v11973_v42  ;;  %v12088_v42 = vld [vmem:[%s17105_s3 + $0x488] ss:$8 sps:$4 sm:$0xff]  }
 0xfa3   :  { %9403 = vmatpush1.bf16.msra.mxu1 %v11976_v34  ;;  %9363 = vmatprep.subr.bf16.mxu0 %v11981_v0  ;;  %v12089_v34 = vld [vmem:[%s17105_s3 + $0x408] ss:$8 sps:$4 sm:$0xff]   ;;  %v12090_v0 = vld [vmem:[%s17105_s3 + $0x498] ss:$8 sps:$4 sm:$0xff]  }
 0xfa4   :  { %9404 = vmatprep.subr.bf16.mxu1 %v11984_v59  ;;  %v12091_v59 = vld [vmem:[%s17105_s3 + $0x418] ss:$8 sps:$4 sm:$0xff]  }
 0xfa6   :  { %9364 = vmatpush1.bf16.msra.mxu0 %v11979_v60  ;;  %v12092_v60 = vld [vmem:[%s17105_s3 + $0x4a8] ss:$8 sps:$4 sm:$0xff]  }
 0xfa7   :  { %9405 = vmatpush1.bf16.msra.mxu1 %v11982_v39  ;;  %9365 = vmatprep.subr.bf16.mxu0 %v11987_v41  ;;  %v12093_v39 = vld [vmem:[%s17105_s3 + $0x428] ss:$8 sps:$4 sm:$0xff]   ;;  %v12094_v41 = vld [vmem:[%s17105_s3 + $0x4b8] ss:$8 sps:$4 sm:$0xff]  }
 0xfa8   :  { %9406 = vmatprep.subr.bf16.mxu1 %v11990_v12  ;;  %v12095_v12 = vld [vmem:[%s17105_s3 + $0x438] ss:$8 sps:$4 sm:$0xff]  }
 0xfaa   :  { %9366 = vmatpush1.bf16.msra.mxu0 %v11985_v43  ;;  %v5832_v43 = vld [vmem:[%s17106_s2 + $0xe00] sm:$0x11] }
 0xfab   :  { %9407 = vmatpush1.bf16.msra.mxu1 %v11988_v52  ;;  %9367 = vmatprep.subr.bf16.mxu0 %v11993_v54  ;;  %v5833_v52 = vld [vmem:[%s17106_s2 + $0xe08] sm:$0x11]  ;;  %v5834_v54 = vunpack.c.l.bf16 %v5832_v43 }
 0xfac   :  { %9408 = vmatprep.subr.bf16.mxu1 %v11996_v33  ;;  %v5835_v33 = vunpack.c.h.bf16 %v5832_v43 }
 0xfae   :  { %9368 = vmatpush1.bf16.msra.mxu0 %v11991_v53  ;;  %v5837_v53 = vunpack.c.h.bf16 %v5833_v52 }
 0xfaf   :  { %9409 = vmatpush1.bf16.msra.mxu1 %v11994_v13  ;;  %9369 = vmatprep.subr.bf16.mxu0 %v11999_v25  ;;  %v5841_v13 = vrot.slane %v5834_v54, %v18133_v63  ;;  %v5845_v25 = vrot.slane %v5835_v33, %v18133_v63 }
 0xfb0   :  { %9410 = vmatprep.subr.bf16.mxu1 %v12002_v61  ;;  %v5853_v61 = vrot.slane %v5837_v53, %v18133_v63 }
 0xfb2   :  { %9370 = vmatpush1.bf16.msra.mxu0 %v11997_v10 }
 0xfb3   :  { %9411 = vmatpush1.bf16.msra.mxu1 %v12000_v50  ;;  %9371 = vmatprep.subr.bf16.mxu0 %v12005_v46 }
 0xfb4   :  { %9412 = vmatprep.subr.bf16.mxu1 %v12008_v8 }
 0xfb6   :  { %9372 = vmatpush1.bf16.msra.mxu0 %v12003_v36 }
 0xfb7   :  { %9413 = vmatpush1.bf16.msra.mxu1 %v12006_v14  ;;  %9750 = vmatprep.subr.bf16.mxu0 %v12011_v47 }
 0xfb8   :  { %11166 = vmatprep.subr.bf16.mxu1 %v12084_v15  ;;  %v12097_v15 = vld [vmem:[%s17105_s3 + $0x448] ss:$8 sps:$4 sm:$0xff]  }
 0xfb9   :  { %9374 = vmatmul.mubr.bf16.vlgmr.msra.gmra.mrb[112].mxu0 %v9017_v26 }
 0xfba   :  { %9415 = vmatmul.mubr.bf16.vlgmr.msra.gmra.mrb[140].mxu1 %v9017_v26  ;;  %9751 = vmatpush1.bf16.msra.mxu0 %v12009_v44 }
 0xfbb   :  { %9752 = vmatprep.subr.bf16.mxu0 %v12014_v1  ;;  %11167 = vmatpush3.bf16.msra.mxu1 %v12085_v21  ;;  %v12098_v21 = vld [vmem:[%s17105_s3 + $0x4d8] ss:$8 sps:$4 sm:$0xff]  }
 0xfbc   :  { %11168 = vmatprep.subr.bf16.mxu1 %v12086_v35  ;;  %v12099_v35 = vld [vmem:[%s17105_s3 + $0x458] ss:$8 sps:$4 sm:$0xff]  }
 0xfbe   :  { %9753 = vmatpush1.bf16.msra.mxu0 %v12012_v56 }
 0xfbf   :  { %9754 = vmatprep.subr.bf16.mxu0 %v12017_v37  ;;  %11169 = vmatpush3.bf16.msra.mxu1 %v12087_v22  ;;  %v9481_v22 = vld [vmem:[%s17105_s3 + $0x3e0] sm:$0x11] }
 0xfc0   :  { %11170 = vmatprep.subr.bf16.mxu1 %v12088_v42  ;;  %v9482_v42 = vunpack.c.l.bf16 %v9481_v22 }
 0xfc2   :  { %9755 = vmatpush1.bf16.msra.mxu0 %v12015_v45 }
 0xfc3   :  { %9756 = vmatprep.subr.bf16.mxu0 %v12020_v38  ;;  %11171 = vmatpush3.bf16.msra.mxu1 %v12089_v34  ;;  %v9483_v34 = vunpack.c.h.bf16 %v9481_v22 }
 0xfc4   :  { %11172 = vmatprep.subr.bf16.mxu1 %v12090_v0  ;;  %v9491_v0 = vrot.slane %v9482_v42, %v18133_v63 }
 0xfc6   :  { %9757 = vmatpush1.bf16.msra.mxu0 %v12018_v24 }
 0xfc7   :  { %9758 = vmatprep.subr.bf16.mxu0 %v12023_v16  ;;  %11173 = vmatpush3.bf16.msra.mxu1 %v12091_v59  ;;  %v12057_v16 = vld [vmem:[%s17105_s3 + $0x350] ss:$8 sps:$4 sm:$0xff]   ;;  %v9495_v59 = vrot.slane %v9483_v34, %v18133_v63 }
 0xfc8   :  { %11174 = vmatprep.subr.bf16.mxu1 %v12092_v60 }
 0xfca   :  { %9759 = vmatpush1.bf16.msra.mxu0 %v12021_v51 }
 0xfcb   :  { %9760 = vmatprep.subr.bf16.mxu0 %v12026_v18  ;;  %11175 = vmatpush3.bf16.msra.mxu1 %v12093_v39  ;;  %v12062_v18 = vld [vmem:[%s17105_s3 + $0x364] ss:$8 sps:$4 sm:$0xff]  }
 0xfcc   :  { %11176 = vmatprep.subr.bf16.mxu1 %v12094_v41 }
 0xfce   :  { %9761 = vmatpush1.bf16.msra.mxu0 %v12024_v62 }
 0xfcf   :  { %9762 = vmatprep.subr.bf16.mxu0 %v12029_v49  ;;  %11177 = vmatpush3.bf16.msra.mxu1 %v12095_v12  ;;  %v12060_v49 = vld [vmem:[%s17105_s3 + $0x360] ss:$8 sps:$4 sm:$0xff]  }
 0xfd2   :  { %9763 = vmatpush1.bf16.msra.mxu0 %v12027_v3  ;;  %v12065_v3 = vld [vmem:[%s17105_s3 + $0x374] ss:$8 sps:$4 sm:$0xff]  }
 0xfd3   :  { %9764 = vmatprep.subr.bf16.mxu0 %v12032_v31  ;;  %v12063_v31 = vld [vmem:[%s17105_s3 + $0x370] ss:$8 sps:$4 sm:$0xff]  }
 0xfd6   :  { %9765 = vmatpush1.bf16.msra.mxu0 %v12030_v30  ;;  %v12068_v30 = vld [vmem:[%s17105_s3 + $0x384] ss:$8 sps:$4 sm:$0xff]  }
 0xfd7   :  { %9766 = vmatprep.subr.bf16.mxu0 %v12035_v57  ;;  %v12066_v57 = vld [vmem:[%s17105_s3 + $0x380] ss:$8 sps:$4 sm:$0xff]  }
 0xfda   :  { %9767 = vmatpush1.bf16.msra.mxu0 %v12033_v5  ;;  %v12071_v5 = vld [vmem:[%s17105_s3 + $0x394] ss:$8 sps:$4 sm:$0xff]  }
 0xfdb   :  { %9768 = vmatprep.subr.bf16.mxu0 %v12038_v17  ;;  %v12069_v17 = vld [vmem:[%s17105_s3 + $0x390] ss:$8 sps:$4 sm:$0xff]  }
 0xfde   :  { %9769 = vmatpush1.bf16.msra.mxu0 %v12036_v23  ;;  %v12074_v23 = vld [vmem:[%s17105_s3 + $0x3a4] ss:$8 sps:$4 sm:$0xff]  }
 0xfdf   :  { %9770 = vmatprep.subr.bf16.mxu0 %v12041_v9  ;;  %v12072_v9 = vld [vmem:[%s17105_s3 + $0x3a0] ss:$8 sps:$4 sm:$0xff]  }
 0xfe2   :  { %9771 = vmatpush1.bf16.msra.mxu0 %v12039_v11  ;;  %v5836_v11 = vunpack.c.l.bf16 %v5833_v52 }
 0xfe3   :  { %9772 = vmatprep.subr.bf16.mxu0 %v12044_v2  ;;  %v12077_v2 = vld [vmem:[%s17105_s3 + $0x3b4] ss:$8 sps:$4 sm:$0xff]  }
 0xfe6   :  { %9773 = vmatpush1.bf16.msra.mxu0 %v12042_v58  ;;  %v12075_v58 = vld [vmem:[%s17105_s3 + $0x3b0] ss:$8 sps:$4 sm:$0xff]  }
 0xfe7   :  { %9774 = vmatprep.subr.bf16.mxu0 %v12047_v4  ;;  %v5849_v4 = vrot.slane %v5836_v11, %v18133_v63 }
 0xfea   :  { %9775 = vmatpush1.bf16.msra.mxu0 %v12045_v48  ;;  %v12080_v48 = vld [vmem:[%s17105_s3 + $0x3c4] ss:$8 sps:$4 sm:$0xff]  }
 0xfeb   :  { %9776 = vmatprep.subr.bf16.mxu0 %v12050_v55  ;;  %v12078_v55 = vld [vmem:[%s17105_s3 + $0x3c0] ss:$8 sps:$4 sm:$0xff]  }
 0xfee   :  { %9777 = vmatpush1.bf16.msra.mxu0 %v12048_v6 }
 0xfef   :  { %9778 = vmatprep.subr.bf16.mxu0 %v12053_v29  ;;  %v12081_v29 = vld [vmem:[%s17105_s3 + $0x3d0] ss:$8 sps:$4 sm:$0xff]  }
 0xff2   :  { %9779 = vmatpush1.bf16.msra.mxu0 %v12051_v40  ;;  %v12083_v40 = vld [vmem:[%s17105_s3 + $0x3d4] ss:$8 sps:$4 sm:$0xff]  }
 0xff3   :  { %9780 = vmatprep.subr.bf16.mxu0 %v12056_v7 }
 0xff6   :  { %9781 = vmatpush1.bf16.msra.mxu0 %v12054_v20 }
 0xff7   :  { %9791 = vmatprep.subr.bf16.mxu0 %v12059_v27  ;;  %v12096_v27 = vld [vmem:[%s17105_s3 + $0x4c8] ss:$8 sps:$4 sm:$0xff]  }
 0xff8   :  { %11178 = vmatprep.subr.bf16.mxu1 %v12096_v27 }
 0xff9   :  { %11179 = vmatpush3.bf16.msra.mxu1 %v12097_v15 }
 0xffa   :  { %11180 = vmatprep.subr.bf16.mxu1 %v12098_v21 }
 0xffd   :  { %11181 = vmatpush3.bf16.msra.mxu1 %v12099_v35 }
 0xffe   :  { %11209 = vmatprep.subr.bf16.mxu1 %v12398_v32 }
0x108c   :  { %v9375_v10 = vpop.f32.mrb[112].mxu0 }
0x108d   :  { %v11221_v50 = vadd.f32 %v9375_v10, %v5841_v13  ;;  %v9416_v46 = vpop.f32.mrb[140].mxu1  ;;  %v9377_v8 = vpop.f32.mrb[113].mxu0  ;;  %v12100_v13 = vld [vmem:[%s17105_s3 + $0x4f0] ss:$8 sps:$4 sm:$0xff]  }
0x108e   :  { %v11222_v36 = vadd.f32 %v9377_v8, %v5845_v25  ;;  %v9418_v14 = vpop.f32.mrb[141].mxu1  ;;  %v9379_v47 = vpop.f32.mrb[114].mxu0  ;;  %v11223_v6 = vadd.f32 %v9416_v46, %v5849_v4  ;;  %v12102_v10 = vld [vmem:[%s17105_s3 + $0x510] ss:$8 sps:$4 sm:$0xff]   ;;  %v9866_v46 = vld [vmem:[%s17105_s3 + $0x4e8] sm:$0x1] }
0x108f   :  { %v9427_v44 = vmax.f32 %v11221_v50, 0.0  ;;  %v11224_v26 = vadd.f32 %v9418_v14, %v5853_v61  ;;  %v9420_v1 = vpop.f32.mrb[142].mxu1  ;;  %v9380_v56 = vpop.f32.mrb[115].mxu0  ;;  %v12101_v61 = vld [vmem:[%s17105_s3 + $0x500] ss:$8 sps:$4 sm:$0xff]   ;;  %v9867_v8 = vunpack.c.l.bf16 %v9866_v46 }
0x1090   :  { %v9428_v37 = vmax.f32 %v11222_v36, 0.0  ;;  %v9421_v45 = vpop.f32.mrb[143].mxu1  ;;  %v9429_v7 = vmax.f32 %v11223_v6, 0.0  ;;  %v12103_v50 = vld [vmem:[%s17105_s3 + $0x520] ss:$8 sps:$4 sm:$0xff]  }
0x1091   :  { %v9430_v38 = vmax.f32 %v11224_v26, 0.0  ;;  %v9484_v51 = vpack.c.bf16 %v9427_v44, %v9427_v44  ;;  %v9873_v14 = vrot.slane %v9867_v8, %v18133_v63 }
0x1092   :  { %v9485_v24 = vpack.c.bf16 %v9428_v37, %v9428_v37  ;;  %v9486_v20 = vpack.c.bf16 %v9429_v7, %v9429_v7 }
0x1093   :  { %v9487_v62 = vpack.c.bf16 %v9430_v38, %v9430_v38  ;;  %v10019_v38 = vld [vmem:[%s17105_s3 + $0x530] sm:$0x1] }
0x1094   :  { %9782 = vmatprep.mubr.bf16.mxu0 %v9485_v24  ;;  %v10020_v24 = vunpack.c.l.bf16 %v10019_v38 }
0x1095   :  { %9783 = vmatmul.mubr.bf16.vlgmr.msra.gmra.mrb[116].mxu0 %v9484_v51 }
0x1096   :  { %9792 = vmatpush1.bf16.msra.mxu0 %v12057_v16  ;;  %11047 = vmatprep.mubr.msk.bf16.mxu0 %vm9746_vm13, %v9487_v62  ;;  %v10025_v16 = vrot.slane %v10020_v24, %v18133_v63 }
0x1097   :  { %9793 = vmatprep.subr.bf16.mxu0 %v12062_v18 }
0x109a   :  { %9794 = vmatpush1.bf16.msra.mxu0 %v12060_v49 }
0x109b   :  { %9795 = vmatprep.subr.bf16.mxu0 %v12065_v3 }
0x109e   :  { %9796 = vmatpush1.bf16.msra.mxu0 %v12063_v31 }
0x109f   :  { %9797 = vmatprep.subr.bf16.mxu0 %v12068_v30 }
0x10a2   :  { %9798 = vmatpush1.bf16.msra.mxu0 %v12066_v57 }
0x10a3   :  { %9799 = vmatprep.subr.bf16.mxu0 %v12071_v5 }
0x10a6   :  { %9800 = vmatpush1.bf16.msra.mxu0 %v12069_v17 }
0x10a7   :  { %9801 = vmatprep.subr.bf16.mxu0 %v12074_v23 }
0x10aa   :  { %9802 = vmatpush1.bf16.msra.mxu0 %v12072_v9 }
0x10ab   :  { %9803 = vmatprep.subr.bf16.mxu0 %v12077_v2 }
0x10ae   :  { %9804 = vmatpush1.bf16.msra.mxu0 %v12075_v58 }
0x10af   :  { %9805 = vmatprep.subr.bf16.mxu0 %v12080_v48 }
0x10b2   :  { %9806 = vmatpush1.bf16.msra.mxu0 %v12078_v55 }
0x10b3   :  { %9807 = vmatprep.subr.bf16.mxu0 %v12083_v40 }
0x10b6   :  { %9808 = vmatpush1.bf16.msra.mxu0 %v12081_v29 }
0x10b9   :  { %9824 = vmatmul.mubr.bf16.vlgmr.msra.gmra.mrb[116].mxu0 %v9486_v20 }
0x118c   :  { %v9825_v60 = vpop.f32.mrb[116].mxu0 }
0x118d   :  { %v11225_v39 = vadd.f32 %v9825_v60, %v9491_v0  ;;  %v9827_v41 = vpop.f32.mrb[117].mxu0 }
0x118e   :  { %v11226_v12 = vadd.f32 %v9827_v41, %v9495_v59  ;;  %v9829_v43 = vpop.f32.mrb[118].mxu0 }
0x118f   :  { %v9832_v52 = vmax.f32 %v11225_v39, 0.0  ;;  %v9830_v54 = vpop.f32.mrb[119].mxu0 }
0x1190   :  { %v9833_v33 = vmax.f32 %v11226_v12, 0.0 }
0x1191   :  { %v9868_v25 = vpack.c.bf16 %v9832_v52, %v9832_v52 }
0x1192   :  { %v9869_v53 = vpack.c.bf16 %v9833_v33, %v9833_v33 }
0x1194   :  { %10002 = vmatprep.mubr.bf16.mxu1 %v9869_v53 }
0x1195   :  { %10003 = vmatmul.mubr.bf16.vlgmr.msra.gmra.mrb[144].mxu1 %v9868_v25 }
0x1196   :  { %11210 = vmatpush3.bf16.msra.mxu1 %v12100_v13  ;;  %11217 = vmatprep.mubr.msk.bf16.mxu1 %vm12400_vm14, %v12398_v32 }
0x1197   :  { %11211 = vmatprep.subr.bf16.mxu1 %v12398_v32 }
0x119a   :  { %11212 = vmatpush3.bf16.msra.mxu1 %v12101_v61 }
0x119b   :  { %11213 = vmatprep.subr.bf16.mxu1 %v12398_v32 }
0x119e   :  { %11214 = vmatpush3.bf16.msra.mxu1 %v12102_v10 }
0x119f   :  { %11215 = vmatprep.subr.bf16.mxu1 %v12398_v32 }
0x11a2   :  { %11216 = vmatpush3.bf16.msra.mxu1 %v12103_v50 }
0x1268   :  { %v11182_v36 = vpop.f32.mrb[144].mxu1 }
0x1269   :  { %v11183_v47 = vpop.f32.mrb[145].mxu1 }
0x126a   :  { %v11184_v44 = vadd.f32 %v11183_v47, %v11182_v36  ;;  %v11185_v26 = vpop.f32.mrb[146].mxu1 }
0x126b   :  { %v11186_v1 = vpop.f32.mrb[147].mxu1 }
0x126c   :  { %v10005_v56 = vadd.f32 %v11184_v44, %v9873_v14 }
0x126e   :  { %v10010_v37 = vmax.f32 %v10005_v56, 0.0 }
0x1270   :  { %v10021_v45 = vpack.c.bf16 %v10010_v37, %v10010_v37 }
0x1272   :  { %11218 = vmatmul.mubr.msk.bf16.vlgmr.msra.gmra.mrb[148].mxu1 %vm410_vm0, %v10021_v45  ;;  %vm17055_vm0 = vcmp.lt.s32.totalorder %v18131_v19, 256 }
0x1345   :  { %v10087_v51 = vpop.f32.mrb[148].mxu1 }
0x1346   :  { %v10088_v18 = vadd.f32 %v10087_v51, %v10025_v16  ;;  %v11219_v62 = vpop.f32.mrb[149].mxu1 }
0x1347   :  { %v10090_v49 = vpop.f32.mrb[150].mxu1 }
0x1348   :  { %v11069_v3 = vmul.f32 -1.442695, %v10088_v18  ;;  %v11220_v31 = vpop.f32.mrb[151].mxu1 }
0x134a   :  { %12392 = vpow2.f32 %v11069_v3 }
0x1354   :  { %v12393_v30 = vpop.eup %12392 }
0x1355   :  { %v10096_v57 = vadd.f32 1.0, %v12393_v30 }
0x1357   :  { %12394 = vrcp.f32 %v10096_v57 }
0x1361   :  { %v12395_v5 = vpop.eup %12394 }
0x1362   :  { %v10116_v17 = vsel %vm10115_vm15, %v12395_v5, 0.0 }
0x1363   :  { %v10119_v23 = vcombine.low %v10116_v17, %v12398_v32  ;;  %v10120_v9 = vcombine.high %v10116_v17, %v12398_v32 }
0x1365   :  { %v10127_v11 = vrot.slane %v10119_v23, %v13689_v28  ;;  %v10134_v63 = vrot.slane %v10120_v9, %v13689_v28 }
0x1367   :  { %v10135_v58 = vcombine.high %v10127_v11, %v10127_v11  ;;  %v10136_v4 = vcombine.high %v10134_v63, %v10134_v63  ;;  %v10143_v48 = vrot.slane %v10127_v11, %v13689_v28  ;;  %v10150_v55 = vrot.slane %v10134_v63, %v13689_v28 }
0x1369   :  { %v10157_v6 = vrot.slane %v10135_v58, %v13689_v28  ;;  %v10164_v40 = vrot.slane %v10136_v4, %v13689_v28  ;;  %v10165_v32 = vcombine.high %v10143_v48, %v10143_v48  ;;  %v10166_v29 = vcombine.high %v10150_v55, %v10150_v55  ;;  %11070 = vst.msk [vmem:[%s17107_s4 + $0x7] ss:$8 sm:$0x3] %vm17055_vm0, %v10143_v48 }
0x136a   :  { %11074 = vst.msk [vmem:[%s17107_s4 + $0x47] ss:$8 sm:$0x3] %vm17055_vm0, %v10150_v55 }
0x136b   :  { %v10167_v19 = vcombine.high %v10157_v6, %v10157_v6  ;;  %v10168_v7 = vcombine.high %v10164_v40, %v10164_v40  ;;  %11071 = vst.msk [vmem:[%s17107_s4 + $0x17] ss:$8 sm:$0x3] %vm17055_vm0, %v10157_v6  ;;  %11072 = vst.msk [vmem:[%s17107_s4 + $0x27] ss:$8 sm:$0x3] %vm17055_vm0, %v10165_v32 }
0x136c   :  { %11075 = vst.msk [vmem:[%s17107_s4 + $0x57] ss:$8 sm:$0x3] %vm17055_vm0, %v10164_v40  ;;  %11076 = vst.msk [vmem:[%s17107_s4 + $0x67] ss:$8 sm:$0x3] %vm17055_vm0, %v10166_v29 }
0x136d   :  { %11073 = vst.msk [vmem:[%s17107_s4 + $0x37] ss:$8 sm:$0x3] %vm17055_vm0, %v10167_v19  ;;  %11077 = vst.msk [vmem:[%s17107_s4 + $0x77] ss:$8 sm:$0x3] %vm17055_vm0, %v10168_v7 }

</bundles_post_ra>
